<compile_context>
chip_gen: v5e
topology: v5e:2x2
jax: 0.10.0
libtpu: 0.0.40
codegen_flags: <defaults>
</compile_context>

<pallas_src>
import jax
import jax.numpy as jnp
from jax.experimental import pallas as pl
from jax.experimental.pallas import tpu as pltpu


# ----------------------------------------------------------------------------
# Fused Conv2d + bias + LeakyReLU + MaxPool2d(2) layer (runs inside the kernel)
# ----------------------------------------------------------------------------
def _conv_lrelu_pool(x_ref, w_ref, b_ref, o_ref, *, k, cin, cout, hin, win):
    """One fused conv layer.

    x_ref : (1, Hin, Cin, Win)  VMEM ref, (batch-of-1, H, C, W) layout (W on lanes)
    w_ref : (k, k, Cout, Cin)   VMEM ref (pre-packed PyTorch (Cout,Cin,kh,kw) weight)
    b_ref : (Cout, 1)           VMEM ref
    o_ref : (1, Hp, Cout, Wp)   VMEM ref (pooled output, same layout convention)
    """
    ho, wo = hin - k + 1, win - k + 1
    hp, wp = ho // 2, wo // 2

    # Column-pool selection matrices: (m @ s_even)[c, j] = m[c, 2j],  (m @ s_odd)[c, j] = m[c, 2j+1]
    r_idx = jax.lax.broadcasted_iota(jnp.int32, (wo, wp), 0)
    c_idx = jax.lax.broadcasted_iota(jnp.int32, (wo, wp), 1)
    s_even = (r_idx == 2 * c_idx).astype(jnp.float32)
    s_odd = (r_idx == 2 * c_idx + 1).astype(jnp.float32)

    bias = b_ref[...]  # (Cout, 1) -> broadcasts along the lane (W) axis

    @pl.loop(0, hp)
    def _row(i):
        # Conv output rows 2i and 2i+1 (the vertical max-pool pair).
        acc0 = jnp.zeros((cout, wo), jnp.float32)
        acc1 = jnp.zeros((cout, wo), jnp.float32)
        for kh in range(k):
            r0 = x_ref[0, 2 * i + kh, :, :]       # (Cin, Win)
            r1 = x_ref[0, 2 * i + 1 + kh, :, :]   # (Cin, Win)
            for kw in range(k):
                wmat = w_ref[kh, kw]              # (Cout, Cin)
                p0 = r0[:, kw:kw + wo]            # (Cin, Wo)
                p1 = r1[:, kw:kw + wo]
                if cin == 1:
                    # K=1 contraction: cheaper/safer as a VPU broadcast outer product.
                    acc0 = acc0 + wmat * p0
                    acc1 = acc1 + wmat * p1
                else:
                    acc0 = acc0 + jnp.dot(wmat, p0, preferred_element_type=jnp.float32)
                    acc1 = acc1 + jnp.dot(wmat, p1, preferred_element_type=jnp.float32)
        y0 = acc0 + bias
        y1 = acc1 + bias
        y0 = jnp.where(y0 >= 0.0, y0, 0.01 * y0)  # LeakyReLU(negative_slope=0.01)
        y1 = jnp.where(y1 >= 0.0, y1, 0.01 * y1)
        m = jnp.maximum(y0, y1)                   # vertical 2x pool
        pooled = jnp.maximum(                     # horizontal 2x pool via selection matmuls
            jnp.dot(m, s_even, preferred_element_type=jnp.float32),
            jnp.dot(m, s_odd, preferred_element_type=jnp.float32))
        o_ref[0, i, :, :] = pooled


# ----------------------------------------------------------------------------
# Kernel 1: the whole backbone for one image (grid step = one batch element)
# ----------------------------------------------------------------------------
def _backbone_kernel(x_ref, w1, b1, w2, b2, w3, b3, w4, b4, o_ref, s1, s2, s3):
    _conv_lrelu_pool(x_ref, w1, b1, s1, k=3, cin=1, cout=32, hin=128, win=128)
    _conv_lrelu_pool(s1, w2, b2, s2, k=4, cin=32, cout=6, hin=63, win=63)
    _conv_lrelu_pool(s2, w3, b3, s3, k=3, cin=6, cout=128, hin=30, win=30)
    _conv_lrelu_pool(s3, w4, b4, o_ref, k=2, cin=128, cout=8, hin=14, win=14)


# ----------------------------------------------------------------------------
# Kernel 2: the whole classifier head (all weights VMEM-resident)
# ----------------------------------------------------------------------------
def _head_kernel(x_ref, w1, b1, w2, b2, w3, b3, w4, b4, o_ref):
    h = x_ref[...]                                                            # (N, 288)
    h = jnp.maximum(jnp.dot(h, w1[...], preferred_element_type=jnp.float32) + b1[...], 0.0)
    h = jnp.maximum(jnp.dot(h, w2[...], preferred_element_type=jnp.float32) + b2[...], 0.0)
    h = jnp.maximum(jnp.dot(h, w3[...], preferred_element_type=jnp.float32) + b3[...], 0.0)
    z = jnp.dot(h, w4[...], preferred_element_type=jnp.float32) + b4[...]     # (N, 12) logits
    z = z - jnp.max(z, axis=-1, keepdims=True)                                # LogSoftmax(dim=1)
    o_ref[...] = z - jnp.log(jnp.sum(jnp.exp(z), axis=-1, keepdims=True))


# ----------------------------------------------------------------------------
# Forward pass
# ----------------------------------------------------------------------------
def forward(packed, x_nchw):
    n, c, hh, ww = x_nchw.shape
    # Linear(288, ...) forces the backbone input to be 1 x 128 x 128 (-> 8*6*6 = 288).
    assert (c, hh, ww) == (1, 128, 128), (c, hh, ww)

    # NCHW -> (N, H, C, W): W maps to the lane axis inside the kernels. (tiny glue)
    x = jnp.transpose(x_nchw, (0, 2, 1, 3)).astype(jnp.float32)

    feats = pl.pallas_call(
        _backbone_kernel,
        out_shape=jax.ShapeDtypeStruct((n, 6, 8, 6), jnp.float32),
        grid=(n,),
        in_specs=[
            pl.BlockSpec((1, 128, 1, 128), lambda i: (i, 0, 0, 0)),   # image
            pl.BlockSpec((3, 3, 32, 1), lambda i: (0, 0, 0, 0)),      # conv1 w
            pl.BlockSpec((32, 1), lambda i: (0, 0)),                  # conv1 b
            pl.BlockSpec((4, 4, 6, 32), lambda i: (0, 0, 0, 0)),      # conv2 w
            pl.BlockSpec((6, 1), lambda i: (0, 0)),                   # conv2 b
            pl.BlockSpec((3, 3, 128, 6), lambda i: (0, 0, 0, 0)),     # conv3 w
            pl.BlockSpec((128, 1), lambda i: (0, 0)),                 # conv3 b
            pl.BlockSpec((2, 2, 8, 128), lambda i: (0, 0, 0, 0)),     # conv4 w
            pl.BlockSpec((8, 1), lambda i: (0, 0)),                   # conv4 b
        ],
        out_specs=pl.BlockSpec((1, 6, 8, 6), lambda i: (i, 0, 0, 0)),
        scratch_shapes=[                                              # VMEM-resident activations
            pltpu.VMEM((1, 63, 32, 63), jnp.float32),                 # after layer 1
            pltpu.VMEM((1, 30, 6, 30), jnp.float32),                  # after layer 2
            pltpu.VMEM((1, 14, 128, 14), jnp.float32),                # after layer 3
        ],
        compiler_params=pltpu.CompilerParams(dimension_semantics=("parallel",)),
    )(x, packed["cw1"], packed["cb1"], packed["cw2"], packed["cb2"],
      packed["cw3"], packed["cb3"], packed["cw4"], packed["cb4"])

    # (N, H=6, C=8, W=6) -> (N, 288); the (h,c,w) order is folded into the packed fc1 weight.
    flat = feats.reshape(n, 288)

    return pl.pallas_call(
        _head_kernel,
        out_shape=jax.ShapeDtypeStruct((n, 12), jnp.float32),
    )(flat, packed["fw1"], packed["fb1"], packed["fw2"], packed["fb2"],
      packed["fw3"], packed["fb3"], packed["fw4"], packed["fb4"])


# ----------------------------------------------------------------------------
# Parameter init (deterministic, synthetic, PyTorch layouts) + one-time packing
# ----------------------------------------------------------------------------
def _init_conv(key, cout, cin, k):
    kw_, kb = jax.random.split(key)
    fan_in = cin * k * k
    w = jax.random.normal(kw_, (cout, cin, k, k), jnp.float32) / jnp.sqrt(float(fan_in))
    b = 0.01 * jax.random.normal(kb, (cout,), jnp.float32)
    return w, b


def _init_linear(key, fin, fout):
    kw_, kb = jax.random.split(key)
    w = jax.random.normal(kw_, (fout, fin), jnp.float32) / jnp.sqrt(float(fin))  # PyTorch (out, in)
    b = 0.01 * jax.random.normal(kb, (fout,), jnp.float32)
    return w, b


def init_params(key):
    ks = jax.random.split(key, 8)
    return {
        "conv1": _init_conv(ks[0], 32, 1, 3),
        "conv2": _init_conv(ks[1], 6, 32, 4),
        "conv3": _init_conv(ks[2], 128, 6, 3),
        "conv4": _init_conv(ks[3], 8, 128, 2),
        "fc1": _init_linear(ks[4], 288, 128),
        "fc2": _init_linear(ks[5], 128, 64),
        "fc3": _init_linear(ks[6], 64, 32),
        "fc4": _init_linear(ks[7], 32, 12),
    }


def pack_params(params):
    """One-time re-layout of PyTorch-style parameters into kernel-friendly tensors."""
    packed = {}
    for idx, name in enumerate(("conv1", "conv2", "conv3", "conv4"), start=1):
        w, b = params[name]                                            # (Cout,Cin,kh,kw), (Cout,)
        packed[f"cw{idx}"] = jnp.transpose(w, (2, 3, 0, 1)).astype(jnp.float32)  # (kh,kw,Cout,Cin)
        packed[f"cb{idx}"] = b.reshape(-1, 1).astype(jnp.float32)                # (Cout, 1)
    # fc1: fold PyTorch's (C,H,W) flatten order vs our (H,C,W) layout into the weight.
    w1, b1 = params["fc1"]                                             # (128, 288), in = c*36+h*6+w
    w1p = jnp.transpose(w1.reshape(128, 8, 6, 6), (2, 1, 3, 0)).reshape(288, 128)
    packed["fw1"] = w1p.astype(jnp.float32)
    packed["fb1"] = b1.reshape(1, -1).astype(jnp.float32)
    for idx, name in ((2, "fc2"), (3, "fc3"), (4, "fc4")):
        w, b = params[name]
        packed[f"fw{idx}"] = jnp.transpose(w).astype(jnp.float32)      # (in, out)
        packed[f"fb{idx}"] = b.reshape(1, -1).astype(jnp.float32)
    return packed


# ----------------------------------------------------------------------------
# Pure-XLA reference of the same module (eval mode) for a correctness check
# ----------------------------------------------------------------------------
def reference_forward(params, x_nchw):
    x = x_nchw.astype(jnp.float32)
    for name in ("conv1", "conv2", "conv3", "conv4"):
        w, b = params[name]
        x = jax.lax.conv_general_dilated(
            x, w, window_strides=(1, 1), padding="VALID",
            dimension_numbers=("NCHW", "OIHW", "NCHW"))
        x = x + b.reshape(1, -1, 1, 1)
        x = jnp.where(x >= 0.0, x, 0.01 * x)
        x = jax.lax.reduce_window(x, -jnp.inf, jax.lax.max,
                                  (1, 1, 2, 2), (1, 1, 2, 2), "VALID")
    x = x.reshape(x.shape[0], -1)
    for name in ("fc1", "fc2", "fc3"):
        w, b = params[name]
        x = jnp.maximum(x @ w.T + b, 0.0)
    w, b = params["fc4"]
    return jax.nn.log_softmax(x @ w.T + b, axis=-1)


if __name__ == "__main__":
    key = jax.random.PRNGKey(0)
    kp, kx = jax.random.split(key)
    params = init_params(kp)
    packed = pack_params(params)
    # 1x128x128 input is the size the module's Linear(288, ...) implies (288 = 8*6*6).
    x = jax.random.normal(kx, (2, 1, 128, 128), jnp.float32)

    out = jax.jit(forward)(packed, x)
    out = jax.block_until_ready(out)

    assert out.shape == (2, 12), out.shape
    # log-softmax rows must (approximately) exponentiate-sum to 1
    row_sums = jnp.exp(out).sum(axis=1)
    assert bool(jnp.all(jnp.abs(row_sums - 1.0) < 1e-3)), row_sums
    # cross-check the fused Pallas path against a plain-XLA reference of the same module
    ref = jax.jit(reference_forward)(params, x)
    ref = jax.block_until_ready(ref)
    assert bool(jnp.allclose(out, ref, atol=0.1, rtol=0.1)), (out, ref)
    print("KERNEL_OK")
</pallas_src>

<mosaic_0001>
module attributes {stable_mosaic.version = 11 : i64} {
  func.func @_head_kernel(%arg0: memref<2x288xf32, #tpu.memory_space<vmem>>, %arg1: memref<288x128xf32, #tpu.memory_space<vmem>>, %arg2: memref<1x128xf32, #tpu.memory_space<vmem>>, %arg3: memref<128x64xf32, #tpu.memory_space<vmem>>, %arg4: memref<1x64xf32, #tpu.memory_space<vmem>>, %arg5: memref<64x32xf32, #tpu.memory_space<vmem>>, %arg6: memref<1x32xf32, #tpu.memory_space<vmem>>, %arg7: memref<32x12xf32, #tpu.memory_space<vmem>>, %arg8: memref<1x12xf32, #tpu.memory_space<vmem>>, %arg9: memref<2x12xf32, #tpu.memory_space<vmem>>) attributes {dimension_semantics = [], scalar_prefetch = 0 : i64, scratch_operands = 0 : i64, tpu.core_type = #tpu.core_type<tc>} {
    %c0 = arith.constant 0 : index
    %c0_0 = arith.constant 0 : index
    %0 = vector.load %arg0[%c0, %c0_0] : memref<2x288xf32, #tpu.memory_space<vmem>>, vector<2x288xf32>
    %c0_1 = arith.constant 0 : index
    %c0_2 = arith.constant 0 : index
    %1 = vector.load %arg1[%c0_1, %c0_2] : memref<288x128xf32, #tpu.memory_space<vmem>>, vector<288x128xf32>
    %cst = arith.constant dense<0.000000e+00> : vector<2x128xf32>
    %2 = tpu.matmul %0, %1, %cst {dimension_numbers = #tpu.dot_dimension_numbers<[1], [0], [0], [1], [0, 0, 1, 1], [], []>} : vector<2x288xf32>, vector<288x128xf32>, vector<2x128xf32> -> vector<2x128xf32>
    %c0_3 = arith.constant 0 : index
    %c0_4 = arith.constant 0 : index
    %3 = vector.load %arg2[%c0_3, %c0_4] : memref<1x128xf32, #tpu.memory_space<vmem>>, vector<1x128xf32>
    %4 = vector.broadcast %3 : vector<1x128xf32> to vector<2x128xf32>
    %5 = arith.addf %2, %4 : vector<2x128xf32>
    %cst_5 = arith.constant 0.000000e+00 : f32
    %6 = vector.broadcast %cst_5 : f32 to vector<2x128xf32>
    %7 = arith.maximumf %5, %6 : vector<2x128xf32>
    %c0_6 = arith.constant 0 : index
    %c0_7 = arith.constant 0 : index
    %8 = vector.load %arg3[%c0_6, %c0_7] : memref<128x64xf32, #tpu.memory_space<vmem>>, vector<128x64xf32>
    %cst_8 = arith.constant dense<0.000000e+00> : vector<2x64xf32>
    %9 = tpu.matmul %7, %8, %cst_8 {dimension_numbers = #tpu.dot_dimension_numbers<[1], [0], [0], [1], [0, 0, 1, 1], [], []>} : vector<2x128xf32>, vector<128x64xf32>, vector<2x64xf32> -> vector<2x64xf32>
    %c0_9 = arith.constant 0 : index
    %c0_10 = arith.constant 0 : index
    %10 = vector.load %arg4[%c0_9, %c0_10] : memref<1x64xf32, #tpu.memory_space<vmem>>, vector<1x64xf32>
    %11 = vector.broadcast %10 : vector<1x64xf32> to vector<2x64xf32>
    %12 = arith.addf %9, %11 : vector<2x64xf32>
    %cst_11 = arith.constant 0.000000e+00 : f32
    %13 = vector.broadcast %cst_11 : f32 to vector<2x64xf32>
    %14 = arith.maximumf %12, %13 : vector<2x64xf32>
    %c0_12 = arith.constant 0 : index
    %c0_13 = arith.constant 0 : index
    %15 = vector.load %arg5[%c0_12, %c0_13] : memref<64x32xf32, #tpu.memory_space<vmem>>, vector<64x32xf32>
    %cst_14 = arith.constant dense<0.000000e+00> : vector<2x32xf32>
    %16 = tpu.matmul %14, %15, %cst_14 {dimension_numbers = #tpu.dot_dimension_numbers<[1], [0], [0], [1], [0, 0, 1, 1], [], []>} : vector<2x64xf32>, vector<64x32xf32>, vector<2x32xf32> -> vector<2x32xf32>
    %c0_15 = arith.constant 0 : index
    %c0_16 = arith.constant 0 : index
    %17 = vector.load %arg6[%c0_15, %c0_16] : memref<1x32xf32, #tpu.memory_space<vmem>>, vector<1x32xf32>
    %18 = vector.broadcast %17 : vector<1x32xf32> to vector<2x32xf32>
    %19 = arith.addf %16, %18 : vector<2x32xf32>
    %cst_17 = arith.constant 0.000000e+00 : f32
    %20 = vector.broadcast %cst_17 : f32 to vector<2x32xf32>
    %21 = arith.maximumf %19, %20 : vector<2x32xf32>
    %c0_18 = arith.constant 0 : index
    %c0_19 = arith.constant 0 : index
    %22 = vector.load %arg7[%c0_18, %c0_19] : memref<32x12xf32, #tpu.memory_space<vmem>>, vector<32x12xf32>
    %cst_20 = arith.constant dense<0.000000e+00> : vector<2x12xf32>
    %23 = tpu.matmul %21, %22, %cst_20 {dimension_numbers = #tpu.dot_dimension_numbers<[1], [0], [0], [1], [0, 0, 1, 1], [], []>} : vector<2x32xf32>, vector<32x12xf32>, vector<2x12xf32> -> vector<2x12xf32>
    %c0_21 = arith.constant 0 : index
    %c0_22 = arith.constant 0 : index
    %24 = vector.load %arg8[%c0_21, %c0_22] : memref<1x12xf32, #tpu.memory_space<vmem>>, vector<1x12xf32>
    %25 = vector.broadcast %24 : vector<1x12xf32> to vector<2x12xf32>
    %26 = arith.addf %23, %25 : vector<2x12xf32>
    %cst_23 = arith.constant dense<0xFF800000> : vector<2xf32>
    %27 = vector.multi_reduction <maximumf>, %26, %cst_23 [1] : vector<2x12xf32> to vector<2xf32>
    %28 = vector.shape_cast %27 : vector<2xf32> to vector<2x1xf32>
    %29 = vector.broadcast %28 : vector<2x1xf32> to vector<2x12xf32>
    %30 = arith.subf %26, %29 : vector<2x12xf32>
    %31 = math.exp %30 : vector<2x12xf32>
    %cst_24 = arith.constant dense<0.000000e+00> : vector<2xf32>
    %32 = vector.multi_reduction <add>, %31, %cst_24 [1] : vector<2x12xf32> to vector<2xf32>
    %33 = vector.shape_cast %32 : vector<2xf32> to vector<2x1xf32>
    %34 = math.log %33 : vector<2x1xf32>
    %35 = vector.broadcast %34 : vector<2x1xf32> to vector<2x12xf32>
    %36 = arith.subf %30, %35 : vector<2x12xf32>
    %c0_25 = arith.constant 0 : index
    %c0_26 = arith.constant 0 : index
    %37 = vector.load %arg9[%c0_25, %c0_26] : memref<2x12xf32, #tpu.memory_space<vmem>>, vector<2x12xf32>
    tpu.vector_store %arg9[%c0_25, %c0_26], %36 {strides = array<i32>} : memref<2x12xf32, #tpu.memory_space<vmem>>, vector<2x12xf32>,
    return
  }
}

module attributes {stable_mosaic.version = 11 : i64} {
  func.func @_backbone_kernel(%arg0: i32, %arg1: memref<1x128x1x128xf32, #tpu.memory_space<vmem>>, %arg2: memref<3x3x32x1xf32, #tpu.memory_space<vmem>>, %arg3: memref<32x1xf32, #tpu.memory_space<vmem>>, %arg4: memref<4x4x6x32xf32, #tpu.memory_space<vmem>>, %arg5: memref<6x1xf32, #tpu.memory_space<vmem>>, %arg6: memref<3x3x128x6xf32, #tpu.memory_space<vmem>>, %arg7: memref<128x1xf32, #tpu.memory_space<vmem>>, %arg8: memref<2x2x8x128xf32, #tpu.memory_space<vmem>>, %arg9: memref<8x1xf32, #tpu.memory_space<vmem>>, %arg10: memref<1x6x8x6xf32, #tpu.memory_space<vmem>>, %arg11: memref<1x63x32x63xf32, #tpu.memory_space<vmem>>, %arg12: memref<1x30x6x30xf32, #tpu.memory_space<vmem>>, %arg13: memref<1x14x128x14xf32, #tpu.memory_space<vmem>>) attributes {dimension_semantics = [#tpu.dimension_semantics<parallel>], iteration_bounds = array<i64: 2>, scalar_prefetch = 0 : i64, scratch_operands = 3 : i64, tpu.core_type = #tpu.core_type<tc>, window_params = [{transform_indices = @transform_0, window_bounds = array<i64: 1, 128, 1, 128>}, {pipeline_mode = #tpu.pipeline_mode<synchronous>, transform_indices = @transform_1, window_bounds = array<i64: 3, 3, 32, 1>}, {pipeline_mode = #tpu.pipeline_mode<synchronous>, transform_indices = @transform_2, window_bounds = array<i64: 32, 1>}, {pipeline_mode = #tpu.pipeline_mode<synchronous>, transform_indices = @transform_3, window_bounds = array<i64: 4, 4, 6, 32>}, {pipeline_mode = #tpu.pipeline_mode<synchronous>, transform_indices = @transform_4, window_bounds = array<i64: 6, 1>}, {pipeline_mode = #tpu.pipeline_mode<synchronous>, transform_indices = @transform_5, window_bounds = array<i64: 3, 3, 128, 6>}, {pipeline_mode = #tpu.pipeline_mode<synchronous>, transform_indices = @transform_6, window_bounds = array<i64: 128, 1>}, {pipeline_mode = #tpu.pipeline_mode<synchronous>, transform_indices = @transform_7, window_bounds = array<i64: 2, 2, 8, 128>}, {pipeline_mode = #tpu.pipeline_mode<synchronous>, transform_indices = @transform_8, window_bounds = array<i64: 8, 1>}, {transform_indices = @transform_9, window_bounds = array<i64: 1, 6, 8, 6>}]} {
    %0 = tpu.iota {dimensions = array<i32: 0>} : vector<126x63xi32>
    %1 = tpu.iota {dimensions = array<i32: 1>} : vector<126x63xi32>
    %c2_i32 = arith.constant 2 : i32
    %2 = vector.broadcast %c2_i32 : i32 to vector<126x63xi32>
    %3 = arith.muli %2, %1 : vector<126x63xi32>
    %4 = arith.cmpi eq, %0, %3 : vector<126x63xi32>
    %5 = arith.extui %4 : vector<126x63xi1> to vector<126x63xi32>
    %6 = arith.sitofp %5 : vector<126x63xi32> to vector<126x63xf32>
    %c2_i32_0 = arith.constant 2 : i32
    %7 = vector.broadcast %c2_i32_0 : i32 to vector<126x63xi32>
    %8 = arith.muli %7, %1 : vector<126x63xi32>
    %c1_i32 = arith.constant 1 : i32
    %9 = vector.broadcast %c1_i32 : i32 to vector<126x63xi32>
    %10 = arith.addi %8, %9 : vector<126x63xi32>
    %11 = arith.cmpi eq, %0, %10 : vector<126x63xi32>
    %12 = arith.extui %11 : vector<126x63xi1> to vector<126x63xi32>
    %13 = arith.sitofp %12 : vector<126x63xi32> to vector<126x63xf32>
    %c0 = arith.constant 0 : index
    %c0_1 = arith.constant 0 : index
    %14 = vector.load %arg3[%c0, %c0_1] : memref<32x1xf32, #tpu.memory_space<vmem>>, vector<32x1xf32>
    %c0_i32 = arith.constant 0 : i32
    %c63_i32 = arith.constant 63 : i32
    %15 = arith.addi %c0_i32, %c63_i32 : i32
    %c1_i32_2 = arith.constant 1 : i32
    scf.for %arg14 = %c0_i32 to %15 step %c1_i32_2  : i32 {
      %c1_i32_28 = arith.constant 1 : i32
      %64 = arith.muli %arg14, %c1_i32_28 : i32
      %c0_i32_29 = arith.constant 0 : i32
      %65 = arith.addi %c0_i32_29, %64 : i32
      %cst = arith.constant 0.000000e+00 : f32
      %66 = vector.broadcast %cst : f32 to vector<32x126xf32>
      %cst_30 = arith.constant 0.000000e+00 : f32
      %67 = vector.broadcast %cst_30 : f32 to vector<32x126xf32>
      %c2_i32_31 = arith.constant 2 : i32
      %68 = arith.muli %c2_i32_31, %65 : i32
      %c0_i32_32 = arith.constant 0 : i32
      %69 = arith.addi %68, %c0_i32_32 : i32
      %c0_33 = arith.constant 0 : index
      %70 = arith.index_cast %69 : i32 to index
      %c0_34 = arith.constant 0 : index
      %c0_35 = arith.constant 0 : index
      %71 = vector.load %arg1[%c0_33, %70, %c0_34, %c0_35] : memref<1x128x1x128xf32, #tpu.memory_space<vmem>>, vector<1x1x1x128xf32>
      %72 = vector.shape_cast %71 : vector<1x1x1x128xf32> to vector<1x128xf32>
      %c2_i32_36 = arith.constant 2 : i32
      %73 = arith.muli %c2_i32_36, %65 : i32
      %c1_i32_37 = arith.constant 1 : i32
      %74 = arith.addi %73, %c1_i32_37 : i32
      %c0_i32_38 = arith.constant 0 : i32
      %75 = arith.addi %74, %c0_i32_38 : i32
      %c0_39 = arith.constant 0 : index
      %76 = arith.index_cast %75 : i32 to index
      %c0_40 = arith.constant 0 : index
      %c0_41 = arith.constant 0 : index
      %77 = vector.load %arg1[%c0_39, %76, %c0_40, %c0_41] : memref<1x128x1x128xf32, #tpu.memory_space<vmem>>, vector<1x1x1x128xf32>
      %78 = vector.shape_cast %77 : vector<1x1x1x128xf32> to vector<1x128xf32>
      %c0_42 = arith.constant 0 : index
      %c0_43 = arith.constant 0 : index
      %c0_44 = arith.constant 0 : index
      %c0_45 = arith.constant 0 : index
      %79 = vector.load %arg2[%c0_42, %c0_43, %c0_44, %c0_45] : memref<3x3x32x1xf32, #tpu.memory_space<vmem>>, vector<1x1x32x1xf32>
      %80 = vector.shape_cast %79 : vector<1x1x32x1xf32> to vector<32x1xf32>
      %81 = vector.extract_strided_slice %72 {offsets = [0, 0], sizes = [1, 126], strides = [1, 1]} : vector<1x128xf32> to vector<1x126xf32>
      %82 = vector.extract_strided_slice %78 {offsets = [0, 0], sizes = [1, 126], strides = [1, 1]} : vector<1x128xf32> to vector<1x126xf32>
      %83 = vector.broadcast %80 : vector<32x1xf32> to vector<32x126xf32>
      %84 = vector.broadcast %81 : vector<1x126xf32> to vector<32x126xf32>
      %85 = arith.mulf %83, %84 : vector<32x126xf32>
      %86 = arith.addf %66, %85 : vector<32x126xf32>
      %87 = vector.broadcast %80 : vector<32x1xf32> to vector<32x126xf32>
      %88 = vector.broadcast %82 : vector<1x126xf32> to vector<32x126xf32>
      %89 = arith.mulf %87, %88 : vector<32x126xf32>
      %90 = arith.addf %67, %89 : vector<32x126xf32>
      %c0_46 = arith.constant 0 : index
      %c1 = arith.constant 1 : index
      %c0_47 = arith.constant 0 : index
      %c0_48 = arith.constant 0 : index
      %91 = vector.load %arg2[%c0_46, %c1, %c0_47, %c0_48] : memref<3x3x32x1xf32, #tpu.memory_space<vmem>>, vector<1x1x32x1xf32>
      %92 = vector.shape_cast %91 : vector<1x1x32x1xf32> to vector<32x1xf32>
      %93 = vector.extract_strided_slice %72 {offsets = [0, 1], sizes = [1, 126], strides = [1, 1]} : vector<1x128xf32> to vector<1x126xf32>
      %94 = vector.extract_strided_slice %78 {offsets = [0, 1], sizes = [1, 126], strides = [1, 1]} : vector<1x128xf32> to vector<1x126xf32>
      %95 = vector.broadcast %92 : vector<32x1xf32> to vector<32x126xf32>
      %96 = vector.broadcast %93 : vector<1x126xf32> to vector<32x126xf32>
      %97 = arith.mulf %95, %96 : vector<32x126xf32>
      %98 = arith.addf %86, %97 : vector<32x126xf32>
      %99 = vector.broadcast %92 : vector<32x1xf32> to vector<32x126xf32>
      %100 = vector.broadcast %94 : vector<1x126xf32> to vector<32x126xf32>
      %101 = arith.mulf %99, %100 : vector<32x126xf32>
      %102 = arith.addf %90, %101 : vector<32x126xf32>
      %c0_49 = arith.constant 0 : index
      %c2 = arith.constant 2 : index
      %c0_50 = arith.constant 0 : index
      %c0_51 = arith.constant 0 : index
      %103 = vector.load %arg2[%c0_49, %c2, %c0_50, %c0_51] : memref<3x3x32x1xf32, #tpu.memory_space<vmem>>, vector<1x1x32x1xf32>
      %104 = vector.shape_cast %103 : vector<1x1x32x1xf32> to vector<32x1xf32>
      %105 = vector.extract_strided_slice %72 {offsets = [0, 2], sizes = [1, 126], strides = [1, 1]} : vector<1x128xf32> to vector<1x126xf32>
      %106 = vector.extract_strided_slice %78 {offsets = [0, 2], sizes = [1, 126], strides = [1, 1]} : vector<1x128xf32> to vector<1x126xf32>
      %107 = vector.broadcast %104 : vector<32x1xf32> to vector<32x126xf32>
      %108 = vector.broadcast %105 : vector<1x126xf32> to vector<32x126xf32>
      %109 = arith.mulf %107, %108 : vector<32x126xf32>
      %110 = arith.addf %98, %109 : vector<32x126xf32>
      %111 = vector.broadcast %104 : vector<32x1xf32> to vector<32x126xf32>
      %112 = vector.broadcast %106 : vector<1x126xf32> to vector<32x126xf32>
      %113 = arith.mulf %111, %112 : vector<32x126xf32>
      %114 = arith.addf %102, %113 : vector<32x126xf32>
      %c2_i32_52 = arith.constant 2 : i32
      %115 = arith.muli %c2_i32_52, %65 : i32
      %c1_i32_53 = arith.constant 1 : i32
      %116 = arith.addi %115, %c1_i32_53 : i32
      %c0_54 = arith.constant 0 : index
      %117 = arith.index_cast %116 : i32 to index
      %c0_55 = arith.constant 0 : index
      %c0_56 = arith.constant 0 : index
      %118 = vector.load %arg1[%c0_54, %117, %c0_55, %c0_56] : memref<1x128x1x128xf32, #tpu.memory_space<vmem>>, vector<1x1x1x128xf32>
      %119 = vector.shape_cast %118 : vector<1x1x1x128xf32> to vector<1x128xf32>
      %c2_i32_57 = arith.constant 2 : i32
      %120 = arith.muli %c2_i32_57, %65 : i32
      %c1_i32_58 = arith.constant 1 : i32
      %121 = arith.addi %120, %c1_i32_58 : i32
      %c1_i32_59 = arith.constant 1 : i32
      %122 = arith.addi %121, %c1_i32_59 : i32
      %c0_60 = arith.constant 0 : index
      %123 = arith.index_cast %122 : i32 to index
      %c0_61 = arith.constant 0 : index
      %c0_62 = arith.constant 0 : index
      %124 = vector.load %arg1[%c0_60, %123, %c0_61, %c0_62] : memref<1x128x1x128xf32, #tpu.memory_space<vmem>>, vector<1x1x1x128xf32>
      %125 = vector.shape_cast %124 : vector<1x1x1x128xf32> to vector<1x128xf32>
      %c1_63 = arith.constant 1 : index
      %c0_64 = arith.constant 0 : index
      %c0_65 = arith.constant 0 : index
      %c0_66 = arith.constant 0 : index
      %126 = vector.load %arg2[%c1_63, %c0_64, %c0_65, %c0_66] : memref<3x3x32x1xf32, #tpu.memory_space<vmem>>, vector<1x1x32x1xf32>
      %127 = vector.shape_cast %126 : vector<1x1x32x1xf32> to vector<32x1xf32>
      %128 = vector.extract_strided_slice %119 {offsets = [0, 0], sizes = [1, 126], strides = [1, 1]} : vector<1x128xf32> to vector<1x126xf32>
      %129 = vector.extract_strided_slice %125 {offsets = [0, 0], sizes = [1, 126], strides = [1, 1]} : vector<1x128xf32> to vector<1x126xf32>
      %130 = vector.broadcast %127 : vector<32x1xf32> to vector<32x126xf32>
      %131 = vector.broadcast %128 : vector<1x126xf32> to vector<32x126xf32>
      %132 = arith.mulf %130, %131 : vector<32x126xf32>
      %133 = arith.addf %110, %132 : vector<32x126xf32>
      %134 = vector.broadcast %127 : vector<32x1xf32> to vector<32x126xf32>
      %135 = vector.broadcast %129 : vector<1x126xf32> to vector<32x126xf32>
      %136 = arith.mulf %134, %135 : vector<32x126xf32>
      %137 = arith.addf %114, %136 : vector<32x126xf32>
      %c1_67 = arith.constant 1 : index
      %c1_68 = arith.constant 1 : index
      %c0_69 = arith.constant 0 : index
      %c0_70 = arith.constant 0 : index
      %138 = vector.load %arg2[%c1_67, %c1_68, %c0_69, %c0_70] : memref<3x3x32x1xf32, #tpu.memory_space<vmem>>, vector<1x1x32x1xf32>
      %139 = vector.shape_cast %138 : vector<1x1x32x1xf32> to vector<32x1xf32>
      %140 = vector.extract_strided_slice %119 {offsets = [0, 1], sizes = [1, 126], strides = [1, 1]} : vector<1x128xf32> to vector<1x126xf32>
      %141 = vector.extract_strided_slice %125 {offsets = [0, 1], sizes = [1, 126], strides = [1, 1]} : vector<1x128xf32> to vector<1x126xf32>
      %142 = vector.broadcast %139 : vector<32x1xf32> to vector<32x126xf32>
      %143 = vector.broadcast %140 : vector<1x126xf32> to vector<32x126xf32>
      %144 = arith.mulf %142, %143 : vector<32x126xf32>
      %145 = arith.addf %133, %144 : vector<32x126xf32>
      %146 = vector.broadcast %139 : vector<32x1xf32> to vector<32x126xf32>
      %147 = vector.broadcast %141 : vector<1x126xf32> to vector<32x126xf32>
      %148 = arith.mulf %146, %147 : vector<32x126xf32>
      %149 = arith.addf %137, %148 : vector<32x126xf32>
      %c1_71 = arith.constant 1 : index
      %c2_72 = arith.constant 2 : index
      %c0_73 = arith.constant 0 : index
      %c0_74 = arith.constant 0 : index
      %150 = vector.load %arg2[%c1_71, %c2_72, %c0_73, %c0_74] : memref<3x3x32x1xf32, #tpu.memory_space<vmem>>, vector<1x1x32x1xf32>
      %151 = vector.shape_cast %150 : vector<1x1x32x1xf32> to vector<32x1xf32>
      %152 = vector.extract_strided_slice %119 {offsets = [0, 2], sizes = [1, 126], strides = [1, 1]} : vector<1x128xf32> to vector<1x126xf32>
      %153 = vector.extract_strided_slice %125 {offsets = [0, 2], sizes = [1, 126], strides = [1, 1]} : vector<1x128xf32> to vector<1x126xf32>
      %154 = vector.broadcast %151 : vector<32x1xf32> to vector<32x126xf32>
      %155 = vector.broadcast %152 : vector<1x126xf32> to vector<32x126xf32>
      %156 = arith.mulf %154, %155 : vector<32x126xf32>
      %157 = arith.addf %145, %156 : vector<32x126xf32>
      %158 = vector.broadcast %151 : vector<32x1xf32> to vector<32x126xf32>
      %159 = vector.broadcast %153 : vector<1x126xf32> to vector<32x126xf32>
      %160 = arith.mulf %158, %159 : vector<32x126xf32>
      %161 = arith.addf %149, %160 : vector<32x126xf32>
      %c2_i32_75 = arith.constant 2 : i32
      %162 = arith.muli %c2_i32_75, %65 : i32
      %c2_i32_76 = arith.constant 2 : i32
      %163 = arith.addi %162, %c2_i32_76 : i32
      %c0_77 = arith.constant 0 : index
      %164 = arith.index_cast %163 : i32 to index
      %c0_78 = arith.constant 0 : index
      %c0_79 = arith.constant 0 : index
      %165 = vector.load %arg1[%c0_77, %164, %c0_78, %c0_79] : memref<1x128x1x128xf32, #tpu.memory_space<vmem>>, vector<1x1x1x128xf32>
      %166 = vector.shape_cast %165 : vector<1x1x1x128xf32> to vector<1x128xf32>
      %c2_i32_80 = arith.constant 2 : i32
      %167 = arith.muli %c2_i32_80, %65 : i32
      %c1_i32_81 = arith.constant 1 : i32
      %168 = arith.addi %167, %c1_i32_81 : i32
      %c2_i32_82 = arith.constant 2 : i32
      %169 = arith.addi %168, %c2_i32_82 : i32
      %c0_83 = arith.constant 0 : index
      %170 = arith.index_cast %169 : i32 to index
      %c0_84 = arith.constant 0 : index
      %c0_85 = arith.constant 0 : index
      %171 = vector.load %arg1[%c0_83, %170, %c0_84, %c0_85] : memref<1x128x1x128xf32, #tpu.memory_space<vmem>>, vector<1x1x1x128xf32>
      %172 = vector.shape_cast %171 : vector<1x1x1x128xf32> to vector<1x128xf32>
      %c2_86 = arith.constant 2 : index
      %c0_87 = arith.constant 0 : index
      %c0_88 = arith.constant 0 : index
      %c0_89 = arith.constant 0 : index
      %173 = vector.load %arg2[%c2_86, %c0_87, %c0_88, %c0_89] : memref<3x3x32x1xf32, #tpu.memory_space<vmem>>, vector<1x1x32x1xf32>
      %174 = vector.shape_cast %173 : vector<1x1x32x1xf32> to vector<32x1xf32>
      %175 = vector.extract_strided_slice %166 {offsets = [0, 0], sizes = [1, 126], strides = [1, 1]} : vector<1x128xf32> to vector<1x126xf32>
      %176 = vector.extract_strided_slice %172 {offsets = [0, 0], sizes = [1, 126], strides = [1, 1]} : vector<1x128xf32> to vector<1x126xf32>
      %177 = vector.broadcast %174 : vector<32x1xf32> to vector<32x126xf32>
      %178 = vector.broadcast %175 : vector<1x126xf32> to vector<32x126xf32>
      %179 = arith.mulf %177, %178 : vector<32x126xf32>
      %180 = arith.addf %157, %179 : vector<32x126xf32>
      %181 = vector.broadcast %174 : vector<32x1xf32> to vector<32x126xf32>
      %182 = vector.broadcast %176 : vector<1x126xf32> to vector<32x126xf32>
      %183 = arith.mulf %181, %182 : vector<32x126xf32>
      %184 = arith.addf %161, %183 : vector<32x126xf32>
      %c2_90 = arith.constant 2 : index
      %c1_91 = arith.constant 1 : index
      %c0_92 = arith.constant 0 : index
      %c0_93 = arith.constant 0 : index
      %185 = vector.load %arg2[%c2_90, %c1_91, %c0_92, %c0_93] : memref<3x3x32x1xf32, #tpu.memory_space<vmem>>, vector<1x1x32x1xf32>
      %186 = vector.shape_cast %185 : vector<1x1x32x1xf32> to vector<32x1xf32>
      %187 = vector.extract_strided_slice %166 {offsets = [0, 1], sizes = [1, 126], strides = [1, 1]} : vector<1x128xf32> to vector<1x126xf32>
      %188 = vector.extract_strided_slice %172 {offsets = [0, 1], sizes = [1, 126], strides = [1, 1]} : vector<1x128xf32> to vector<1x126xf32>
      %189 = vector.broadcast %186 : vector<32x1xf32> to vector<32x126xf32>
      %190 = vector.broadcast %187 : vector<1x126xf32> to vector<32x126xf32>
      %191 = arith.mulf %189, %190 : vector<32x126xf32>
      %192 = arith.addf %180, %191 : vector<32x126xf32>
      %193 = vector.broadcast %186 : vector<32x1xf32> to vector<32x126xf32>
      %194 = vector.broadcast %188 : vector<1x126xf32> to vector<32x126xf32>
      %195 = arith.mulf %193, %194 : vector<32x126xf32>
      %196 = arith.addf %184, %195 : vector<32x126xf32>
      %c2_94 = arith.constant 2 : index
      %c2_95 = arith.constant 2 : index
      %c0_96 = arith.constant 0 : index
      %c0_97 = arith.constant 0 : index
      %197 = vector.load %arg2[%c2_94, %c2_95, %c0_96, %c0_97] : memref<3x3x32x1xf32, #tpu.memory_space<vmem>>, vector<1x1x32x1xf32>
      %198 = vector.shape_cast %197 : vector<1x1x32x1xf32> to vector<32x1xf32>
      %199 = vector.extract_strided_slice %166 {offsets = [0, 2], sizes = [1, 126], strides = [1, 1]} : vector<1x128xf32> to vector<1x126xf32>
      %200 = vector.extract_strided_slice %172 {offsets = [0, 2], sizes = [1, 126], strides = [1, 1]} : vector<1x128xf32> to vector<1x126xf32>
      %201 = vector.broadcast %198 : vector<32x1xf32> to vector<32x126xf32>
      %202 = vector.broadcast %199 : vector<1x126xf32> to vector<32x126xf32>
      %203 = arith.mulf %201, %202 : vector<32x126xf32>
      %204 = arith.addf %192, %203 : vector<32x126xf32>
      %205 = vector.broadcast %198 : vector<32x1xf32> to vector<32x126xf32>
      %206 = vector.broadcast %200 : vector<1x126xf32> to vector<32x126xf32>
      %207 = arith.mulf %205, %206 : vector<32x126xf32>
      %208 = arith.addf %196, %207 : vector<32x126xf32>
      %209 = vector.broadcast %14 : vector<32x1xf32> to vector<32x126xf32>
      %210 = arith.addf %204, %209 : vector<32x126xf32>
      %211 = vector.broadcast %14 : vector<32x1xf32> to vector<32x126xf32>
      %212 = arith.addf %208, %211 : vector<32x126xf32>
      %cst_98 = arith.constant 0.000000e+00 : f32
      %213 = vector.broadcast %cst_98 : f32 to vector<32x126xf32>
      %214 = arith.cmpf oge, %210, %213 : vector<32x126xf32>
      %cst_99 = arith.constant 0.00999999977 : f32
      %215 = vector.broadcast %cst_99 : f32 to vector<32x126xf32>
      %216 = arith.mulf %215, %210 : vector<32x126xf32>
      %217 = arith.select %214, %210, %216 : vector<32x126xi1>, vector<32x126xf32>
      %cst_100 = arith.constant 0.000000e+00 : f32
      %218 = vector.broadcast %cst_100 : f32 to vector<32x126xf32>
      %219 = arith.cmpf oge, %212, %218 : vector<32x126xf32>
      %cst_101 = arith.constant 0.00999999977 : f32
      %220 = vector.broadcast %cst_101 : f32 to vector<32x126xf32>
      %221 = arith.mulf %220, %212 : vector<32x126xf32>
      %222 = arith.select %219, %212, %221 : vector<32x126xi1>, vector<32x126xf32>
      %223 = arith.maximumf %217, %222 : vector<32x126xf32>
      %cst_102 = arith.constant dense<0.000000e+00> : vector<32x63xf32>
      %224 = tpu.matmul %223, %6, %cst_102 {dimension_numbers = #tpu.dot_dimension_numbers<[1], [0], [0], [1], [0, 0, 1, 1], [], []>} : vector<32x126xf32>, vector<126x63xf32>, vector<32x63xf32> -> vector<32x63xf32>
      %cst_103 = arith.constant dense<0.000000e+00> : vector<32x63xf32>
      %225 = tpu.matmul %223, %13, %cst_103 {dimension_numbers = #tpu.dot_dimension_numbers<[1], [0], [0], [1], [0, 0, 1, 1], [], []>} : vector<32x126xf32>, vector<126x63xf32>, vector<32x63xf32> -> vector<32x63xf32>
      %226 = arith.maximumf %224, %225 : vector<32x63xf32>
      %c0_104 = arith.constant 0 : index
      %227 = arith.index_cast %65 : i32 to index
      %c0_105 = arith.constant 0 : index
      %c0_106 = arith.constant 0 : index
      %228 = vector.load %arg11[%c0_104, %227, %c0_105, %c0_106] : memref<1x63x32x63xf32, #tpu.memory_space<vmem>>, vector<1x1x32x63xf32>
      %229 = vector.shape_cast %228 : vector<1x1x32x63xf32> to vector<32x63xf32>
      %230 = vector.shape_cast %226 : vector<32x63xf32> to vector<1x1x32x63xf32>
      tpu.vector_store %arg11[%c0_104, %227, %c0_105, %c0_106], %230 {strides = array<i32>} : memref<1x63x32x63xf32, #tpu.memory_space<vmem>>, vector<1x1x32x63xf32>,
    }
    %c63_i32_3 = arith.constant 63 : i32
    %16 = tpu.iota {dimensions = array<i32: 0>} : vector<60x30xi32>
    %17 = tpu.iota {dimensions = array<i32: 1>} : vector<60x30xi32>
    %c2_i32_4 = arith.constant 2 : i32
    %18 = vector.broadcast %c2_i32_4 : i32 to vector<60x30xi32>
    %19 = arith.muli %18, %17 : vector<60x30xi32>
    %20 = arith.cmpi eq, %16, %19 : vector<60x30xi32>
    %21 = arith.extui %20 : vector<60x30xi1> to vector<60x30xi32>
    %22 = arith.sitofp %21 : vector<60x30xi32> to vector<60x30xf32>
    %c2_i32_5 = arith.constant 2 : i32
    %23 = vector.broadcast %c2_i32_5 : i32 to vector<60x30xi32>
    %24 = arith.muli %23, %17 : vector<60x30xi32>
    %c1_i32_6 = arith.constant 1 : i32
    %25 = vector.broadcast %c1_i32_6 : i32 to vector<60x30xi32>
    %26 = arith.addi %24, %25 : vector<60x30xi32>
    %27 = arith.cmpi eq, %16, %26 : vector<60x30xi32>
    %28 = arith.extui %27 : vector<60x30xi1> to vector<60x30xi32>
    %29 = arith.sitofp %28 : vector<60x30xi32> to vector<60x30xf32>
    %c0_7 = arith.constant 0 : index
    %c0_8 = arith.constant 0 : index
    %30 = vector.load %arg5[%c0_7, %c0_8] : memref<6x1xf32, #tpu.memory_space<vmem>>, vector<6x1xf32>
    %c0_i32_9 = arith.constant 0 : i32
    %c30_i32 = arith.constant 30 : i32
    %31 = arith.addi %c0_i32_9, %c30_i32 : i32
    %c1_i32_10 = arith.constant 1 : i32
    scf.for %arg14 = %c0_i32_9 to %31 step %c1_i32_10  : i32 {
      %c1_i32_28 = arith.constant 1 : i32
      %64 = arith.muli %arg14, %c1_i32_28 : i32
      %c0_i32_29 = arith.constant 0 : i32
      %65 = arith.addi %c0_i32_29, %64 : i32
      %cst = arith.constant 0.000000e+00 : f32
      %66 = vector.broadcast %cst : f32 to vector<6x60xf32>
      %cst_30 = arith.constant 0.000000e+00 : f32
      %67 = vector.broadcast %cst_30 : f32 to vector<6x60xf32>
      %c2_i32_31 = arith.constant 2 : i32
      %68 = arith.muli %c2_i32_31, %65 : i32
      %c0_i32_32 = arith.constant 0 : i32
      %69 = arith.addi %68, %c0_i32_32 : i32
      %c0_33 = arith.constant 0 : index
      %70 = arith.index_cast %69 : i32 to index
      %c0_34 = arith.constant 0 : index
      %c0_35 = arith.constant 0 : index
      %71 = vector.load %arg11[%c0_33, %70, %c0_34, %c0_35] : memref<1x63x32x63xf32, #tpu.memory_space<vmem>>, vector<1x1x32x63xf32>
      %72 = vector.shape_cast %71 : vector<1x1x32x63xf32> to vector<32x63xf32>
      %c2_i32_36 = arith.constant 2 : i32
      %73 = arith.muli %c2_i32_36, %65 : i32
      %c1_i32_37 = arith.constant 1 : i32
      %74 = arith.addi %73, %c1_i32_37 : i32
      %c0_i32_38 = arith.constant 0 : i32
      %75 = arith.addi %74, %c0_i32_38 : i32
      %c0_39 = arith.constant 0 : index
      %76 = arith.index_cast %75 : i32 to index
      %c0_40 = arith.constant 0 : index
      %c0_41 = arith.constant 0 : index
      %77 = vector.load %arg11[%c0_39, %76, %c0_40, %c0_41] : memref<1x63x32x63xf32, #tpu.memory_space<vmem>>, vector<1x1x32x63xf32>
      %78 = vector.shape_cast %77 : vector<1x1x32x63xf32> to vector<32x63xf32>
      %c0_42 = arith.constant 0 : index
      %c0_43 = arith.constant 0 : index
      %c0_44 = arith.constant 0 : index
      %c0_45 = arith.constant 0 : index
      %79 = vector.load %arg4[%c0_42, %c0_43, %c0_44, %c0_45] : memref<4x4x6x32xf32, #tpu.memory_space<vmem>>, vector<1x1x6x32xf32>
      %80 = vector.shape_cast %79 : vector<1x1x6x32xf32> to vector<6x32xf32>
      %81 = vector.extract_strided_slice %72 {offsets = [0, 0], sizes = [32, 60], strides = [1, 1]} : vector<32x63xf32> to vector<32x60xf32>
      %82 = vector.extract_strided_slice %78 {offsets = [0, 0], sizes = [32, 60], strides = [1, 1]} : vector<32x63xf32> to vector<32x60xf32>
      %cst_46 = arith.constant dense<0.000000e+00> : vector<6x60xf32>
      %83 = tpu.matmul %80, %81, %cst_46 {dimension_numbers = #tpu.dot_dimension_numbers<[1], [0], [0], [1], [0, 0, 1, 1], [], []>} : vector<6x32xf32>, vector<32x60xf32>, vector<6x60xf32> -> vector<6x60xf32>
      %84 = arith.addf %66, %83 : vector<6x60xf32>
      %cst_47 = arith.constant dense<0.000000e+00> : vector<6x60xf32>
      %85 = tpu.matmul %80, %82, %cst_47 {dimension_numbers = #tpu.dot_dimension_numbers<[1], [0], [0], [1], [0, 0, 1, 1], [], []>} : vector<6x32xf32>, vector<32x60xf32>, vector<6x60xf32> -> vector<6x60xf32>
      %86 = arith.addf %67, %85 : vector<6x60xf32>
      %c0_48 = arith.constant 0 : index
      %c1 = arith.constant 1 : index
      %c0_49 = arith.constant 0 : index
      %c0_50 = arith.constant 0 : index
      %87 = vector.load %arg4[%c0_48, %c1, %c0_49, %c0_50] : memref<4x4x6x32xf32, #tpu.memory_space<vmem>>, vector<1x1x6x32xf32>
      %88 = vector.shape_cast %87 : vector<1x1x6x32xf32> to vector<6x32xf32>
      %89 = vector.extract_strided_slice %72 {offsets = [0, 1], sizes = [32, 60], strides = [1, 1]} : vector<32x63xf32> to vector<32x60xf32>
      %90 = vector.extract_strided_slice %78 {offsets = [0, 1], sizes = [32, 60], strides = [1, 1]} : vector<32x63xf32> to vector<32x60xf32>
      %cst_51 = arith.constant dense<0.000000e+00> : vector<6x60xf32>
      %91 = tpu.matmul %88, %89, %cst_51 {dimension_numbers = #tpu.dot_dimension_numbers<[1], [0], [0], [1], [0, 0, 1, 1], [], []>} : vector<6x32xf32>, vector<32x60xf32>, vector<6x60xf32> -> vector<6x60xf32>
      %92 = arith.addf %84, %91 : vector<6x60xf32>
      %cst_52 = arith.constant dense<0.000000e+00> : vector<6x60xf32>
      %93 = tpu.matmul %88, %90, %cst_52 {dimension_numbers = #tpu.dot_dimension_numbers<[1], [0], [0], [1], [0, 0, 1, 1], [], []>} : vector<6x32xf32>, vector<32x60xf32>, vector<6x60xf32> -> vector<6x60xf32>
      %94 = arith.addf %86, %93 : vector<6x60xf32>
      %c0_53 = arith.constant 0 : index
      %c2 = arith.constant 2 : index
      %c0_54 = arith.constant 0 : index
      %c0_55 = arith.constant 0 : index
      %95 = vector.load %arg4[%c0_53, %c2, %c0_54, %c0_55] : memref<4x4x6x32xf32, #tpu.memory_space<vmem>>, vector<1x1x6x32xf32>
      %96 = vector.shape_cast %95 : vector<1x1x6x32xf32> to vector<6x32xf32>
      %97 = vector.extract_strided_slice %72 {offsets = [0, 2], sizes = [32, 60], strides = [1, 1]} : vector<32x63xf32> to vector<32x60xf32>
      %98 = vector.extract_strided_slice %78 {offsets = [0, 2], sizes = [32, 60], strides = [1, 1]} : vector<32x63xf32> to vector<32x60xf32>
      %cst_56 = arith.constant dense<0.000000e+00> : vector<6x60xf32>
      %99 = tpu.matmul %96, %97, %cst_56 {dimension_numbers = #tpu.dot_dimension_numbers<[1], [0], [0], [1], [0, 0, 1, 1], [], []>} : vector<6x32xf32>, vector<32x60xf32>, vector<6x60xf32> -> vector<6x60xf32>
      %100 = arith.addf %92, %99 : vector<6x60xf32>
      %cst_57 = arith.constant dense<0.000000e+00> : vector<6x60xf32>
      %101 = tpu.matmul %96, %98, %cst_57 {dimension_numbers = #tpu.dot_dimension_numbers<[1], [0], [0], [1], [0, 0, 1, 1], [], []>} : vector<6x32xf32>, vector<32x60xf32>, vector<6x60xf32> -> vector<6x60xf32>
      %102 = arith.addf %94, %101 : vector<6x60xf32>
      %c0_58 = arith.constant 0 : index
      %c3 = arith.constant 3 : index
      %c0_59 = arith.constant 0 : index
      %c0_60 = arith.constant 0 : index
      %103 = vector.load %arg4[%c0_58, %c3, %c0_59, %c0_60] : memref<4x4x6x32xf32, #tpu.memory_space<vmem>>, vector<1x1x6x32xf32>
      %104 = vector.shape_cast %103 : vector<1x1x6x32xf32> to vector<6x32xf32>
      %105 = vector.extract_strided_slice %72 {offsets = [0, 3], sizes = [32, 60], strides = [1, 1]} : vector<32x63xf32> to vector<32x60xf32>
      %106 = vector.extract_strided_slice %78 {offsets = [0, 3], sizes = [32, 60], strides = [1, 1]} : vector<32x63xf32> to vector<32x60xf32>
      %cst_61 = arith.constant dense<0.000000e+00> : vector<6x60xf32>
      %107 = tpu.matmul %104, %105, %cst_61 {dimension_numbers = #tpu.dot_dimension_numbers<[1], [0], [0], [1], [0, 0, 1, 1], [], []>} : vector<6x32xf32>, vector<32x60xf32>, vector<6x60xf32> -> vector<6x60xf32>
      %108 = arith.addf %100, %107 : vector<6x60xf32>
      %cst_62 = arith.constant dense<0.000000e+00> : vector<6x60xf32>
      %109 = tpu.matmul %104, %106, %cst_62 {dimension_numbers = #tpu.dot_dimension_numbers<[1], [0], [0], [1], [0, 0, 1, 1], [], []>} : vector<6x32xf32>, vector<32x60xf32>, vector<6x60xf32> -> vector<6x60xf32>
      %110 = arith.addf %102, %109 : vector<6x60xf32>
      %c2_i32_63 = arith.constant 2 : i32
      %111 = arith.muli %c2_i32_63, %65 : i32
      %c1_i32_64 = arith.constant 1 : i32
      %112 = arith.addi %111, %c1_i32_64 : i32
      %c0_65 = arith.constant 0 : index
      %113 = arith.index_cast %112 : i32 to index
      %c0_66 = arith.constant 0 : index
      %c0_67 = arith.constant 0 : index
      %114 = vector.load %arg11[%c0_65, %113, %c0_66, %c0_67] : memref<1x63x32x63xf32, #tpu.memory_space<vmem>>, vector<1x1x32x63xf32>
      %115 = vector.shape_cast %114 : vector<1x1x32x63xf32> to vector<32x63xf32>
      %c2_i32_68 = arith.constant 2 : i32
      %116 = arith.muli %c2_i32_68, %65 : i32
      %c1_i32_69 = arith.constant 1 : i32
      %117 = arith.addi %116, %c1_i32_69 : i32
      %c1_i32_70 = arith.constant 1 : i32
      %118 = arith.addi %117, %c1_i32_70 : i32
      %c0_71 = arith.constant 0 : index
      %119 = arith.index_cast %118 : i32 to index
      %c0_72 = arith.constant 0 : index
      %c0_73 = arith.constant 0 : index
      %120 = vector.load %arg11[%c0_71, %119, %c0_72, %c0_73] : memref<1x63x32x63xf32, #tpu.memory_space<vmem>>, vector<1x1x32x63xf32>
      %121 = vector.shape_cast %120 : vector<1x1x32x63xf32> to vector<32x63xf32>
      %c1_74 = arith.constant 1 : index
      %c0_75 = arith.constant 0 : index
      %c0_76 = arith.constant 0 : index
      %c0_77 = arith.constant 0 : index
      %122 = vector.load %arg4[%c1_74, %c0_75, %c0_76, %c0_77] : memref<4x4x6x32xf32, #tpu.memory_space<vmem>>, vector<1x1x6x32xf32>
      %123 = vector.shape_cast %122 : vector<1x1x6x32xf32> to vector<6x32xf32>
      %124 = vector.extract_strided_slice %115 {offsets = [0, 0], sizes = [32, 60], strides = [1, 1]} : vector<32x63xf32> to vector<32x60xf32>
      %125 = vector.extract_strided_slice %121 {offsets = [0, 0], sizes = [32, 60], strides = [1, 1]} : vector<32x63xf32> to vector<32x60xf32>
      %cst_78 = arith.constant dense<0.000000e+00> : vector<6x60xf32>
      %126 = tpu.matmul %123, %124, %cst_78 {dimension_numbers = #tpu.dot_dimension_numbers<[1], [0], [0], [1], [0, 0, 1, 1], [], []>} : vector<6x32xf32>, vector<32x60xf32>, vector<6x60xf32> -> vector<6x60xf32>
      %127 = arith.addf %108, %126 : vector<6x60xf32>
      %cst_79 = arith.constant dense<0.000000e+00> : vector<6x60xf32>
      %128 = tpu.matmul %123, %125, %cst_79 {dimension_numbers = #tpu.dot_dimension_numbers<[1], [0], [0], [1], [0, 0, 1, 1], [], []>} : vector<6x32xf32>, vector<32x60xf32>, vector<6x60xf32> -> vector<6x60xf32>
      %129 = arith.addf %110, %128 : vector<6x60xf32>
      %c1_80 = arith.constant 1 : index
      %c1_81 = arith.constant 1 : index
      %c0_82 = arith.constant 0 : index
      %c0_83 = arith.constant 0 : index
      %130 = vector.load %arg4[%c1_80, %c1_81, %c0_82, %c0_83] : memref<4x4x6x32xf32, #tpu.memory_space<vmem>>, vector<1x1x6x32xf32>
      %131 = vector.shape_cast %130 : vector<1x1x6x32xf32> to vector<6x32xf32>
      %132 = vector.extract_strided_slice %115 {offsets = [0, 1], sizes = [32, 60], strides = [1, 1]} : vector<32x63xf32> to vector<32x60xf32>
      %133 = vector.extract_strided_slice %121 {offsets = [0, 1], sizes = [32, 60], strides = [1, 1]} : vector<32x63xf32> to vector<32x60xf32>
      %cst_84 = arith.constant dense<0.000000e+00> : vector<6x60xf32>
      %134 = tpu.matmul %131, %132, %cst_84 {dimension_numbers = #tpu.dot_dimension_numbers<[1], [0], [0], [1], [0, 0, 1, 1], [], []>} : vector<6x32xf32>, vector<32x60xf32>, vector<6x60xf32> -> vector<6x60xf32>
      %135 = arith.addf %127, %134 : vector<6x60xf32>
      %cst_85 = arith.constant dense<0.000000e+00> : vector<6x60xf32>
      %136 = tpu.matmul %131, %133, %cst_85 {dimension_numbers = #tpu.dot_dimension_numbers<[1], [0], [0], [1], [0, 0, 1, 1], [], []>} : vector<6x32xf32>, vector<32x60xf32>, vector<6x60xf32> -> vector<6x60xf32>
      %137 = arith.addf %129, %136 : vector<6x60xf32>
      %c1_86 = arith.constant 1 : index
      %c2_87 = arith.constant 2 : index
      %c0_88 = arith.constant 0 : index
      %c0_89 = arith.constant 0 : index
      %138 = vector.load %arg4[%c1_86, %c2_87, %c0_88, %c0_89] : memref<4x4x6x32xf32, #tpu.memory_space<vmem>>, vector<1x1x6x32xf32>
      %139 = vector.shape_cast %138 : vector<1x1x6x32xf32> to vector<6x32xf32>
      %140 = vector.extract_strided_slice %115 {offsets = [0, 2], sizes = [32, 60], strides = [1, 1]} : vector<32x63xf32> to vector<32x60xf32>
      %141 = vector.extract_strided_slice %121 {offsets = [0, 2], sizes = [32, 60], strides = [1, 1]} : vector<32x63xf32> to vector<32x60xf32>
      %cst_90 = arith.constant dense<0.000000e+00> : vector<6x60xf32>
      %142 = tpu.matmul %139, %140, %cst_90 {dimension_numbers = #tpu.dot_dimension_numbers<[1], [0], [0], [1], [0, 0, 1, 1], [], []>} : vector<6x32xf32>, vector<32x60xf32>, vector<6x60xf32> -> vector<6x60xf32>
      %143 = arith.addf %135, %142 : vector<6x60xf32>
      %cst_91 = arith.constant dense<0.000000e+00> : vector<6x60xf32>
      %144 = tpu.matmul %139, %141, %cst_91 {dimension_numbers = #tpu.dot_dimension_numbers<[1], [0], [0], [1], [0, 0, 1, 1], [], []>} : vector<6x32xf32>, vector<32x60xf32>, vector<6x60xf32> -> vector<6x60xf32>
      %145 = arith.addf %137, %144 : vector<6x60xf32>
      %c1_92 = arith.constant 1 : index
      %c3_93 = arith.constant 3 : index
      %c0_94 = arith.constant 0 : index
      %c0_95 = arith.constant 0 : index
      %146 = vector.load %arg4[%c1_92, %c3_93, %c0_94, %c0_95] : memref<4x4x6x32xf32, #tpu.memory_space<vmem>>, vector<1x1x6x32xf32>
      %147 = vector.shape_cast %146 : vector<1x1x6x32xf32> to vector<6x32xf32>
      %148 = vector.extract_strided_slice %115 {offsets = [0, 3], sizes = [32, 60], strides = [1, 1]} : vector<32x63xf32> to vector<32x60xf32>
      %149 = vector.extract_strided_slice %121 {offsets = [0, 3], sizes = [32, 60], strides = [1, 1]} : vector<32x63xf32> to vector<32x60xf32>
      %cst_96 = arith.constant dense<0.000000e+00> : vector<6x60xf32>
      %150 = tpu.matmul %147, %148, %cst_96 {dimension_numbers = #tpu.dot_dimension_numbers<[1], [0], [0], [1], [0, 0, 1, 1], [], []>} : vector<6x32xf32>, vector<32x60xf32>, vector<6x60xf32> -> vector<6x60xf32>
      %151 = arith.addf %143, %150 : vector<6x60xf32>
      %cst_97 = arith.constant dense<0.000000e+00> : vector<6x60xf32>
      %152 = tpu.matmul %147, %149, %cst_97 {dimension_numbers = #tpu.dot_dimension_numbers<[1], [0], [0], [1], [0, 0, 1, 1], [], []>} : vector<6x32xf32>, vector<32x60xf32>, vector<6x60xf32> -> vector<6x60xf32>
      %153 = arith.addf %145, %152 : vector<6x60xf32>
      %c2_i32_98 = arith.constant 2 : i32
      %154 = arith.muli %c2_i32_98, %65 : i32
      %c2_i32_99 = arith.constant 2 : i32
      %155 = arith.addi %154, %c2_i32_99 : i32
      %c0_100 = arith.constant 0 : index
      %156 = arith.index_cast %155 : i32 to index
      %c0_101 = arith.constant 0 : index
      %c0_102 = arith.constant 0 : index
      %157 = vector.load %arg11[%c0_100, %156, %c0_101, %c0_102] : memref<1x63x32x63xf32, #tpu.memory_space<vmem>>, vector<1x1x32x63xf32>
      %158 = vector.shape_cast %157 : vector<1x1x32x63xf32> to vector<32x63xf32>
      %c2_i32_103 = arith.constant 2 : i32
      %159 = arith.muli %c2_i32_103, %65 : i32
      %c1_i32_104 = arith.constant 1 : i32
      %160 = arith.addi %159, %c1_i32_104 : i32
      %c2_i32_105 = arith.constant 2 : i32
      %161 = arith.addi %160, %c2_i32_105 : i32
      %c0_106 = arith.constant 0 : index
      %162 = arith.index_cast %161 : i32 to index
      %c0_107 = arith.constant 0 : index
      %c0_108 = arith.constant 0 : index
      %163 = vector.load %arg11[%c0_106, %162, %c0_107, %c0_108] : memref<1x63x32x63xf32, #tpu.memory_space<vmem>>, vector<1x1x32x63xf32>
      %164 = vector.shape_cast %163 : vector<1x1x32x63xf32> to vector<32x63xf32>
      %c2_109 = arith.constant 2 : index
      %c0_110 = arith.constant 0 : index
      %c0_111 = arith.constant 0 : index
      %c0_112 = arith.constant 0 : index
      %165 = vector.load %arg4[%c2_109, %c0_110, %c0_111, %c0_112] : memref<4x4x6x32xf32, #tpu.memory_space<vmem>>, vector<1x1x6x32xf32>
      %166 = vector.shape_cast %165 : vector<1x1x6x32xf32> to vector<6x32xf32>
      %167 = vector.extract_strided_slice %158 {offsets = [0, 0], sizes = [32, 60], strides = [1, 1]} : vector<32x63xf32> to vector<32x60xf32>
      %168 = vector.extract_strided_slice %164 {offsets = [0, 0], sizes = [32, 60], strides = [1, 1]} : vector<32x63xf32> to vector<32x60xf32>
      %cst_113 = arith.constant dense<0.000000e+00> : vector<6x60xf32>
      %169 = tpu.matmul %166, %167, %cst_113 {dimension_numbers = #tpu.dot_dimension_numbers<[1], [0], [0], [1], [0, 0, 1, 1], [], []>} : vector<6x32xf32>, vector<32x60xf32>, vector<6x60xf32> -> vector<6x60xf32>
      %170 = arith.addf %151, %169 : vector<6x60xf32>
      %cst_114 = arith.constant dense<0.000000e+00> : vector<6x60xf32>
      %171 = tpu.matmul %166, %168, %cst_114 {dimension_numbers = #tpu.dot_dimension_numbers<[1], [0], [0], [1], [0, 0, 1, 1], [], []>} : vector<6x32xf32>, vector<32x60xf32>, vector<6x60xf32> -> vector<6x60xf32>
      %172 = arith.addf %153, %171 : vector<6x60xf32>
      %c2_115 = arith.constant 2 : index
      %c1_116 = arith.constant 1 : index
      %c0_117 = arith.constant 0 : index
      %c0_118 = arith.constant 0 : index
      %173 = vector.load %arg4[%c2_115, %c1_116, %c0_117, %c0_118] : memref<4x4x6x32xf32, #tpu.memory_space<vmem>>, vector<1x1x6x32xf32>
      %174 = vector.shape_cast %173 : vector<1x1x6x32xf32> to vector<6x32xf32>
      %175 = vector.extract_strided_slice %158 {offsets = [0, 1], sizes = [32, 60], strides = [1, 1]} : vector<32x63xf32> to vector<32x60xf32>
      %176 = vector.extract_strided_slice %164 {offsets = [0, 1], sizes = [32, 60], strides = [1, 1]} : vector<32x63xf32> to vector<32x60xf32>
      %cst_119 = arith.constant dense<0.000000e+00> : vector<6x60xf32>
      %177 = tpu.matmul %174, %175, %cst_119 {dimension_numbers = #tpu.dot_dimension_numbers<[1], [0], [0], [1], [0, 0, 1, 1], [], []>} : vector<6x32xf32>, vector<32x60xf32>, vector<6x60xf32> -> vector<6x60xf32>
      %178 = arith.addf %170, %177 : vector<6x60xf32>
      %cst_120 = arith.constant dense<0.000000e+00> : vector<6x60xf32>
      %179 = tpu.matmul %174, %176, %cst_120 {dimension_numbers = #tpu.dot_dimension_numbers<[1], [0], [0], [1], [0, 0, 1, 1], [], []>} : vector<6x32xf32>, vector<32x60xf32>, vector<6x60xf32> -> vector<6x60xf32>
      %180 = arith.addf %172, %179 : vector<6x60xf32>
      %c2_121 = arith.constant 2 : index
      %c2_122 = arith.constant 2 : index
      %c0_123 = arith.constant 0 : index
      %c0_124 = arith.constant 0 : index
      %181 = vector.load %arg4[%c2_121, %c2_122, %c0_123, %c0_124] : memref<4x4x6x32xf32, #tpu.memory_space<vmem>>, vector<1x1x6x32xf32>
      %182 = vector.shape_cast %181 : vector<1x1x6x32xf32> to vector<6x32xf32>
      %183 = vector.extract_strided_slice %158 {offsets = [0, 2], sizes = [32, 60], strides = [1, 1]} : vector<32x63xf32> to vector<32x60xf32>
      %184 = vector.extract_strided_slice %164 {offsets = [0, 2], sizes = [32, 60], strides = [1, 1]} : vector<32x63xf32> to vector<32x60xf32>
      %cst_125 = arith.constant dense<0.000000e+00> : vector<6x60xf32>
      %185 = tpu.matmul %182, %183, %cst_125 {dimension_numbers = #tpu.dot_dimension_numbers<[1], [0], [0], [1], [0, 0, 1, 1], [], []>} : vector<6x32xf32>, vector<32x60xf32>, vector<6x60xf32> -> vector<6x60xf32>
      %186 = arith.addf %178, %185 : vector<6x60xf32>
      %cst_126 = arith.constant dense<0.000000e+00> : vector<6x60xf32>
      %187 = tpu.matmul %182, %184, %cst_126 {dimension_numbers = #tpu.dot_dimension_numbers<[1], [0], [0], [1], [0, 0, 1, 1], [], []>} : vector<6x32xf32>, vector<32x60xf32>, vector<6x60xf32> -> vector<6x60xf32>
      %188 = arith.addf %180, %187 : vector<6x60xf32>
      %c2_127 = arith.constant 2 : index
      %c3_128 = arith.constant 3 : index
      %c0_129 = arith.constant 0 : index
      %c0_130 = arith.constant 0 : index
      %189 = vector.load %arg4[%c2_127, %c3_128, %c0_129, %c0_130] : memref<4x4x6x32xf32, #tpu.memory_space<vmem>>, vector<1x1x6x32xf32>
      %190 = vector.shape_cast %189 : vector<1x1x6x32xf32> to vector<6x32xf32>
      %191 = vector.extract_strided_slice %158 {offsets = [0, 3], sizes = [32, 60], strides = [1, 1]} : vector<32x63xf32> to vector<32x60xf32>
      %192 = vector.extract_strided_slice %164 {offsets = [0, 3], sizes = [32, 60], strides = [1, 1]} : vector<32x63xf32> to vector<32x60xf32>
      %cst_131 = arith.constant dense<0.000000e+00> : vector<6x60xf32>
      %193 = tpu.matmul %190, %191, %cst_131 {dimension_numbers = #tpu.dot_dimension_numbers<[1], [0], [0], [1], [0, 0, 1, 1], [], []>} : vector<6x32xf32>, vector<32x60xf32>, vector<6x60xf32> -> vector<6x60xf32>
      %194 = arith.addf %186, %193 : vector<6x60xf32>
      %cst_132 = arith.constant dense<0.000000e+00> : vector<6x60xf32>
      %195 = tpu.matmul %190, %192, %cst_132 {dimension_numbers = #tpu.dot_dimension_numbers<[1], [0], [0], [1], [0, 0, 1, 1], [], []>} : vector<6x32xf32>, vector<32x60xf32>, vector<6x60xf32> -> vector<6x60xf32>
      %196 = arith.addf %188, %195 : vector<6x60xf32>
      %c2_i32_133 = arith.constant 2 : i32
      %197 = arith.muli %c2_i32_133, %65 : i32
      %c3_i32 = arith.constant 3 : i32
      %198 = arith.addi %197, %c3_i32 : i32
      %c0_134 = arith.constant 0 : index
      %199 = arith.index_cast %198 : i32 to index
      %c0_135 = arith.constant 0 : index
      %c0_136 = arith.constant 0 : index
      %200 = vector.load %arg11[%c0_134, %199, %c0_135, %c0_136] : memref<1x63x32x63xf32, #tpu.memory_space<vmem>>, vector<1x1x32x63xf32>
      %201 = vector.shape_cast %200 : vector<1x1x32x63xf32> to vector<32x63xf32>
      %c2_i32_137 = arith.constant 2 : i32
      %202 = arith.muli %c2_i32_137, %65 : i32
      %c1_i32_138 = arith.constant 1 : i32
      %203 = arith.addi %202, %c1_i32_138 : i32
      %c3_i32_139 = arith.constant 3 : i32
      %204 = arith.addi %203, %c3_i32_139 : i32
      %c0_140 = arith.constant 0 : index
      %205 = arith.index_cast %204 : i32 to index
      %c0_141 = arith.constant 0 : index
      %c0_142 = arith.constant 0 : index
      %206 = vector.load %arg11[%c0_140, %205, %c0_141, %c0_142] : memref<1x63x32x63xf32, #tpu.memory_space<vmem>>, vector<1x1x32x63xf32>
      %207 = vector.shape_cast %206 : vector<1x1x32x63xf32> to vector<32x63xf32>
      %c3_143 = arith.constant 3 : index
      %c0_144 = arith.constant 0 : index
      %c0_145 = arith.constant 0 : index
      %c0_146 = arith.constant 0 : index
      %208 = vector.load %arg4[%c3_143, %c0_144, %c0_145, %c0_146] : memref<4x4x6x32xf32, #tpu.memory_space<vmem>>, vector<1x1x6x32xf32>
      %209 = vector.shape_cast %208 : vector<1x1x6x32xf32> to vector<6x32xf32>
      %210 = vector.extract_strided_slice %201 {offsets = [0, 0], sizes = [32, 60], strides = [1, 1]} : vector<32x63xf32> to vector<32x60xf32>
      %211 = vector.extract_strided_slice %207 {offsets = [0, 0], sizes = [32, 60], strides = [1, 1]} : vector<32x63xf32> to vector<32x60xf32>
      %cst_147 = arith.constant dense<0.000000e+00> : vector<6x60xf32>
      %212 = tpu.matmul %209, %210, %cst_147 {dimension_numbers = #tpu.dot_dimension_numbers<[1], [0], [0], [1], [0, 0, 1, 1], [], []>} : vector<6x32xf32>, vector<32x60xf32>, vector<6x60xf32> -> vector<6x60xf32>
      %213 = arith.addf %194, %212 : vector<6x60xf32>
      %cst_148 = arith.constant dense<0.000000e+00> : vector<6x60xf32>
      %214 = tpu.matmul %209, %211, %cst_148 {dimension_numbers = #tpu.dot_dimension_numbers<[1], [0], [0], [1], [0, 0, 1, 1], [], []>} : vector<6x32xf32>, vector<32x60xf32>, vector<6x60xf32> -> vector<6x60xf32>
      %215 = arith.addf %196, %214 : vector<6x60xf32>
      %c3_149 = arith.constant 3 : index
      %c1_150 = arith.constant 1 : index
      %c0_151 = arith.constant 0 : index
      %c0_152 = arith.constant 0 : index
      %216 = vector.load %arg4[%c3_149, %c1_150, %c0_151, %c0_152] : memref<4x4x6x32xf32, #tpu.memory_space<vmem>>, vector<1x1x6x32xf32>
      %217 = vector.shape_cast %216 : vector<1x1x6x32xf32> to vector<6x32xf32>
      %218 = vector.extract_strided_slice %201 {offsets = [0, 1], sizes = [32, 60], strides = [1, 1]} : vector<32x63xf32> to vector<32x60xf32>
      %219 = vector.extract_strided_slice %207 {offsets = [0, 1], sizes = [32, 60], strides = [1, 1]} : vector<32x63xf32> to vector<32x60xf32>
      %cst_153 = arith.constant dense<0.000000e+00> : vector<6x60xf32>
      %220 = tpu.matmul %217, %218, %cst_153 {dimension_numbers = #tpu.dot_dimension_numbers<[1], [0], [0], [1], [0, 0, 1, 1], [], []>} : vector<6x32xf32>, vector<32x60xf32>, vector<6x60xf32> -> vector<6x60xf32>
      %221 = arith.addf %213, %220 : vector<6x60xf32>
      %cst_154 = arith.constant dense<0.000000e+00> : vector<6x60xf32>
      %222 = tpu.matmul %217, %219, %cst_154 {dimension_numbers = #tpu.dot_dimension_numbers<[1], [0], [0], [1], [0, 0, 1, 1], [], []>} : vector<6x32xf32>, vector<32x60xf32>, vector<6x60xf32> -> vector<6x60xf32>
      %223 = arith.addf %215, %222 : vector<6x60xf32>
      %c3_155 = arith.constant 3 : index
      %c2_156 = arith.constant 2 : index
      %c0_157 = arith.constant 0 : index
      %c0_158 = arith.constant 0 : index
      %224 = vector.load %arg4[%c3_155, %c2_156, %c0_157, %c0_158] : memref<4x4x6x32xf32, #tpu.memory_space<vmem>>, vector<1x1x6x32xf32>
      %225 = vector.shape_cast %224 : vector<1x1x6x32xf32> to vector<6x32xf32>
      %226 = vector.extract_strided_slice %201 {offsets = [0, 2], sizes = [32, 60], strides = [1, 1]} : vector<32x63xf32> to vector<32x60xf32>
      %227 = vector.extract_strided_slice %207 {offsets = [0, 2], sizes = [32, 60], strides = [1, 1]} : vector<32x63xf32> to vector<32x60xf32>
      %cst_159 = arith.constant dense<0.000000e+00> : vector<6x60xf32>
      %228 = tpu.matmul %225, %226, %cst_159 {dimension_numbers = #tpu.dot_dimension_numbers<[1], [0], [0], [1], [0, 0, 1, 1], [], []>} : vector<6x32xf32>, vector<32x60xf32>, vector<6x60xf32> -> vector<6x60xf32>
      %229 = arith.addf %221, %228 : vector<6x60xf32>
      %cst_160 = arith.constant dense<0.000000e+00> : vector<6x60xf32>
      %230 = tpu.matmul %225, %227, %cst_160 {dimension_numbers = #tpu.dot_dimension_numbers<[1], [0], [0], [1], [0, 0, 1, 1], [], []>} : vector<6x32xf32>, vector<32x60xf32>, vector<6x60xf32> -> vector<6x60xf32>
      %231 = arith.addf %223, %230 : vector<6x60xf32>
      %c3_161 = arith.constant 3 : index
      %c3_162 = arith.constant 3 : index
      %c0_163 = arith.constant 0 : index
      %c0_164 = arith.constant 0 : index
      %232 = vector.load %arg4[%c3_161, %c3_162, %c0_163, %c0_164] : memref<4x4x6x32xf32, #tpu.memory_space<vmem>>, vector<1x1x6x32xf32>
      %233 = vector.shape_cast %232 : vector<1x1x6x32xf32> to vector<6x32xf32>
      %234 = vector.extract_strided_slice %201 {offsets = [0, 3], sizes = [32, 60], strides = [1, 1]} : vector<32x63xf32> to vector<32x60xf32>
      %235 = vector.extract_strided_slice %207 {offsets = [0, 3], sizes = [32, 60], strides = [1, 1]} : vector<32x63xf32> to vector<32x60xf32>
      %cst_165 = arith.constant dense<0.000000e+00> : vector<6x60xf32>
      %236 = tpu.matmul %233, %234, %cst_165 {dimension_numbers = #tpu.dot_dimension_numbers<[1], [0], [0], [1], [0, 0, 1, 1], [], []>} : vector<6x32xf32>, vector<32x60xf32>, vector<6x60xf32> -> vector<6x60xf32>
      %237 = arith.addf %229, %236 : vector<6x60xf32>
      %cst_166 = arith.constant dense<0.000000e+00> : vector<6x60xf32>
      %238 = tpu.matmul %233, %235, %cst_166 {dimension_numbers = #tpu.dot_dimension_numbers<[1], [0], [0], [1], [0, 0, 1, 1], [], []>} : vector<6x32xf32>, vector<32x60xf32>, vector<6x60xf32> -> vector<6x60xf32>
      %239 = arith.addf %231, %238 : vector<6x60xf32>
      %240 = vector.broadcast %30 : vector<6x1xf32> to vector<6x60xf32>
      %241 = arith.addf %237, %240 : vector<6x60xf32>
      %242 = vector.broadcast %30 : vector<6x1xf32> to vector<6x60xf32>
      %243 = arith.addf %239, %242 : vector<6x60xf32>
      %cst_167 = arith.constant 0.000000e+00 : f32
      %244 = vector.broadcast %cst_167 : f32 to vector<6x60xf32>
      %245 = arith.cmpf oge, %241, %244 : vector<6x60xf32>
      %cst_168 = arith.constant 0.00999999977 : f32
      %246 = vector.broadcast %cst_168 : f32 to vector<6x60xf32>
      %247 = arith.mulf %246, %241 : vector<6x60xf32>
      %248 = arith.select %245, %241, %247 : vector<6x60xi1>, vector<6x60xf32>
      %cst_169 = arith.constant 0.000000e+00 : f32
      %249 = vector.broadcast %cst_169 : f32 to vector<6x60xf32>
      %250 = arith.cmpf oge, %243, %249 : vector<6x60xf32>
      %cst_170 = arith.constant 0.00999999977 : f32
      %251 = vector.broadcast %cst_170 : f32 to vector<6x60xf32>
      %252 = arith.mulf %251, %243 : vector<6x60xf32>
      %253 = arith.select %250, %243, %252 : vector<6x60xi1>, vector<6x60xf32>
      %254 = arith.maximumf %248, %253 : vector<6x60xf32>
      %cst_171 = arith.constant dense<0.000000e+00> : vector<6x30xf32>
      %255 = tpu.matmul %254, %22, %cst_171 {dimension_numbers = #tpu.dot_dimension_numbers<[1], [0], [0], [1], [0, 0, 1, 1], [], []>} : vector<6x60xf32>, vector<60x30xf32>, vector<6x30xf32> -> vector<6x30xf32>
      %cst_172 = arith.constant dense<0.000000e+00> : vector<6x30xf32>
      %256 = tpu.matmul %254, %29, %cst_172 {dimension_numbers = #tpu.dot_dimension_numbers<[1], [0], [0], [1], [0, 0, 1, 1], [], []>} : vector<6x60xf32>, vector<60x30xf32>, vector<6x30xf32> -> vector<6x30xf32>
      %257 = arith.maximumf %255, %256 : vector<6x30xf32>
      %c0_173 = arith.constant 0 : index
      %258 = arith.index_cast %65 : i32 to index
      %c0_174 = arith.constant 0 : index
      %c0_175 = arith.constant 0 : index
      %259 = vector.load %arg12[%c0_173, %258, %c0_174, %c0_175] : memref<1x30x6x30xf32, #tpu.memory_space<vmem>>, vector<1x1x6x30xf32>
      %260 = vector.shape_cast %259 : vector<1x1x6x30xf32> to vector<6x30xf32>
      %261 = vector.shape_cast %257 : vector<6x30xf32> to vector<1x1x6x30xf32>
      tpu.vector_store %arg12[%c0_173, %258, %c0_174, %c0_175], %261 {strides = array<i32>} : memref<1x30x6x30xf32, #tpu.memory_space<vmem>>, vector<1x1x6x30xf32>,
    }
    %c30_i32_11 = arith.constant 30 : i32
    %32 = tpu.iota {dimensions = array<i32: 0>} : vector<28x14xi32>
    %33 = tpu.iota {dimensions = array<i32: 1>} : vector<28x14xi32>
    %c2_i32_12 = arith.constant 2 : i32
    %34 = vector.broadcast %c2_i32_12 : i32 to vector<28x14xi32>
    %35 = arith.muli %34, %33 : vector<28x14xi32>
    %36 = arith.cmpi eq, %32, %35 : vector<28x14xi32>
    %37 = arith.extui %36 : vector<28x14xi1> to vector<28x14xi32>
    %38 = arith.sitofp %37 : vector<28x14xi32> to vector<28x14xf32>
    %c2_i32_13 = arith.constant 2 : i32
    %39 = vector.broadcast %c2_i32_13 : i32 to vector<28x14xi32>
    %40 = arith.muli %39, %33 : vector<28x14xi32>
    %c1_i32_14 = arith.constant 1 : i32
    %41 = vector.broadcast %c1_i32_14 : i32 to vector<28x14xi32>
    %42 = arith.addi %40, %41 : vector<28x14xi32>
    %43 = arith.cmpi eq, %32, %42 : vector<28x14xi32>
    %44 = arith.extui %43 : vector<28x14xi1> to vector<28x14xi32>
    %45 = arith.sitofp %44 : vector<28x14xi32> to vector<28x14xf32>
    %c0_15 = arith.constant 0 : index
    %c0_16 = arith.constant 0 : index
    %46 = vector.load %arg7[%c0_15, %c0_16] : memref<128x1xf32, #tpu.memory_space<vmem>>, vector<128x1xf32>
    %c0_i32_17 = arith.constant 0 : i32
    %c14_i32 = arith.constant 14 : i32
    %47 = arith.addi %c0_i32_17, %c14_i32 : i32
    %c1_i32_18 = arith.constant 1 : i32
    scf.for %arg14 = %c0_i32_17 to %47 step %c1_i32_18  : i32 {
      %c1_i32_28 = arith.constant 1 : i32
      %64 = arith.muli %arg14, %c1_i32_28 : i32
      %c0_i32_29 = arith.constant 0 : i32
      %65 = arith.addi %c0_i32_29, %64 : i32
      %cst = arith.constant 0.000000e+00 : f32
      %66 = vector.broadcast %cst : f32 to vector<128x28xf32>
      %cst_30 = arith.constant 0.000000e+00 : f32
      %67 = vector.broadcast %cst_30 : f32 to vector<128x28xf32>
      %c2_i32_31 = arith.constant 2 : i32
      %68 = arith.muli %c2_i32_31, %65 : i32
      %c0_i32_32 = arith.constant 0 : i32
      %69 = arith.addi %68, %c0_i32_32 : i32
      %c0_33 = arith.constant 0 : index
      %70 = arith.index_cast %69 : i32 to index
      %c0_34 = arith.constant 0 : index
      %c0_35 = arith.constant 0 : index
      %71 = vector.load %arg12[%c0_33, %70, %c0_34, %c0_35] : memref<1x30x6x30xf32, #tpu.memory_space<vmem>>, vector<1x1x6x30xf32>
      %72 = vector.shape_cast %71 : vector<1x1x6x30xf32> to vector<6x30xf32>
      %c2_i32_36 = arith.constant 2 : i32
      %73 = arith.muli %c2_i32_36, %65 : i32
      %c1_i32_37 = arith.constant 1 : i32
      %74 = arith.addi %73, %c1_i32_37 : i32
      %c0_i32_38 = arith.constant 0 : i32
      %75 = arith.addi %74, %c0_i32_38 : i32
      %c0_39 = arith.constant 0 : index
      %76 = arith.index_cast %75 : i32 to index
      %c0_40 = arith.constant 0 : index
      %c0_41 = arith.constant 0 : index
      %77 = vector.load %arg12[%c0_39, %76, %c0_40, %c0_41] : memref<1x30x6x30xf32, #tpu.memory_space<vmem>>, vector<1x1x6x30xf32>
      %78 = vector.shape_cast %77 : vector<1x1x6x30xf32> to vector<6x30xf32>
      %c0_42 = arith.constant 0 : index
      %c0_43 = arith.constant 0 : index
      %c0_44 = arith.constant 0 : index
      %c0_45 = arith.constant 0 : index
      %79 = vector.load %arg6[%c0_42, %c0_43, %c0_44, %c0_45] : memref<3x3x128x6xf32, #tpu.memory_space<vmem>>, vector<1x1x128x6xf32>
      %80 = vector.shape_cast %79 : vector<1x1x128x6xf32> to vector<128x6xf32>
      %81 = vector.extract_strided_slice %72 {offsets = [0, 0], sizes = [6, 28], strides = [1, 1]} : vector<6x30xf32> to vector<6x28xf32>
      %82 = vector.extract_strided_slice %78 {offsets = [0, 0], sizes = [6, 28], strides = [1, 1]} : vector<6x30xf32> to vector<6x28xf32>
      %cst_46 = arith.constant dense<0.000000e+00> : vector<128x28xf32>
      %83 = tpu.matmul %80, %81, %cst_46 {dimension_numbers = #tpu.dot_dimension_numbers<[1], [0], [0], [1], [0, 0, 1, 1], [], []>} : vector<128x6xf32>, vector<6x28xf32>, vector<128x28xf32> -> vector<128x28xf32>
      %84 = arith.addf %66, %83 : vector<128x28xf32>
      %cst_47 = arith.constant dense<0.000000e+00> : vector<128x28xf32>
      %85 = tpu.matmul %80, %82, %cst_47 {dimension_numbers = #tpu.dot_dimension_numbers<[1], [0], [0], [1], [0, 0, 1, 1], [], []>} : vector<128x6xf32>, vector<6x28xf32>, vector<128x28xf32> -> vector<128x28xf32>
      %86 = arith.addf %67, %85 : vector<128x28xf32>
      %c0_48 = arith.constant 0 : index
      %c1 = arith.constant 1 : index
      %c0_49 = arith.constant 0 : index
      %c0_50 = arith.constant 0 : index
      %87 = vector.load %arg6[%c0_48, %c1, %c0_49, %c0_50] : memref<3x3x128x6xf32, #tpu.memory_space<vmem>>, vector<1x1x128x6xf32>
      %88 = vector.shape_cast %87 : vector<1x1x128x6xf32> to vector<128x6xf32>
      %89 = vector.extract_strided_slice %72 {offsets = [0, 1], sizes = [6, 28], strides = [1, 1]} : vector<6x30xf32> to vector<6x28xf32>
      %90 = vector.extract_strided_slice %78 {offsets = [0, 1], sizes = [6, 28], strides = [1, 1]} : vector<6x30xf32> to vector<6x28xf32>
      %cst_51 = arith.constant dense<0.000000e+00> : vector<128x28xf32>
      %91 = tpu.matmul %88, %89, %cst_51 {dimension_numbers = #tpu.dot_dimension_numbers<[1], [0], [0], [1], [0, 0, 1, 1], [], []>} : vector<128x6xf32>, vector<6x28xf32>, vector<128x28xf32> -> vector<128x28xf32>
      %92 = arith.addf %84, %91 : vector<128x28xf32>
      %cst_52 = arith.constant dense<0.000000e+00> : vector<128x28xf32>
      %93 = tpu.matmul %88, %90, %cst_52 {dimension_numbers = #tpu.dot_dimension_numbers<[1], [0], [0], [1], [0, 0, 1, 1], [], []>} : vector<128x6xf32>, vector<6x28xf32>, vector<128x28xf32> -> vector<128x28xf32>
      %94 = arith.addf %86, %93 : vector<128x28xf32>
      %c0_53 = arith.constant 0 : index
      %c2 = arith.constant 2 : index
      %c0_54 = arith.constant 0 : index
      %c0_55 = arith.constant 0 : index
      %95 = vector.load %arg6[%c0_53, %c2, %c0_54, %c0_55] : memref<3x3x128x6xf32, #tpu.memory_space<vmem>>, vector<1x1x128x6xf32>
      %96 = vector.shape_cast %95 : vector<1x1x128x6xf32> to vector<128x6xf32>
      %97 = vector.extract_strided_slice %72 {offsets = [0, 2], sizes = [6, 28], strides = [1, 1]} : vector<6x30xf32> to vector<6x28xf32>
      %98 = vector.extract_strided_slice %78 {offsets = [0, 2], sizes = [6, 28], strides = [1, 1]} : vector<6x30xf32> to vector<6x28xf32>
      %cst_56 = arith.constant dense<0.000000e+00> : vector<128x28xf32>
      %99 = tpu.matmul %96, %97, %cst_56 {dimension_numbers = #tpu.dot_dimension_numbers<[1], [0], [0], [1], [0, 0, 1, 1], [], []>} : vector<128x6xf32>, vector<6x28xf32>, vector<128x28xf32> -> vector<128x28xf32>
      %100 = arith.addf %92, %99 : vector<128x28xf32>
      %cst_57 = arith.constant dense<0.000000e+00> : vector<128x28xf32>
      %101 = tpu.matmul %96, %98, %cst_57 {dimension_numbers = #tpu.dot_dimension_numbers<[1], [0], [0], [1], [0, 0, 1, 1], [], []>} : vector<128x6xf32>, vector<6x28xf32>, vector<128x28xf32> -> vector<128x28xf32>
      %102 = arith.addf %94, %101 : vector<128x28xf32>
      %c2_i32_58 = arith.constant 2 : i32
      %103 = arith.muli %c2_i32_58, %65 : i32
      %c1_i32_59 = arith.constant 1 : i32
      %104 = arith.addi %103, %c1_i32_59 : i32
      %c0_60 = arith.constant 0 : index
      %105 = arith.index_cast %104 : i32 to index
      %c0_61 = arith.constant 0 : index
      %c0_62 = arith.constant 0 : index
      %106 = vector.load %arg12[%c0_60, %105, %c0_61, %c0_62] : memref<1x30x6x30xf32, #tpu.memory_space<vmem>>, vector<1x1x6x30xf32>
      %107 = vector.shape_cast %106 : vector<1x1x6x30xf32> to vector<6x30xf32>
      %c2_i32_63 = arith.constant 2 : i32
      %108 = arith.muli %c2_i32_63, %65 : i32
      %c1_i32_64 = arith.constant 1 : i32
      %109 = arith.addi %108, %c1_i32_64 : i32
      %c1_i32_65 = arith.constant 1 : i32
      %110 = arith.addi %109, %c1_i32_65 : i32
      %c0_66 = arith.constant 0 : index
      %111 = arith.index_cast %110 : i32 to index
      %c0_67 = arith.constant 0 : index
      %c0_68 = arith.constant 0 : index
      %112 = vector.load %arg12[%c0_66, %111, %c0_67, %c0_68] : memref<1x30x6x30xf32, #tpu.memory_space<vmem>>, vector<1x1x6x30xf32>
      %113 = vector.shape_cast %112 : vector<1x1x6x30xf32> to vector<6x30xf32>
      %c1_69 = arith.constant 1 : index
      %c0_70 = arith.constant 0 : index
      %c0_71 = arith.constant 0 : index
      %c0_72 = arith.constant 0 : index
      %114 = vector.load %arg6[%c1_69, %c0_70, %c0_71, %c0_72] : memref<3x3x128x6xf32, #tpu.memory_space<vmem>>, vector<1x1x128x6xf32>
      %115 = vector.shape_cast %114 : vector<1x1x128x6xf32> to vector<128x6xf32>
      %116 = vector.extract_strided_slice %107 {offsets = [0, 0], sizes = [6, 28], strides = [1, 1]} : vector<6x30xf32> to vector<6x28xf32>
      %117 = vector.extract_strided_slice %113 {offsets = [0, 0], sizes = [6, 28], strides = [1, 1]} : vector<6x30xf32> to vector<6x28xf32>
      %cst_73 = arith.constant dense<0.000000e+00> : vector<128x28xf32>
      %118 = tpu.matmul %115, %116, %cst_73 {dimension_numbers = #tpu.dot_dimension_numbers<[1], [0], [0], [1], [0, 0, 1, 1], [], []>} : vector<128x6xf32>, vector<6x28xf32>, vector<128x28xf32> -> vector<128x28xf32>
      %119 = arith.addf %100, %118 : vector<128x28xf32>
      %cst_74 = arith.constant dense<0.000000e+00> : vector<128x28xf32>
      %120 = tpu.matmul %115, %117, %cst_74 {dimension_numbers = #tpu.dot_dimension_numbers<[1], [0], [0], [1], [0, 0, 1, 1], [], []>} : vector<128x6xf32>, vector<6x28xf32>, vector<128x28xf32> -> vector<128x28xf32>
      %121 = arith.addf %102, %120 : vector<128x28xf32>
      %c1_75 = arith.constant 1 : index
      %c1_76 = arith.constant 1 : index
      %c0_77 = arith.constant 0 : index
      %c0_78 = arith.constant 0 : index
      %122 = vector.load %arg6[%c1_75, %c1_76, %c0_77, %c0_78] : memref<3x3x128x6xf32, #tpu.memory_space<vmem>>, vector<1x1x128x6xf32>
      %123 = vector.shape_cast %122 : vector<1x1x128x6xf32> to vector<128x6xf32>
      %124 = vector.extract_strided_slice %107 {offsets = [0, 1], sizes = [6, 28], strides = [1, 1]} : vector<6x30xf32> to vector<6x28xf32>
      %125 = vector.extract_strided_slice %113 {offsets = [0, 1], sizes = [6, 28], strides = [1, 1]} : vector<6x30xf32> to vector<6x28xf32>
      %cst_79 = arith.constant dense<0.000000e+00> : vector<128x28xf32>
      %126 = tpu.matmul %123, %124, %cst_79 {dimension_numbers = #tpu.dot_dimension_numbers<[1], [0], [0], [1], [0, 0, 1, 1], [], []>} : vector<128x6xf32>, vector<6x28xf32>, vector<128x28xf32> -> vector<128x28xf32>
      %127 = arith.addf %119, %126 : vector<128x28xf32>
      %cst_80 = arith.constant dense<0.000000e+00> : vector<128x28xf32>
      %128 = tpu.matmul %123, %125, %cst_80 {dimension_numbers = #tpu.dot_dimension_numbers<[1], [0], [0], [1], [0, 0, 1, 1], [], []>} : vector<128x6xf32>, vector<6x28xf32>, vector<128x28xf32> -> vector<128x28xf32>
      %129 = arith.addf %121, %128 : vector<128x28xf32>
      %c1_81 = arith.constant 1 : index
      %c2_82 = arith.constant 2 : index
      %c0_83 = arith.constant 0 : index
      %c0_84 = arith.constant 0 : index
      %130 = vector.load %arg6[%c1_81, %c2_82, %c0_83, %c0_84] : memref<3x3x128x6xf32, #tpu.memory_space<vmem>>, vector<1x1x128x6xf32>
      %131 = vector.shape_cast %130 : vector<1x1x128x6xf32> to vector<128x6xf32>
      %132 = vector.extract_strided_slice %107 {offsets = [0, 2], sizes = [6, 28], strides = [1, 1]} : vector<6x30xf32> to vector<6x28xf32>
      %133 = vector.extract_strided_slice %113 {offsets = [0, 2], sizes = [6, 28], strides = [1, 1]} : vector<6x30xf32> to vector<6x28xf32>
      %cst_85 = arith.constant dense<0.000000e+00> : vector<128x28xf32>
      %134 = tpu.matmul %131, %132, %cst_85 {dimension_numbers = #tpu.dot_dimension_numbers<[1], [0], [0], [1], [0, 0, 1, 1], [], []>} : vector<128x6xf32>, vector<6x28xf32>, vector<128x28xf32> -> vector<128x28xf32>
      %135 = arith.addf %127, %134 : vector<128x28xf32>
      %cst_86 = arith.constant dense<0.000000e+00> : vector<128x28xf32>
      %136 = tpu.matmul %131, %133, %cst_86 {dimension_numbers = #tpu.dot_dimension_numbers<[1], [0], [0], [1], [0, 0, 1, 1], [], []>} : vector<128x6xf32>, vector<6x28xf32>, vector<128x28xf32> -> vector<128x28xf32>
      %137 = arith.addf %129, %136 : vector<128x28xf32>
      %c2_i32_87 = arith.constant 2 : i32
      %138 = arith.muli %c2_i32_87, %65 : i32
      %c2_i32_88 = arith.constant 2 : i32
      %139 = arith.addi %138, %c2_i32_88 : i32
      %c0_89 = arith.constant 0 : index
      %140 = arith.index_cast %139 : i32 to index
      %c0_90 = arith.constant 0 : index
      %c0_91 = arith.constant 0 : index
      %141 = vector.load %arg12[%c0_89, %140, %c0_90, %c0_91] : memref<1x30x6x30xf32, #tpu.memory_space<vmem>>, vector<1x1x6x30xf32>
      %142 = vector.shape_cast %141 : vector<1x1x6x30xf32> to vector<6x30xf32>
      %c2_i32_92 = arith.constant 2 : i32
      %143 = arith.muli %c2_i32_92, %65 : i32
      %c1_i32_93 = arith.constant 1 : i32
      %144 = arith.addi %143, %c1_i32_93 : i32
      %c2_i32_94 = arith.constant 2 : i32
      %145 = arith.addi %144, %c2_i32_94 : i32
      %c0_95 = arith.constant 0 : index
      %146 = arith.index_cast %145 : i32 to index
      %c0_96 = arith.constant 0 : index
      %c0_97 = arith.constant 0 : index
      %147 = vector.load %arg12[%c0_95, %146, %c0_96, %c0_97] : memref<1x30x6x30xf32, #tpu.memory_space<vmem>>, vector<1x1x6x30xf32>
      %148 = vector.shape_cast %147 : vector<1x1x6x30xf32> to vector<6x30xf32>
      %c2_98 = arith.constant 2 : index
      %c0_99 = arith.constant 0 : index
      %c0_100 = arith.constant 0 : index
      %c0_101 = arith.constant 0 : index
      %149 = vector.load %arg6[%c2_98, %c0_99, %c0_100, %c0_101] : memref<3x3x128x6xf32, #tpu.memory_space<vmem>>, vector<1x1x128x6xf32>
      %150 = vector.shape_cast %149 : vector<1x1x128x6xf32> to vector<128x6xf32>
      %151 = vector.extract_strided_slice %142 {offsets = [0, 0], sizes = [6, 28], strides = [1, 1]} : vector<6x30xf32> to vector<6x28xf32>
      %152 = vector.extract_strided_slice %148 {offsets = [0, 0], sizes = [6, 28], strides = [1, 1]} : vector<6x30xf32> to vector<6x28xf32>
      %cst_102 = arith.constant dense<0.000000e+00> : vector<128x28xf32>
      %153 = tpu.matmul %150, %151, %cst_102 {dimension_numbers = #tpu.dot_dimension_numbers<[1], [0], [0], [1], [0, 0, 1, 1], [], []>} : vector<128x6xf32>, vector<6x28xf32>, vector<128x28xf32> -> vector<128x28xf32>
      %154 = arith.addf %135, %153 : vector<128x28xf32>
      %cst_103 = arith.constant dense<0.000000e+00> : vector<128x28xf32>
      %155 = tpu.matmul %150, %152, %cst_103 {dimension_numbers = #tpu.dot_dimension_numbers<[1], [0], [0], [1], [0, 0, 1, 1], [], []>} : vector<128x6xf32>, vector<6x28xf32>, vector<128x28xf32> -> vector<128x28xf32>
      %156 = arith.addf %137, %155 : vector<128x28xf32>
      %c2_104 = arith.constant 2 : index
      %c1_105 = arith.constant 1 : index
      %c0_106 = arith.constant 0 : index
      %c0_107 = arith.constant 0 : index
      %157 = vector.load %arg6[%c2_104, %c1_105, %c0_106, %c0_107] : memref<3x3x128x6xf32, #tpu.memory_space<vmem>>, vector<1x1x128x6xf32>
      %158 = vector.shape_cast %157 : vector<1x1x128x6xf32> to vector<128x6xf32>
      %159 = vector.extract_strided_slice %142 {offsets = [0, 1], sizes = [6, 28], strides = [1, 1]} : vector<6x30xf32> to vector<6x28xf32>
      %160 = vector.extract_strided_slice %148 {offsets = [0, 1], sizes = [6, 28], strides = [1, 1]} : vector<6x30xf32> to vector<6x28xf32>
      %cst_108 = arith.constant dense<0.000000e+00> : vector<128x28xf32>
      %161 = tpu.matmul %158, %159, %cst_108 {dimension_numbers = #tpu.dot_dimension_numbers<[1], [0], [0], [1], [0, 0, 1, 1], [], []>} : vector<128x6xf32>, vector<6x28xf32>, vector<128x28xf32> -> vector<128x28xf32>
      %162 = arith.addf %154, %161 : vector<128x28xf32>
      %cst_109 = arith.constant dense<0.000000e+00> : vector<128x28xf32>
      %163 = tpu.matmul %158, %160, %cst_109 {dimension_numbers = #tpu.dot_dimension_numbers<[1], [0], [0], [1], [0, 0, 1, 1], [], []>} : vector<128x6xf32>, vector<6x28xf32>, vector<128x28xf32> -> vector<128x28xf32>
      %164 = arith.addf %156, %163 : vector<128x28xf32>
      %c2_110 = arith.constant 2 : index
      %c2_111 = arith.constant 2 : index
      %c0_112 = arith.constant 0 : index
      %c0_113 = arith.constant 0 : index
      %165 = vector.load %arg6[%c2_110, %c2_111, %c0_112, %c0_113] : memref<3x3x128x6xf32, #tpu.memory_space<vmem>>, vector<1x1x128x6xf32>
      %166 = vector.shape_cast %165 : vector<1x1x128x6xf32> to vector<128x6xf32>
      %167 = vector.extract_strided_slice %142 {offsets = [0, 2], sizes = [6, 28], strides = [1, 1]} : vector<6x30xf32> to vector<6x28xf32>
      %168 = vector.extract_strided_slice %148 {offsets = [0, 2], sizes = [6, 28], strides = [1, 1]} : vector<6x30xf32> to vector<6x28xf32>
      %cst_114 = arith.constant dense<0.000000e+00> : vector<128x28xf32>
      %169 = tpu.matmul %166, %167, %cst_114 {dimension_numbers = #tpu.dot_dimension_numbers<[1], [0], [0], [1], [0, 0, 1, 1], [], []>} : vector<128x6xf32>, vector<6x28xf32>, vector<128x28xf32> -> vector<128x28xf32>
      %170 = arith.addf %162, %169 : vector<128x28xf32>
      %cst_115 = arith.constant dense<0.000000e+00> : vector<128x28xf32>
      %171 = tpu.matmul %166, %168, %cst_115 {dimension_numbers = #tpu.dot_dimension_numbers<[1], [0], [0], [1], [0, 0, 1, 1], [], []>} : vector<128x6xf32>, vector<6x28xf32>, vector<128x28xf32> -> vector<128x28xf32>
      %172 = arith.addf %164, %171 : vector<128x28xf32>
      %173 = vector.broadcast %46 : vector<128x1xf32> to vector<128x28xf32>
      %174 = arith.addf %170, %173 : vector<128x28xf32>
      %175 = vector.broadcast %46 : vector<128x1xf32> to vector<128x28xf32>
      %176 = arith.addf %172, %175 : vector<128x28xf32>
      %cst_116 = arith.constant 0.000000e+00 : f32
      %177 = vector.broadcast %cst_116 : f32 to vector<128x28xf32>
      %178 = arith.cmpf oge, %174, %177 : vector<128x28xf32>
      %cst_117 = arith.constant 0.00999999977 : f32
      %179 = vector.broadcast %cst_117 : f32 to vector<128x28xf32>
      %180 = arith.mulf %179, %174 : vector<128x28xf32>
      %181 = arith.select %178, %174, %180 : vector<128x28xi1>, vector<128x28xf32>
      %cst_118 = arith.constant 0.000000e+00 : f32
      %182 = vector.broadcast %cst_118 : f32 to vector<128x28xf32>
      %183 = arith.cmpf oge, %176, %182 : vector<128x28xf32>
      %cst_119 = arith.constant 0.00999999977 : f32
      %184 = vector.broadcast %cst_119 : f32 to vector<128x28xf32>
      %185 = arith.mulf %184, %176 : vector<128x28xf32>
      %186 = arith.select %183, %176, %185 : vector<128x28xi1>, vector<128x28xf32>
      %187 = arith.maximumf %181, %186 : vector<128x28xf32>
      %cst_120 = arith.constant dense<0.000000e+00> : vector<128x14xf32>
      %188 = tpu.matmul %187, %38, %cst_120 {dimension_numbers = #tpu.dot_dimension_numbers<[1], [0], [0], [1], [0, 0, 1, 1], [], []>} : vector<128x28xf32>, vector<28x14xf32>, vector<128x14xf32> -> vector<128x14xf32>
      %cst_121 = arith.constant dense<0.000000e+00> : vector<128x14xf32>
      %189 = tpu.matmul %187, %45, %cst_121 {dimension_numbers = #tpu.dot_dimension_numbers<[1], [0], [0], [1], [0, 0, 1, 1], [], []>} : vector<128x28xf32>, vector<28x14xf32>, vector<128x14xf32> -> vector<128x14xf32>
      %190 = arith.maximumf %188, %189 : vector<128x14xf32>
      %c0_122 = arith.constant 0 : index
      %191 = arith.index_cast %65 : i32 to index
      %c0_123 = arith.constant 0 : index
      %c0_124 = arith.constant 0 : index
      %192 = vector.load %arg13[%c0_122, %191, %c0_123, %c0_124] : memref<1x14x128x14xf32, #tpu.memory_space<vmem>>, vector<1x1x128x14xf32>
      %193 = vector.shape_cast %192 : vector<1x1x128x14xf32> to vector<128x14xf32>
      %194 = vector.shape_cast %190 : vector<128x14xf32> to vector<1x1x128x14xf32>
      tpu.vector_store %arg13[%c0_122, %191, %c0_123, %c0_124], %194 {strides = array<i32>} : memref<1x14x128x14xf32, #tpu.memory_space<vmem>>, vector<1x1x128x14xf32>,
    }
    %c14_i32_19 = arith.constant 14 : i32
    %48 = tpu.iota {dimensions = array<i32: 0>} : vector<13x6xi32>
    %49 = tpu.iota {dimensions = array<i32: 1>} : vector<13x6xi32>
    %c2_i32_20 = arith.constant 2 : i32
    %50 = vector.broadcast %c2_i32_20 : i32 to vector<13x6xi32>
    %51 = arith.muli %50, %49 : vector<13x6xi32>
    %52 = arith.cmpi eq, %48, %51 : vector<13x6xi32>
    %53 = arith.extui %52 : vector<13x6xi1> to vector<13x6xi32>
    %54 = arith.sitofp %53 : vector<13x6xi32> to vector<13x6xf32>
    %c2_i32_21 = arith.constant 2 : i32
    %55 = vector.broadcast %c2_i32_21 : i32 to vector<13x6xi32>
    %56 = arith.muli %55, %49 : vector<13x6xi32>
    %c1_i32_22 = arith.constant 1 : i32
    %57 = vector.broadcast %c1_i32_22 : i32 to vector<13x6xi32>
    %58 = arith.addi %56, %57 : vector<13x6xi32>
    %59 = arith.cmpi eq, %48, %58 : vector<13x6xi32>
    %60 = arith.extui %59 : vector<13x6xi1> to vector<13x6xi32>
    %61 = arith.sitofp %60 : vector<13x6xi32> to vector<13x6xf32>
    %c0_23 = arith.constant 0 : index
    %c0_24 = arith.constant 0 : index
    %62 = vector.load %arg9[%c0_23, %c0_24] : memref<8x1xf32, #tpu.memory_space<vmem>>, vector<8x1xf32>
    %c0_i32_25 = arith.constant 0 : i32
    %c6_i32 = arith.constant 6 : i32
    %63 = arith.addi %c0_i32_25, %c6_i32 : i32
    %c1_i32_26 = arith.constant 1 : i32
    scf.for %arg14 = %c0_i32_25 to %63 step %c1_i32_26  : i32 {
      %c1_i32_28 = arith.constant 1 : i32
      %64 = arith.muli %arg14, %c1_i32_28 : i32
      %c0_i32_29 = arith.constant 0 : i32
      %65 = arith.addi %c0_i32_29, %64 : i32
      %cst = arith.constant 0.000000e+00 : f32
      %66 = vector.broadcast %cst : f32 to vector<8x13xf32>
      %cst_30 = arith.constant 0.000000e+00 : f32
      %67 = vector.broadcast %cst_30 : f32 to vector<8x13xf32>
      %c2_i32_31 = arith.constant 2 : i32
      %68 = arith.muli %c2_i32_31, %65 : i32
      %c0_i32_32 = arith.constant 0 : i32
      %69 = arith.addi %68, %c0_i32_32 : i32
      %c0_33 = arith.constant 0 : index
      %70 = arith.index_cast %69 : i32 to index
      %c0_34 = arith.constant 0 : index
      %c0_35 = arith.constant 0 : index
      %71 = vector.load %arg13[%c0_33, %70, %c0_34, %c0_35] : memref<1x14x128x14xf32, #tpu.memory_space<vmem>>, vector<1x1x128x14xf32>
      %72 = vector.shape_cast %71 : vector<1x1x128x14xf32> to vector<128x14xf32>
      %c2_i32_36 = arith.constant 2 : i32
      %73 = arith.muli %c2_i32_36, %65 : i32
      %c1_i32_37 = arith.constant 1 : i32
      %74 = arith.addi %73, %c1_i32_37 : i32
      %c0_i32_38 = arith.constant 0 : i32
      %75 = arith.addi %74, %c0_i32_38 : i32
      %c0_39 = arith.constant 0 : index
      %76 = arith.index_cast %75 : i32 to index
      %c0_40 = arith.constant 0 : index
      %c0_41 = arith.constant 0 : index
      %77 = vector.load %arg13[%c0_39, %76, %c0_40, %c0_41] : memref<1x14x128x14xf32, #tpu.memory_space<vmem>>, vector<1x1x128x14xf32>
      %78 = vector.shape_cast %77 : vector<1x1x128x14xf32> to vector<128x14xf32>
      %c0_42 = arith.constant 0 : index
      %c0_43 = arith.constant 0 : index
      %c0_44 = arith.constant 0 : index
      %c0_45 = arith.constant 0 : index
      %79 = vector.load %arg8[%c0_42, %c0_43, %c0_44, %c0_45] : memref<2x2x8x128xf32, #tpu.memory_space<vmem>>, vector<1x1x8x128xf32>
      %80 = vector.shape_cast %79 : vector<1x1x8x128xf32> to vector<8x128xf32>
      %81 = vector.extract_strided_slice %72 {offsets = [0, 0], sizes = [128, 13], strides = [1, 1]} : vector<128x14xf32> to vector<128x13xf32>
      %82 = vector.extract_strided_slice %78 {offsets = [0, 0], sizes = [128, 13], strides = [1, 1]} : vector<128x14xf32> to vector<128x13xf32>
      %cst_46 = arith.constant dense<0.000000e+00> : vector<8x13xf32>
      %83 = tpu.matmul %80, %81, %cst_46 {dimension_numbers = #tpu.dot_dimension_numbers<[1], [0], [0], [1], [0, 0, 1, 1], [], []>} : vector<8x128xf32>, vector<128x13xf32>, vector<8x13xf32> -> vector<8x13xf32>
      %84 = arith.addf %66, %83 : vector<8x13xf32>
      %cst_47 = arith.constant dense<0.000000e+00> : vector<8x13xf32>
      %85 = tpu.matmul %80, %82, %cst_47 {dimension_numbers = #tpu.dot_dimension_numbers<[1], [0], [0], [1], [0, 0, 1, 1], [], []>} : vector<8x128xf32>, vector<128x13xf32>, vector<8x13xf32> -> vector<8x13xf32>
      %86 = arith.addf %67, %85 : vector<8x13xf32>
      %c0_48 = arith.constant 0 : index
      %c1 = arith.constant 1 : index
      %c0_49 = arith.constant 0 : index
      %c0_50 = arith.constant 0 : index
      %87 = vector.load %arg8[%c0_48, %c1, %c0_49, %c0_50] : memref<2x2x8x128xf32, #tpu.memory_space<vmem>>, vector<1x1x8x128xf32>
      %88 = vector.shape_cast %87 : vector<1x1x8x128xf32> to vector<8x128xf32>
      %89 = vector.extract_strided_slice %72 {offsets = [0, 1], sizes = [128, 13], strides = [1, 1]} : vector<128x14xf32> to vector<128x13xf32>
      %90 = vector.extract_strided_slice %78 {offsets = [0, 1], sizes = [128, 13], strides = [1, 1]} : vector<128x14xf32> to vector<128x13xf32>
      %cst_51 = arith.constant dense<0.000000e+00> : vector<8x13xf32>
      %91 = tpu.matmul %88, %89, %cst_51 {dimension_numbers = #tpu.dot_dimension_numbers<[1], [0], [0], [1], [0, 0, 1, 1], [], []>} : vector<8x128xf32>, vector<128x13xf32>, vector<8x13xf32> -> vector<8x13xf32>
      %92 = arith.addf %84, %91 : vector<8x13xf32>
      %cst_52 = arith.constant dense<0.000000e+00> : vector<8x13xf32>
      %93 = tpu.matmul %88, %90, %cst_52 {dimension_numbers = #tpu.dot_dimension_numbers<[1], [0], [0], [1], [0, 0, 1, 1], [], []>} : vector<8x128xf32>, vector<128x13xf32>, vector<8x13xf32> -> vector<8x13xf32>
      %94 = arith.addf %86, %93 : vector<8x13xf32>
      %c2_i32_53 = arith.constant 2 : i32
      %95 = arith.muli %c2_i32_53, %65 : i32
      %c1_i32_54 = arith.constant 1 : i32
      %96 = arith.addi %95, %c1_i32_54 : i32
      %c0_55 = arith.constant 0 : index
      %97 = arith.index_cast %96 : i32 to index
      %c0_56 = arith.constant 0 : index
      %c0_57 = arith.constant 0 : index
      %98 = vector.load %arg13[%c0_55, %97, %c0_56, %c0_57] : memref<1x14x128x14xf32, #tpu.memory_space<vmem>>, vector<1x1x128x14xf32>
      %99 = vector.shape_cast %98 : vector<1x1x128x14xf32> to vector<128x14xf32>
      %c2_i32_58 = arith.constant 2 : i32
      %100 = arith.muli %c2_i32_58, %65 : i32
      %c1_i32_59 = arith.constant 1 : i32
      %101 = arith.addi %100, %c1_i32_59 : i32
      %c1_i32_60 = arith.constant 1 : i32
      %102 = arith.addi %101, %c1_i32_60 : i32
      %c0_61 = arith.constant 0 : index
      %103 = arith.index_cast %102 : i32 to index
      %c0_62 = arith.constant 0 : index
      %c0_63 = arith.constant 0 : index
      %104 = vector.load %arg13[%c0_61, %103, %c0_62, %c0_63] : memref<1x14x128x14xf32, #tpu.memory_space<vmem>>, vector<1x1x128x14xf32>
      %105 = vector.shape_cast %104 : vector<1x1x128x14xf32> to vector<128x14xf32>
      %c1_64 = arith.constant 1 : index
      %c0_65 = arith.constant 0 : index
      %c0_66 = arith.constant 0 : index
      %c0_67 = arith.constant 0 : index
      %106 = vector.load %arg8[%c1_64, %c0_65, %c0_66, %c0_67] : memref<2x2x8x128xf32, #tpu.memory_space<vmem>>, vector<1x1x8x128xf32>
      %107 = vector.shape_cast %106 : vector<1x1x8x128xf32> to vector<8x128xf32>
      %108 = vector.extract_strided_slice %99 {offsets = [0, 0], sizes = [128, 13], strides = [1, 1]} : vector<128x14xf32> to vector<128x13xf32>
      %109 = vector.extract_strided_slice %105 {offsets = [0, 0], sizes = [128, 13], strides = [1, 1]} : vector<128x14xf32> to vector<128x13xf32>
      %cst_68 = arith.constant dense<0.000000e+00> : vector<8x13xf32>
      %110 = tpu.matmul %107, %108, %cst_68 {dimension_numbers = #tpu.dot_dimension_numbers<[1], [0], [0], [1], [0, 0, 1, 1], [], []>} : vector<8x128xf32>, vector<128x13xf32>, vector<8x13xf32> -> vector<8x13xf32>
      %111 = arith.addf %92, %110 : vector<8x13xf32>
      %cst_69 = arith.constant dense<0.000000e+00> : vector<8x13xf32>
      %112 = tpu.matmul %107, %109, %cst_69 {dimension_numbers = #tpu.dot_dimension_numbers<[1], [0], [0], [1], [0, 0, 1, 1], [], []>} : vector<8x128xf32>, vector<128x13xf32>, vector<8x13xf32> -> vector<8x13xf32>
      %113 = arith.addf %94, %112 : vector<8x13xf32>
      %c1_70 = arith.constant 1 : index
      %c1_71 = arith.constant 1 : index
      %c0_72 = arith.constant 0 : index
      %c0_73 = arith.constant 0 : index
      %114 = vector.load %arg8[%c1_70, %c1_71, %c0_72, %c0_73] : memref<2x2x8x128xf32, #tpu.memory_space<vmem>>, vector<1x1x8x128xf32>
      %115 = vector.shape_cast %114 : vector<1x1x8x128xf32> to vector<8x128xf32>
      %116 = vector.extract_strided_slice %99 {offsets = [0, 1], sizes = [128, 13], strides = [1, 1]} : vector<128x14xf32> to vector<128x13xf32>
      %117 = vector.extract_strided_slice %105 {offsets = [0, 1], sizes = [128, 13], strides = [1, 1]} : vector<128x14xf32> to vector<128x13xf32>
      %cst_74 = arith.constant dense<0.000000e+00> : vector<8x13xf32>
      %118 = tpu.matmul %115, %116, %cst_74 {dimension_numbers = #tpu.dot_dimension_numbers<[1], [0], [0], [1], [0, 0, 1, 1], [], []>} : vector<8x128xf32>, vector<128x13xf32>, vector<8x13xf32> -> vector<8x13xf32>
      %119 = arith.addf %111, %118 : vector<8x13xf32>
      %cst_75 = arith.constant dense<0.000000e+00> : vector<8x13xf32>
      %120 = tpu.matmul %115, %117, %cst_75 {dimension_numbers = #tpu.dot_dimension_numbers<[1], [0], [0], [1], [0, 0, 1, 1], [], []>} : vector<8x128xf32>, vector<128x13xf32>, vector<8x13xf32> -> vector<8x13xf32>
      %121 = arith.addf %113, %120 : vector<8x13xf32>
      %122 = vector.broadcast %62 : vector<8x1xf32> to vector<8x13xf32>
      %123 = arith.addf %119, %122 : vector<8x13xf32>
      %124 = vector.broadcast %62 : vector<8x1xf32> to vector<8x13xf32>
      %125 = arith.addf %121, %124 : vector<8x13xf32>
      %cst_76 = arith.constant 0.000000e+00 : f32
      %126 = vector.broadcast %cst_76 : f32 to vector<8x13xf32>
      %127 = arith.cmpf oge, %123, %126 : vector<8x13xf32>
      %cst_77 = arith.constant 0.00999999977 : f32
      %128 = vector.broadcast %cst_77 : f32 to vector<8x13xf32>
      %129 = arith.mulf %128, %123 : vector<8x13xf32>
      %130 = arith.select %127, %123, %129 : vector<8x13xi1>, vector<8x13xf32>
      %cst_78 = arith.constant 0.000000e+00 : f32
      %131 = vector.broadcast %cst_78 : f32 to vector<8x13xf32>
      %132 = arith.cmpf oge, %125, %131 : vector<8x13xf32>
      %cst_79 = arith.constant 0.00999999977 : f32
      %133 = vector.broadcast %cst_79 : f32 to vector<8x13xf32>
      %134 = arith.mulf %133, %125 : vector<8x13xf32>
      %135 = arith.select %132, %125, %134 : vector<8x13xi1>, vector<8x13xf32>
      %136 = arith.maximumf %130, %135 : vector<8x13xf32>
      %cst_80 = arith.constant dense<0.000000e+00> : vector<8x6xf32>
      %137 = tpu.matmul %136, %54, %cst_80 {dimension_numbers = #tpu.dot_dimension_numbers<[1], [0], [0], [1], [0, 0, 1, 1], [], []>} : vector<8x13xf32>, vector<13x6xf32>, vector<8x6xf32> -> vector<8x6xf32>
      %cst_81 = arith.constant dense<0.000000e+00> : vector<8x6xf32>
      %138 = tpu.matmul %136, %61, %cst_81 {dimension_numbers = #tpu.dot_dimension_numbers<[1], [0], [0], [1], [0, 0, 1, 1], [], []>} : vector<8x13xf32>, vector<13x6xf32>, vector<8x6xf32> -> vector<8x6xf32>
      %139 = arith.maximumf %137, %138 : vector<8x6xf32>
      %c0_82 = arith.constant 0 : index
      %140 = arith.index_cast %65 : i32 to index
      %c0_83 = arith.constant 0 : index
      %c0_84 = arith.constant 0 : index
      %141 = vector.load %arg10[%c0_82, %140, %c0_83, %c0_84] : memref<1x6x8x6xf32, #tpu.memory_space<vmem>>, vector<1x1x8x6xf32>
      %142 = vector.shape_cast %141 : vector<1x1x8x6xf32> to vector<8x6xf32>
      %143 = vector.shape_cast %139 : vector<8x6xf32> to vector<1x1x8x6xf32>
      tpu.vector_store %arg10[%c0_82, %140, %c0_83, %c0_84], %143 {strides = array<i32>} : memref<1x6x8x6xf32, #tpu.memory_space<vmem>>, vector<1x1x8x6xf32>,
    }
    %c6_i32_27 = arith.constant 6 : i32
    return
  }
  func.func @transform_0(%arg0: i32) -> (i32, i32, i32, i32) {
    %c0_i32 = arith.constant 0 : i32
    %c0_i32_0 = arith.constant 0 : i32
    %c0_i32_1 = arith.constant 0 : i32
    %c0_i32_2 = arith.constant 0 : i32
    return %arg0, %c0_i32, %c0_i32_0, %c0_i32_1 : i32, i32, i32, i32
  }
  func.func @transform_1(%arg0: i32) -> (i32, i32, i32, i32) {
    %c0_i32 = arith.constant 0 : i32
    %c0_i32_0 = arith.constant 0 : i32
    %c0_i32_1 = arith.constant 0 : i32
    %c0_i32_2 = arith.constant 0 : i32
    %c0_i32_3 = arith.constant 0 : i32
    return %c0_i32, %c0_i32_0, %c0_i32_1, %c0_i32_2 : i32, i32, i32, i32
  }
  func.func @transform_2(%arg0: i32) -> (i32, i32) {
    %c0_i32 = arith.constant 0 : i32
    %c0_i32_0 = arith.constant 0 : i32
    %c0_i32_1 = arith.constant 0 : i32
    return %c0_i32, %c0_i32_0 : i32, i32
  }
  func.func @transform_3(%arg0: i32) -> (i32, i32, i32, i32) {
    %c0_i32 = arith.constant 0 : i32
    %c0_i32_0 = arith.constant 0 : i32
    %c0_i32_1 = arith.constant 0 : i32
    %c0_i32_2 = arith.constant 0 : i32
    %c0_i32_3 = arith.constant 0 : i32
    return %c0_i32, %c0_i32_0, %c0_i32_1, %c0_i32_2 : i32, i32, i32, i32
  }
  func.func @transform_4(%arg0: i32) -> (i32, i32) {
    %c0_i32 = arith.constant 0 : i32
    %c0_i32_0 = arith.constant 0 : i32
    %c0_i32_1 = arith.constant 0 : i32
    return %c0_i32, %c0_i32_0 : i32, i32
  }
  func.func @transform_5(%arg0: i32) -> (i32, i32, i32, i32) {
    %c0_i32 = arith.constant 0 : i32
    %c0_i32_0 = arith.constant 0 : i32
    %c0_i32_1 = arith.constant 0 : i32
    %c0_i32_2 = arith.constant 0 : i32
    %c0_i32_3 = arith.constant 0 : i32
    return %c0_i32, %c0_i32_0, %c0_i32_1, %c0_i32_2 : i32, i32, i32, i32
  }
  func.func @transform_6(%arg0: i32) -> (i32, i32) {
    %c0_i32 = arith.constant 0 : i32
    %c0_i32_0 = arith.constant 0 : i32
    %c0_i32_1 = arith.constant 0 : i32
    return %c0_i32, %c0_i32_0 : i32, i32
  }
  func.func @transform_7(%arg0: i32) -> (i32, i32, i32, i32) {
    %c0_i32 = arith.constant 0 : i32
    %c0_i32_0 = arith.constant 0 : i32
    %c0_i32_1 = arith.constant 0 : i32
    %c0_i32_2 = arith.constant 0 : i32
    %c0_i32_3 = arith.constant 0 : i32
    return %c0_i32, %c0_i32_0, %c0_i32_1, %c0_i32_2 : i32, i32, i32, i32
  }
  func.func @transform_8(%arg0: i32) -> (i32, i32) {
    %c0_i32 = arith.constant 0 : i32
    %c0_i32_0 = arith.constant 0 : i32
    %c0_i32_1 = arith.constant 0 : i32
    return %c0_i32, %c0_i32_0 : i32, i32
  }
  func.func @transform_9(%arg0: i32) -> (i32, i32, i32, i32) {
    %c0_i32 = arith.constant 0 : i32
    %c0_i32_0 = arith.constant 0 : i32
    %c0_i32_1 = arith.constant 0 : i32
    %c0_i32_2 = arith.constant 0 : i32
    return %arg0, %c0_i32, %c0_i32_0, %c0_i32_1 : i32, i32, i32, i32
  }
}

</mosaic_0001>

<bundles_post_ra>
// kernel: forward.3
= control target key start
LH: loop header
LB: loop body
LE: loop exit
PB: predicated region body
PF: predicated region fallthrough
CT: control target
= control target key end

     0   :  { %vm81_vm0 = vcmask 261120   ;;  %s588_s0 = inlined_call_operand.vmem [shape: f32[2,288], index: 0, kind: input, shape index: {}]   ;;  %s589_s1 = inlined_call_operand.vmem [shape: f32[288,128], index: 1, kind: input, shape index: {}]   ;;  %s590_s2 = inlined_call_operand.vmem [shape: f32[1,128], index: 2, kind: input, shape index: {}]   ;;  %s591_s3 = inlined_call_operand.vmem [shape: f32[128,64], index: 3, kind: input, shape index: {}]   ;;  %s592_s4 = inlined_call_operand.vmem [shape: f32[1,64], index: 4, kind: input, shape index: {}]   ;;  %s593_s5 = inlined_call_operand.vmem [shape: f32[64,32], index: 5, kind: input, shape index: {}]   ;;  %s594_s6 = inlined_call_operand.vmem [shape: f32[1,32], index: 6, kind: input, shape index: {}]   ;;  %s595_s7 = inlined_call_operand.vmem [shape: f32[32,12], index: 7, kind: input, shape index: {}]   ;;  %s596_s8 = inlined_call_operand.vmem [shape: f32[1,12], index: 8, kind: input, shape index: {}]   ;;  %s597_s9 = inlined_call_operand.hbm [shape: f32[2,12], index: 9, kind: output, shape index: {}]  }
   0x1   :  { %v49_v0 = vld [vmem:[%s589_s1 + $0x78] sm:$0xff]  ;;  %v48_v1 = vld [vmem:[%s589_s1 + $0x70] sm:$0xff]  ;;  %v47_v4 = vld [vmem:[%s589_s1 + $0x68] sm:$0xff] }
   0x2   :  { %v65_v2 = vld [vmem:[%s589_s1 + $0xf8] sm:$0xff]  ;;  %84 = vmatpush.msra.mxu0 %v49_v0  ;;  %v64_v3 = vld [vmem:[%s589_s1 + $0xf0] sm:$0xff]  ;;  %v63_v5 = vld [vmem:[%s589_s1 + $0xe8] sm:$0xff] }
   0x3   :  { %104 = vmatpush.msra.mxu1 %v65_v2  ;;  %v46_v6 = vld [vmem:[%s589_s1 + $0x60] sm:$0xff]  ;;  %v45_v8 = vld [vmem:[%s589_s1 + $0x58] sm:$0xff]  ;;  %v44_v11 = vld [vmem:[%s589_s1 + $0x50] sm:$0xff] }
   0x4   :  { %85 = vmatpush.msra.mxu0 %v48_v1  ;;  %v62_v7 = vld [vmem:[%s589_s1 + $0xe0] sm:$0xff]  ;;  %v61_v9 = vld [vmem:[%s589_s1 + $0xd8] sm:$0xff]  ;;  %v60_v12 = vld [vmem:[%s589_s1 + $0xd0] sm:$0xff] }
   0x5   :  { %105 = vmatpush.msra.mxu1 %v64_v3  ;;  %v69_v10 = vld [vmem:[%s589_s1 + $0x118] sm:$0xff]  ;;  %v68_v13 = vld [vmem:[%s589_s1 + $0x110] sm:$0xff]  ;;  %v67_v14 = vld [vmem:[%s589_s1 + $0x108] sm:$0xff] }
   0x6   :  { %86 = vmatpush.msra.mxu0 %v47_v4  ;;  %136 = vmatpush.msra.mxu2 %v69_v10  ;;  %v43_v15 = vld [vmem:[%s589_s1 + $0x48] sm:$0xff]  ;;  %v66_v17 = vld [vmem:[%s589_s1 + $0x100] sm:$0xff]  ;;  %v160_v21 = vld [vmem:[%s591_s3 + $0x78] sm:$0xff] }
   0x7   :  { %106 = vmatpush.msra.mxu1 %v63_v5  ;;  %v59_v16 = vld [vmem:[%s589_s1 + $0xc8] sm:$0xff]  ;;  %v33_v18 = vld [vmem:[%s588_s0] sm:$0x3f]  ;;  %v159_v22 = vld [vmem:[%s591_s3 + $0x70] sm:$0xff]  ;;  %165 = vmatpush.msra.mxu3 %v160_v21 }
   0x8   :  { %87 = vmatpush.msra.mxu0 %v46_v6  ;;  %137 = vmatpush.msra.mxu2 %v68_v13  ;;  %v42_v19 = vld [vmem:[%s589_s1 + $0x40] sm:$0xff]  ;;  %75 = vst [vmem:[#allocation1] ss:$4 sm:$0xff] %v33_v18  ;;  %v41_v23 = vld [vmem:[%s589_s1 + $0x38] sm:$0xff]  ;;  %v40_v25 = vld [vmem:[%s589_s1 + $0x30] sm:$0xff] }
   0x9   :  { %107 = vmatpush.msra.mxu1 %v62_v7  ;;  %v58_v20 = vld [vmem:[%s589_s1 + $0xc0] sm:$0xff]  ;;  %v57_v24 = vld [vmem:[%s589_s1 + $0xb8] sm:$0xff]  ;;  %v56_v26 = vld [vmem:[%s589_s1 + $0xb0] sm:$0xff]  ;;  %166 = vmatpush.msra.mxu3 %v159_v22 }
   0xa   :  { %88 = vmatpush.msra.mxu0 %v45_v8  ;;  %138 = vmatpush.msra.mxu2 %v67_v14  ;;  %v158_v27 = vld [vmem:[%s591_s3 + $0x68] sm:$0xff]  ;;  %v157_v28 = vld [vmem:[%s591_s3 + $0x60] sm:$0xff] }
   0xb   :  { %108 = vmatpush.msra.mxu1 %v61_v9 }
   0xc   :  { %89 = vmatpush.msra.mxu0 %v44_v11  ;;  %139 = vmatpush.msra.mxu2 %v66_v17 }
   0xd   :  { %109 = vmatpush.msra.mxu1 %v60_v12 }
   0xe   :  { %90 = vmatpush.msra.mxu0 %v43_v15 }
   0xf   :  { %110 = vmatpush.msra.mxu1 %v59_v16 }
  0x10   :  { %91 = vmatpush.msra.mxu0 %v42_v19 }
  0x11   :  { %111 = vmatpush.msra.mxu1 %v58_v20 }
  0x12   :  { %92 = vmatpush.msra.mxu0 %v41_v23 }
  0x13   :  { %112 = vmatpush.msra.mxu1 %v57_v24 }
  0x14   :  { %14 = vsyncpa [#allocation3], 0  ;;  %v39_v29 = vld [vmem:[%s589_s1 + $0x28] sm:$0xff]  ;;  %167 = vmatpush.msra.mxu3 %v158_v27  ;;  %93 = vmatpush.msra.mxu0 %v40_v25  ;;  %v78_v31 = vld.sshfl [vmem:[#allocation1 + $0x10] sm:$0xff pattern:$0x73625140] }
  0x15   :  { %v55_v30 = vld [vmem:[%s589_s1 + $0xa8] sm:$0xff]  ;;  %113 = vmatpush.msra.mxu1 %v56_v26  ;;  %v156_v32 = vld [vmem:[%s591_s3 + $0x58] sm:$0xff]  ;;  %v38_v33 = vld [vmem:[%s589_s1 + $0x20] sm:$0xff]  ;;  %284 = vmatmul.msk.f32.vlgmr.msra.gmra.mxu2 %vm81_vm0, %v78_v31  ;;  %vm198_vm1 = vcmask 523264   ;;  %vm254_vm2 = vcmask 91136   ;;  %s275_s12 = sshll.u32 %s597_s9, 4  ;;  %s276_s12 = int_to_ptr.hbm [resolvable:$true] %s275_s12 }
  0x16   :  { %v54_v34 = vld [vmem:[%s589_s1 + $0xa0] sm:$0xff]  ;;  %168 = vmatpush.msra.mxu3 %v157_v28  ;;  %94 = vmatpush.msra.mxu0 %v39_v29  ;;  %v155_v35 = vld [vmem:[%s591_s3 + $0x50] sm:$0xff]  ;;  %v37_v36 = vld [vmem:[%s589_s1 + $0x18] sm:$0xff] }
  0x17   :  { %114 = vmatpush.msra.mxu1 %v55_v30  ;;  %v53_v37 = vld [vmem:[%s589_s1 + $0x98] sm:$0xff]  ;;  %v154_v38 = vld [vmem:[%s591_s3 + $0x48] sm:$0xff]  ;;  %v36_v39 = vld [vmem:[%s589_s1 + $0x10] sm:$0xff] }
  0x18   :  { %169 = vmatpush.msra.mxu3 %v156_v32  ;;  %95 = vmatpush.msra.mxu0 %v38_v33  ;;  %v52_v40 = vld [vmem:[%s589_s1 + $0x90] sm:$0xff]  ;;  %v153_v41 = vld [vmem:[%s591_s3 + $0x40] sm:$0xff]  ;;  %v35_v42 = vld [vmem:[%s589_s1 + $0x8] sm:$0xff] }
  0x19   :  { %115 = vmatpush.msra.mxu1 %v54_v34  ;;  %v51_v43 = vld [vmem:[%s589_s1 + $0x88] sm:$0xff]  ;;  %v152_v44 = vld [vmem:[%s591_s3 + $0x38] sm:$0xff]  ;;  %v34_v45 = vld [vmem:[%s589_s1] sm:$0xff] }
  0x1a   :  { %170 = vmatpush.msra.mxu3 %v155_v35  ;;  %96 = vmatpush.msra.mxu0 %v37_v36  ;;  %v50_v46 = vld [vmem:[%s589_s1 + $0x80] sm:$0xff]  ;;  %v77_v48 = vld.sshfl [vmem:[#allocation1 + $0x8] sm:$0xff pattern:$0x73625140]  ;;  %v151_v49 = vld [vmem:[%s591_s3 + $0x30] sm:$0xff] }
  0x1b   :  { %116 = vmatpush.msra.mxu1 %v53_v37  ;;  %v76_v47 = vld.sshfl [vmem:[#allocation1] sm:$0xff pattern:$0x73625140]  ;;  %v150_v50 = vld [vmem:[%s591_s3 + $0x28] sm:$0xff]  ;;  %v148_v52 = vld [vmem:[%s591_s3 + $0x18] sm:$0xff] }
  0x1c   :  { %171 = vmatpush.msra.mxu3 %v154_v38  ;;  %97 = vmatpush.msra.mxu0 %v36_v39  ;;  %v149_v51 = vld [vmem:[%s591_s3 + $0x20] sm:$0xff]  ;;  %v147_v53 = vld [vmem:[%s591_s3 + $0x10] sm:$0xff]  ;;  %v146_v54 = vld [vmem:[%s591_s3 + $0x8] sm:$0xff] }
  0x1d   :  { %117 = vmatpush.msra.mxu1 %v52_v40  ;;  %v145_v55 = vld [vmem:[%s591_s3] sm:$0xff]  ;;  %v193_v56 = vld [vmem:[%s593_s5 + $0x38] sm:$0xff]  ;;  %v192_v57 = vld [vmem:[%s593_s5 + $0x30] sm:$0xff] }
  0x1e   :  { %172 = vmatpush.msra.mxu3 %v153_v41  ;;  %98 = vmatpush.msra.mxu0 %v35_v42  ;;  %v191_v58 = vld [vmem:[%s593_s5 + $0x28] sm:$0xff]  ;;  %v190_v59 = vld [vmem:[%s593_s5 + $0x20] sm:$0xff]  ;;  %v189_v60 = vld [vmem:[%s593_s5 + $0x18] sm:$0xff] }
  0x1f   :  { %118 = vmatpush.msra.mxu1 %v51_v43  ;;  %210 = vmatpush.msrb.mxu2 %v193_v56  ;;  %v288_v61 = vld [vmem:[%s590_s2] ss:$0 sm:$0xff]  ;;  %v188_v5 = vld [vmem:[%s593_s5 + $0x10] sm:$0xff]  ;;  %v187_v6 = vld [vmem:[%s593_s5 + $0x8] sm:$0xff] }
  0x20   :  { %173 = vmatpush.msra.mxu3 %v152_v44  ;;  %99 = vmatpush.msra.mxu0 %v34_v45  ;;  %v186_v7 = vld [vmem:[%s593_s5] sm:$0xff]  ;;  %v226_v8 = vld [vmem:[%s595_s7 + $0x18] sm:$0xff]  ;;  %v225_v9 = vld [vmem:[%s595_s7 + $0x10] sm:$0xff] }
  0x21   :  { %119 = vmatpush.msra.mxu1 %v50_v46  ;;  %100 = vmatmul.f32.vlgmr.msra.gmra.mxu0 %v76_v47  ;;  %v289_v10 = vld [vmem:[%s592_s4] ss:$0 sm:$0xff]  ;;  %v224_v14 = vld [vmem:[%s595_s7 + $0x8] sm:$0xff] }
  0x22   :  { %120 = vmatmul.f32.vlgmr.msra.gmra.mxu1 %v77_v48  ;;  %174 = vmatpush.msra.mxu3 %v151_v49  ;;  %v223_v15 = vld [vmem:[%s595_s7] sm:$0xff] }
  0x23   :  { %211 = vmatpush.msrb.mxu2 %v192_v57  ;;  %v290_v16 = vld [vmem:[%s594_s6] ss:$0 sm:$0xff]  ;;  %s322_s6 = smov [#allocation2]  }
  0x24   :  { %175 = vmatpush.msra.mxu3 %v150_v50  ;;  %v291_v20 = vld [vmem:[%s596_s8] ss:$0 sm:$0xff]  ;;  %s273_s7 = sshll.u32 %s322_s6, 4  ;;  %s274_s7 = int_to_ptr.vmem [resolvable:$true] %s273_s7 }
  0x25   :  { %212 = vmatpush.msrb.mxu2 %v191_v58 }
  0x26   :  { %176 = vmatpush.msra.mxu3 %v149_v51 }
  0x27   :  { %213 = vmatpush.msrb.mxu2 %v190_v59 }
  0x28   :  { %177 = vmatpush.msra.mxu3 %v148_v52 }
  0x29   :  { %214 = vmatpush.msrb.mxu2 %v189_v60 }
  0x2a   :  { %178 = vmatpush.msra.mxu3 %v147_v53 }
  0x2b   :  { %215 = vmatpush.msrb.mxu2 %v188_v5 }
  0x2c   :  { %179 = vmatpush.msra.mxu3 %v146_v54 }
  0x2d   :  { %216 = vmatpush.msrb.mxu2 %v187_v6 }
  0x2e   :  { %180 = vmatpush.msra.mxu3 %v145_v55 }
  0x2f   :  { %217 = vmatpush.msrb.mxu2 %v186_v7 }
  0x31   :  { %246 = vmatpush.msra.mxu2 %v226_v8 }
  0x33   :  { %247 = vmatpush.msra.mxu2 %v225_v9 }
  0x35   :  { %248 = vmatpush.msra.mxu2 %v224_v14 }
  0x37   :  { %249 = vmatpush.msra.mxu2 %v223_v15 }
  0x98   :  { %v141_v1 = vpop.f32.mrf.mxu2 }
  0x9e   :  { %v101_v62 = vpop.f32.mrf.mxu0 }
  0x9f   :  { %v121_v63 = vpop.f32.mrf.mxu1  ;;  %v102_v0 = vadd.f32 %v288_v61, %v101_v62 }
  0xa1   :  { %v122_v2 = vadd.f32 %v121_v63, %v102_v0 }
  0xa3   :  { %v142_v3 = vadd.f32 %v141_v1, %v122_v2 }
  0xa5   :  { %v144_v4 = vmax.f32 %v142_v3, 0.0 }
  0xa7   :  { %181 = vmatmul.f32.vlgmr.msra.gmra.mxu3 %v144_v4 }
 0x12a   :  { %v182_v11 = vpop.f32.mrf.mxu3 }
 0x12b   :  { %v183_v12 = vadd.f32 %v289_v10, %v182_v11 }
 0x12d   :  { %v185_v13 = vmax.f32 %v183_v12, 0.0 }
 0x12f   :  { %285 = vmatmul.msk.f32.vlgmr.msrb.gmra.mxu2 %vm198_vm1, %v185_v13 }
 0x1b2   :  { %v219_v17 = vpop.f32.mrf.mxu2 }
 0x1b3   :  { %v220_v18 = vadd.f32 %v290_v16, %v219_v17 }
 0x1b5   :  { %v222_v19 = vmax.f32 %v220_v18, 0.0 }
 0x1b7   :  { %286 = vmatmul.msk.f32.vlgmr.msra.gmra.mxu2 %vm81_vm0, %v222_v19 }
 0x23a   :  { %v251_v21 = vpop.f32.mrf.mxu2 }
 0x23b   :  { %v252_v22 = vadd.f32 %v291_v20, %v251_v21 }
 0x23d   :  { %v255_v23 = vsel %vm254_vm2, %v252_v22, -inf }
 0x23e   :  { %256 = vmax.xlane.f32.xlu0 %v255_v23 }
 0x2b1   :  { %v257_v24 = vpop.xlane.xlu0 %256 }
 0x2b2   :  { %v258_v25 = vsub.f32 %v252_v22, %v257_v24 }
 0x2b4   :  { %v259_v26 = vmul.f32 1.442695, %v258_v25 }
 0x2b6   :  { %292 = vpow2.f32 %v259_v26 }
 0x2bc   :  { %v293_v27 = vpop.eup %292 }
 0x2bd   :  { %v261_v28 = vsel %vm254_vm2, %v293_v27, 0.0 }
 0x2be   :  { %262 = vadd.xlane.f32.xlu0 %v261_v28 }
 0x331   :  { %v263_v29 = vpop.xlane.xlu0 %262 }
 0x332   :  { %294 = vlog2.f32 %v263_v29 }
 0x338   :  { %v295_v30 = vpop.eup %294 }
 0x339   :  { %v265_v31 = vmul.f32 0.6931472, %v295_v30 }
 0x33b   :  { %v266_v32 = vsub.f32 %v258_v25, %v265_v31 }
 0x33d   :  { %267 = vst.msk [vmem:[#allocation2] sm:$0x3] %vm254_vm2, %v266_v32 }
 0x33e   :  { %278 = dma.vmem_to_hbm [thread:$0]  %s274_s7, 32, %s276_s12, [#allocation3]  }
 0x33f   :  { %320 = dma.done.wait [#allocation3], 32  }
 0x340   :  { %321 = vsyncadd [#allocation3], 4294967264 }
 0x341   :  { %283 = vsyncpa [#allocation3], 1 }

// kernel: forward.2
= control target key start
LH: loop header
LB: loop body
LE: loop exit
PB: predicated region body
PF: predicated region fallthrough
CT: control target
= control target key end

     0   :  { %s6624_s30 = smov 0   ;;  %s9958_s0 = inlined_call_operand.vmem [shape: f32[2,128,1,128], index: 0, kind: input, shape index: {}]   ;;  %s9959_s1 = inlined_call_operand.vmem [shape: f32[3,3,32,1], index: 1, kind: input, shape index: {}]   ;;  %s9960_s2 = inlined_call_operand.vmem [shape: f32[32,1], index: 2, kind: input, shape index: {}]   ;;  %s9961_s3 = inlined_call_operand.vmem [shape: f32[4,4,6,32], index: 3, kind: input, shape index: {}]   ;;  %s9962_s4 = inlined_call_operand.vmem [shape: f32[6,1], index: 4, kind: input, shape index: {}]   ;;  %s9963_s5 = inlined_call_operand.vmem [shape: f32[3,3,128,6], index: 5, kind: input, shape index: {}]   ;;  %s9964_s6 = inlined_call_operand.vmem [shape: f32[128,1], index: 6, kind: input, shape index: {}]   ;;  %s9965_s7 = inlined_call_operand.vmem [shape: f32[2,2,8,128], index: 7, kind: input, shape index: {}]   ;;  %s9966_s8 = inlined_call_operand.vmem [shape: f32[8,1], index: 8, kind: input, shape index: {}]   ;;  %s9967_s9 = inlined_call_operand.vmem [shape: f32[2,6,8,6], index: 9, kind: output, shape index: {}]  }
   0x1 LB: > { %s5386_s10 = sadd.s32 4294967295, %s6539_s30   ;;  %p5390_p0 = scmp.ge.s32.totalorder %s6539_s30, 1  ;;  %s6539_s30 = sphi %s6624_s30, %s19_s30  }
   0x2   : > { %p286_p1 = scmp.lt.s32.totalorder %s6539_s30, 3 }
   0x4   : > { %p287_p2 = pnand %p5390_p0, %p286_p1 }
   0x6   : > { %290 = sbr.rel (%p287_p2) target bundleno = 2580 (0xa14), region = 56 }
   0xb   : > { %p321_p3 = scmp.lt.s32.totalorder %s5386_s10, 1  ;;  %v330_v0 = vlaneseq  ;;  %v6635_v1 = vld [vmem:[%s9960_s2] sm:$0xff]  ;;  %v6640_v2 = vld [vmem:[%s9960_s2 + $0x8] sm:$0xff]  ;;  %v6645_v3 = vld [vmem:[%s9960_s2 + $0x10] sm:$0xff]  ;;  %v9992_v23 = vmov 0  ;;  %v9995_v24 = vmov 0 }
   0xc   : > { %9985 = vst [vmem:[#allocation5_spill] sm:$0xff] %v6635_v1  ;;  %v6650_v4 = vld [vmem:[%s9960_s2 + $0x18] sm:$0xff]  ;;  %v6557_v25 = vmov 0.0   ;;  %v10001_v31 = vmov 0  ;;  %v10004_v32 = vmov 0  ;;  %s6799_s27 = smov 0  }
   0xd   : > { %9986 = vst [vmem:[#allocation6_spill] sm:$0xff] %v6640_v2  ;;  %s10247_s10 = smov (!%p321_p3, %s5386_s10), 1  ;;  %v331_v5 = vshrl.u32 %v330_v0, 7  ;;  %v348_v6 = vand.u32 127, %v330_v0 }
   0xe   : > { %9987 = vst [vmem:[#allocation7_spill] sm:$0xff] %v6645_v3  ;;  %s5391_s19 = sshll.u32 %s10247_s10, 7  ;;  %s6177_s20 = smul.u32 48, %s10247_s10 }
   0xf   : > { %9988 = vst [vmem:[#allocation8_spill] sm:$0xff] %v6650_v4  ;;  %s6655_s23 = scalar_lea.vmem %s9958_s0, %s5391_s19  ;;  %v332_v7 = vadd.s32 8, %v331_v5  ;;  %v6657_v8 = vadd.s32 16, %v331_v5  ;;  %v6659_v9 = vadd.s32 24, %v331_v5  ;;  %v6661_v10 = vadd.s32 32, %v331_v5 }
  0x10   : > { %s6666_s26 = scalar_lea.vmem %s9967_s9, %s6177_s20  ;;  %v6668_v11 = vadd.s32 40, %v331_v5  ;;  %v6670_v12 = vadd.s32 48, %v331_v5  ;;  %v6672_v13 = vadd.s32 56, %v331_v5  ;;  %v6674_v14 = vadd.s32 64, %v331_v5 }
  0x11   : > { %9989 = vst [vmem:[#allocation9_spill] sm:$0xff] %v6657_v8  ;;  %v6676_v15 = vadd.s32 72, %v331_v5  ;;  %v6678_v16 = vadd.s32 80, %v331_v5  ;;  %v6680_v17 = vadd.s32 88, %v331_v5  ;;  %v6682_v18 = vmul.u32 2, %v348_v6 }
  0x12   : > { %9990 = vst [vmem:[#allocation10_spill] sm:$0xff] %v6672_v13  ;;  %v6684_v19 = vadd.s32 96, %v331_v5  ;;  %v6686_v20 = vadd.s32 104, %v331_v5  ;;  %v6688_v21 = vadd.s32 112, %v331_v5  ;;  %v346_v22 = vadd.s32 120, %v331_v5 }
  0x13   : > { %9991 = vst [vmem:[#allocation11_spill] sm:$0xff] %v6682_v18  ;;  %vm6691_vm0 = vcmp.eq.s32.totalorder %v331_v5, %v6682_v18  ;;  %vm6696_vm1 = vcmp.eq.s32.totalorder %v332_v7, %v6682_v18  ;;  %vm9968_vm3 = vcmp.eq.s32.totalorder %v6659_v9, %v6682_v18  ;;  %vm9969_vm7 = vcmp.eq.s32.totalorder %v6672_v13, %v6682_v18 }
  0x14   : > { %v9993_v23 = vsel %vm6691_vm0, 4294967295, %v9992_v23  ;;  %v9996_v24 = vsel %vm6696_vm1, 4294967295, %v9995_v24  ;;  %vm362_vm12 = vcmp.eq.s32.totalorder %v6684_v19, %v6682_v18  ;;  %vm363_vm13 = vcmp.eq.s32.totalorder %v6686_v20, %v6682_v18 }
  0x15   : > { %9994 = vst [vmem:[#allocation12_spill] sm:$0xff] %v9993_v23  ;;  %vm364_vm14 = vcmp.eq.s32.totalorder %v6688_v21, %v6682_v18  ;;  %vm365_vm15 = vcmp.eq.s32.totalorder %v346_v22, %v6682_v18  ;;  %v6729_v26 = vsel %vm6696_vm1, 1.0, %v6557_v25  ;;  %v6734_v27 = vsel %vm9968_vm3, 1.0, %v6557_v25 }
  0x16   : > { %9997 = vst [vmem:[#allocation13_spill] sm:$0xff] %v9996_v24  ;;  %v6739_v28 = vsel %vm9969_vm7, 1.0, %v6557_v25  ;;  %v6741_v29 = vsel %vm365_vm15, 1.0, %v6557_v25  ;;  %v6744_v30 = vadd.s32 1, %v6682_v18 }
  0x17   : > { %9998 = vst [vmem:[#allocation14_spill] sm:$0xff] %v6729_v26 }
  0x18   : > { %9999 = vst [vmem:[#allocation15_spill] sm:$0xff] %v6734_v27  ;;  %vm6747_vm2 = vcmp.eq.s32.totalorder %v331_v5, %v6744_v30  ;;  %vm6752_vm4 = vcmp.eq.s32.totalorder %v332_v7, %v6744_v30  ;;  %vm402_vm15 = vcmp.eq.s32.totalorder %v6659_v9, %v6744_v30  ;;  %vm406_vm8 = vcmp.eq.s32.totalorder %v6672_v13, %v6744_v30 }
  0x19   : > { %10000 = vst [vmem:[#allocation16_spill] sm:$0xff] %v6744_v30  ;;  %v10002_v31 = vsel %vm6747_vm2, 4294967295, %v10001_v31  ;;  %v10005_v32 = vsel %vm6752_vm4, 4294967295, %v10004_v32  ;;  %vm409_vm10 = vcmp.eq.s32.totalorder %v6678_v16, %v6744_v30  ;;  %vm414_vm9 = vcmp.eq.s32.totalorder %v346_v22, %v6744_v30 }
  0x1a   : > { %10003 = vst [vmem:[#allocation17_spill] sm:$0xff] %v10002_v31  ;;  %v6785_v33 = vsel %vm6752_vm4, 1.0, %v6557_v25  ;;  %v6790_v34 = vsel %vm402_vm15, 1.0, %v6557_v25  ;;  %v6795_v35 = vsel %vm406_vm8, 1.0, %v6557_v25  ;;  %v6797_v36 = vsel %vm414_vm9, 1.0, %v6557_v25 }
  0x1b   : > { %10006 = vst [vmem:[#allocation18_spill] sm:$0xff] %v10005_v32 }
  0x1c   : > { %10007 = vst [vmem:[#allocation19_spill] sm:$0xff] %v6785_v33 }
  0x1d   : > { %10008 = vst [vmem:[#allocation20_spill] sm:$0xff] %v6790_v34 }
  0x1e LB: >> { %v10009_v13 = vld [vmem:[#allocation10_spill] sm:$0xff]  ;;  %v5428_v37 = vld [vmem:[%s9959_s1 + $0x20] sm:$0xff]  ;;  %v465_v38 = vld [vmem:[%s9959_s1 + $0x10] sm:$0xff]  ;;  %v6558_v40 = vmov 0   ;;  %s5425_s14 = sshll.u32 %s6543_s27, 1  ;;  %s6559_s20 = smov 127   ;;  %vm10012_vm11 = vcmp.eq.s32.totalorder %v6688_v21, %v6744_v30  ;;  %vm10013_vm7 = vcmp.eq.s32.totalorder %v6686_v20, %v6744_v30  ;;  %vm10016_vm6 = vcmp.eq.s32.totalorder %v6684_v19, %v6744_v30  ;;  %s6543_s27 = sphi %s6799_s27, %s456_s27  }
  0x1f   : >> { %v463_v39 = vld [vmem:[%s9959_s1] sm:$0xff]  ;;  %6237 = vset.pattern.permute.xlu2 %v6558_v40  ;;  %6236 = vset.pattern.permute.xlu1 %v6558_v40  ;;  %s6815_s15 = scalar_lea.vmem %s6655_s23, %s5425_s14  ;;  %v5429_v41 = vld [vmem:[%s9959_s1 + $0x28] sm:$0xff]  ;;  %v466_v42 = vld [vmem:[%s9959_s1 + $0x18] sm:$0xff]  ;;  %s6560_s21 = smov 126   ;;  %vm1110_vm9 = vcmask 1045504   ;;  %vm10018_vm5 = vcmp.eq.s32.totalorder %v6680_v17, %v6744_v30  ;;  %vm10022_vm3 = vcmp.eq.s32.totalorder %v6676_v15, %v6744_v30 }
  0x20   : >> { %6235 = vset.pattern.permute.xlu0 %v6558_v40  ;;  %516 = vperm.xlu2 %6237, %v5428_v37   ;;  %v464_v43 = vld [vmem:[%s9959_s1 + $0x8] sm:$0xff]  ;;  %v5431_v45 = vld [vmem:[%s9959_s1 + $0x38] sm:$0xff]  ;;  %v5430_v46 = vld [vmem:[%s9959_s1 + $0x30] sm:$0xff]  ;;  %s5504_s19 = sshll.u32 %s6543_s27, 5  ;;  %s456_s27 = sadd.s32 1, %s6543_s27  }
  0x21   : >> { %479 = vperm.xlu1 %6236, %v465_v38   ;;  %469 = vperm.xlu0 %6235, %v463_v39   ;;  %v5433_v44 = vld [vmem:[%s9959_s1 + $0x48] sm:$0xff]  ;;  %v5432_v48 = vld [vmem:[%s9959_s1 + $0x40] sm:$0xff]  ;;  %v5434_v49 = vld [vmem:[%s9959_s1 + $0x50] sm:$0xff]  ;;  %p453_p4 = scmp.ge.s32.totalorder %s456_s27, 63  }
  0x22   : >> { %v5439_v47 = vld [vmem:[%s9959_s1 + $0x68] sm:$0xff]  ;;  %v5442_v50 = vld [vmem:[%s9959_s1 + $0x80] sm:$0xff]  ;;  %v5435_v51 = vld [vmem:[%s9959_s1 + $0x58] sm:$0xff]  ;;  %6145 = vmatpush.msk.msra.mxu2 %vm1110_vm9, %v6741_v29  ;;  %6161 = vmatpush.msk.msra.mxu3 %vm1110_vm9, %v6797_v36  ;;  %s7399_s24 = smov (%p453_p4), 0  }
  0x23   : >> { %v5440_v52 = vld [vmem:[%s9959_s1 + $0x70] sm:$0xff]  ;;  %v5438_v54 = vld [vmem:[%s9959_s1 + $0x60] sm:$0xff]  ;;  %v5441_v57 = vld [vmem:[%s9959_s1 + $0x78] sm:$0xff]  ;;  %5464 = vmatpush.msk.msra.mxu0 %vm1110_vm9, %v6741_v29  ;;  %5484 = vmatpush.msk.msra.mxu1 %vm1110_vm9, %v6797_v36 }
  0x24   : >> { %v5458_v53 = vld [vmem:[%s9959_s1 + $0xf0] sm:$0xff]  ;;  %v5445_v58 = vld [vmem:[%s9959_s1 + $0x98] sm:$0xff]  ;;  %v5443_v59 = vld [vmem:[%s9959_s1 + $0x88] sm:$0xff] }
  0x25   : >> { %v5444_v55 = vld [vmem:[%s9959_s1 + $0x90] sm:$0xff]  ;;  %v5449_v61 = vld [vmem:[%s9959_s1 + $0xb8] sm:$0xff]  ;;  %v5447_v62 = vld [vmem:[%s9959_s1 + $0xa8] sm:$0xff] }
  0x26   : >> { %v5462_v56 = vld [vmem:[%s9959_s1 + $0x110] sm:$0xff]  ;;  %v5446_v63 = vld [vmem:[%s9959_s1 + $0xa0] sm:$0xff]  ;;  %v5459_v0 = vld [vmem:[%s9959_s1 + $0xf8] sm:$0xff] }
  0x27   : >> { %v5448_v60 = vld [vmem:[%s9959_s1 + $0xb0] sm:$0xff]  ;;  %v5456_v5 = vld [vmem:[%s9959_s1 + $0xe0] sm:$0xff]  ;;  %v10014_v2 = vld [vmem:[#allocation6_spill] sm:$0xff] }
  0x28   : >> { %521 = vperm.xlu2 %6237, %v5429_v41   ;;  %v5460_v6 = vld [vmem:[%s9959_s1 + $0x100] sm:$0xff]  ;;  %v10011_v1 = vld [vmem:[#allocation5_spill] sm:$0xff]  ;;  %v10015_v4 = vld [vmem:[#allocation8_spill] sm:$0xff] }
  0x29   : >> { %484 = vperm.xlu1 %6236, %v466_v42   ;;  %474 = vperm.xlu0 %6235, %v464_v43   ;;  %v6238_v7 = vld [vmem:[%s6815_s15] ss:$0 sm:$0xff]  ;;  %v6898_v39 = vld [vmem:[%s6815_s15 + $0x1] ss:$0 sm:$0xff] }
  0x2a   : >> { %v10010_v3 = vld [vmem:[#allocation7_spill] sm:$0xff] }
  0x30   : >> { %594 = vperm.xlu2 %6237, %v5433_v44  }
  0x31   : >> { %531 = vperm.xlu1 %6236, %v5431_v45   ;;  %526 = vperm.xlu0 %6235, %v5430_v46  }
  0x38   : >> { %670 = vperm.xlu2 %6237, %v5439_v47  }
  0x39   : >> { %589 = vperm.xlu1 %6236, %v5432_v48   ;;  %599 = vperm.xlu0 %6235, %v5434_v49  }
  0x40   : >> { %709 = vperm.xlu2 %6237, %v5442_v50  }
  0x41   : >> { %604 = vperm.xlu1 %6236, %v5435_v51   ;;  %675 = vperm.xlu0 %6235, %v5440_v52  }
  0x48   : >> { %912 = vperm.xlu2 %6237, %v5458_v53  }
  0x49   : >> { %665 = vperm.xlu1 %6236, %v5438_v54   ;;  %719 = vperm.xlu0 %6235, %v5444_v55  }
  0x50   : >> { %985 = vperm.xlu2 %6237, %v5462_v56  }
  0x51   : >> { %680 = vperm.xlu1 %6236, %v5441_v57   ;;  %724 = vperm.xlu0 %6235, %v5445_v58  }
  0x58   : >> { %714 = vperm.xlu2 %6237, %v5443_v59  }
  0x59   : >> { %792 = vperm.xlu1 %6236, %v5448_v60   ;;  %797 = vperm.xlu0 %6235, %v5449_v61  }
  0x60   : >> { %787 = vperm.xlu2 %6237, %v5447_v62  }
  0x61   : >> { %782 = vperm.xlu1 %6236, %v5446_v63   ;;  %917 = vperm.xlu0 %6235, %v5459_v0  }
  0x69   : >> { %902 = vperm.xlu1 %6236, %v5456_v5  }
  0x71   : >> { %975 = vperm.xlu1 %6236, %v5460_v6  }
  0x7a   : >> { %v517_v22 = vpop.permute.xlu2 %516 }
  0x7b   : >> { %v534_v25 = vmul.f32 %v6238_v7, %v517_v22  ;;  %v558_v40 = vmul.f32 %v6898_v39, %v517_v22 }
  0x7d   : >> { %542 = vrot.lane.b32.xlu2 %v534_v25, %s6559_s20 }
  0x82   : >> { %v522_v37 = vpop.permute.xlu2 %521 }
  0x83   : >> { %v535_v38 = vmul.f32 %v6238_v7, %v522_v37  ;;  %v559_v58 = vmul.f32 %v6898_v39, %v522_v37 }
  0x85   : >> { %544 = vrot.lane.b32.xlu0 %v535_v38, %s6559_s20 }
  0x8a   : >> { %v595_v41 = vpop.permute.xlu2 %594 }
  0x8b   : >> { %v608_v59 = vmul.f32 %v6238_v7, %v595_v41  ;;  %v632_v25 = vmul.f32 %v6898_v39, %v595_v41  ;;  %v5463_v41 = vld [vmem:[%s9959_s1 + $0x118] sm:$0xff] }
  0x8d   : >> { %566 = vrot.lane.b32.xlu0 %v558_v40, %s6559_s20 }
  0x92   : >> { %v6923_v50 = vpop.permute.xlu2 %670 }
  0x93   : >> { %v6903_v42 = vpop.permute.xlu1 %479  ;;  %v6905_v43 = vpop.permute.xlu0 %469 }
  0x94   : >> { %v6908_v44 = vmul.f32 %v6238_v7, %v6903_v42  ;;  %v6911_v45 = vmul.f32 %v6238_v7, %v6905_v43 }
  0x9a   : >> { %v710_v56 = vpop.permute.xlu2 %709 }
  0x9b   : >> { %v6913_v46 = vpop.permute.xlu1 %484  ;;  %v6915_v47 = vpop.permute.xlu0 %474 }
  0x9c   : >> { %v6918_v48 = vmul.f32 %v6238_v7, %v6913_v46  ;;  %v6921_v49 = vmul.f32 %v6238_v7, %v6915_v47 }
  0xa2   : >> { %v913_v61 = vpop.permute.xlu2 %912 }
  0xa3   : >> { %v532_v51 = vpop.permute.xlu1 %531  ;;  %v527_v52 = vpop.permute.xlu0 %526 }
  0xa4   : >> { %v537_v53 = vmul.f32 %v6238_v7, %v532_v51  ;;  %v561_v54 = vmul.f32 %v6898_v39, %v532_v51  ;;  %v536_v55 = vmul.f32 %v6238_v7, %v527_v52  ;;  %v560_v60 = vmul.f32 %v6898_v39, %v527_v52  ;;  %v5457_v52 = vld [vmem:[%s9959_s1 + $0xe8] sm:$0xff] }
  0xa6   : >> { %546 = vrot.lane.b32.xlu1 %v536_v55, %s6559_s20  ;;  %572 = vrot.lane.b32.xlu0 %v561_v54, %s6559_s20 }
  0xa7   : >> { %548 = vrot.lane.b32.xlu2 %v537_v53, %s6559_s20 }
  0xaa   : >> { %v986_v22 = vpop.permute.xlu2 %985 }
  0xab   : >> { %v590_v57 = vpop.permute.xlu1 %589  ;;  %v600_v62 = vpop.permute.xlu0 %599 }
  0xac   : >> { %v631_v0 = vmul.f32 %v6898_v39, %v590_v57  ;;  %v609_v5 = vmul.f32 %v6238_v7, %v600_v62  ;;  %v607_v6 = vmul.f32 %v6238_v7, %v590_v57  ;;  %v6960_v57 = vld [vmem:[%s6815_s15 + $0x2] ss:$0 sm:$0xff] }
  0xae   : >> { %568 = vrot.lane.b32.xlu1 %v559_v58, %s6559_s20  ;;  %617 = vrot.lane.b32.xlu0 %v608_v59, %s6560_s21 }
  0xaf   : >> { %570 = vrot.lane.b32.xlu2 %v560_v60, %s6559_s20  ;;  %v5461_v60 = vld [vmem:[%s9959_s1 + $0x108] sm:$0xff] }
  0xb2   : >> { %v6954_v53 = vpop.permute.xlu2 %714 }
  0xb3   : >> { %v605_v63 = vpop.permute.xlu1 %604  ;;  %v6944_v51 = vpop.permute.xlu0 %675 }
  0xb4   : >> { %v634_v37 = vmul.f32 %v6898_v39, %v605_v63  ;;  %v610_v38 = vmul.f32 %v6238_v7, %v605_v63  ;;  %v633_v7 = vmul.f32 %v6898_v39, %v600_v62 }
  0xb6   : >> { %619 = vrot.lane.b32.xlu1 %v609_v5, %s6560_s21  ;;  %639 = vrot.lane.b32.xlu0 %v631_v0, %s6560_s21  ;;  %v5454_v0 = vld [vmem:[%s9959_s1 + $0xd0] sm:$0xff] }
  0xb7   : >> { %615 = vrot.lane.b32.xlu2 %v607_v6, %s6560_s21 }
  0xba   : >> { %v6969_v62 = vpop.permute.xlu2 %787 }
  0xbb   : >> { %v6940_v40 = vpop.permute.xlu1 %665  ;;  %v720_v55 = vpop.permute.xlu0 %719 }
  0xbc   : >> { %v729_v58 = vmul.f32 %v6898_v39, %v720_v55  ;;  %v753_v59 = vmul.f32 %v6960_v57, %v720_v55  ;;  %v6986_v55 = vld [vmem:[%s6815_s15 + $0x3] ss:$0 sm:$0xff] }
  0xbe   : >> { %641 = vrot.lane.b32.xlu1 %v632_v25, %s6560_s21  ;;  %645 = vrot.lane.b32.xlu0 %v634_v37, %s6560_s21 }
  0xbf   : >> { %621 = vrot.lane.b32.xlu2 %v610_v38, %s6560_s21 }
  0xc3   : >> { %v6956_v54 = vpop.permute.xlu1 %680  ;;  %v725_v38 = vpop.permute.xlu0 %724 }
  0xc6   : >> { %907 = vperm.xlu1 %6236, %v5457_v52   ;;  %990 = vperm.xlu0 %6235, %v5463_v41   ;;  %v751_v52 = vmul.f32 %v6960_v57, %v710_v56  ;;  %v922_v41 = vmul.f32 %v6960_v57, %v913_v61 }
  0xc7   : >> { %643 = vrot.lane.b32.xlu2 %v633_v7, %s6560_s21  ;;  %v727_v7 = vmul.f32 %v6898_v39, %v710_v56 }
  0xcb   : >> { %v793_v63 = vpop.permute.xlu1 %792 }
  0xcc   : >> { %v826_v5 = vmul.f32 %v6960_v57, %v793_v63  ;;  %v802_v6 = vmul.f32 %v6898_v39, %v793_v63  ;;  %v5452_v63 = vld [vmem:[%s9959_s1 + $0xc0] sm:$0xff] }
  0xce   : >> { %763 = vrot.lane.b32.xlu1 %v753_v59, %s6559_s20  ;;  %739 = vrot.lane.b32.xlu0 %v729_v58, %s6559_s20  ;;  %v730_v58 = vmul.f32 %v6898_v39, %v725_v38  ;;  %v754_v59 = vmul.f32 %v6960_v57, %v725_v38  ;;  %v995_v38 = vmul.f32 %v6960_v57, %v986_v22 }
  0xcf   : >> { %980 = vperm.xlu2 %6237, %v5461_v60   ;;  %v798_v60 = vpop.permute.xlu0 %797 }
  0xd3   : >> { %v783_v56 = vpop.permute.xlu1 %782 }
  0xd6   : >> { %868 = vperm.xlu1 %6236, %v5454_v0   ;;  %836 = vrot.lane.b32.xlu0 %v826_v5, %s6560_s21  ;;  %v824_v0 = vmul.f32 %v6960_v57, %v783_v56  ;;  %v800_v5 = vmul.f32 %v6898_v39, %v783_v56 }
  0xd7   : >> { %812 = vrot.lane.b32.xlu2 %v802_v6, %s6560_s21  ;;  %v543_v25 = vpop.permute.xlu2 %542  ;;  %v1019_v6 = vmul.f32 %v6986_v55, %v986_v22 }
  0xd8   : >> { %v554_v37 = vadd.f32 %v543_v25, %v6911_v45  ;;  %v946_v45 = vmul.f32 %v6986_v55, %v913_v61  ;;  %v918_v61 = vpop.permute.xlu0 %917  ;;  %v803_v25 = vmul.f32 %v6898_v39, %v798_v60 }
  0xdb   : >> { %v903_v56 = vpop.permute.xlu1 %902 }
  0xde   : >> { %932 = vrot.lane.b32.xlu1 %v922_v41, %s6559_s20  ;;  %759 = vrot.lane.b32.xlu0 %v751_v52, %s6559_s20 }
  0xdf   : >> { %735 = vrot.lane.b32.xlu2 %v727_v7, %s6559_s20  ;;  %v5455_v7 = vld [vmem:[%s9959_s1 + $0xd8] sm:$0xff] }
  0xe6   : >> { %765 = vrot.lane.b32.xlu1 %v754_v59, %s6559_s20  ;;  %741 = vrot.lane.b32.xlu0 %v730_v58, %s6559_s20  ;;  %v827_v58 = vmul.f32 %v6960_v57, %v798_v60  ;;  %v501_v59 = vmul.f32 %v6898_v39, %v6905_v43  ;;  %v920_v60 = vmul.f32 %v6960_v57, %v903_v56 }
  0xe7   : >> { %956 = vrot.lane.b32.xlu2 %v946_v45, %s6559_s20 }
  0xee   : >> { %858 = vperm.xlu1 %6236, %v5452_v63   ;;  %832 = vrot.lane.b32.xlu0 %v824_v0, %s6560_s21  ;;  %v728_v0 = vmul.f32 %v6898_v39, %v6954_v53 }
  0xef   : >> { %808 = vrot.lane.b32.xlu2 %v800_v5, %s6560_s21  ;;  %v944_v5 = vmul.f32 %v6986_v55, %v903_v56  ;;  %v504_v56 = vmul.f32 %v6898_v39, %v6913_v46  ;;  %v825_v46 = vmul.f32 %v6960_v57, %v6969_v62 }
  0xf6   : >> { %814 = vrot.lane.b32.xlu1 %v803_v25, %s6560_s21  ;;  %1029 = vrot.lane.b32.xlu0 %v1019_v6, %s6560_s21  ;;  %v923_v6 = vmul.f32 %v6960_v57, %v918_v61  ;;  %v947_v25 = vmul.f32 %v6986_v55, %v918_v61 }
  0xf7   : >> { %1005 = vrot.lane.b32.xlu2 %v995_v38, %s6560_s21  ;;  %v545_v52 = vpop.permute.xlu0 %544  ;;  %v976_v38 = vpop.permute.xlu1 %975 }
  0xf8   : >> { %v555_v41 = vadd.f32 %v545_v52, %v6921_v49  ;;  %v1017_v61 = vmul.f32 %v6986_v55, %v976_v38 }
  0xfe   : >> { %1053 = vperm.xlu1 %6236, %v10010_v3   ;;  %873 = vperm.xlu0 %6235, %v5455_v7   ;;  %v683_v7 = vmul.f32 %v6898_v39, %v6940_v40 }
  0xff   : >> { %838 = vrot.lane.b32.xlu2 %v827_v58, %s6560_s21  ;;  %v567_v22 = vpop.permute.xlu0 %566 }
 0x100   : >> { %v578_v45 = vadd.f32 %v567_v22, %v501_v59  ;;  %v801_v59 = vmul.f32 %v6898_v39, %v6969_v62  ;;  %v696_v62 = vmul.f32 %v6960_v57, %v6944_v51 }
 0x101   : >> { %v549_v63 = vpop.permute.xlu2 %548 }
 0x102   : >> { %v557_v49 = vadd.f32 %v549_v63, %v6918_v48  ;;  %v752_v48 = vmul.f32 %v6960_v57, %v6954_v53  ;;  %v993_v53 = vmul.f32 %v6960_v57, %v976_v38 }
 0x106   : >> { %737 = vrot.lane.b32.xlu1 %v728_v0, %s6559_s20  ;;  %952 = vrot.lane.b32.xlu0 %v944_v5, %s6559_s20 }
 0x107   : >> { %928 = vrot.lane.b32.xlu2 %v920_v60, %s6559_s20 }
 0x109   : >> { %v571_v43 = vpop.permute.xlu2 %570 }
 0x10e   : >> { %958 = vrot.lane.b32.xlu1 %v947_v25, %s6559_s20  ;;  %934 = vrot.lane.b32.xlu0 %v923_v6, %s6559_s20  ;;  %v686_v6 = vmul.f32 %v6898_v39, %v6956_v54 }
 0x10f   : >> { %761 = vrot.lane.b32.xlu2 %v752_v48, %s6559_s20  ;;  %v5453_v48 = vld [vmem:[%s9959_s1 + $0xc8] sm:$0xff] }
 0x111   : >> { %v616_v52 = vpop.permute.xlu2 %615 }
 0x112   : >> { %v627_v58 = vadd.f32 %v616_v52, %v554_v37  ;;  %v503_v52 = vmul.f32 %v6898_v39, %v6903_v42 }
 0x114   : >> { %v7036_v22 = vadd.f32 %v683_v7, %v627_v58  ;;  %v580_v7 = vadd.f32 %v571_v43, %v503_v52 }
 0x116   : >> { %810 = vrot.lane.b32.xlu1 %v801_v59, %s6560_s21  ;;  %1025 = vrot.lane.b32.xlu0 %v1017_v61, %s6560_s21  ;;  %v684_v59 = vmul.f32 %v6898_v39, %v6923_v50 }
 0x117   : >> { %1001 = vrot.lane.b32.xlu2 %v993_v53, %s6560_s21 }
 0x118   : >> { %v547_v63 = vpop.permute.xlu1 %546  ;;  %v573_v37 = vpop.permute.xlu0 %572 }
 0x119   : >> { %v556_v0 = vadd.f32 %v547_v63, %v6908_v44  ;;  %v581_v5 = vadd.f32 %v573_v37, %v504_v56  ;;  %v622_v60 = vpop.permute.xlu2 %621  ;;  %v502_v44 = vmul.f32 %v6898_v39, %v6915_v47 }
 0x11a   : >> { %v630_v25 = vadd.f32 %v622_v60, %v557_v49  ;;  %v685_v60 = vmul.f32 %v6898_v39, %v6944_v51 }
 0x11c   : >> { %v7050_v38 = vadd.f32 %v686_v6, %v630_v25  ;;  %v694_v6 = vmul.f32 %v6960_v57, %v6940_v40 }
 0x11e   : >> { %863 = vperm.xlu0 %6235, %v5453_v48  }
 0x11f   : >> { %834 = vrot.lane.b32.xlu2 %v825_v46, %s6560_s21 }
 0x120   : >> { %v569_v49 = vpop.permute.xlu1 %568  ;;  %v618_v58 = vpop.permute.xlu0 %617 }
 0x121   : >> { %v579_v61 = vadd.f32 %v569_v49, %v502_v44  ;;  %v628_v53 = vadd.f32 %v618_v58, %v555_v41  ;;  %v644_v56 = vpop.permute.xlu2 %643  ;;  %v697_v49 = vmul.f32 %v6960_v57, %v6956_v54 }
 0x122   : >> { %v653_v63 = vadd.f32 %v644_v56, %v580_v7  ;;  %v695_v7 = vmul.f32 %v6960_v57, %v6923_v50  ;;  %v6561_v50 = vmov 1.0  }
 0x123   : >> { %v7063_v42 = vadd.f32 %v684_v59, %v628_v53  ;;  %6146 = vmatpush.msk.msra.mxu2 %vm364_vm14, %v6561_v50  ;;  %6162 = vmatpush.msk.msra.mxu3 %vm10012_vm11, %v6561_v50 }
 0x124   : >> { %v7065_v37 = vadd.f32 %v696_v62, %v653_v63  ;;  %5465 = vmatpush.msk.msra.mxu0 %vm364_vm14, %v6561_v50  ;;  %5485 = vmatpush.msk.msra.mxu1 %vm10012_vm11, %v6561_v50  ;;  %vm10017_vm11 = vcmp.eq.s32.totalorder %v6680_v17, %v6682_v18 }
 0x125   : >> { %6147 = vmatpush.msk.msra.mxu2 %vm363_vm13, %v6561_v50  ;;  %6163 = vmatpush.msk.msra.mxu3 %vm10013_vm7, %v6561_v50 }
 0x126   : >> { %1043 = vperm.xlu0 %6235, %v10011_v1   ;;  %5466 = vmatpush.msk.msra.mxu0 %vm363_vm13, %v6561_v50 }
 0x127   : >> { %6148 = vmatpush.msk.msra.mxu2 %vm362_vm12, %v6561_v50  ;;  %5486 = vmatpush.msk.msra.mxu1 %vm10013_vm7, %v6561_v50  ;;  %vm10019_vm7 = vcmp.eq.s32.totalorder %v6678_v16, %v6682_v18 }
 0x128   : >> { %v620_v47 = vpop.permute.xlu1 %619  ;;  %v640_v43 = vpop.permute.xlu0 %639  ;;  %6164 = vmatpush.msk.msra.mxu3 %vm10016_vm6, %v6561_v50  ;;  %5467 = vmatpush.msk.msra.mxu0 %vm362_vm12, %v6561_v50 }
 0x129   : >> { %v629_v41 = vadd.f32 %v620_v47, %v556_v0  ;;  %v651_v25 = vadd.f32 %v640_v43, %v578_v45  ;;  %v981_v0 = vpop.permute.xlu2 %980  ;;  %6149 = vmatpush.msk.msra.mxu2 %vm10017_vm11, %v6561_v50  ;;  %5487 = vmatpush.msk.msra.mxu1 %vm10016_vm6, %v6561_v50  ;;  %vm10026_vm6 = vcmp.eq.s32.totalorder %v6676_v15, %v6682_v18 }
 0x12a   : >> { %6165 = vmatpush.msk.msra.mxu3 %vm10018_vm5, %v6561_v50  ;;  %5468 = vmatpush.msk.msra.mxu0 %vm10017_vm11, %v6561_v50  ;;  %vm10021_vm11 = vcmp.eq.s32.totalorder %v6678_v16, %v6682_v18 }
 0x12b   : >> { %v7072_v48 = vadd.f32 %v685_v60, %v629_v41  ;;  %v7074_v46 = vadd.f32 %v694_v6, %v651_v25  ;;  %6150 = vmatpush.msk.msra.mxu2 %vm10019_vm7, %v6561_v50  ;;  %5488 = vmatpush.msk.msra.mxu1 %vm10018_vm5, %v6561_v50  ;;  %v994_v60 = vmul.f32 %v6960_v57, %v981_v0 }
 0x12c   : >> { %6166 = vmatpush.msk.msra.mxu3 %vm409_vm10, %v6561_v50  ;;  %vm10020_vm7 = vcmp.eq.s32.totalorder %v6676_v15, %v6682_v18  ;;  %5469 = vmatpush.msk.msra.mxu0 %vm10021_vm11, %v6561_v50  ;;  %v1018_v6 = vmul.f32 %v6986_v55, %v981_v0  ;;  %vm10024_vm11 = vcmp.eq.s32.totalorder %v6674_v14, %v6744_v30 }
 0x12d   : >> { %6151 = vmatpush.msk.msra.mxu2 %vm10020_vm7, %v6561_v50  ;;  %5489 = vmatpush.msk.msra.mxu1 %vm409_vm10, %v6561_v50  ;;  %vm10023_vm7 = vcmp.eq.s32.totalorder %v6674_v14, %v6682_v18  ;;  %vm10025_vm5 = vcmp.eq.s32.totalorder %v10009_v13, %v6682_v18 }
 0x12e   : >> { %6167 = vmatpush.msk.msra.mxu3 %vm10022_vm3, %v6561_v50  ;;  %5470 = vmatpush.msk.msra.mxu0 %vm10026_vm6, %v6561_v50  ;;  %vm10029_vm6 = vcmp.eq.s32.totalorder %v6670_v12, %v6744_v30 }
 0x12f   : >> { %6152 = vmatpush.msk.msra.mxu2 %vm10023_vm7, %v6561_v50  ;;  %5490 = vmatpush.msk.msra.mxu1 %vm10022_vm3, %v6561_v50  ;;  %vm10027_vm7 = vcmp.eq.s32.totalorder %v6670_v12, %v6682_v18  ;;  %vm10032_vm3 = vcmp.eq.s32.totalorder %v6668_v11, %v6744_v30 }
 0x130   : >> { %v642_v52 = vpop.permute.xlu1 %641  ;;  %v646_v44 = vpop.permute.xlu0 %645  ;;  %6168 = vmatpush.msk.msra.mxu3 %vm10024_vm11, %v6561_v50 }
 0x131   : >> { %v652_v58 = vadd.f32 %v642_v52, %v579_v61  ;;  %v654_v59 = vadd.f32 %v646_v44, %v581_v5  ;;  %v7139_v63 = vpop.permute.xlu2 %812  ;;  %6153 = vmatpush.msk.msra.mxu2 %vm10025_vm5, %v6561_v50  ;;  %vm10028_vm5 = vcmp.eq.s32.totalorder %v6674_v14, %v6682_v18  ;;  %5491 = vmatpush.msk.msra.mxu1 %vm10024_vm11, %v6561_v50 }
 0x132   : >> { %6169 = vmatpush.msk.msra.mxu3 %vm406_vm8, %v6561_v50  ;;  %5471 = vmatpush.msk.msra.mxu0 %vm10028_vm5, %v6561_v50  ;;  %vm10031_vm5 = vcmp.eq.s32.totalorder %v10009_v13, %v6682_v18  ;;  %vm10034_vm11 = vcmp.eq.s32.totalorder %v6670_v12, %v6682_v18 }
 0x133   : >> { %v7080_v39 = vadd.f32 %v697_v49, %v654_v59  ;;  %v7082_v51 = vadd.f32 %v695_v7, %v652_v58  ;;  %6154 = vmatpush.msk.msra.mxu2 %vm10027_vm7, %v6561_v50  ;;  %vm10030_vm7 = vcmp.eq.s32.totalorder %v6668_v11, %v6682_v18  ;;  %5492 = vmatpush.msk.msra.mxu1 %vm406_vm8, %v6561_v50 }
 0x134   : >> { %6170 = vmatpush.msk.msra.mxu3 %vm10029_vm6, %v6561_v50  ;;  %5472 = vmatpush.msk.msra.mxu0 %vm10031_vm5, %v6561_v50  ;;  %vm10033_vm6 = vcmp.eq.s32.totalorder %v6661_v10, %v6682_v18  ;;  %vm10037_vm5 = vcmp.eq.s32.totalorder %v6659_v9, %v6682_v18 }
 0x135   : >> { %6155 = vmatpush.msk.msra.mxu2 %vm10030_vm7, %v6561_v50  ;;  %vm10035_vm7 = vcmp.eq.s32.totalorder %v6661_v10, %v6744_v30 }
 0x136   : >> { %6171 = vmatpush.msk.msra.mxu3 %vm10032_vm3, %v6561_v50  ;;  %5473 = vmatpush.msk.msra.mxu0 %vm10034_vm11, %v6561_v50  ;;  %vm10036_vm3 = vcmp.eq.s32.totalorder %v6670_v12, %v6744_v30  ;;  %vm10039_vm11 = vcmp.eq.s32.totalorder %v6668_v11, %v6744_v30 }
 0x137   : >> { %6156 = vmatpush.msk.msra.mxu2 %vm10033_vm6, %v6561_v50  ;;  %5493 = vmatpush.msk.msra.mxu1 %vm10036_vm3, %v6561_v50  ;;  %vm10038_vm6 = vcmp.eq.s32.totalorder %v6668_v11, %v6682_v18  ;;  %vm10041_vm3 = vcmp.eq.s32.totalorder %v6661_v10, %v6682_v18 }
 0x138   : >> { %v908_v40 = vpop.permute.xlu1 %907  ;;  %v991_v45 = vpop.permute.xlu0 %990  ;;  %6172 = vmatpush.msk.msra.mxu3 %vm10035_vm7, %v6561_v50  ;;  %5474 = vmatpush.msk.msra.mxu0 %vm10038_vm6, %v6561_v50  ;;  %vm10040_vm7 = vcmp.eq.s32.totalorder %v6657_v8, %v6682_v18  ;;  %vm10043_vm6 = vcmp.eq.s32.totalorder %v6661_v10, %v6744_v30 }
 0x139   : >> { %v945_v53 = vmul.f32 %v6986_v55, %v908_v40  ;;  %v996_v56 = vmul.f32 %v6960_v57, %v991_v45  ;;  %v1020_v62 = vmul.f32 %v6986_v55, %v991_v45  ;;  %v921_v61 = vmul.f32 %v6960_v57, %v908_v40  ;;  %v7212_v41 = vpop.permute.xlu2 %735  ;;  %6157 = vmatpush.msk.msra.mxu2 %vm10037_vm5, %v6561_v50 }
 0x13a   : >> { %6173 = vmatpush.msk.msra.mxu3 %vm402_vm15, %v6561_v50  ;;  %5494 = vmatpush.msk.msra.mxu1 %vm10039_vm11, %v6561_v50  ;;  %vm10042_vm5 = vcmp.eq.s32.totalorder %v6657_v8, %v6744_v30  ;;  %vm10044_vm11 = vcmp.eq.s32.totalorder %v6659_v9, %v6682_v18 }
 0x13b   : >> { %954 = vrot.lane.b32.xlu0 %v945_v53, %s6559_s20  ;;  %1007 = vrot.lane.b32.xlu1 %v996_v56, %s6560_s21 }
 0x13c   : >> { %1031 = vrot.lane.b32.xlu2 %v1020_v62, %s6560_s21  ;;  %6158 = vmatpush.msk.msra.mxu2 %vm10040_vm7, %v6561_v50 }
 0x13d   : >> { %5475 = vmatpush.msk.msra.mxu0 %vm10041_vm3, %v6561_v50  ;;  %6174 = vmatpush.msk.msra.mxu3 %vm10042_vm5, %v6561_v50  ;;  %vm10045_vm3 = vmmov %vm10042_vm5 }
 0x13e   : >> { %5495 = vmatpush.msk.msra.mxu1 %vm10043_vm6, %v6561_v50  ;;  %6159 = vmatpush.msk.msra.mxu2 %vm6696_vm1, %v6561_v50 }
 0x13f   : >> { %5476 = vmatpush.msk.msra.mxu0 %vm10044_vm11, %v6561_v50  ;;  %6175 = vmatpush.msk.msra.mxu3 %vm6752_vm4, %v6561_v50  ;;  %vm1097_vm11 = vcmask 1031168  }
 0x140   : >> { %v7110_v54 = vpop.permute.xlu1 %763  ;;  %v7112_v5 = vpop.permute.xlu0 %739  ;;  %5496 = vmatpush.msk.msra.mxu1 %vm402_vm15, %v6561_v50  ;;  %6160 = vmatpush.msk.msra.mxu2 %vm6691_vm0, %v6561_v50 }
 0x141   : >> { %v957_v44 = vpop.permute.xlu2 %956  ;;  %5477 = vmatpush.msk.msra.mxu0 %vm10040_vm7, %v6561_v50  ;;  %6176 = vmatpush.msk.msra.mxu3 %vm6747_vm2, %v6561_v50  ;;  %v773_v45 = vadd.f32 %v7110_v54, %v7065_v37  ;;  %v749_v0 = vadd.f32 %v7112_v5, %v7072_v48 }
 0x142   : >> { %5497 = vmatpush.msk.msra.mxu1 %vm10045_vm3, %v6561_v50 }
 0x143   : >> { %1048 = vperm.xlu0 %6235, %v10014_v2   ;;  %1058 = vperm.xlu1 %6236, %v10015_v4  }
 0x144   : >> { %930 = vrot.lane.b32.xlu2 %v921_v61, %s6559_s20  ;;  %5478 = vmatpush.msk.msra.mxu0 %vm6696_vm1, %v6561_v50  ;;  %v822_v61 = vadd.f32 %v7139_v63, %v749_v0  ;;  %s1180_s20 = scalar_lea.vmem [#allocation2], %s5504_s19 }
 0x145   : >> { %5498 = vmatpush.msk.msra.mxu1 %vm6752_vm4, %v6561_v50 }
 0x146   : >> { %5479 = vmatpush.msk.msra.mxu0 %vm6691_vm0, %v6561_v50 }
 0x147   : >> { %5499 = vmatpush.msk.msra.mxu1 %vm6747_vm2, %v6561_v50 }
 0x148   : >> { %v7172_v47 = vpop.permute.xlu1 %868  ;;  %v7174_v43 = vpop.permute.xlu0 %836 }
 0x149   : >> { %v809_v40 = vpop.permute.xlu2 %808  ;;  %v878_v53 = vmul.f32 %v6960_v57, %v7172_v47  ;;  %v889_v56 = vmul.f32 %v6986_v55, %v7172_v47  ;;  %v846_v62 = vadd.f32 %v7174_v43, %v773_v45 }
 0x14b   : >> { %1003 = vrot.lane.b32.xlu1 %v994_v60, %s6560_s21  ;;  %v893_v50 = vadd.f32 %v889_v56, %v846_v62 }
 0x14c   : >> { %1027 = vrot.lane.b32.xlu2 %v1018_v6, %s6560_s21 }
 0x14d   : >> { %v966_v1 = vadd.f32 %v957_v44, %v893_v50 }
 0x150   : >> { %v933_v25 = vpop.permute.xlu1 %932  ;;  %v7238_v52 = vpop.permute.xlu0 %759 }
 0x151   : >> { %v1006_v54 = vpop.permute.xlu2 %1005  ;;  %v771_v62 = vadd.f32 %v7238_v52, %v7074_v46 }
 0x158   : >> { %v766_v7 = vpop.permute.xlu1 %765  ;;  %v742_v49 = vpop.permute.xlu0 %741 }
 0x159   : >> { %v7313_v58 = vadd.f32 %v766_v7, %v7080_v39  ;;  %v750_v59 = vadd.f32 %v742_v49, %v7050_v38  ;;  %v882_v7 = vadd.f32 %v878_v53, %v822_v61  ;;  %v839_v63 = vpop.permute.xlu2 %838 }
 0x15b   : >> { %v942_v37 = vadd.f32 %v933_v25, %v882_v7 }
 0x15d   : >> { %v1015_v48 = vadd.f32 %v1006_v54, %v942_v37 }
 0x160   : >> { %v859_v38 = vpop.permute.xlu1 %858  ;;  %v833_v39 = vpop.permute.xlu0 %832 }
 0x161   : >> { %v929_v25 = vpop.permute.xlu2 %928  ;;  %v887_v61 = vmul.f32 %v6986_v55, %v859_v38 }
 0x168   : >> { %v815_v60 = vpop.permute.xlu1 %814  ;;  %v1030_v6 = vpop.permute.xlu0 %1029 }
 0x169   : >> { %v7366_v49 = vadd.f32 %v815_v60, %v750_v59  ;;  %v1039_v5 = vadd.f32 %v1030_v6, %v966_v1  ;;  %v762_v56 = vpop.permute.xlu2 %761  ;;  %v844_v60 = vadd.f32 %v833_v39, %v771_v62 }
 0x16b   : >> { %v891_v54 = vadd.f32 %v887_v61, %v844_v60  ;;  %v772_v60 = vadd.f32 %v762_v56, %v7082_v51 }
 0x170   : >> { %v1054_v2 = vpop.permute.xlu1 %1053  ;;  %v874_v3 = vpop.permute.xlu0 %873 }
 0x171   : >> { %v1063_v4 = vadd.f32 %v1054_v2, %v1015_v48  ;;  %v1067_v13 = vadd.f32 %v1054_v2, %v1039_v5  ;;  %v747_v2 = vadd.f32 %v7212_v41, %v7036_v22  ;;  %v1002_v37 = vpop.permute.xlu2 %1001 }
 0x173   : >> { %vm1071_vm5 = vcmp.ge.f32.partialorder %v1063_v4, 0.0  ;;  %v1075_v47 = vmul.f32 0.01, %v1063_v4  ;;  %vm1083_vm6 = vcmp.ge.f32.partialorder %v1067_v13, 0.0  ;;  %v1087_v43 = vmul.f32 0.01, %v1067_v13 }
 0x175   : >> { %v1079_v45 = vsel %vm1071_vm5, %v1063_v4, %v1075_v47  ;;  %v1091_v0 = vsel %vm1083_vm6, %v1067_v13, %v1087_v43  ;;  %v876_v4 = vmul.f32 %v6960_v57, %v859_v38  ;;  %v820_v13 = vadd.f32 %v809_v40, %v747_v2 }
 0x176   : >> { %v1095_v53 = vmax.f32 %v1079_v45, %v1091_v0  ;;  %v890_v2 = vmul.f32 %v6986_v55, %v874_v3 }
 0x177   : >> { %v880_v50 = vadd.f32 %v876_v4, %v820_v13  ;;  %v847_v4 = vadd.f32 %v839_v63, %v7313_v58 }
 0x178   : >> { %v953_v59 = vpop.permute.xlu0 %952  ;;  %5482 = vmatmul.msk.f32.vlgmr.msra.gmra.mxu2 %vm1097_vm11, %v1095_v53  ;;  %5502 = vmatmul.msk.f32.vlgmr.msra.gmra.mxu3 %vm1097_vm11, %v1095_v53  ;;  %v738_v7 = vpop.permute.xlu1 %737 }
 0x179   : >> { %v940_v48 = vadd.f32 %v929_v25, %v880_v50  ;;  %v964_v5 = vadd.f32 %v953_v59, %v891_v54  ;;  %v835_v40 = vpop.permute.xlu2 %834  ;;  %v894_v50 = vadd.f32 %v890_v2, %v847_v4 }
 0x17b   : >> { %v1013_v47 = vadd.f32 %v1002_v37, %v940_v48  ;;  %v845_v48 = vadd.f32 %v835_v40, %v772_v60 }
 0x180   : >> { %v935_v1 = vpop.permute.xlu0 %934  ;;  %v959_v0 = vpop.permute.xlu1 %958 }
 0x188   : >> { %v1026_v44 = vpop.permute.xlu0 %1025  ;;  %v811_v25 = vpop.permute.xlu1 %810 }
 0x189   : >> { %v1037_v43 = vadd.f32 %v1026_v44, %v964_v5  ;;  %v879_v44 = vmul.f32 %v6960_v57, %v874_v3  ;;  %v967_v5 = vadd.f32 %v959_v0, %v894_v50  ;;  %v748_v3 = vadd.f32 %v738_v7, %v7063_v42 }
 0x18b   : >> { %v883_v37 = vadd.f32 %v879_v44, %v7366_v49  ;;  %v821_v51 = vadd.f32 %v811_v25, %v748_v3  ;;  %v7397_v3 = vld [vmem:[%s9962_s4] sm:$0x3f] (%p453_p4) }
 0x190   : >> { %v864_v6 = vpop.permute.xlu0 %863 }
 0x191   : >> { %v888_v54 = vmul.f32 %v6986_v55, %v864_v6  ;;  %v877_v58 = vmul.f32 %v6960_v57, %v864_v6 }
 0x193   : >> { %v881_v0 = vadd.f32 %v877_v58, %v821_v51 }
 0x196   : >> { %v1032_v59 = vpop.permute.xlu2 %1031 }
 0x198   : >> { %v1044_v45 = vpop.permute.xlu0 %1043 }
 0x199   : >> { %v1061_v22 = vadd.f32 %v1044_v45, %v1013_v47  ;;  %v1065_v41 = vadd.f32 %v1044_v45, %v1037_v43  ;;  %v943_v47 = vadd.f32 %v935_v1, %v883_v37  ;;  %v1040_v43 = vadd.f32 %v1032_v59, %v967_v5 }
 0x19b   : >> { %vm1069_vm7 = vcmp.ge.f32.partialorder %v1061_v22, 0.0  ;;  %v1073_v46 = vmul.f32 0.01, %v1061_v22  ;;  %vm1081_vm3 = vcmp.ge.f32.partialorder %v1065_v41, 0.0  ;;  %v1085_v52 = vmul.f32 0.01, %v1065_v41 }
 0x19d   : >> { %v1077_v38 = vsel %vm1069_vm7, %v1061_v22, %v1073_v46  ;;  %v1089_v39 = vsel %vm1081_vm3, %v1065_v41, %v1085_v52  ;;  %v892_v22 = vadd.f32 %v888_v54, %v845_v48 }
 0x19e   : >> { %v1093_v53 = vmax.f32 %v1077_v38, %v1089_v39  ;;  %v931_v13 = vpop.permute.xlu2 %930 }
 0x19f   : >> { %v941_v59 = vadd.f32 %v931_v13, %v881_v0 }
 0x1a0   : >> { %5480 = vmatmul.msk.f32.vlgmr.msra.gmra.mxu0 %vm1097_vm11, %v1093_v53  ;;  %5500 = vmatmul.msk.f32.vlgmr.msra.gmra.mxu1 %vm1097_vm11, %v1093_v53 }
 0x1a6   : >> { %v1028_v55 = vpop.permute.xlu2 %1027 }
 0x1ad   : >> { %v1008_v62 = vpop.permute.xlu1 %1007  ;;  %v955_v61 = vpop.permute.xlu0 %954 }
 0x1ae   : >> { %v1016_v45 = vadd.f32 %v1008_v62, %v943_v47  ;;  %v965_v63 = vadd.f32 %v955_v61, %v892_v22 }
 0x1b0   : >> { %v1038_v1 = vadd.f32 %v1028_v55, %v965_v63 }
 0x1b5   : >> { %v1059_v41 = vpop.permute.xlu1 %1058  ;;  %v1049_v40 = vpop.permute.xlu0 %1048 }
 0x1b6   : >> { %v1064_v46 = vadd.f32 %v1059_v41, %v1016_v45  ;;  %v1068_v52 = vadd.f32 %v1059_v41, %v1040_v43  ;;  %v1066_v42 = vadd.f32 %v1049_v40, %v1038_v1 }
 0x1b8   : >> { %vm1072_vm5 = vcmp.ge.f32.partialorder %v1064_v46, 0.0  ;;  %v1076_v56 = vmul.f32 0.01, %v1064_v46  ;;  %vm1084_vm6 = vcmp.ge.f32.partialorder %v1068_v52, 0.0  ;;  %v1088_v49 = vmul.f32 0.01, %v1068_v52 }
 0x1b9   : >> { %v1086_v6 = vmul.f32 0.01, %v1066_v42  ;;  %vm1082_vm7 = vcmp.ge.f32.partialorder %v1066_v42, 0.0 }
 0x1ba   : >> { %v1080_v38 = vsel %vm1072_vm5, %v1064_v46, %v1076_v56  ;;  %v1092_v39 = vsel %vm1084_vm6, %v1068_v52, %v1088_v49  ;;  %vm1181_vm5 = vcmask 515072  }
 0x1bb   : >> { %v1096_v53 = vmax.f32 %v1080_v38, %v1092_v39  ;;  %v1090_v62 = vsel %vm1082_vm7, %v1066_v42, %v1086_v6 }
 0x1bd   : >> { %v1004_v7 = vpop.permute.xlu1 %1003  ;;  %5483 = vmatmul.msk.f32.gmra.mxu2 %vm1097_vm11, %v1096_v53  ;;  %5503 = vmatmul.msk.f32.gmra.mxu3 %vm1097_vm11, %v1096_v53 }
 0x1be   : >> { %v1014_v57 = vadd.f32 %v1004_v7, %v941_v59 }
 0x1c0   : >> { %v1062_v25 = vadd.f32 %v1049_v40, %v1014_v57 }
 0x1c2   : >> { %vm1070_vm3 = vcmp.ge.f32.partialorder %v1062_v25, 0.0  ;;  %v1074_v44 = vmul.f32 0.01, %v1062_v25 }
 0x1c4   : >> { %v1078_v2 = vsel %vm1070_vm3, %v1062_v25, %v1074_v44 }
 0x1c5   : >> { %v1094_v4 = vmax.f32 %v1078_v2, %v1090_v62 }
 0x1c7   : >> { %5481 = vmatmul.msk.f32.gmra.mxu0 %vm1097_vm11, %v1094_v4  ;;  %5501 = vmatmul.msk.f32.gmra.mxu1 %vm1097_vm11, %v1094_v4 }
 0x1fb   : >> { %v1137_v13 = vpop.f32.mrf.mxu2  ;;  %v1169_v61 = vpop.f32.mrf.mxu3 }
 0x1fc   : >> { %v1177_v60 = vmax.f32 %v1137_v13, %v1169_v61 }
 0x1fe   : >> { %1184 = vst.msk [vmem:[%s1180_s20 + $0x10] sm:$0xff] %vm1181_vm5, %v1177_v60 }
 0x21d   : >> { %v1131_v50 = vpop.f32.mrf.mxu0  ;;  %v1163_v37 = vpop.f32.mrf.mxu1 }
 0x21e   : >> { %v1175_v54 = vmax.f32 %v1131_v50, %v1163_v37 }
 0x220   : >> { %1182 = vst.msk [vmem:[%s1180_s20] sm:$0xff] %vm1181_vm5, %v1175_v54 }
 0x240   : >> { %v1140_v48 = vpop.f32.mrf.mxu2  ;;  %v1172_v5 = vpop.f32.mrf.mxu3 }
 0x241   : >> { %v1178_v47 = vmax.f32 %v1140_v48, %v1172_v5 }
 0x243   : >> { %1185 = vst.msk [vmem:[%s1180_s20 + $0x18] sm:$0xff] %vm1181_vm5, %v1178_v47  ;;  %455 = sbr.rel (!%p453_p4) target bundleno = 30 (0x1e), region = 168 }
 0x244   : >> { %v1134_v43 = vpop.f32.mrf.mxu0  ;;  %v1166_v45 = vpop.f32.mrf.mxu1 }
 0x245   : >> { %v1176_v22 = vmax.f32 %v1134_v43, %v1166_v45 }
 0x247   : >> { %1183 = vst.msk [vmem:[%s1180_s20 + $0x8] sm:$0xff] %vm1181_vm5, %v1176_v22 }
 0x248 LB: >> { %s6133_s25 = sshll.u32 %s6547_s24, 6  ;;  %s6562_s23 = smov 127   ;;  %v1207_v60 = vld [vmem:[%s9961_s3] sm:$0x3f]  ;;  %vm1226_vm8 = vcmask 261120   ;;  %vm2194_vm10 = vcmask 1043456   ;;  %vm10046_vm12 = vcmp.eq.s32.totalorder %v6670_v12, %v6682_v18  ;;  %vm10047_vm13 = vcmp.eq.s32.totalorder %v6670_v12, %v6744_v30  ;;  %s6547_s24 = sphi %s7399_s24, %s1192_s24  }
 0x249   : >> { %s7405_s28 = scalar_lea.vmem [#allocation2], %s6133_s25  ;;  %s6563_s27 = smov 125   ;;  %vm10048_vm14 = vcmp.eq.s32.totalorder %v6668_v11, %v6682_v18  ;;  %vm10049_vm11 = vcmp.eq.s32.totalorder %v6668_v11, %v6744_v30  ;;  %vm10050_vm6 = vcmp.eq.s32.totalorder %v6661_v10, %v6682_v18  ;;  %vm10051_vm7 = vcmp.eq.s32.totalorder %v6661_v10, %v6744_v30 }
 0x24a   : >> { %s6564_s29 = smov 126   ;;  %vm10052_vm3 = vcmp.eq.s32.totalorder %v6659_v9, %v6682_v18  ;;  %vm10053_vm5 = vcmp.eq.s32.totalorder %v6657_v8, %v6682_v18 }
 0x24e   : >> { %v1198_v14 = vld [vmem:[%s7405_s28 + $0x10] sm:$0xff]  ;;  %v1199_v15 = vld [vmem:[%s7405_s28 + $0x18] sm:$0xff]  ;;  %v1196_v29 = vld [vmem:[%s7405_s28] sm:$0xff] }
 0x24f   : >> { %v7410_v16 = vld [vmem:[%s7405_s28 + $0x30] sm:$0xff]  ;;  %v6242_v17 = vpack.i.bf16 %v1198_v14, %v1199_v15  ;;  %v7413_v19 = vld [vmem:[%s7405_s28 + $0x38] sm:$0xff]  ;;  %1265 = vmatpush.msra.mxu3 %v1199_v15  ;;  %v1197_v36 = vld [vmem:[%s7405_s28 + $0x8] sm:$0xff] }
 0x250   : >> { %v6252_v20 = vpack.i.bf16 %v7410_v16, %v7413_v19  ;;  %v6262_v21 = vpack.i.bf16 %v7413_v19, %v1199_v15  ;;  %v7424_v41 = vld [vmem:[%s7405_s28 + $0x20] sm:$0xff]  ;;  %v7427_v58 = vld [vmem:[%s7405_s28 + $0x28] sm:$0xff]  ;;  %v6247_v63 = vpack.i.bf16 %v1196_v29, %v1197_v36  ;;  %v6267_v52 = vpack.i.bf16 %v7410_v16, %v1198_v14  ;;  %v7445_v49 = vld [vmem:[%s7405_s28 + $0x50] sm:$0xff] }
 0x251   : >> { %6243 = vrot.lane.b32.xlu0 %v6242_v17, %s6562_s23  ;;  %1266 = vmatpush.msra.mxu3 %v1198_v14  ;;  %v6257_v46 = vpack.i.bf16 %v7424_v41, %v7427_v58  ;;  %v6277_v51 = vpack.i.bf16 %v7427_v58, %v1197_v36  ;;  %v6287_v56 = vpack.i.bf16 %v7424_v41, %v1196_v29  ;;  %v7448_v55 = vld [vmem:[%s7405_s28 + $0x58] sm:$0xff]  ;;  %v7456_v0 = vld [vmem:[%s7405_s28 + $0x40] sm:$0xff]  ;;  %v7459_v1 = vld [vmem:[%s7405_s28 + $0x48] sm:$0xff] }
 0x252   : >> { %6253 = vrot.lane.b32.xlu1 %v6252_v20, %s6562_s23  ;;  %6263 = vrot.lane.b32.xlu2 %v6262_v21, %s6563_s27  ;;  %v6297_v40 = vpack.i.bf16 %v7445_v49, %v7448_v55  ;;  %v6307_v38 = vpack.i.bf16 %v7456_v0, %v7459_v1  ;;  %v7469_v39 = vld [vmem:[%s7405_s28 + $0x70] sm:$0xff]  ;;  %v7472_v53 = vld [vmem:[%s7405_s28 + $0x78] sm:$0xff] }
 0x253   : >> { %1267 = vmatpush.msra.mxu3 %v1197_v36  ;;  %v7476_v59 = vld [vmem:[%s7405_s28 + $0x60] sm:$0xff]  ;;  %v7479_v42 = vld [vmem:[%s7405_s28 + $0x68] sm:$0xff]  ;;  %v6332_v7 = vpack.i.bf16 %v7469_v39, %v7472_v53  ;;  %v7491_v6 = vld [vmem:[%s7405_s28 + $0x90] sm:$0xff] }
 0x254   : >> { %v6337_v57 = vpack.i.bf16 %v7476_v59, %v7479_v42  ;;  %v7494_v25 = vld [vmem:[%s7405_s28 + $0x98] sm:$0xff]  ;;  %v7498_v44 = vld [vmem:[%s7405_s28 + $0x80] sm:$0xff]  ;;  %v7501_v2 = vld [vmem:[%s7405_s28 + $0x88] sm:$0xff]  ;;  %s5596_s28 = sshll.u32 %s6547_s24, 3  ;;  %s1192_s24 = sadd.s32 1, %s6547_s24  }
 0x255   : >> { %1268 = vmatpush.msra.mxu3 %v1196_v29  ;;  %v6362_v62 = vpack.i.bf16 %v7491_v6, %v7494_v25  ;;  %v6367_v4 = vpack.i.bf16 %v7498_v44, %v7501_v2  ;;  %v5513_v17 = vld [vmem:[%s9961_s3 + $0x8] sm:$0x3f]  ;;  %p1189_p5 = scmp.ge.s32.totalorder %s1192_s24, 30  }
 0x256   : >> { %5515 = vmatmul.msk.f32.vlgmr.msra.gmra.mxu3 %vm1226_vm8, %v1207_v60  ;;  %v7759_v9 = vld [vmem:[%s9964_s6 + $0x20] sm:$0xff] (%p1189_p5)  ;;  %v7764_v10 = vld [vmem:[%s9964_s6 + $0x28] sm:$0xff] (%p1189_p5)  ;;  %v7769_v11 = vld [vmem:[%s9964_s6 + $0x30] sm:$0xff] (%p1189_p5)  ;;  %s7816_s20 = smov (%p1189_p5), 0  }
 0x257   : >> { %1321 = vmatpush.msrb.mxu3 %v7413_v19  ;;  %10059 = vst [vmem:[#allocation10_spill] sm:$0xff] (%p1189_p5), %v7759_v9  ;;  %v7774_v12 = vld [vmem:[%s9964_s6 + $0x38] sm:$0xff] (%p1189_p5) }
 0x258   : > { %10060 = vst [vmem:[#allocation21_spill] sm:$0xff] (%p1189_p5), %v7764_v10 }
 0x259   : >> { %6248 = vrot.lane.b32.xlu0 %v6247_v63, %s6562_s23  ;;  %1322 = vmatpush.msrb.mxu3 %v7410_v16  ;;  %10061 = vst [vmem:[#allocation22_spill] sm:$0xff] (%p1189_p5), %v7769_v11 }
 0x25a   : >> { %6258 = vrot.lane.b32.xlu1 %v6257_v46, %s6562_s23  ;;  %6268 = vrot.lane.b32.xlu2 %v6267_v52, %s6563_s27  ;;  %10062 = vst [vmem:[#allocation23_spill] sm:$0xff] (%p1189_p5), %v7774_v12 }
 0x25b   : >> { %1323 = vmatpush.msrb.mxu3 %v7427_v58 }
 0x25d   : >> { %1324 = vmatpush.msrb.mxu3 %v7424_v41 }
 0x25e   : >> { %5517 = vmatmul.msk.f32.vlgmr.msrb.gmra.mxu3 %vm1226_vm8, %v1207_v60 }
 0x261   : >> { %6273 = vrot.lane.b32.xlu0 %v6262_v21, %s6564_s29 }
 0x262   : >> { %6278 = vrot.lane.b32.xlu1 %v6277_v51, %s6563_s27  ;;  %6283 = vrot.lane.b32.xlu2 %v6267_v52, %s6564_s29 }
 0x269   : >> { %6288 = vrot.lane.b32.xlu0 %v6287_v56, %s6563_s27 }
 0x26a   : >> { %6293 = vrot.lane.b32.xlu1 %v6277_v51, %s6564_s29  ;;  %6298 = vrot.lane.b32.xlu2 %v6297_v40, %s6562_s23 }
 0x271   : >> { %6303 = vrot.lane.b32.xlu0 %v6287_v56, %s6564_s29 }
 0x272   : >> { %6308 = vrot.lane.b32.xlu1 %v6307_v38, %s6562_s23  ;;  %6313 = vrot.lane.b32.xlu2 %v6297_v40, %s6563_s27 }
 0x279   : >> { %6318 = vrot.lane.b32.xlu0 %v6297_v40, %s6564_s29 }
 0x27a   : >> { %6323 = vrot.lane.b32.xlu1 %v6307_v38, %s6563_s27  ;;  %6328 = vrot.lane.b32.xlu2 %v6307_v38, %s6564_s29 }
 0x281   : >> { %6333 = vrot.lane.b32.xlu0 %v6332_v7, %s6562_s23 }
 0x282   : >> { %6338 = vrot.lane.b32.xlu1 %v6337_v57, %s6562_s23  ;;  %6343 = vrot.lane.b32.xlu2 %v6332_v7, %s6563_s27 }
 0x289   : >> { %6348 = vrot.lane.b32.xlu0 %v6332_v7, %s6564_s29 }
 0x28a   : >> { %6353 = vrot.lane.b32.xlu1 %v6337_v57, %s6563_s27  ;;  %6358 = vrot.lane.b32.xlu2 %v6337_v57, %s6564_s29 }
 0x291   : >> { %6363 = vrot.lane.b32.xlu0 %v6362_v62, %s6562_s23 }
 0x292   : >> { %6368 = vrot.lane.b32.xlu1 %v6367_v4, %s6562_s23  ;;  %6373 = vrot.lane.b32.xlu2 %v6362_v62, %s6563_s27  ;;  %s2243_s23 = scalar_lea.vmem [#allocation3], %s5596_s28 }
 0x299   : >> { %6378 = vrot.lane.b32.xlu0 %v6362_v62, %s6564_s29 }
 0x29a   : >> { %6383 = vrot.lane.b32.xlu1 %v6367_v4, %s6563_s27  ;;  %6388 = vrot.lane.b32.xlu2 %v6367_v4, %s6564_s29 }
 0x2ac   : >> { %v7513_v13 = vpop.permute.xlu2 %6263 }
 0x2ad   : >> { %v6266_v61 = vunpack.i.h.bf16 %v7513_v13  ;;  %v6265_v7 = vunpack.i.l.bf16 %v7513_v13 }
 0x2af   : >> { %1462 = vmatpush.msra.mxu3 %v6266_v61 }
 0x2b4   : >> { %v7522_v50 = vpop.permute.xlu2 %6268 }
 0x2b5   : >> { %v6271_v37 = vunpack.i.h.bf16 %v7522_v50  ;;  %v6270_v57 = vunpack.i.l.bf16 %v7522_v50 }
 0x2b7   : >> { %1463 = vmatpush.msra.mxu3 %v6271_v37 }
 0x2bc   : >> { %v7531_v21 = vpop.permute.xlu2 %6283 }
 0x2bd   : >> { %v6285_v51 = vunpack.i.l.bf16 %v7531_v21  ;;  %v6286_v38 = vunpack.i.h.bf16 %v7531_v21 }
 0x2c3   : >> { %v6244_v54 = vpop.permute.xlu0 %6243 }
 0x2c4   : >> { %v6254_v48 = vpop.permute.xlu1 %6253  ;;  %v6245_v5 = vunpack.i.l.bf16 %v6244_v54  ;;  %v6246_v47 = vunpack.i.h.bf16 %v6244_v54  ;;  %v7551_v60 = vpop.permute.xlu2 %6298 }
 0x2c5   : >> { %v6255_v15 = vunpack.i.l.bf16 %v6254_v48  ;;  %v6256_v20 = vunpack.i.h.bf16 %v6254_v48 }
 0x2c6   : >> { %1242 = vmatpush.msra.mxu2 %v6245_v5 }
 0x2c8   : >> { %1243 = vmatpush.msra.mxu2 %v6246_v47 }
 0x2cb   : >> { %v6249_v43 = vpop.permute.xlu0 %6248 }
 0x2cc   : >> { %v6259_v45 = vpop.permute.xlu1 %6258  ;;  %v6250_v22 = vunpack.i.l.bf16 %v6249_v43  ;;  %v6251_v14 = vunpack.i.h.bf16 %v6249_v43 }
 0x2cd   : >> { %v6260_v36 = vunpack.i.l.bf16 %v6259_v45  ;;  %v6261_v40 = vunpack.i.h.bf16 %v6259_v45  ;;  %v6300_v45 = vunpack.i.l.bf16 %v7551_v60 }
 0x2ce   : >> { %1244 = vmatpush.msra.mxu2 %v6250_v22  ;;  %v5521_v22 = vld [vmem:[%s9961_s3 + $0x18] sm:$0x3f] }
 0x2d0   : >> { %1245 = vmatpush.msra.mxu2 %v6251_v14  ;;  %v6301_v14 = vunpack.i.h.bf16 %v7551_v60  ;;  %v5536_v60 = vld [vmem:[%s9961_s3 + $0x30] sm:$0x3f] }
 0x2d1   : >> { %5514 = vmatmul.msk.f32.vlgmr.msra.gmra.mxu2 %vm1226_vm8, %v5513_v17 }
 0x2d2   : >> { %1301 = vmatpush.msrb.mxu2 %v6255_v15 }
 0x2d3   : >> { %v7534_v29 = vpop.permute.xlu0 %6273 }
 0x2d4   : >> { %1302 = vmatpush.msrb.mxu2 %v6256_v20  ;;  %v7536_v63 = vpop.permute.xlu1 %6278  ;;  %v6275_v46 = vunpack.i.l.bf16 %v7534_v29  ;;  %v6276_v52 = vunpack.i.h.bf16 %v7534_v29  ;;  %v5539_v29 = vld [vmem:[%s9961_s3 + $0x38] sm:$0x3f] }
 0x2d5   : >> { %v6281_v56 = vunpack.i.h.bf16 %v7536_v63  ;;  %v6280_v62 = vunpack.i.l.bf16 %v7536_v63 }
 0x2d6   : >> { %1303 = vmatpush.msrb.mxu2 %v6260_v36  ;;  %1358 = vmatpush.msra.mxu0 %v6275_v46 }
 0x2d7   : >> { %1391 = vmatpush.msra.mxu1 %v6276_v52  ;;  %1464 = vmatpush.msra.mxu3 %v6281_v56 }
 0x2d8   : >> { %1304 = vmatpush.msrb.mxu2 %v6261_v40  ;;  %1359 = vmatpush.msra.mxu0 %v6285_v51 }
 0x2d9   : >> { %1392 = vmatpush.msra.mxu1 %v6286_v38  ;;  %5516 = vmatmul.msk.f32.vlgmr.msrb.gmra.mxu2 %vm1226_vm8, %v5513_v17 }
 0x2da   : >> { %1429 = vmatpush.msra.mxu2 %v6265_v7 }
 0x2db   : >> { %v6289_v4 = vpop.permute.xlu0 %6288 }
 0x2dc   : >> { %1430 = vmatpush.msra.mxu2 %v6270_v57  ;;  %v6291_v54 = vunpack.i.h.bf16 %v6289_v4  ;;  %v6290_v48 = vunpack.i.l.bf16 %v6289_v4  ;;  %v7553_v5 = vpop.permute.xlu1 %6293 }
 0x2dd   : >> { %v6295_v47 = vunpack.i.l.bf16 %v7553_v5  ;;  %v6296_v43 = vunpack.i.h.bf16 %v7553_v5 }
 0x2de   : >> { %1431 = vmatpush.msra.mxu2 %v6280_v62  ;;  %1465 = vmatpush.msra.mxu3 %v6291_v54 }
 0x2df   : >> { %1360 = vmatpush.msra.mxu0 %v6295_v47  ;;  %1393 = vmatpush.msra.mxu1 %v6296_v43  ;;  %v5551_v47 = vld [vmem:[%s9961_s3 + $0x48] sm:$0x3f] }
 0x2e0   : >> { %1432 = vmatpush.msra.mxu2 %v6290_v48  ;;  %5523 = vmatmul.msk.f32.vlgmr.msra.gmra.mxu3 %vm1226_vm8, %v5521_v22 }
 0x2e1   : >> { %1579 = vmatpush.msrb.mxu3 %v6300_v45  ;;  %5522 = vmatmul.msk.f32.vlgmr.msra.gmra.mxu2 %vm1226_vm8, %v5521_v22 }
 0x2e2   : >> { %1542 = vmatpush.msrb.mxu2 %v6255_v15  ;;  %v5518_v15 = vld [vmem:[%s9961_s3 + $0x10] sm:$0x3f] }
 0x2e3   : >> { %v7566_v17 = vpop.permute.xlu0 %6303  ;;  %1580 = vmatpush.msrb.mxu3 %v6301_v14 }
 0x2e4   : >> { %1543 = vmatpush.msrb.mxu2 %v6256_v20  ;;  %v6309_v63 = vpop.permute.xlu1 %6308  ;;  %v6305_v46 = vunpack.i.l.bf16 %v7566_v17  ;;  %v6306_v51 = vunpack.i.h.bf16 %v7566_v17  ;;  %v6314_v20 = vpop.permute.xlu2 %6313 }
 0x2e5   : >> { %v6310_v7 = vunpack.i.l.bf16 %v6309_v63  ;;  %v6311_v57 = vunpack.i.h.bf16 %v6309_v63  ;;  %v6315_v13 = vunpack.i.l.bf16 %v6314_v20 }
 0x2e6   : >> { %1544 = vmatpush.msrb.mxu2 %v6260_v36  ;;  %1361 = vmatpush.msra.mxu0 %v6305_v46  ;;  %v5533_v36 = vld [vmem:[%s9961_s3 + $0x28] sm:$0x3f] }
 0x2e7   : >> { %1394 = vmatpush.msra.mxu1 %v6306_v51  ;;  %5519 = vmatmul.msk.f32.vlgmr.msra.gmra.mxu0 %vm1226_vm8, %v5518_v15 }
 0x2e8   : >> { %1545 = vmatpush.msrb.mxu2 %v6261_v40  ;;  %5520 = vmatmul.msk.f32.vlgmr.msra.gmra.mxu1 %vm1226_vm8, %v5518_v15 }
 0x2e9   : >> { %1495 = vmatpush.msrb.mxu0 %v7413_v19  ;;  %1516 = vmatpush.msrb.mxu1 %v7448_v55  ;;  %v6316_v19 = vunpack.i.h.bf16 %v6314_v20 }
 0x2ea   : >> { %1664 = vmatpush.msra.mxu2 %v6266_v61  ;;  %1581 = vmatpush.msrb.mxu3 %v6310_v7 }
 0x2eb   : >> { %1496 = vmatpush.msrb.mxu0 %v7410_v16  ;;  %1517 = vmatpush.msrb.mxu1 %v7445_v49  ;;  %v7586_v61 = vpop.permute.xlu0 %6318  ;;  %v5530_v16 = vld [vmem:[%s9961_s3 + $0x20] sm:$0x3f] }
 0x2ec   : >> { %1665 = vmatpush.msra.mxu2 %v6271_v37  ;;  %1582 = vmatpush.msrb.mxu3 %v6311_v57  ;;  %v6320_v40 = vunpack.i.l.bf16 %v7586_v61  ;;  %v6324_v50 = vpop.permute.xlu1 %6323 }
 0x2ed   : >> { %5534 = vmatmul.msk.f32.vlgmr.msrb.gmra.mxu2 %vm1226_vm8, %v5533_v36  ;;  %1497 = vmatpush.msrb.mxu0 %v7427_v58  ;;  %v6325_v37 = vunpack.i.l.bf16 %v6324_v50  ;;  %v7600_v58 = vpop.permute.xlu2 %6328 }
 0x2ee   : >> { %1666 = vmatpush.msra.mxu2 %v6281_v56  ;;  %1518 = vmatpush.msrb.mxu1 %v7459_v1  ;;  %v6321_v56 = vunpack.i.h.bf16 %v7586_v61  ;;  %v6330_v62 = vunpack.i.l.bf16 %v7600_v58  ;;  %v6331_v4 = vunpack.i.h.bf16 %v7600_v58 }
 0x2ef   : >> { %5535 = vmatmul.msk.f32.vlgmr.msrb.gmra.mxu3 %vm1226_vm8, %v5533_v36  ;;  %1498 = vmatpush.msrb.mxu0 %v7424_v41  ;;  %v6326_v41 = vunpack.i.h.bf16 %v6324_v50 }
 0x2f0   : >> { %1667 = vmatpush.msra.mxu2 %v6291_v54  ;;  %1697 = vmatpush.msra.mxu3 %v6315_v13 }
 0x2f1   : >> { %1519 = vmatpush.msrb.mxu1 %v7456_v0  ;;  %1605 = vmatpush.msra.mxu0 %v6276_v52 }
 0x2f2   : >> { %1777 = vmatpush.msrb.mxu2 %v6300_v45  ;;  %1698 = vmatpush.msra.mxu3 %v6316_v19 }
 0x2f3   : >> { %1638 = vmatpush.msra.mxu1 %v6320_v40  ;;  %5531 = vmatmul.msk.f32.vlgmr.msrb.gmra.mxu0 %vm1226_vm8, %v5530_v16  ;;  %v6334_v52 = vpop.permute.xlu0 %6333 }
 0x2f4   : >> { %5532 = vmatmul.msk.f32.vlgmr.msrb.gmra.mxu1 %vm1226_vm8, %v5530_v16  ;;  %1778 = vmatpush.msrb.mxu2 %v6301_v14  ;;  %v6335_v21 = vunpack.i.l.bf16 %v6334_v52  ;;  %v6336_v48 = vunpack.i.h.bf16 %v6334_v52  ;;  %v5548_v14 = vld [vmem:[%s9961_s3 + $0x40] sm:$0x3f]  ;;  %v6565_v52 = vmov 0  }
 0x2f5   : >> { %1606 = vmatpush.msra.mxu0 %v6286_v38  ;;  %1639 = vmatpush.msra.mxu1 %v6321_v56  ;;  %v6339_v38 = vpop.permute.xlu1 %6338  ;;  %v6344_v54 = vpop.permute.xlu2 %6343 }
 0x2f6   : >> { %1699 = vmatpush.msra.mxu3 %v6325_v37  ;;  %1779 = vmatpush.msrb.mxu2 %v6310_v7  ;;  %v6340_v5 = vunpack.i.l.bf16 %v6339_v38 }
 0x2f7   : >> { %1607 = vmatpush.msra.mxu0 %v6296_v43  ;;  %5540 = vmatmul.msk.f32.vlgmr.msra.gmra.mxu2 %vm1226_vm8, %v5539_v29  ;;  %v6341_v43 = vunpack.i.h.bf16 %v6339_v38 }
 0x2f8   : >> { %1700 = vmatpush.msra.mxu3 %v6326_v41  ;;  %1780 = vmatpush.msrb.mxu2 %v6311_v57 }
 0x2f9   : >> { %5541 = vmatmul.msk.f32.vlgmr.msra.gmra.mxu3 %vm1226_vm8, %v5539_v29  ;;  %1608 = vmatpush.msra.mxu0 %v6306_v51  ;;  %v5557_v51 = vld [vmem:[%s9961_s3 + $0x58] sm:$0x3f] }
 0x2fa   : >> { %1640 = vmatpush.msra.mxu1 %v6330_v62  ;;  %1899 = vmatpush.msra.mxu2 %v6315_v13  ;;  %v5554_v13 = vld [vmem:[%s9961_s3 + $0x50] sm:$0x3f] }
 0x2fb   : >> { %1730 = vmatpush.msrb.mxu0 %v7448_v55  ;;  %1814 = vmatpush.msrb.mxu3 %v6335_v21  ;;  %v7630_v55 = vpop.permute.xlu0 %6348 }
 0x2fc   : >> { %1641 = vmatpush.msra.mxu1 %v6331_v4  ;;  %1900 = vmatpush.msra.mxu2 %v6316_v19  ;;  %v6350_v22 = vunpack.i.l.bf16 %v7630_v55  ;;  %v6351_v63 = vunpack.i.h.bf16 %v7630_v55 }
 0x2fd   : >> { %5537 = vmatmul.msk.f32.vlgmr.msra.gmra.mxu0 %vm1226_vm8, %v5536_v60  ;;  %5538 = vmatmul.msk.f32.vlgmr.msra.gmra.mxu1 %vm1226_vm8, %v5536_v60  ;;  %v6354_v45 = vpop.permute.xlu1 %6353 }
 0x2fe   : >> { %1731 = vmatpush.msrb.mxu0 %v7445_v49  ;;  %1751 = vmatpush.msrb.mxu1 %v7472_v53  ;;  %v6345_v49 = vunpack.i.l.bf16 %v6344_v54  ;;  %v6355_v17 = vunpack.i.l.bf16 %v6354_v45  ;;  %v6356_v46 = vunpack.i.h.bf16 %v6354_v45 }
 0x2ff   : >> { %1815 = vmatpush.msrb.mxu3 %v6336_v48  ;;  %1901 = vmatpush.msra.mxu2 %v6325_v37 }
 0x300   : >> { %1732 = vmatpush.msrb.mxu0 %v7459_v1  ;;  %1752 = vmatpush.msrb.mxu1 %v7469_v39  ;;  %v6346_v1 = vunpack.i.h.bf16 %v6344_v54 }
 0x301   : >> { %5552 = vmatmul.msk.f32.vlgmr.msrb.gmra.mxu2 %vm1226_vm8, %v5551_v47  ;;  %1816 = vmatpush.msrb.mxu3 %v6340_v5 }
 0x302   : >> { %1902 = vmatpush.msra.mxu2 %v6326_v41  ;;  %1733 = vmatpush.msrb.mxu0 %v7456_v0  ;;  %v7644_v0 = vpop.permute.xlu2 %6358 }
 0x303   : >> { %1753 = vmatpush.msrb.mxu1 %v7479_v42  ;;  %1817 = vmatpush.msrb.mxu3 %v6341_v43  ;;  %v6364_v15 = vpop.permute.xlu0 %6363  ;;  %v6360_v7 = vunpack.i.l.bf16 %v7644_v0  ;;  %v6361_v20 = vunpack.i.h.bf16 %v7644_v0 }
 0x304   : >> { %2012 = vmatpush.msrb.mxu2 %v6335_v21  ;;  %1840 = vmatpush.msra.mxu0 %v6320_v40  ;;  %v6365_v57 = vunpack.i.l.bf16 %v6364_v15  ;;  %v6366_v19 = vunpack.i.h.bf16 %v6364_v15  ;;  %v1270_v21 = vpop.f32.mrf.mxu3 }
 0x305   : >> { %1754 = vmatpush.msrb.mxu1 %v7476_v59  ;;  %5553 = vmatmul.msk.f32.vlgmr.msrb.gmra.mxu3 %vm1226_vm8, %v5551_v47  ;;  %v6369_v36 = vpop.permute.xlu1 %6368 }
 0x306   : >> { %2013 = vmatpush.msrb.mxu2 %v6336_v48  ;;  %1932 = vmatpush.msra.mxu3 %v6345_v49  ;;  %v6370_v40 = vunpack.i.l.bf16 %v6369_v36 }
 0x307   : >> { %1841 = vmatpush.msra.mxu0 %v6321_v56  ;;  %1873 = vmatpush.msra.mxu1 %v6350_v22 }
 0x308   : >> { %5549 = vmatmul.msk.f32.vlgmr.msrb.gmra.mxu0 %vm1226_vm8, %v5548_v14  ;;  %5550 = vmatmul.msk.f32.vlgmr.msrb.gmra.mxu1 %vm1226_vm8, %v5548_v14 }
 0x309   : >> { %1933 = vmatpush.msra.mxu3 %v6346_v1  ;;  %2014 = vmatpush.msrb.mxu2 %v6340_v5 }
 0x30a   : >> { %1842 = vmatpush.msra.mxu0 %v6330_v62  ;;  %1874 = vmatpush.msra.mxu1 %v6351_v63  ;;  %v6374_v61 = vpop.permute.xlu2 %6373  ;;  %v5572_v62 = vld [vmem:[%s9961_s3 + $0x70] sm:$0x3f] }
 0x30b   : >> { %1934 = vmatpush.msra.mxu3 %v6355_v17  ;;  %2015 = vmatpush.msrb.mxu2 %v6341_v43  ;;  %v6375_v50 = vunpack.i.l.bf16 %v6374_v61  ;;  %v6379_v16 = vpop.permute.xlu0 %6378  ;;  %v6376_v37 = vunpack.i.h.bf16 %v6374_v61 }
 0x30c   : >> { %1843 = vmatpush.msra.mxu0 %v6331_v4  ;;  %5558 = vmatmul.msk.f32.vlgmr.msra.gmra.mxu2 %vm1226_vm8, %v5557_v51  ;;  %v6381_v56 = vunpack.i.h.bf16 %v6379_v16  ;;  %v1326_v60 = vpop.f32.mrf.mxu3 }
 0x30d   : >> { %1935 = vmatpush.msra.mxu3 %v6356_v46  ;;  %2134 = vmatpush.msra.mxu2 %v6345_v49 }
 0x30e   : >> { %1965 = vmatpush.msrb.mxu0 %v7472_v53  ;;  %1875 = vmatpush.msra.mxu1 %v6360_v7  ;;  %v5569_v53 = vld [vmem:[%s9961_s3 + $0x68] sm:$0x3f] }
 0x30f   : >> { %5559 = vmatmul.msk.f32.vlgmr.msra.gmra.mxu3 %vm1226_vm8, %v5557_v51  ;;  %2135 = vmatpush.msra.mxu2 %v6346_v1  ;;  %v6566_v51 = vmov 1.0  }
 0x310   : >> { %1966 = vmatpush.msrb.mxu0 %v7469_v39  ;;  %1876 = vmatpush.msra.mxu1 %v6361_v20  ;;  %v6371_v39 = vunpack.i.h.bf16 %v6369_v36 }
 0x311   : >> { %2049 = vmatpush.msrb.mxu3 %v6365_v57  ;;  %2136 = vmatpush.msra.mxu2 %v6355_v17 }
 0x312   : >> { %5555 = vmatmul.msk.f32.vlgmr.msra.gmra.mxu0 %vm1226_vm8, %v5554_v13  ;;  %5556 = vmatmul.msk.f32.vlgmr.msra.gmra.mxu1 %vm1226_vm8, %v5554_v13  ;;  %v6389_v58 = vpop.permute.xlu2 %6388 }
 0x313   : >> { %1967 = vmatpush.msrb.mxu0 %v7479_v42  ;;  %1986 = vmatpush.msrb.mxu1 %v7494_v25  ;;  %v6384_v42 = vpop.permute.xlu1 %6383  ;;  %v5566_v25 = vld [vmem:[%s9961_s3 + $0x60] sm:$0x3f]  ;;  %v6390_v29 = vunpack.i.l.bf16 %v6389_v58 }
 0x314   : >> { %2050 = vmatpush.msrb.mxu3 %v6366_v19  ;;  %2137 = vmatpush.msra.mxu2 %v6356_v46  ;;  %v6386_v41 = vunpack.i.h.bf16 %v6384_v42 }
 0x315   : >> { %1968 = vmatpush.msrb.mxu0 %v7476_v59  ;;  %1987 = vmatpush.msrb.mxu1 %v7491_v6  ;;  %v6380_v59 = vunpack.i.l.bf16 %v6379_v16  ;;  %v6385_v6 = vunpack.i.l.bf16 %v6384_v42 }
 0x316   : >> { %2051 = vmatpush.msrb.mxu3 %v6370_v40  ;;  %5570 = vmatmul.msk.f32.vlgmr.msrb.gmra.mxu2 %vm1226_vm8, %v5569_v53 }
 0x317   : >> { %2075 = vmatpush.msra.mxu0 %v6350_v22  ;;  %1988 = vmatpush.msrb.mxu1 %v7501_v2  ;;  %v5575_v2 = vld [vmem:[%s9961_s3 + $0x78] sm:$0x3f] }
 0x318   : >> { %2052 = vmatpush.msrb.mxu3 %v6371_v39  ;;  %6392 = vset.pattern.permute.xlu0 %v6565_v52 }
 0x319   : >> { %2076 = vmatpush.msra.mxu0 %v6351_v63  ;;  %5571 = vmatmul.msk.f32.vlgmr.msrb.gmra.mxu3 %vm1226_vm8, %v5569_v53 }
 0x31a   : >> { %2167 = vmatpush.msra.mxu3 %v6375_v50  ;;  %1989 = vmatpush.msrb.mxu1 %v7498_v44  ;;  %v6391_v44 = vunpack.i.h.bf16 %v6389_v58 }
 0x31b   : >> { %2077 = vmatpush.msra.mxu0 %v6360_v7  ;;  %5568 = vmatmul.msk.f32.vlgmr.msrb.gmra.mxu1 %vm1226_vm8, %v5566_v25 }
 0x31c   : >> { %5567 = vmatmul.msk.f32.vlgmr.msrb.gmra.mxu0 %vm1226_vm8, %v5566_v25  ;;  %2168 = vmatpush.msra.mxu3 %v6376_v37 }
 0x31d   : >> { %2078 = vmatpush.msra.mxu0 %v6361_v20  ;;  %2108 = vmatpush.msra.mxu1 %v6380_v59 }
 0x31e   : >> { %2169 = vmatpush.msra.mxu3 %v6385_v6  ;;  %5576 = vmatmul.msk.f32.vlgmr.msra.gmra.mxu2 %vm1226_vm8, %v5575_v2 }
 0x31f   : >> { %2109 = vmatpush.msra.mxu1 %v6381_v56  ;;  %2178 = vperm.xlu0 %6392, %v7397_v3   ;;  %v7789_v3 = vld [vmem:[%s9964_s6 + $0x50] sm:$0xff] (%p1189_p5) }
 0x320   : >> { %2170 = vmatpush.msra.mxu3 %v6386_v41  ;;  %5578 = vmatpush.msk.msrb.mxu0 %vm2194_vm10, %v6739_v28  ;;  %v7779_v28 = vld [vmem:[%s9964_s6 + $0x40] sm:$0xff] (%p1189_p5)  ;;  %10065 = vst [vmem:[#allocation26_spill] sm:$0xff] (%p1189_p5), %v7789_v3 }
 0x321   : >> { %2110 = vmatpush.msra.mxu1 %v6390_v29  ;;  %5577 = vmatmul.msk.f32.vlgmr.msra.gmra.mxu3 %vm1226_vm8, %v5575_v2  ;;  %10063 = vst [vmem:[#allocation24_spill] sm:$0xff] (%p1189_p5), %v7779_v28 }
 0x322   : >> { %5579 = vmatpush.msk.msrb.mxu0 %vm10046_vm12, %v6566_v51 }
 0x323   : >> { %2111 = vmatpush.msra.mxu1 %v6391_v44 }
 0x324   : >> { %5573 = vmatmul.msk.f32.vlgmr.msra.gmra.mxu0 %vm1226_vm8, %v5572_v62  ;;  %5574 = vmatmul.msk.f32.vlgmr.msra.gmra.mxu1 %vm1226_vm8, %v5572_v62  ;;  %vm10054_vm8 = vcmp.eq.s32.totalorder %v6657_v8, %v6744_v30 }
 0x325   : >> { %5587 = vmatpush.msk.msrb.mxu1 %vm2194_vm10, %v6795_v35  ;;  %5580 = vmatpush.msk.msrb.mxu0 %vm10048_vm14, %v6566_v51  ;;  %vm2190_vm14 = vcmask 490496   ;;  %v7784_v35 = vld [vmem:[%s9964_s6 + $0x48] sm:$0xff] (%p1189_p5) }
 0x326   : > { %10064 = vst [vmem:[#allocation25_spill] sm:$0xff] (%p1189_p5), %v7784_v35 }
 0x327   : >> { %5588 = vmatpush.msk.msrb.mxu1 %vm10047_vm13, %v6566_v51  ;;  %5581 = vmatpush.msk.msrb.mxu0 %vm10050_vm6, %v6566_v51 }
 0x329   : >> { %5589 = vmatpush.msk.msrb.mxu1 %vm10049_vm11, %v6566_v51  ;;  %5582 = vmatpush.msk.msrb.mxu0 %vm10052_vm3, %v6566_v51  ;;  %vm2244_vm11 = vcmask 242688  }
 0x32b   : >> { %5590 = vmatpush.msk.msrb.mxu1 %vm10051_vm7, %v6566_v51  ;;  %5583 = vmatpush.msk.msrb.mxu0 %vm10053_vm5, %v6566_v51 }
 0x32d   : >> { %5591 = vmatpush.msk.msrb.mxu1 %vm402_vm15, %v6566_v51  ;;  %5584 = vmatpush.msk.msrb.mxu0 %vm6696_vm1, %v6566_v51 }
 0x32f   : >> { %5592 = vmatpush.msk.msrb.mxu1 %vm10054_vm8, %v6566_v51  ;;  %5585 = vmatpush.msk.msrb.mxu0 %vm6691_vm0, %v6566_v51 }
 0x331   : >> { %5593 = vmatpush.msk.msrb.mxu1 %vm6752_vm4, %v6566_v51 }
 0x333   : >> { %5594 = vmatpush.msk.msrb.mxu1 %vm6747_vm2, %v6566_v51 }
 0x354   : >> { %v1247_v4 = vpop.f32.mrf.mxu2 }
 0x355   : >> { %v1271_v1 = vadd.f32 %v1270_v21, %v1247_v4 }
 0x35c   : >> { %v1306_v38 = vpop.f32.mrf.mxu2 }
 0x35d   : >> { %v1327_v15 = vadd.f32 %v1326_v60, %v1306_v38 }
 0x363   : >> { %v1467_v47 = vpop.f32.mrf.mxu3 }
 0x364   : >> { %v1363_v54 = vpop.f32.mrf.mxu0  ;;  %v1434_v5 = vpop.f32.mrf.mxu2 }
 0x365   : >> { %v1396_v48 = vpop.f32.mrf.mxu1  ;;  %v1366_v17 = vadd.f32 %v1363_v54, %v1271_v1 }
 0x366   : >> { %v1399_v20 = vadd.f32 %v1396_v48, %v1327_v15 }
 0x367   : >> { %v1437_v46 = vadd.f32 %v1434_v5, %v1366_v17 }
 0x368   : >> { %v1470_v19 = vadd.f32 %v1467_v47, %v1399_v20 }
 0x370   : >> { %v1500_v55 = vpop.f32.mrf.mxu0  ;;  %v1547_v49 = vpop.f32.mrf.mxu2 }
 0x371   : >> { %v1521_v43 = vpop.f32.mrf.mxu1  ;;  %v1503_v7 = vadd.f32 %v1500_v55, %v1437_v46 }
 0x372   : >> { %v1584_v45 = vpop.f32.mrf.mxu3  ;;  %v1524_v39 = vadd.f32 %v1521_v43, %v1470_v19 }
 0x373   : >> { %v1550_v61 = vadd.f32 %v1547_v49, %v1503_v7 }
 0x374   : >> { %v1587_v16 = vadd.f32 %v1584_v45, %v1524_v39  ;;  %v7749_v39 = vld [vmem:[%s9964_s6 + $0x10] sm:$0xff] (%p1189_p5) }
 0x375   : > { %10057 = vst [vmem:[#allocation7_spill] sm:$0xff] (%p1189_p5), %v7749_v39 }
 0x37a   : >> { %v1610_v22 = vpop.f32.mrf.mxu0  ;;  %v1643_v14 = vpop.f32.mrf.mxu1 }
 0x37b   : >> { %v1669_v0 = vpop.f32.mrf.mxu2  ;;  %v1613_v53 = vadd.f32 %v1610_v22, %v1550_v61  ;;  %v1646_v6 = vadd.f32 %v1643_v14, %v1587_v16  ;;  %v7794_v16 = vld [vmem:[%s9964_s6 + $0x58] sm:$0xff] (%p1189_p5) }
 0x37c   : >> { %v1702_v63 = vpop.f32.mrf.mxu3  ;;  %10066 = vst [vmem:[#allocation27_spill] sm:$0xff] (%p1189_p5), %v7794_v16 }
 0x37d   : >> { %v1672_v50 = vadd.f32 %v1669_v0, %v1613_v53  ;;  %v1705_v41 = vadd.f32 %v1702_v63, %v1646_v6  ;;  %v7744_v53 = vld [vmem:[%s9964_s6 + $0x8] sm:$0xff] (%p1189_p5) }
 0x37e   : > { %10056 = vst [vmem:[#allocation6_spill] sm:$0xff] (%p1189_p5), %v7744_v53 }
 0x384   : >> { %v1782_v13 = vpop.f32.mrf.mxu2 }
 0x385   : >> { %v1735_v57 = vpop.f32.mrf.mxu0  ;;  %v1756_v36 = vpop.f32.mrf.mxu1 }
 0x386   : >> { %v1738_v37 = vadd.f32 %v1735_v57, %v1672_v50  ;;  %v1759_v29 = vadd.f32 %v1756_v36, %v1705_v41  ;;  %v7754_v50 = vld [vmem:[%s9964_s6 + $0x18] sm:$0xff] (%p1189_p5) }
 0x387   : > { %10058 = vst [vmem:[#allocation8_spill] sm:$0xff] (%p1189_p5), %v7754_v50 }
 0x388   : >> { %v1819_v40 = vpop.f32.mrf.mxu3  ;;  %v1785_v56 = vadd.f32 %v1782_v13, %v1738_v37  ;;  %v7804_v37 = vld [vmem:[%s9964_s6 + $0x68] sm:$0xff] (%p1189_p5) }
 0x389   : >> { %v1822_v44 = vadd.f32 %v1819_v40, %v1759_v29  ;;  %v7739_v40 = vld [vmem:[%s9964_s6] sm:$0xff] (%p1189_p5)  ;;  %10068 = vst [vmem:[#allocation29_spill] sm:$0xff] (%p1189_p5), %v7804_v37 }
 0x38a   : > { %10055 = vst [vmem:[#allocation5_spill] sm:$0xff] (%p1189_p5), %v7739_v40 }
 0x38f   : >> { %v1845_v42 = vpop.f32.mrf.mxu0  ;;  %v1878_v25 = vpop.f32.mrf.mxu1 }
 0x390   : >> { %v1904_v59 = vpop.f32.mrf.mxu2  ;;  %v1848_v2 = vadd.f32 %v1845_v42, %v1785_v56  ;;  %v1881_v38 = vadd.f32 %v1878_v25, %v1822_v44  ;;  %v7799_v42 = vld [vmem:[%s9964_s6 + $0x60] sm:$0xff] (%p1189_p5)  ;;  %v7809_v25 = vld [vmem:[%s9964_s6 + $0x70] sm:$0xff] (%p1189_p5) }
 0x391   : >> { %v2179_v14 = vpop.permute.xlu0 %2178  ;;  %10067 = vst [vmem:[#allocation28_spill] sm:$0xff] (%p1189_p5), %v7799_v42 }
 0x392   : >> { %v1937_v58 = vpop.f32.mrf.mxu3  ;;  %v1907_v4 = vadd.f32 %v1904_v59, %v1848_v2  ;;  %10069 = vst [vmem:[#allocation30_spill] sm:$0xff] (%p1189_p5), %v7809_v25  ;;  %v7814_v59 = vld [vmem:[%s9964_s6 + $0x78] sm:$0xff] (%p1189_p5) }
 0x393   : >> { %v1940_v48 = vadd.f32 %v1937_v58, %v1881_v38  ;;  %10070 = vst [vmem:[#allocation31_spill] sm:$0xff] (%p1189_p5), %v7814_v59 }
 0x398   : >> { %v1991_v52 = vpop.f32.mrf.mxu1 }
 0x399   : >> { %v1970_v62 = vpop.f32.mrf.mxu0  ;;  %v2017_v21 = vpop.f32.mrf.mxu2  ;;  %v1994_v5 = vadd.f32 %v1991_v52, %v1940_v48 }
 0x39a   : >> { %v1973_v60 = vadd.f32 %v1970_v62, %v1907_v4 }
 0x39c   : >> { %v2054_v54 = vpop.f32.mrf.mxu3  ;;  %v2020_v47 = vadd.f32 %v2017_v21, %v1973_v60 }
 0x39d   : >> { %v2057_v55 = vadd.f32 %v2054_v54, %v1994_v5 }
 0x3a1   : >> { %v2080_v43 = vpop.f32.mrf.mxu0  ;;  %v2113_v49 = vpop.f32.mrf.mxu1 }
 0x3a2   : >> { %v2083_v45 = vadd.f32 %v2080_v43, %v2020_v47  ;;  %v2139_v22 = vpop.f32.mrf.mxu2  ;;  %v2116_v1 = vadd.f32 %v2113_v49, %v2057_v55 }
 0x3a4   : >> { %v2142_v0 = vadd.f32 %v2139_v22, %v2083_v45  ;;  %v2172_v17 = vpop.f32.mrf.mxu3 }
 0x3a5   : >> { %v2175_v63 = vadd.f32 %v2172_v17, %v2116_v1 }
 0x3a6   : >> { %v2181_v46 = vadd.f32 %v2179_v14, %v2142_v0 }
 0x3a7   : >> { %v2182_v51 = vadd.f32 %v2179_v14, %v2175_v63 }
 0x3a8   : >> { %vm2183_vm12 = vcmp.ge.f32.partialorder %v2181_v46, 0.0  ;;  %v2184_v15 = vmul.f32 0.01, %v2181_v46 }
 0x3a9   : >> { %vm2186_vm13 = vcmp.ge.f32.partialorder %v2182_v51, 0.0  ;;  %v2187_v7 = vmul.f32 0.01, %v2182_v51 }
 0x3aa   : >> { %v2185_v20 = vsel %vm2183_vm12, %v2181_v46, %v2184_v15 }
 0x3ab   : >> { %v2188_v57 = vsel %vm2186_vm13, %v2182_v51, %v2187_v7 }
 0x3ac   : >> { %v2189_v36 = vmax.f32 %v2185_v20, %v2188_v57 }
 0x3ae   : >> { %5586 = vmatmul.msk.f32.vlgmr.msrb.gmra.mxu0 %vm2190_vm14, %v2189_v36  ;;  %5595 = vmatmul.msk.f32.vlgmr.msrb.gmra.mxu1 %vm2190_vm14, %v2189_v36 }
 0x42a   : > { %1191 = sbr.rel (!%p1189_p5) target bundleno = 584 (0x248), region = 179 }
 0x42b   : >> { %v2215_v13 = vpop.f32.mrf.mxu0  ;;  %v2238_v61 = vpop.f32.mrf.mxu1 }
 0x42c   : >> { %v2241_v19 = vmax.f32 %v2215_v13, %v2238_v61 }
 0x42e   : >> { %2245 = vst.msk [vmem:[%s2243_s23] sm:$0x3f] %vm2244_vm11, %v2241_v19 }
 0x42f LB: >> { %s6138_s21 = sshll.u32 %s6551_s20, 4  ;;  %v2276_v56 = vld [vmem:[%s9963_s5] sm:$0xff]  ;;  %vm2312_vm15 = vcmask 48128   ;;  %s6567_s23 = smov 126   ;;  %v2277_v41 = vld [vmem:[%s9963_s5 + $0x8] sm:$0xff]  ;;  %v2278_v2 = vld [vmem:[%s9963_s5 + $0x10] sm:$0xff]  ;;  %s6551_s20 = sphi %s7816_s20, %s2267_s20  }
 0x430   : >> { %s7822_s22 = scalar_lea.vmem [#allocation3], %s6138_s21  ;;  %s6568_s27 = smov 127   ;;  %v2279_v29 = vld [vmem:[%s9963_s5 + $0x18] sm:$0xff]  ;;  %v2280_v52 = vld [vmem:[%s9963_s5 + $0x20] sm:$0xff]  ;;  %v2281_v44 = vld [vmem:[%s9963_s5 + $0x28] sm:$0xff]  ;;  %vm4532_vm8 = vcmask 228352  }
 0x431   : >> { %v2282_v62 = vld [vmem:[%s9963_s5 + $0x30] sm:$0xff]  ;;  %v2283_v4 = vld [vmem:[%s9963_s5 + $0x38] sm:$0xff]  ;;  %v2284_v21 = vld [vmem:[%s9963_s5 + $0x40] sm:$0xff] }
 0x432   : >> { %v2285_v38 = vld [vmem:[%s9963_s5 + $0x48] sm:$0xff]  ;;  %v2286_v60 = vld [vmem:[%s9963_s5 + $0x50] sm:$0xff]  ;;  %v2287_v54 = vld [vmem:[%s9963_s5 + $0x58] sm:$0xff] }
 0x433   : >> { %v2288_v48 = vld [vmem:[%s9963_s5 + $0x60] sm:$0xff]  ;;  %v2289_v47 = vld [vmem:[%s9963_s5 + $0x68] sm:$0xff]  ;;  %v2290_v55 = vld [vmem:[%s9963_s5 + $0x70] sm:$0xff] }
 0x434   : >> { %v5602_v49 = vld [vmem:[%s9963_s5 + $0x80] sm:$0xff]  ;;  %v2291_v22 = vld [vmem:[%s9963_s5 + $0x78] sm:$0xff]  ;;  %v5603_v14 = vld [vmem:[%s9963_s5 + $0x88] sm:$0xff] }
 0x435   : >> { %v7825_v6 = vld [vmem:[%s7822_s22 + $0x8] sm:$0x3f]  ;;  %v2271_v58 = vld [vmem:[%s7822_s22] sm:$0x3f]  ;;  %v7901_v5 = vld [vmem:[%s7822_s22 + $0x10] sm:$0x3f] }
 0x436   : >> { %5669 = vmatpush.msk.msra.mxu3 %vm1110_vm9, %v7825_v6  ;;  %2698 = vrot.lane.b32.xlu1 %v2271_v58, %s6567_s23  ;;  %v7948_v63 = vld [vmem:[%s9963_s5 + $0x100] sm:$0xff]  ;;  %v5604_v51 = vld [vmem:[%s9963_s5 + $0x90] sm:$0xff]  ;;  %v7971_v20 = vld [vmem:[%s9963_s5 + $0x108] sm:$0xff] }
 0x437   : >> { %2310 = vrot.lane.b32.xlu0 %v2271_v58, %s6568_s27  ;;  %5635 = vmatpush.msk.msra.mxu1 %vm1110_vm9, %v2271_v58  ;;  %v7953_v46 = vld [vmem:[%s9963_s5 + $0x180] sm:$0xff]  ;;  %v7976_v57 = vld [vmem:[%s9963_s5 + $0x188] sm:$0xff]  ;;  %v5605_v36 = vld [vmem:[%s9963_s5 + $0x98] sm:$0xff] }
 0x438   : >> { %5636 = vmatmul.msk.f32.vlgmr.msra.gmra.mxu1 %vm2312_vm15, %v2276_v56  ;;  %5670 = vmatmul.msk.f32.vlgmr.msra.gmra.mxu3 %vm2312_vm15, %v2276_v56  ;;  %v7994_v19 = vld [vmem:[%s9963_s5 + $0x110] sm:$0xff]  ;;  %v5606_v58 = vld [vmem:[%s9963_s5 + $0xa0] sm:$0xff]  ;;  %v8155_v31 = vld [vmem:[%s9963_s5 + $0x148] sm:$0xff] }
 0x439   : >> { %5772 = vmatpush.msk.msrb.mxu3 %vm1110_vm9, %v7901_v5  ;;  %3296 = vrot.lane.b32.xlu2 %v7901_v5, %s6568_s27  ;;  %v8137_v33 = vld [vmem:[%s9963_s5 + $0x1c0] sm:$0xff]  ;;  %v8160_v23 = vld [vmem:[%s9963_s5 + $0x1c8] sm:$0xff]  ;;  %v8178_v24 = vld [vmem:[%s9963_s5 + $0x150] sm:$0xff] }
 0x43a   : >> { %v8183_v30 = vld [vmem:[%s9963_s5 + $0x1d0] sm:$0xff]  ;;  %v8201_v8 = vld [vmem:[%s9963_s5 + $0x158] sm:$0xff]  ;;  %v8230_v16 = vld [vmem:[%s9963_s5 + $0x1e0] sm:$0xff] }
 0x43b   : >> { %v8252_v37 = vld [vmem:[%s9963_s5 + $0x168] sm:$0xff]  ;;  %v8278_v3 = vld [vmem:[%s9963_s5 + $0x170] sm:$0xff]  ;;  %v8309_v35 = vld [vmem:[%s9963_s5 + $0x1f8] sm:$0xff] }
 0x43c   : >> { %v8257_v28 = vld [vmem:[%s9963_s5 + $0x1e8] sm:$0xff]  ;;  %v8283_v10 = vld [vmem:[%s9963_s5 + $0x1f0] sm:$0xff]  ;;  %v8332_v12 = vld [vmem:[%s9963_s5 + $0x280] sm:$0xff] }
 0x43d   : >> { %v10101_v34 = vld [vmem:[#allocation20_spill] sm:$0xff]  ;;  %v10107_v27 = vld [vmem:[#allocation15_spill] sm:$0xff]  ;;  %v10137_v53 = vld [vmem:[#allocation6_spill] sm:$0xff] }
 0x43e   : >> { %2831 = vrot.lane.b32.xlu1 %v7825_v6, %s6567_s23  ;;  %v10138_v39 = vld [vmem:[#allocation7_spill] sm:$0xff]  ;;  %v10139_v40 = vld [vmem:[#allocation5_spill] sm:$0xff]  ;;  %v10140_v9 = vld [vmem:[#allocation10_spill] sm:$0xff] }
 0x43f   : >> { %2545 = vrot.lane.b32.xlu0 %v7825_v6, %s6568_s27 }
 0x440   : >> { %5637 = vmatmul.msk.f32.gmra.mxu1 %vm2312_vm15, %v2277_v41  ;;  %5671 = vmatmul.msk.f32.gmra.mxu3 %vm2312_vm15, %v2277_v41 }
 0x441   : >> { %3527 = vrot.lane.b32.xlu2 %v7901_v5, %s6567_s23 }
 0x448   : >> { %5638 = vmatmul.msk.f32.gmra.mxu1 %vm2312_vm15, %v2278_v2  ;;  %5672 = vmatmul.msk.f32.gmra.mxu3 %vm2312_vm15, %v2278_v2  ;;  %v8017_v2 = vld [vmem:[%s9963_s5 + $0x118] sm:$0xff] }
 0x450   : >> { %5639 = vmatmul.msk.f32.gmra.mxu1 %vm2312_vm15, %v2279_v29  ;;  %5673 = vmatmul.msk.f32.gmra.mxu3 %vm2312_vm15, %v2279_v29  ;;  %v8022_v29 = vld [vmem:[%s9963_s5 + $0x198] sm:$0xff] }
 0x458   : >> { %5640 = vmatmul.msk.f32.gmra.mxu1 %vm2312_vm15, %v2280_v52  ;;  %5674 = vmatmul.msk.f32.gmra.mxu3 %vm2312_vm15, %v2280_v52  ;;  %v5607_v52 = vld [vmem:[%s9963_s5 + $0xa8] sm:$0xff] }
 0x460   : >> { %5641 = vmatmul.msk.f32.gmra.mxu1 %vm2312_vm15, %v2281_v44  ;;  %5675 = vmatmul.msk.f32.gmra.mxu3 %vm2312_vm15, %v2281_v44 }
 0x468   : >> { %5642 = vmatmul.msk.f32.gmra.mxu1 %vm2312_vm15, %v2282_v62  ;;  %5676 = vmatmul.msk.f32.gmra.mxu3 %vm2312_vm15, %v2282_v62 }
 0x470   : >> { %5643 = vmatmul.msk.f32.gmra.mxu1 %vm2312_vm15, %v2283_v4  ;;  %5677 = vmatmul.msk.f32.gmra.mxu3 %vm2312_vm15, %v2283_v4  ;;  %v8040_v4 = vld [vmem:[%s9963_s5 + $0x120] sm:$0xff] }
 0x478   : >> { %5644 = vmatmul.msk.f32.gmra.mxu1 %vm2312_vm15, %v2284_v21  ;;  %5678 = vmatmul.msk.f32.gmra.mxu3 %vm2312_vm15, %v2284_v21  ;;  %v8045_v21 = vld [vmem:[%s9963_s5 + $0x1a0] sm:$0xff] }
 0x480   : >> { %5645 = vmatmul.msk.f32.gmra.mxu1 %vm2312_vm15, %v2285_v38  ;;  %5679 = vmatmul.msk.f32.gmra.mxu3 %vm2312_vm15, %v2285_v38  ;;  %v5608_v38 = vld [vmem:[%s9963_s5 + $0xb0] sm:$0xff] }
 0x488   : >> { %5646 = vmatmul.msk.f32.gmra.mxu1 %vm2312_vm15, %v2286_v60  ;;  %5680 = vmatmul.msk.f32.gmra.mxu3 %vm2312_vm15, %v2286_v60 }
 0x490   : >> { %5647 = vmatmul.msk.f32.gmra.mxu1 %vm2312_vm15, %v2287_v54  ;;  %5681 = vmatmul.msk.f32.gmra.mxu3 %vm2312_vm15, %v2287_v54 }
 0x498   : >> { %5648 = vmatmul.msk.f32.gmra.mxu1 %vm2312_vm15, %v2288_v48  ;;  %5682 = vmatmul.msk.f32.gmra.mxu3 %vm2312_vm15, %v2288_v48  ;;  %v8063_v48 = vld [vmem:[%s9963_s5 + $0x128] sm:$0xff] }
 0x4a0   : >> { %5649 = vmatmul.msk.f32.gmra.mxu1 %vm2312_vm15, %v2289_v47  ;;  %5683 = vmatmul.msk.f32.gmra.mxu3 %vm2312_vm15, %v2289_v47  ;;  %v8068_v47 = vld [vmem:[%s9963_s5 + $0x1a8] sm:$0xff] }
 0x4a8   : >> { %5650 = vmatmul.msk.f32.gmra.mxu1 %vm2312_vm15, %v2290_v55  ;;  %5684 = vmatmul.msk.f32.gmra.mxu3 %vm2312_vm15, %v2290_v55  ;;  %v2699_v43 = vpop.permute.xlu1 %2698  ;;  %v5609_v55 = vld [vmem:[%s9963_s5 + $0xb8] sm:$0xff] }
 0x4a9   : >> { %v2311_v45 = vpop.permute.xlu0 %2310 }
 0x4aa   : >> { %5618 = vmatpush.msk.msra.mxu0 %vm1110_vm9, %v2311_v45  ;;  %v8086_v45 = vld [vmem:[%s9963_s5 + $0x130] sm:$0xff] }
 0x4ab   : >> { %5619 = vmatmul.msk.f32.vlgmr.msra.gmra.mxu0 %vm2312_vm15, %v5602_v49 }
 0x4ac   : >> { %5702 = vmatpush.msk.msrb.mxu0 %vm1110_vm9, %v2699_v43 }
 0x4b0   : >> { %5651 = vmatmul.msk.f32.gmra.mxu1 %vm2312_vm15, %v2291_v22  ;;  %5685 = vmatmul.msk.f32.gmra.mxu3 %vm2312_vm15, %v2291_v22  ;;  %v2832_v1 = vpop.permute.xlu1 %2831  ;;  %v8091_v22 = vld [vmem:[%s9963_s5 + $0x1b0] sm:$0xff] }
 0x4b1   : >> { %v2546_v0 = vpop.permute.xlu0 %2545  ;;  %5719 = vmatpush.msk.msrb.mxu1 %vm1110_vm9, %v2832_v1 }
 0x4b2   : >> { %5652 = vmatpush.msk.msra.mxu2 %vm1110_vm9, %v2546_v0  ;;  %5805 = vmatpush.msk.msra.mxu0 %vm1110_vm9, %v2546_v0 }
 0x4b3   : >> { %5620 = vmatmul.msk.f32.gmra.mxu0 %vm2312_vm15, %v5603_v14  ;;  %5653 = vmatmul.msk.f32.vlgmr.msra.gmra.mxu2 %vm2312_vm15, %v5602_v49 }
 0x4b4   : >> { %5755 = vmatpush.msk.msrb.mxu2 %vm1110_vm9, %v7825_v6  ;;  %v7999_v6 = vld [vmem:[%s9963_s5 + $0x190] sm:$0xff] }
 0x4b5   : >> { %v7943_v17 = vpop.f32.mrf.mxu1 }
 0x4b6   : >> { %5855 = vmatpush.msk.msra.mxu2 %vm1110_vm9, %v2832_v1  ;;  %v5610_v1 = vld [vmem:[%s9963_s5 + $0xc0] sm:$0xff] }
 0x4b8   : >> { %5720 = vmatmul.msk.f32.vlgmr.msrb.gmra.mxu1 %vm2312_vm15, %v7948_v63  ;;  %5773 = vmatmul.msk.f32.vlgmr.msrb.gmra.mxu3 %vm2312_vm15, %v7953_v46 }
 0x4bb   : >> { %5621 = vmatmul.msk.f32.gmra.mxu0 %vm2312_vm15, %v5604_v51  ;;  %5654 = vmatmul.msk.f32.gmra.mxu2 %vm2312_vm15, %v5603_v14  ;;  %v7964_v15 = vpop.f32.mrf.mxu3 }
 0x4bd   : >> { %v7966_v7 = vpop.f32.mrf.mxu1 }
 0x4be   : >> { %10071 = vst [vmem:[#allocation32_spill] sm:$0xff] %v7966_v7 }
 0x4c0   : >> { %5721 = vmatmul.msk.f32.gmra.mxu1 %vm2312_vm15, %v7971_v20  ;;  %5774 = vmatmul.msk.f32.gmra.mxu3 %vm2312_vm15, %v7976_v57 }
 0x4c3   : >> { %5622 = vmatmul.msk.f32.gmra.mxu0 %vm2312_vm15, %v5605_v36  ;;  %5655 = vmatmul.msk.f32.gmra.mxu2 %vm2312_vm15, %v5604_v51  ;;  %v7987_v13 = vpop.f32.mrf.mxu3  ;;  %v8109_v51 = vld [vmem:[%s9963_s5 + $0x138] sm:$0xff] }
 0x4c5   : >> { %v7989_v61 = vpop.f32.mrf.mxu1 }
 0x4c6   : >> { %10072 = vst [vmem:[#allocation33_spill] sm:$0xff] %v7989_v61 }
 0x4c8   : >> { %5722 = vmatmul.msk.f32.gmra.mxu1 %vm2312_vm15, %v7994_v19  ;;  %5775 = vmatmul.msk.f32.gmra.mxu3 %vm2312_vm15, %v7999_v6 }
 0x4cb   : >> { %5623 = vmatmul.msk.f32.gmra.mxu0 %vm2312_vm15, %v5606_v58  ;;  %5656 = vmatmul.msk.f32.gmra.mxu2 %vm2312_vm15, %v5605_v36  ;;  %v8010_v56 = vpop.f32.mrf.mxu3  ;;  %v8114_v36 = vld [vmem:[%s9963_s5 + $0x1b8] sm:$0xff] }
 0x4cd   : >> { %v8012_v41 = vpop.f32.mrf.mxu1 }
 0x4ce   : >> { %10073 = vst [vmem:[#allocation34_spill] sm:$0xff] %v8012_v41  ;;  %v5891_v41 = vld [vmem:[%s7822_s22 + $0x18] sm:$0x3f] }
 0x4cf   : >> { %3992 = vrot.lane.b32.xlu0 %v5891_v41, %s6568_s27  ;;  %4223 = vrot.lane.b32.xlu1 %v5891_v41, %s6567_s23  ;;  %s6082_s27 = sshll.u32 %s6551_s20, 7  ;;  %s2267_s20 = sadd.s32 1, %s6551_s20  }
 0x4d0   : >> { %5723 = vmatmul.msk.f32.gmra.mxu1 %vm2312_vm15, %v8017_v2  ;;  %5776 = vmatmul.msk.f32.gmra.mxu3 %vm2312_vm15, %v8022_v29  ;;  %s9600_s11 = scalar_lea.vmem [#allocation4], %s6082_s27  ;;  %p2264_p6 = scmp.ge.s32.totalorder %s2267_s20, 14  }
 0x4d1   : > { %s9642_s14 = smov (%p2264_p6), 0  }
 0x4d3   : >> { %5624 = vmatmul.msk.f32.gmra.mxu0 %vm2312_vm15, %v5607_v52  ;;  %5657 = vmatmul.msk.f32.gmra.mxu2 %vm2312_vm15, %v5606_v58  ;;  %v8033_v44 = vpop.f32.mrf.mxu3  ;;  %v5611_v58 = vld [vmem:[%s9963_s5 + $0xc8] sm:$0xff] }
 0x4d5   : >> { %v8035_v62 = vpop.f32.mrf.mxu1 }
 0x4d6   : >> { %10074 = vst [vmem:[#allocation35_spill] sm:$0xff] %v8035_v62 }
 0x4d8   : >> { %5724 = vmatmul.msk.f32.gmra.mxu1 %vm2312_vm15, %v8040_v4  ;;  %5777 = vmatmul.msk.f32.gmra.mxu3 %vm2312_vm15, %v8045_v21 }
 0x4db   : >> { %5625 = vmatmul.msk.f32.gmra.mxu0 %vm2312_vm15, %v5608_v38  ;;  %5658 = vmatmul.msk.f32.gmra.mxu2 %vm2312_vm15, %v5607_v52  ;;  %v8056_v60 = vpop.f32.mrf.mxu3 }
 0x4dd   : >> { %v8058_v54 = vpop.f32.mrf.mxu1 }
 0x4de   : >> { %10075 = vst [vmem:[#allocation36_spill] sm:$0xff] %v8058_v54  ;;  %v8225_v54 = vld [vmem:[%s9963_s5 + $0x160] sm:$0xff] }
 0x4e0   : >> { %5725 = vmatmul.msk.f32.gmra.mxu1 %vm2312_vm15, %v8063_v48  ;;  %5778 = vmatmul.msk.f32.gmra.mxu3 %vm2312_vm15, %v8068_v47 }
 0x4e3   : >> { %5626 = vmatmul.msk.f32.gmra.mxu0 %vm2312_vm15, %v5609_v55  ;;  %5659 = vmatmul.msk.f32.gmra.mxu2 %vm2312_vm15, %v5608_v38  ;;  %v8079_v43 = vpop.f32.mrf.mxu3 }
 0x4e5   : >> { %v8081_v49 = vpop.f32.mrf.mxu1 }
 0x4e6   : >> { %10076 = vst [vmem:[#allocation37_spill] sm:$0xff] %v8081_v49  ;;  %v3297_v49 = vpop.permute.xlu2 %3296 }
 0x4e7   : >> { %5822 = vmatpush.msk.msra.mxu1 %vm1110_vm9, %v3297_v49 }
 0x4e8   : >> { %5726 = vmatmul.msk.f32.gmra.mxu1 %vm2312_vm15, %v8086_v45  ;;  %5779 = vmatmul.msk.f32.gmra.mxu3 %vm2312_vm15, %v8091_v22 }
 0x4e9   : >> { %5925 = vmatpush.msk.msrb.mxu1 %vm1110_vm9, %v5891_v41  ;;  %v8304_v41 = vld [vmem:[%s9963_s5 + $0x178] sm:$0xff] }
 0x4eb   : >> { %5627 = vmatmul.msk.f32.gmra.mxu0 %vm2312_vm15, %v5610_v1  ;;  %5660 = vmatmul.msk.f32.gmra.mxu2 %vm2312_vm15, %v5609_v55  ;;  %v8102_v14 = vpop.f32.mrf.mxu3  ;;  %v8132_v55 = vld [vmem:[%s9963_s5 + $0x140] sm:$0xff] }
 0x4ed   : >> { %v8104_v0 = vpop.f32.mrf.mxu1 }
 0x4ee   : >> { %10077 = vst [vmem:[#allocation38_spill] sm:$0xff] %v8104_v0  ;;  %v8206_v0 = vld [vmem:[%s9963_s5 + $0x1d8] sm:$0xff]  ;;  %v8232_v62 = vpop.permute.xlu2 %3527 }
 0x4ef   : >> { %5872 = vmatpush.msk.msra.mxu3 %vm1110_vm9, %v8232_v62 }
 0x4f0   : >> { %5727 = vmatmul.msk.f32.gmra.mxu1 %vm2312_vm15, %v8109_v51  ;;  %5780 = vmatmul.msk.f32.gmra.mxu3 %vm2312_vm15, %v8114_v36 }
 0x4f3   : >> { %5628 = vmatmul.msk.f32.gmra.mxu0 %vm2312_vm15, %v5611_v58  ;;  %5661 = vmatmul.msk.f32.gmra.mxu2 %vm2312_vm15, %v5610_v1  ;;  %v8125_v52 = vpop.f32.mrf.mxu3  ;;  %v5612_v1 = vld [vmem:[%s9963_s5 + $0xd0] sm:$0xff] }
 0x4f5   : >> { %v8127_v38 = vpop.f32.mrf.mxu1 }
 0x4f6   : >> { %10078 = vst [vmem:[#allocation39_spill] sm:$0xff] %v8127_v38 }
 0x4f8   : >> { %5728 = vmatmul.msk.f32.gmra.mxu1 %vm2312_vm15, %v8132_v55  ;;  %5781 = vmatmul.msk.f32.gmra.mxu3 %vm2312_vm15, %v8137_v33 }
 0x4fb   : >> { %5629 = vmatmul.msk.f32.gmra.mxu0 %vm2312_vm15, %v5612_v1  ;;  %5662 = vmatmul.msk.f32.gmra.mxu2 %vm2312_vm15, %v5611_v58  ;;  %v8148_v26 = vpop.f32.mrf.mxu3  ;;  %v5613_v58 = vld [vmem:[%s9963_s5 + $0xd8] sm:$0xff] }
 0x4fd   : >> { %v8150_v38 = vpop.f32.mrf.mxu1 }
 0x4fe   : >> { %10079 = vst [vmem:[#allocation40_spill] sm:$0xff] %v8150_v38 }
 0x500   : >> { %5729 = vmatmul.msk.f32.gmra.mxu1 %vm2312_vm15, %v8155_v31  ;;  %5782 = vmatmul.msk.f32.gmra.mxu3 %vm2312_vm15, %v8160_v23 }
 0x503   : >> { %5630 = vmatmul.msk.f32.gmra.mxu0 %vm2312_vm15, %v5613_v58  ;;  %5663 = vmatmul.msk.f32.gmra.mxu2 %vm2312_vm15, %v5612_v1  ;;  %v8171_v38 = vpop.f32.mrf.mxu3  ;;  %v5614_v1 = vld [vmem:[%s9963_s5 + $0xe0] sm:$0xff] }
 0x505   : >> { %v8173_v32 = vpop.f32.mrf.mxu1 }
 0x506   : >> { %10080 = vst [vmem:[#allocation41_spill] sm:$0xff] %v8173_v32 }
 0x508   : >> { %5730 = vmatmul.msk.f32.gmra.mxu1 %vm2312_vm15, %v8178_v24  ;;  %5783 = vmatmul.msk.f32.gmra.mxu3 %vm2312_vm15, %v8183_v30 }
 0x50b   : >> { %5631 = vmatmul.msk.f32.gmra.mxu0 %vm2312_vm15, %v5614_v1  ;;  %5664 = vmatmul.msk.f32.gmra.mxu2 %vm2312_vm15, %v5613_v58  ;;  %v8194_v32 = vpop.f32.mrf.mxu3  ;;  %v5615_v58 = vld [vmem:[%s9963_s5 + $0xe8] sm:$0xff] }
 0x50d   : >> { %v8196_v18 = vpop.f32.mrf.mxu1 }
 0x50e   : >> { %10081 = vst [vmem:[#allocation42_spill] sm:$0xff] %v8196_v18 }
 0x510   : >> { %5731 = vmatmul.msk.f32.gmra.mxu1 %vm2312_vm15, %v8201_v8  ;;  %5784 = vmatmul.msk.f32.gmra.mxu3 %vm2312_vm15, %v8206_v0 }
 0x513   : >> { %5632 = vmatmul.msk.f32.gmra.mxu0 %vm2312_vm15, %v5615_v58  ;;  %5665 = vmatmul.msk.f32.gmra.mxu2 %vm2312_vm15, %v5614_v1  ;;  %v8218_v18 = vpop.f32.mrf.mxu3  ;;  %v5616_v1 = vld [vmem:[%s9963_s5 + $0xf0] sm:$0xff] }
 0x515   : >> { %v8220_v25 = vpop.f32.mrf.mxu1 }
 0x516   : >> { %10082 = vst [vmem:[#allocation43_spill] sm:$0xff] %v8220_v25 }
 0x518   : >> { %5732 = vmatmul.msk.f32.gmra.mxu1 %vm2312_vm15, %v8225_v54  ;;  %5785 = vmatmul.msk.f32.gmra.mxu3 %vm2312_vm15, %v8230_v16 }
 0x51b   : >> { %5633 = vmatmul.msk.f32.gmra.mxu0 %vm2312_vm15, %v5616_v1  ;;  %5666 = vmatmul.msk.f32.gmra.mxu2 %vm2312_vm15, %v5615_v58  ;;  %v8245_v25 = vpop.f32.mrf.mxu3  ;;  %v5617_v58 = vld [vmem:[%s9963_s5 + $0xf8] sm:$0xff] }
 0x51d   : >> { %v8247_v59 = vpop.f32.mrf.mxu1 }
 0x51e   : >> { %10083 = vst [vmem:[#allocation44_spill] sm:$0xff] %v8247_v59 }
 0x520   : >> { %5733 = vmatmul.msk.f32.gmra.mxu1 %vm2312_vm15, %v8252_v37  ;;  %5786 = vmatmul.msk.f32.gmra.mxu3 %vm2312_vm15, %v8257_v28 }
 0x523   : >> { %5634 = vmatmul.msk.f32.gmra.mxu0 %vm2312_vm15, %v5617_v58  ;;  %5667 = vmatmul.msk.f32.gmra.mxu2 %vm2312_vm15, %v5616_v1  ;;  %v8268_v59 = vpop.f32.mrf.mxu3 }
 0x525   : >> { %v8273_v42 = vpop.f32.mrf.mxu1 }
 0x526   : >> { %10084 = vst [vmem:[#allocation45_spill] sm:$0xff] %v8273_v42 }
 0x528   : >> { %v8286_v1 = vpop.f32.mrf.mxu0  ;;  %5734 = vmatmul.msk.f32.gmra.mxu1 %vm2312_vm15, %v8278_v3  ;;  %5787 = vmatmul.msk.f32.gmra.mxu3 %vm2312_vm15, %v8283_v10 }
 0x52b   : >> { %5668 = vmatmul.msk.f32.gmra.mxu2 %vm2312_vm15, %v5617_v58  ;;  %v8293_v42 = vpop.f32.mrf.mxu3  ;;  %5703 = vmatmul.msk.f32.vlgmr.msrb.gmra.mxu0 %vm2312_vm15, %v7948_v63 }
 0x52c   : >> { %5908 = vmatpush.msk.msrb.mxu0 %vm1110_vm9, %v7901_v5 }
 0x52d   : >> { %v8299_v61 = vpop.f32.mrf.mxu1 }
 0x52e   : >> { %10085 = vst [vmem:[#allocation46_spill] sm:$0xff] %v8299_v61  ;;  %v8327_v61 = vld [vmem:[%s9963_s5 + $0x200] sm:$0xff] }
 0x530   : >> { %v8311_v58 = vpop.f32.mrf.mxu0  ;;  %5735 = vmatmul.msk.f32.gmra.mxu1 %vm2312_vm15, %v8304_v41  ;;  %5788 = vmatmul.msk.f32.gmra.mxu3 %vm2312_vm15, %v8309_v35 }
 0x531   : >> { %10086 = vst [vmem:[#allocation47_spill] sm:$0xff] %v8311_v58 }
 0x533   : >> { %v8317_v5 = vpop.f32.mrf.mxu3  ;;  %5704 = vmatmul.msk.f32.gmra.mxu0 %vm2312_vm15, %v7971_v20  ;;  %5756 = vmatmul.msk.f32.vlgmr.msrb.gmra.mxu2 %vm2312_vm15, %v7953_v46 }
 0x534   : >> { %5958 = vmatpush.msk.msrb.mxu2 %vm1110_vm9, %v3297_v49 }
 0x535   : >> { %v2852_v63 = vpop.f32.mrf.mxu1 }
 0x536   : >> { %v2566_v50 = vpop.f32.mrf.mxu2 }
 0x537   : >> { %v2634_v7 = vadd.f32 %v7964_v15, %v2566_v50  ;;  %v8350_v50 = vld [vmem:[%s9963_s5 + $0x208] sm:$0xff] }
 0x538   : >> { %v8335_v20 = vpop.f32.mrf.mxu0  ;;  %5823 = vmatmul.msk.f32.vlgmr.msra.gmra.mxu1 %vm2312_vm15, %v8327_v61  ;;  %5873 = vmatmul.msk.f32.vlgmr.msra.gmra.mxu3 %vm2312_vm15, %v8332_v12  ;;  %v8355_v15 = vld [vmem:[%s9963_s5 + $0x288] sm:$0xff] }
 0x539   : >> { %10087 = vst [vmem:[#allocation48_spill] sm:$0xff] %v8335_v20  ;;  %v2900_v46 = vadd.f32 %v2852_v63, %v2634_v7 }
 0x53b   : >> { %5705 = vmatmul.msk.f32.gmra.mxu0 %vm2312_vm15, %v7994_v19  ;;  %5757 = vmatmul.msk.f32.gmra.mxu2 %vm2312_vm15, %v7976_v57  ;;  %v3086_v49 = vpop.f32.mrf.mxu3 }
 0x53c   : >> { %v8345_v58 = vadd.f32 %v3086_v49, %v2900_v46 }
 0x53d   : >> { %v2855_v11 = vpop.f32.mrf.mxu1 }
 0x53e   : >> { %v2569_v7 = vpop.f32.mrf.mxu2 }
 0x53f   : >> { %v2637_v19 = vadd.f32 %v7987_v13, %v2569_v7  ;;  %v8373_v13 = vld [vmem:[%s9963_s5 + $0x210] sm:$0xff] }
 0x540   : >> { %v8358_v63 = vpop.f32.mrf.mxu0  ;;  %5824 = vmatmul.msk.f32.gmra.mxu1 %vm2312_vm15, %v8350_v50  ;;  %5874 = vmatmul.msk.f32.gmra.mxu3 %vm2312_vm15, %v8355_v15  ;;  %v8378_v7 = vld [vmem:[%s9963_s5 + $0x290] sm:$0xff] }
 0x541   : >> { %10088 = vst [vmem:[#allocation49_spill] sm:$0xff] %v8358_v63  ;;  %v2901_v57 = vadd.f32 %v2855_v11, %v2637_v19 }
 0x543   : >> { %5706 = vmatmul.msk.f32.gmra.mxu0 %vm2312_vm15, %v8017_v2  ;;  %5758 = vmatmul.msk.f32.gmra.mxu2 %vm2312_vm15, %v7999_v6  ;;  %v3089_v46 = vpop.f32.mrf.mxu3 }
 0x544   : >> { %v8368_v49 = vadd.f32 %v3089_v46, %v2901_v57 }
 0x545   : >> { %v2858_v20 = vpop.f32.mrf.mxu1 }
 0x546   : >> { %v2572_v11 = vpop.f32.mrf.mxu2 }
 0x547   : >> { %v2640_v2 = vadd.f32 %v8010_v56, %v2572_v11  ;;  %v8396_v56 = vld [vmem:[%s9963_s5 + $0x218] sm:$0xff] }
 0x548   : >> { %v8381_v19 = vpop.f32.mrf.mxu0  ;;  %5825 = vmatmul.msk.f32.gmra.mxu1 %vm2312_vm15, %v8373_v13  ;;  %5875 = vmatmul.msk.f32.gmra.mxu3 %vm2312_vm15, %v8378_v7  ;;  %v8401_v11 = vld [vmem:[%s9963_s5 + $0x298] sm:$0xff] }
 0x549   : >> { %10089 = vst [vmem:[#allocation50_spill] sm:$0xff] %v8381_v19  ;;  %v2902_v6 = vadd.f32 %v2858_v20, %v2640_v2 }
 0x54b   : >> { %5707 = vmatmul.msk.f32.gmra.mxu0 %vm2312_vm15, %v8040_v4  ;;  %5759 = vmatmul.msk.f32.gmra.mxu2 %vm2312_vm15, %v8022_v29  ;;  %v3092_v57 = vpop.f32.mrf.mxu3 }
 0x54c   : >> { %v8391_v46 = vadd.f32 %v3092_v57, %v2902_v6 }
 0x54d   : >> { %v2861_v63 = vpop.f32.mrf.mxu1 }
 0x54e   : >> { %v2575_v20 = vpop.f32.mrf.mxu2 }
 0x54f   : >> { %v2643_v4 = vadd.f32 %v8033_v44, %v2575_v20  ;;  %v8419_v44 = vld [vmem:[%s9963_s5 + $0x220] sm:$0xff] }
 0x550   : >> { %v8404_v2 = vpop.f32.mrf.mxu0  ;;  %5826 = vmatmul.msk.f32.gmra.mxu1 %vm2312_vm15, %v8396_v56  ;;  %5876 = vmatmul.msk.f32.gmra.mxu3 %vm2312_vm15, %v8401_v11  ;;  %v8424_v20 = vld [vmem:[%s9963_s5 + $0x2a0] sm:$0xff] }
 0x551   : >> { %10090 = vst [vmem:[#allocation51_spill] sm:$0xff] %v8404_v2  ;;  %v2903_v29 = vadd.f32 %v2861_v63, %v2643_v4 }
 0x553   : >> { %5708 = vmatmul.msk.f32.gmra.mxu0 %vm2312_vm15, %v8063_v48  ;;  %5760 = vmatmul.msk.f32.gmra.mxu2 %vm2312_vm15, %v8045_v21  ;;  %v3095_v6 = vpop.f32.mrf.mxu3 }
 0x554   : >> { %v8414_v57 = vadd.f32 %v3095_v6, %v2903_v29 }
 0x555   : >> { %v2864_v19 = vpop.f32.mrf.mxu1 }
 0x556   : >> { %v2578_v63 = vpop.f32.mrf.mxu2 }
 0x557   : >> { %v2646_v48 = vadd.f32 %v8056_v60, %v2578_v63  ;;  %v8442_v60 = vld [vmem:[%s9963_s5 + $0x228] sm:$0xff] }
 0x558   : >> { %v8427_v4 = vpop.f32.mrf.mxu0  ;;  %5827 = vmatmul.msk.f32.gmra.mxu1 %vm2312_vm15, %v8419_v44  ;;  %5877 = vmatmul.msk.f32.gmra.mxu3 %vm2312_vm15, %v8424_v20  ;;  %v8447_v63 = vld [vmem:[%s9963_s5 + $0x2a8] sm:$0xff] }
 0x559   : >> { %10091 = vst [vmem:[#allocation52_spill] sm:$0xff] %v8427_v4  ;;  %v2904_v21 = vadd.f32 %v2864_v19, %v2646_v48 }
 0x55b   : >> { %5709 = vmatmul.msk.f32.gmra.mxu0 %vm2312_vm15, %v8086_v45  ;;  %5761 = vmatmul.msk.f32.gmra.mxu2 %vm2312_vm15, %v8068_v47  ;;  %v3098_v29 = vpop.f32.mrf.mxu3 }
 0x55c   : >> { %v8437_v6 = vadd.f32 %v3098_v29, %v2904_v21 }
 0x55d   : >> { %v2867_v2 = vpop.f32.mrf.mxu1 }
 0x55e   : >> { %v2581_v19 = vpop.f32.mrf.mxu2 }
 0x55f   : >> { %v2649_v45 = vadd.f32 %v8079_v43, %v2581_v19  ;;  %v8465_v43 = vld [vmem:[%s9963_s5 + $0x230] sm:$0xff] }
 0x560   : >> { %v8450_v48 = vpop.f32.mrf.mxu0  ;;  %5828 = vmatmul.msk.f32.gmra.mxu1 %vm2312_vm15, %v8442_v60  ;;  %5878 = vmatmul.msk.f32.gmra.mxu3 %vm2312_vm15, %v8447_v63  ;;  %v8470_v19 = vld [vmem:[%s9963_s5 + $0x2b0] sm:$0xff] }
 0x561   : >> { %10092 = vst [vmem:[#allocation53_spill] sm:$0xff] %v8450_v48  ;;  %v2905_v47 = vadd.f32 %v2867_v2, %v2649_v45 }
 0x563   : >> { %5710 = vmatmul.msk.f32.gmra.mxu0 %vm2312_vm15, %v8109_v51  ;;  %5762 = vmatmul.msk.f32.gmra.mxu2 %vm2312_vm15, %v8091_v22  ;;  %v3101_v21 = vpop.f32.mrf.mxu3 }
 0x564   : >> { %v8460_v29 = vadd.f32 %v3101_v21, %v2905_v47 }
 0x565   : >> { %v2870_v4 = vpop.f32.mrf.mxu1 }
 0x566   : >> { %v2584_v2 = vpop.f32.mrf.mxu2 }
 0x567   : >> { %v2652_v51 = vadd.f32 %v8102_v14, %v2584_v2  ;;  %v8488_v14 = vld [vmem:[%s9963_s5 + $0x238] sm:$0xff] }
 0x568   : >> { %v8473_v45 = vpop.f32.mrf.mxu0  ;;  %5829 = vmatmul.msk.f32.gmra.mxu1 %vm2312_vm15, %v8465_v43  ;;  %5879 = vmatmul.msk.f32.gmra.mxu3 %vm2312_vm15, %v8470_v19  ;;  %v8493_v2 = vld [vmem:[%s9963_s5 + $0x2b8] sm:$0xff] }
 0x569   : >> { %10093 = vst [vmem:[#allocation54_spill] sm:$0xff] %v8473_v45  ;;  %v2906_v22 = vadd.f32 %v2870_v4, %v2652_v51 }
 0x56b   : >> { %5711 = vmatmul.msk.f32.gmra.mxu0 %vm2312_vm15, %v8132_v55  ;;  %5763 = vmatmul.msk.f32.gmra.mxu2 %vm2312_vm15, %v8114_v36  ;;  %v3104_v47 = vpop.f32.mrf.mxu3 }
 0x56c   : >> { %v8483_v21 = vadd.f32 %v3104_v47, %v2906_v22 }
 0x56d   : >> { %v2873_v48 = vpop.f32.mrf.mxu1 }
 0x56e   : >> { %v2587_v4 = vpop.f32.mrf.mxu2 }
 0x56f   : >> { %v2655_v55 = vadd.f32 %v8125_v52, %v2587_v4  ;;  %v8511_v52 = vld [vmem:[%s9963_s5 + $0x240] sm:$0xff] }
 0x570   : >> { %v8496_v51 = vpop.f32.mrf.mxu0  ;;  %5830 = vmatmul.msk.f32.gmra.mxu1 %vm2312_vm15, %v8488_v14  ;;  %5880 = vmatmul.msk.f32.gmra.mxu3 %vm2312_vm15, %v8493_v2  ;;  %v8516_v4 = vld [vmem:[%s9963_s5 + $0x2c0] sm:$0xff] }
 0x571   : >> { %10094 = vst [vmem:[#allocation55_spill] sm:$0xff] %v8496_v51  ;;  %v2907_v36 = vadd.f32 %v2873_v48, %v2655_v55 }
 0x573   : >> { %5712 = vmatmul.msk.f32.gmra.mxu0 %vm2312_vm15, %v8155_v31  ;;  %5764 = vmatmul.msk.f32.gmra.mxu2 %vm2312_vm15, %v8137_v33  ;;  %v3107_v22 = vpop.f32.mrf.mxu3 }
 0x574   : >> { %v8506_v47 = vadd.f32 %v3107_v22, %v2907_v36 }
 0x575   : >> { %v2876_v45 = vpop.f32.mrf.mxu1 }
 0x576   : >> { %v2590_v48 = vpop.f32.mrf.mxu2 }
 0x577   : >> { %v2658_v31 = vadd.f32 %v8148_v26, %v2590_v48  ;;  %v8534_v26 = vld [vmem:[%s9963_s5 + $0x248] sm:$0xff] }
 0x578   : >> { %v8519_v55 = vpop.f32.mrf.mxu0  ;;  %5831 = vmatmul.msk.f32.gmra.mxu1 %vm2312_vm15, %v8511_v52  ;;  %5881 = vmatmul.msk.f32.gmra.mxu3 %vm2312_vm15, %v8516_v4  ;;  %v8539_v48 = vld [vmem:[%s9963_s5 + $0x2c8] sm:$0xff] }
 0x579   : >> { %10095 = vst [vmem:[#allocation56_spill] sm:$0xff] %v8519_v55  ;;  %v2908_v33 = vadd.f32 %v2876_v45, %v2658_v31 }
 0x57b   : >> { %5713 = vmatmul.msk.f32.gmra.mxu0 %vm2312_vm15, %v8178_v24  ;;  %5765 = vmatmul.msk.f32.gmra.mxu2 %vm2312_vm15, %v8160_v23  ;;  %v3110_v36 = vpop.f32.mrf.mxu3 }
 0x57c   : >> { %v8529_v22 = vadd.f32 %v3110_v36, %v2908_v33 }
 0x57d   : >> { %v2879_v51 = vpop.f32.mrf.mxu1 }
 0x57e   : >> { %v2593_v45 = vpop.f32.mrf.mxu2 }
 0x57f   : >> { %v2661_v24 = vadd.f32 %v8171_v38, %v2593_v45  ;;  %v8557_v38 = vld [vmem:[%s9963_s5 + $0x250] sm:$0xff] }
 0x580   : >> { %v8542_v31 = vpop.f32.mrf.mxu0  ;;  %5832 = vmatmul.msk.f32.gmra.mxu1 %vm2312_vm15, %v8534_v26  ;;  %5882 = vmatmul.msk.f32.gmra.mxu3 %vm2312_vm15, %v8539_v48  ;;  %v8562_v45 = vld [vmem:[%s9963_s5 + $0x2d0] sm:$0xff] }
 0x581   : >> { %10096 = vst [vmem:[#allocation57_spill] sm:$0xff] %v8542_v31  ;;  %v2909_v23 = vadd.f32 %v2879_v51, %v2661_v24 }
 0x583   : >> { %5714 = vmatmul.msk.f32.gmra.mxu0 %vm2312_vm15, %v8201_v8  ;;  %5766 = vmatmul.msk.f32.gmra.mxu2 %vm2312_vm15, %v8183_v30  ;;  %v3113_v33 = vpop.f32.mrf.mxu3 }
 0x584   : >> { %v8552_v36 = vadd.f32 %v3113_v33, %v2909_v23 }
 0x585   : >> { %v2882_v55 = vpop.f32.mrf.mxu1 }
 0x586   : >> { %v2596_v51 = vpop.f32.mrf.mxu2 }
 0x587   : >> { %v2664_v8 = vadd.f32 %v8194_v32, %v2596_v51  ;;  %v8580_v32 = vld [vmem:[%s9963_s5 + $0x258] sm:$0xff] }
 0x588   : >> { %v8565_v24 = vpop.f32.mrf.mxu0  ;;  %5833 = vmatmul.msk.f32.gmra.mxu1 %vm2312_vm15, %v8557_v38  ;;  %5883 = vmatmul.msk.f32.gmra.mxu3 %vm2312_vm15, %v8562_v45  ;;  %v8585_v51 = vld [vmem:[%s9963_s5 + $0x2d8] sm:$0xff] }
 0x589   : >> { %10097 = vst [vmem:[#allocation58_spill] sm:$0xff] %v8565_v24  ;;  %v2910_v30 = vadd.f32 %v2882_v55, %v2664_v8 }
 0x58b   : >> { %5715 = vmatmul.msk.f32.gmra.mxu0 %vm2312_vm15, %v8225_v54  ;;  %5767 = vmatmul.msk.f32.gmra.mxu2 %vm2312_vm15, %v8206_v0  ;;  %v3116_v23 = vpop.f32.mrf.mxu3 }
 0x58c   : >> { %v8575_v33 = vadd.f32 %v3116_v23, %v2910_v30 }
 0x58d   : >> { %v2885_v31 = vpop.f32.mrf.mxu1 }
 0x58e   : >> { %v2599_v55 = vpop.f32.mrf.mxu2 }
 0x58f   : >> { %v2667_v54 = vadd.f32 %v8218_v18, %v2599_v55  ;;  %v8603_v18 = vld [vmem:[%s9963_s5 + $0x260] sm:$0xff] }
 0x590   : >> { %v8588_v8 = vpop.f32.mrf.mxu0  ;;  %5834 = vmatmul.msk.f32.gmra.mxu1 %vm2312_vm15, %v8580_v32  ;;  %5884 = vmatmul.msk.f32.gmra.mxu3 %vm2312_vm15, %v8585_v51  ;;  %v8608_v55 = vld [vmem:[%s9963_s5 + $0x2e0] sm:$0xff] }
 0x591   : >> { %10098 = vst [vmem:[#allocation59_spill] sm:$0xff] %v8588_v8  ;;  %v2911_v0 = vadd.f32 %v2885_v31, %v2667_v54  ;;  %v3993_v54 = vpop.permute.xlu0 %3992  ;;  %v8732_v8 = vld [vmem:[%s9963_s5 + $0x388] sm:$0xff] }
 0x592   : >> { %5975 = vmatpush.msk.msrb.mxu3 %vm1110_vm9, %v3993_v54  ;;  %v8629_v54 = vld [vmem:[%s9963_s5 + $0x268] sm:$0xff] }
 0x593   : >> { %5716 = vmatmul.msk.f32.gmra.mxu0 %vm2312_vm15, %v8252_v37  ;;  %5768 = vmatmul.msk.f32.gmra.mxu2 %vm2312_vm15, %v8230_v16  ;;  %v3119_v30 = vpop.f32.mrf.mxu3 }
 0x594   : >> { %v8598_v23 = vadd.f32 %v3119_v30, %v2911_v0  ;;  %6062 = vmatpush.msk.msra.mxu3 %vm2194_vm10, %v10101_v34 }
 0x595   : >> { %v2888_v24 = vpop.f32.mrf.mxu1 }
 0x596   : >> { %10099 = vst [vmem:[#allocation60_spill] sm:$0xff] %v8598_v23  ;;  %v2602_v31 = vpop.f32.mrf.mxu2  ;;  %v8857_v23 = vld [vmem:[%s9963_s5 + $0x3b0] sm:$0xff] }
 0x597   : >> { %v2670_v37 = vadd.f32 %v8245_v25, %v2602_v31 }
 0x598   : >> { %v8612_v16 = vpop.f32.mrf.mxu0  ;;  %5835 = vmatmul.msk.f32.gmra.mxu1 %vm2312_vm15, %v8603_v18  ;;  %5885 = vmatmul.msk.f32.gmra.mxu3 %vm2312_vm15, %v8608_v55 }
 0x599   : >> { %10100 = vst [vmem:[#allocation61_spill] sm:$0xff] %v8612_v16  ;;  %v2912_v0 = vadd.f32 %v2888_v24, %v2670_v37  ;;  %v8634_v24 = vld [vmem:[%s9963_s5 + $0x2e8] sm:$0xff] }
 0x59b   : >> { %5717 = vmatmul.msk.f32.gmra.mxu0 %vm2312_vm15, %v8278_v3  ;;  %5769 = vmatmul.msk.f32.gmra.mxu2 %vm2312_vm15, %v8257_v28  ;;  %v3122_v25 = vpop.f32.mrf.mxu3 }
 0x59c   : >> { %v8624_v30 = vadd.f32 %v3122_v25, %v2912_v0 }
 0x59d   : >> { %v2891_v31 = vpop.f32.mrf.mxu1 }
 0x59e   : >> { %10102 = vst [vmem:[#allocation62_spill] sm:$0xff] %v8624_v30  ;;  %v2605_v37 = vpop.f32.mrf.mxu2  ;;  %v8832_v30 = vld [vmem:[%s9963_s5 + $0x3a8] sm:$0xff] }
 0x59f   : >> { %v2673_v3 = vadd.f32 %v8268_v59, %v2605_v37  ;;  %v8652_v59 = vld [vmem:[%s9963_s5 + $0x270] sm:$0xff] }
 0x5a0   : >> { %v8637_v34 = vpop.f32.mrf.mxu0  ;;  %5836 = vmatmul.msk.f32.gmra.mxu1 %vm2312_vm15, %v8629_v54  ;;  %5886 = vmatmul.msk.f32.gmra.mxu3 %vm2312_vm15, %v8634_v24  ;;  %v8657_v37 = vld [vmem:[%s9963_s5 + $0x2f0] sm:$0xff] }
 0x5a1   : >> { %10103 = vst [vmem:[#allocation63_spill] sm:$0xff] %v8637_v34  ;;  %v2913_v28 = vadd.f32 %v2891_v31, %v2673_v3  ;;  %v8727_v34 = vld [vmem:[%s9963_s5 + $0x308] sm:$0xff] }
 0x5a3   : >> { %5718 = vmatmul.msk.f32.gmra.mxu0 %vm2312_vm15, %v8304_v41  ;;  %5770 = vmatmul.msk.f32.gmra.mxu2 %vm2312_vm15, %v8283_v10  ;;  %v3125_v0 = vpop.f32.mrf.mxu3 }
 0x5a4   : >> { %v8647_v25 = vadd.f32 %v3125_v0, %v2913_v28 }
 0x5a5   : >> { %v2894_v16 = vpop.f32.mrf.mxu1 }
 0x5a6   : >> { %10104 = vst [vmem:[#allocation64_spill] sm:$0xff] %v8647_v25  ;;  %v2608_v31 = vpop.f32.mrf.mxu2  ;;  %v8807_v25 = vld [vmem:[%s9963_s5 + $0x3a0] sm:$0xff] }
 0x5a7   : >> { %v2676_v41 = vadd.f32 %v8293_v42, %v2608_v31  ;;  %v8677_v31 = vld [vmem:[%s9963_s5 + $0x278] sm:$0xff] }
 0x5a8   : >> { %v8660_v3 = vpop.f32.mrf.mxu0  ;;  %5837 = vmatmul.msk.f32.gmra.mxu1 %vm2312_vm15, %v8652_v59  ;;  %5887 = vmatmul.msk.f32.gmra.mxu3 %vm2312_vm15, %v8657_v37 }
 0x5a9   : >> { %v2914_v10 = vadd.f32 %v2894_v16, %v2676_v41  ;;  %v8682_v16 = vld [vmem:[%s9963_s5 + $0x2f8] sm:$0xff] }
 0x5ab   : >> { %5771 = vmatmul.msk.f32.gmra.mxu2 %vm2312_vm15, %v8309_v35  ;;  %v3128_v28 = vpop.f32.mrf.mxu3  ;;  %5806 = vmatmul.msk.f32.vlgmr.msra.gmra.mxu0 %vm2312_vm15, %v8327_v61 }
 0x5ac   : >> { %v8670_v0 = vadd.f32 %v3128_v28, %v2914_v10  ;;  %6008 = vmatpush.msk.msra.mxu0 %vm1110_vm9, %v8232_v62 }
 0x5ad   : >> { %v2897_v42 = vpop.f32.mrf.mxu1 }
 0x5ae   : >> { %10105 = vst [vmem:[#allocation65_spill] sm:$0xff] %v8670_v0  ;;  %v2611_v35 = vpop.f32.mrf.mxu2  ;;  %v8782_v0 = vld [vmem:[%s9963_s5 + $0x398] sm:$0xff] }
 0x5af   : >> { %v2679_v41 = vadd.f32 %v8317_v5, %v2611_v35  ;;  %v8702_v35 = vld [vmem:[%s9963_s5 + $0x300] sm:$0xff] }
 0x5b0   : >> { %v8685_v61 = vpop.f32.mrf.mxu0  ;;  %5838 = vmatmul.msk.f32.gmra.mxu1 %vm2312_vm15, %v8677_v31  ;;  %5888 = vmatmul.msk.f32.gmra.mxu3 %vm2312_vm15, %v8682_v16 }
 0x5b1   : >> { %v2915_v62 = vadd.f32 %v2897_v42, %v2679_v41  ;;  %v8707_v42 = vld [vmem:[%s9963_s5 + $0x380] sm:$0xff] }
 0x5b3   : >> { %v3131_v10 = vpop.f32.mrf.mxu3  ;;  %5807 = vmatmul.msk.f32.gmra.mxu0 %vm2312_vm15, %v8350_v50  ;;  %5856 = vmatmul.msk.f32.vlgmr.msra.gmra.mxu2 %vm2312_vm15, %v8332_v12 }
 0x5b4   : >> { %v8695_v28 = vadd.f32 %v3131_v10, %v2915_v62  ;;  %6042 = vmatpush.msk.msra.mxu2 %vm2194_vm10, %v10107_v27 }
 0x5b5   : >> { %v3317_v5 = vpop.f32.mrf.mxu1 }
 0x5b6   : >> { %10106 = vst [vmem:[#allocation66_spill] sm:$0xff] %v8695_v28  ;;  %v8709_v50 = vpop.f32.mrf.mxu2  ;;  %v3365_v12 = vadd.f32 %v3317_v5, %v8345_v58  ;;  %v8757_v28 = vld [vmem:[%s9963_s5 + $0x390] sm:$0xff] }
 0x5b8   : >> { %v8711_v41 = vpop.f32.mrf.mxu0  ;;  %5926 = vmatmul.msk.f32.vlgmr.msrb.gmra.mxu1 %vm2312_vm15, %v8702_v35  ;;  %5976 = vmatmul.msk.f32.vlgmr.msrb.gmra.mxu3 %vm2312_vm15, %v8707_v42 }
 0x5bb   : >> { %5808 = vmatmul.msk.f32.gmra.mxu0 %vm2312_vm15, %v8373_v13  ;;  %5857 = vmatmul.msk.f32.gmra.mxu2 %vm2312_vm15, %v8355_v15  ;;  %v3548_v62 = vpop.f32.mrf.mxu3 }
 0x5bc   : >> { %v8722_v10 = vadd.f32 %v3548_v62, %v3365_v12 }
 0x5bd   : >> { %v3320_v27 = vpop.f32.mrf.mxu1 }
 0x5be   : >> { %10108 = vst [vmem:[#allocation67_spill] sm:$0xff] %v8722_v10  ;;  %v8734_v58 = vpop.f32.mrf.mxu2  ;;  %v3366_v15 = vadd.f32 %v3320_v27, %v8368_v49  ;;  %v8752_v10 = vld [vmem:[%s9963_s5 + $0x310] sm:$0xff] }
 0x5c0   : >> { %v8736_v13 = vpop.f32.mrf.mxu0  ;;  %5927 = vmatmul.msk.f32.gmra.mxu1 %vm2312_vm15, %v8727_v34  ;;  %5977 = vmatmul.msk.f32.gmra.mxu3 %vm2312_vm15, %v8732_v8 }
 0x5c3   : >> { %5809 = vmatmul.msk.f32.gmra.mxu0 %vm2312_vm15, %v8396_v56  ;;  %5858 = vmatmul.msk.f32.gmra.mxu2 %vm2312_vm15, %v8378_v7  ;;  %v3551_v5 = vpop.f32.mrf.mxu3 }
 0x5c4   : >> { %v8747_v12 = vadd.f32 %v3551_v5, %v3366_v15 }
 0x5c5   : >> { %v3323_v62 = vpop.f32.mrf.mxu1 }
 0x5c6   : >> { %10109 = vst [vmem:[#allocation68_spill] sm:$0xff] %v8747_v12  ;;  %v8759_v27 = vpop.f32.mrf.mxu2  ;;  %v3367_v7 = vadd.f32 %v3323_v62, %v8391_v46  ;;  %v8777_v12 = vld [vmem:[%s9963_s5 + $0x318] sm:$0xff] }
 0x5c8   : >> { %v8761_v49 = vpop.f32.mrf.mxu0  ;;  %5928 = vmatmul.msk.f32.gmra.mxu1 %vm2312_vm15, %v8752_v10  ;;  %5978 = vmatmul.msk.f32.gmra.mxu3 %vm2312_vm15, %v8757_v28 }
 0x5cb   : >> { %5810 = vmatmul.msk.f32.gmra.mxu0 %vm2312_vm15, %v8419_v44  ;;  %5859 = vmatmul.msk.f32.gmra.mxu2 %vm2312_vm15, %v8401_v11  ;;  %v3554_v56 = vpop.f32.mrf.mxu3 }
 0x5cc   : >> { %v8772_v15 = vadd.f32 %v3554_v56, %v3367_v7 }
 0x5cd   : >> { %v3326_v5 = vpop.f32.mrf.mxu1 }
 0x5ce   : >> { %10110 = vst [vmem:[#allocation69_spill] sm:$0xff] %v8772_v15  ;;  %v8784_v46 = vpop.f32.mrf.mxu2  ;;  %v3368_v11 = vadd.f32 %v3326_v5, %v8414_v57  ;;  %v8802_v15 = vld [vmem:[%s9963_s5 + $0x320] sm:$0xff] }
 0x5d0   : >> { %v8786_v44 = vpop.f32.mrf.mxu0  ;;  %5929 = vmatmul.msk.f32.gmra.mxu1 %vm2312_vm15, %v8777_v12  ;;  %5979 = vmatmul.msk.f32.gmra.mxu3 %vm2312_vm15, %v8782_v0 }
 0x5d3   : >> { %5811 = vmatmul.msk.f32.gmra.mxu0 %vm2312_vm15, %v8442_v60  ;;  %5860 = vmatmul.msk.f32.gmra.mxu2 %vm2312_vm15, %v8424_v20  ;;  %v3557_v62 = vpop.f32.mrf.mxu3 }
 0x5d4   : >> { %v8797_v7 = vadd.f32 %v3557_v62, %v3368_v11 }
 0x5d5   : >> { %v3329_v56 = vpop.f32.mrf.mxu1 }
 0x5d6   : >> { %10111 = vst [vmem:[#allocation70_spill] sm:$0xff] %v8797_v7  ;;  %v8809_v57 = vpop.f32.mrf.mxu2  ;;  %v3369_v20 = vadd.f32 %v3329_v56, %v8437_v6  ;;  %v8827_v7 = vld [vmem:[%s9963_s5 + $0x328] sm:$0xff] }
 0x5d8   : >> { %v8811_v60 = vpop.f32.mrf.mxu0  ;;  %5930 = vmatmul.msk.f32.gmra.mxu1 %vm2312_vm15, %v8802_v15  ;;  %5980 = vmatmul.msk.f32.gmra.mxu3 %vm2312_vm15, %v8807_v25 }
 0x5db   : >> { %5812 = vmatmul.msk.f32.gmra.mxu0 %vm2312_vm15, %v8465_v43  ;;  %5861 = vmatmul.msk.f32.gmra.mxu2 %vm2312_vm15, %v8447_v63  ;;  %v3560_v5 = vpop.f32.mrf.mxu3 }
 0x5dc   : >> { %v8822_v11 = vadd.f32 %v3560_v5, %v3369_v20 }
 0x5dd   : >> { %v3332_v62 = vpop.f32.mrf.mxu1 }
 0x5de   : >> { %10112 = vst [vmem:[#allocation71_spill] sm:$0xff] %v8822_v11  ;;  %v8834_v6 = vpop.f32.mrf.mxu2  ;;  %v3370_v63 = vadd.f32 %v3332_v62, %v8460_v29  ;;  %v8852_v11 = vld [vmem:[%s9963_s5 + $0x330] sm:$0xff] }
 0x5e0   : >> { %v8836_v43 = vpop.f32.mrf.mxu0  ;;  %5931 = vmatmul.msk.f32.gmra.mxu1 %vm2312_vm15, %v8827_v7  ;;  %5981 = vmatmul.msk.f32.gmra.mxu3 %vm2312_vm15, %v8832_v30 }
 0x5e3   : >> { %5813 = vmatmul.msk.f32.gmra.mxu0 %vm2312_vm15, %v8488_v14  ;;  %5862 = vmatmul.msk.f32.gmra.mxu2 %vm2312_vm15, %v8470_v19  ;;  %v3563_v56 = vpop.f32.mrf.mxu3 }
 0x5e4   : >> { %v8847_v20 = vadd.f32 %v3563_v56, %v3370_v63 }
 0x5e5   : >> { %v3335_v5 = vpop.f32.mrf.mxu1 }
 0x5e6   : >> { %10113 = vst [vmem:[#allocation72_spill] sm:$0xff] %v8847_v20  ;;  %v8859_v29 = vpop.f32.mrf.mxu2  ;;  %v3371_v19 = vadd.f32 %v3335_v5, %v8483_v21  ;;  %v8877_v20 = vld [vmem:[%s9963_s5 + $0x338] sm:$0xff] }
 0x5e8   : >> { %v8861_v14 = vpop.f32.mrf.mxu0  ;;  %5932 = vmatmul.msk.f32.gmra.mxu1 %vm2312_vm15, %v8852_v11  ;;  %5982 = vmatmul.msk.f32.gmra.mxu3 %vm2312_vm15, %v8857_v23 }
 0x5e9   : >> { %10114 = vst [vmem:[#allocation73_spill] sm:$0xff] %v8861_v14  ;;  %v8882_v14 = vld [vmem:[%s9963_s5 + $0x3b8] sm:$0xff] }
 0x5eb   : >> { %5814 = vmatmul.msk.f32.gmra.mxu0 %vm2312_vm15, %v8511_v52  ;;  %5863 = vmatmul.msk.f32.gmra.mxu2 %vm2312_vm15, %v8493_v2  ;;  %v3566_v62 = vpop.f32.mrf.mxu3 }
 0x5ec   : >> { %v8872_v63 = vadd.f32 %v3566_v62, %v3371_v19 }
 0x5ed   : >> { %v3338_v56 = vpop.f32.mrf.mxu1 }
 0x5ee   : >> { %10115 = vst [vmem:[#allocation74_spill] sm:$0xff] %v8872_v63  ;;  %v8884_v21 = vpop.f32.mrf.mxu2  ;;  %v3372_v2 = vadd.f32 %v3338_v56, %v8506_v47  ;;  %v8904_v63 = vld [vmem:[%s9963_s5 + $0x340] sm:$0xff] }
 0x5ef   : >> { %v8909_v47 = vld [vmem:[%s9963_s5 + $0x3c0] sm:$0xff] }
 0x5f0   : >> { %v8886_v52 = vpop.f32.mrf.mxu0  ;;  %5933 = vmatmul.msk.f32.gmra.mxu1 %vm2312_vm15, %v8877_v20  ;;  %5983 = vmatmul.msk.f32.gmra.mxu3 %vm2312_vm15, %v8882_v14 }
 0x5f1   : >> { %10116 = vst [vmem:[#allocation75_spill] sm:$0xff] %v8886_v52 }
 0x5f3   : >> { %5815 = vmatmul.msk.f32.gmra.mxu0 %vm2312_vm15, %v8534_v26  ;;  %5864 = vmatmul.msk.f32.gmra.mxu2 %vm2312_vm15, %v8516_v4  ;;  %v3569_v5 = vpop.f32.mrf.mxu3 }
 0x5f4   : >> { %v8897_v19 = vadd.f32 %v3569_v5, %v3372_v2  ;;  %v8928_v2 = vld [vmem:[%s9963_s5 + $0x348] sm:$0xff] }
 0x5f5   : >> { %v8899_v62 = vpop.f32.mrf.mxu1  ;;  %v8933_v5 = vld [vmem:[%s9963_s5 + $0x3c8] sm:$0xff] }
 0x5f6   : >> { %10117 = vst [vmem:[#allocation76_spill] sm:$0xff] %v8897_v19  ;;  %v8911_v56 = vpop.f32.mrf.mxu2 }
 0x5f7   : >> { %10118 = vst [vmem:[#allocation77_spill] sm:$0xff] %v8911_v56 }
 0x5f8   : >> { %v8913_v26 = vpop.f32.mrf.mxu0  ;;  %5934 = vmatmul.msk.f32.gmra.mxu1 %vm2312_vm15, %v8904_v63  ;;  %5984 = vmatmul.msk.f32.gmra.mxu3 %vm2312_vm15, %v8909_v47 }
 0x5f9   : >> { %10119 = vst [vmem:[#allocation78_spill] sm:$0xff] %v8913_v26 }
 0x5fb   : >> { %5816 = vmatmul.msk.f32.gmra.mxu0 %vm2312_vm15, %v8557_v38  ;;  %5865 = vmatmul.msk.f32.gmra.mxu2 %vm2312_vm15, %v8539_v48  ;;  %v8952_v38 = vld [vmem:[%s9963_s5 + $0x350] sm:$0xff] }
 0x5fd   : >> { %v8923_v4 = vpop.f32.mrf.mxu1 }
 0x5fe   : >> { %v8935_v19 = vpop.f32.mrf.mxu2 }
 0x5ff   : >> { %10120 = vst [vmem:[#allocation79_spill] sm:$0xff] %v8935_v19 }
 0x600   : >> { %v8937_v26 = vpop.f32.mrf.mxu0  ;;  %5935 = vmatmul.msk.f32.gmra.mxu1 %vm2312_vm15, %v8928_v2  ;;  %5985 = vmatmul.msk.f32.gmra.mxu3 %vm2312_vm15, %v8933_v5 }
 0x601   : >> { %10121 = vst [vmem:[#allocation80_spill] sm:$0xff] %v8937_v26  ;;  %v8957_v26 = vld [vmem:[%s9963_s5 + $0x3d0] sm:$0xff] }
 0x603   : >> { %5817 = vmatmul.msk.f32.gmra.mxu0 %vm2312_vm15, %v8580_v32  ;;  %5866 = vmatmul.msk.f32.gmra.mxu2 %vm2312_vm15, %v8562_v45  ;;  %v8976_v32 = vld [vmem:[%s9963_s5 + $0x358] sm:$0xff] }
 0x605   : >> { %v8947_v48 = vpop.f32.mrf.mxu1 }
 0x606   : >> { %v8959_v19 = vpop.f32.mrf.mxu2 }
 0x607   : >> { %10122 = vst [vmem:[#allocation81_spill] sm:$0xff] %v8959_v19 }
 0x608   : >> { %v8961_v52 = vpop.f32.mrf.mxu0  ;;  %5936 = vmatmul.msk.f32.gmra.mxu1 %vm2312_vm15, %v8952_v38  ;;  %5986 = vmatmul.msk.f32.gmra.mxu3 %vm2312_vm15, %v8957_v26 }
 0x609   : >> { %10123 = vst [vmem:[#allocation82_spill] sm:$0xff] %v8961_v52  ;;  %v8981_v52 = vld [vmem:[%s9963_s5 + $0x3d8] sm:$0xff] }
 0x60a   : >> { %10124 = vst [vmem:[#allocation83_spill] sm:$0xff] %v8981_v52 }
 0x60b   : >> { %5818 = vmatmul.msk.f32.gmra.mxu0 %vm2312_vm15, %v8603_v18  ;;  %5867 = vmatmul.msk.f32.gmra.mxu2 %vm2312_vm15, %v8585_v51  ;;  %v4224_v51 = vpop.permute.xlu1 %4223 }
 0x60c   : >> { %6025 = vmatpush.msk.msra.mxu1 %vm1110_vm9, %v4224_v51 }
 0x60d   : >> { %v8971_v45 = vpop.f32.mrf.mxu1 }
 0x60e   : >> { %v8983_v19 = vpop.f32.mrf.mxu2 }
 0x60f   : >> { %10125 = vst [vmem:[#allocation84_spill] sm:$0xff] %v8983_v19  ;;  %v9006_v19 = vld [vmem:[%s9963_s5 + $0x3e0] sm:$0xff] }
 0x610   : >> { %v8985_v56 = vpop.f32.mrf.mxu0  ;;  %5937 = vmatmul.msk.f32.gmra.mxu1 %vm2312_vm15, %v8976_v32  ;;  %5987 = vmatmul.msk.f32.gmra.mxu3 %vm2312_vm15, %v8981_v52  ;;  %10127 = vst [vmem:[#allocation86_spill] sm:$0xff] %v9006_v19 }
 0x611   : >> { %10126 = vst [vmem:[#allocation85_spill] sm:$0xff] %v8985_v56  ;;  %v9001_v56 = vld [vmem:[%s9963_s5 + $0x360] sm:$0xff] }
 0x613   : >> { %5819 = vmatmul.msk.f32.gmra.mxu0 %vm2312_vm15, %v8629_v54  ;;  %5868 = vmatmul.msk.f32.gmra.mxu2 %vm2312_vm15, %v8608_v55  ;;  %v9025_v54 = vld [vmem:[%s9963_s5 + $0x368] sm:$0xff] }
 0x615   : >> { %v8996_v18 = vpop.f32.mrf.mxu1 }
 0x616   : >> { %v9008_v52 = vpop.f32.mrf.mxu2 }
 0x617   : >> { %10128 = vst [vmem:[#allocation87_spill] sm:$0xff] %v9008_v52 }
 0x618   : >> { %v9010_v51 = vpop.f32.mrf.mxu0  ;;  %5938 = vmatmul.msk.f32.gmra.mxu1 %vm2312_vm15, %v9001_v56  ;;  %5988 = vmatmul.msk.f32.gmra.mxu3 %vm2312_vm15, %v9006_v19 }
 0x619   : >> { %10129 = vst [vmem:[#allocation88_spill] sm:$0xff] %v9010_v51  ;;  %v9030_v51 = vld [vmem:[%s9963_s5 + $0x3e8] sm:$0xff] }
 0x61a   : >> { %10130 = vst [vmem:[#allocation89_spill] sm:$0xff] %v9030_v51 }
 0x61b   : >> { %5820 = vmatmul.msk.f32.gmra.mxu0 %vm2312_vm15, %v8652_v59  ;;  %5869 = vmatmul.msk.f32.gmra.mxu2 %vm2312_vm15, %v8634_v24  ;;  %v9049_v59 = vld [vmem:[%s9963_s5 + $0x370] sm:$0xff] }
 0x61d   : >> { %v9020_v55 = vpop.f32.mrf.mxu1 }
 0x61e   : >> { %v9032_v52 = vpop.f32.mrf.mxu2 }
 0x61f   : >> { %10131 = vst [vmem:[#allocation90_spill] sm:$0xff] %v9032_v52 }
 0x620   : >> { %v9034_v19 = vpop.f32.mrf.mxu0  ;;  %5939 = vmatmul.msk.f32.gmra.mxu1 %vm2312_vm15, %v9025_v54  ;;  %5989 = vmatmul.msk.f32.gmra.mxu3 %vm2312_vm15, %v9030_v51 }
 0x621   : >> { %10132 = vst [vmem:[#allocation91_spill] sm:$0xff] %v9034_v19  ;;  %v9054_v19 = vld [vmem:[%s9963_s5 + $0x3f0] sm:$0xff] }
 0x622   : >> { %10134 = vst [vmem:[#allocation93_spill] sm:$0xff] %v9054_v19 }
 0x623   : >> { %5821 = vmatmul.msk.f32.gmra.mxu0 %vm2312_vm15, %v8677_v31  ;;  %5870 = vmatmul.msk.f32.gmra.mxu2 %vm2312_vm15, %v8657_v37  ;;  %v6569_v37 = vmov 0  }
 0x624   : >> { %6394 = vset.pattern.permute.xlu0 %v6569_v37  ;;  %6395 = vset.pattern.permute.xlu1 %v6569_v37 }
 0x625   : >> { %v9044_v24 = vpop.f32.mrf.mxu1  ;;  %4315 = vperm.xlu0 %6394, %v10137_v53   ;;  %4320 = vperm.xlu1 %6395, %v10138_v39   ;;  %v10141_v39 = vld [vmem:[#allocation22_spill] sm:$0xff] }
 0x626   : >> { %10133 = vst [vmem:[#allocation92_spill] sm:$0xff] %v9044_v24  ;;  %v9056_v52 = vpop.f32.mrf.mxu2  ;;  %6393 = vset.pattern.permute.xlu2 %v6569_v37  ;;  %v9100_v37 = vld [vmem:[%s9963_s5 + $0x400] sm:$0xff] }
 0x627   : >> { %10135 = vst [vmem:[#allocation94_spill] sm:$0xff] %v9056_v52  ;;  %v9071_v52 = vld [vmem:[%s9963_s5 + $0x378] sm:$0xff]  ;;  %4310 = vperm.xlu2 %6393, %v10139_v40   ;;  %v10144_v40 = vld [vmem:[#allocation8_spill] sm:$0xff] }
 0x628   : >> { %v3232_v51 = vpop.f32.mrf.mxu0  ;;  %5940 = vmatmul.msk.f32.gmra.mxu1 %vm2312_vm15, %v9049_v59  ;;  %5990 = vmatmul.msk.f32.gmra.mxu3 %vm2312_vm15, %v9054_v19  ;;  %v9076_v19 = vld [vmem:[%s9963_s5 + $0x3f8] sm:$0xff] }
 0x62b   : >> { %5871 = vmatmul.msk.f32.gmra.mxu2 %vm2312_vm15, %v8682_v16  ;;  %5909 = vmatmul.msk.f32.vlgmr.msrb.gmra.mxu0 %vm2312_vm15, %v8702_v35  ;;  %v2497_v35 = vadd.f32 %v7943_v17, %v8286_v1 }
 0x62d   : >> { %v9066_v31 = vpop.f32.mrf.mxu1  ;;  %v2815_v24 = vadd.f32 %v8660_v3, %v2497_v35  ;;  %4330 = vperm.xlu1 %6395, %v10140_v9   ;;  %4340 = vperm.xlu0 %6394, %v10141_v39  }
 0x62e   : >> { %10136 = vst [vmem:[#allocation95_spill] sm:$0xff] %v9066_v31  ;;  %v9080_v16 = vpop.f32.mrf.mxu2 }
 0x62f   : >> { %v3050_v53 = vadd.f32 %v8709_v50, %v2815_v24  ;;  %v10142_v50 = vld [vmem:[#allocation47_spill] sm:$0xff]  ;;  %v10143_v24 = vld [vmem:[#allocation32_spill] sm:$0xff]  ;;  %4325 = vperm.xlu2 %6393, %v10144_v40  }
 0x630   : >> { %v3235_v31 = vpop.f32.mrf.mxu0  ;;  %5941 = vmatmul.msk.f32.gmra.mxu1 %vm2312_vm15, %v9071_v52  ;;  %5991 = vmatmul.msk.f32.gmra.mxu3 %vm2312_vm15, %v9076_v19  ;;  %v2500_v35 = vadd.f32 %v10143_v24, %v10142_v50  ;;  %v9122_v40 = vld [vmem:[%s9963_s5 + $0x408] sm:$0xff]  ;;  %v10148_v24 = vld [vmem:[#allocation33_spill] sm:$0xff] }
 0x631   : >> { %v3280_v17 = vadd.f32 %v3232_v51, %v3050_v53 }
 0x633   : >> { %5910 = vmatmul.msk.f32.gmra.mxu0 %vm2312_vm15, %v8727_v34  ;;  %5959 = vmatmul.msk.f32.vlgmr.msrb.gmra.mxu2 %vm2312_vm15, %v8707_v42  ;;  %v2816_v42 = vadd.f32 %v8685_v61, %v2500_v35 }
 0x635   : >> { %v9095_v1 = vpop.f32.mrf.mxu1  ;;  %v3051_v51 = vadd.f32 %v8734_v58, %v2816_v42  ;;  %v10147_v58 = vld [vmem:[#allocation48_spill] sm:$0xff]  ;;  %v10149_v42 = vld [vmem:[#allocation21_spill] sm:$0xff] }
 0x636   : >> { %v3463_v3 = vpop.f32.mrf.mxu2  ;;  %v2503_v35 = vadd.f32 %v10148_v24, %v10147_v58  ;;  %v10151_v58 = vld [vmem:[#allocation28_spill] sm:$0xff]  ;;  %v10153_v24 = vld [vmem:[#allocation34_spill] sm:$0xff] }
 0x637   : >> { %v9106_v34 = vadd.f32 %v3463_v3, %v3280_v17  ;;  %v3281_v39 = vadd.f32 %v3235_v31, %v3051_v51  ;;  %v10145_v17 = vld [vmem:[#allocation23_spill] sm:$0xff]  ;;  %v10146_v3 = vld [vmem:[#allocation25_spill] sm:$0xff]  ;;  %4335 = vperm.xlu2 %6393, %v10149_v42   ;;  %v10154_v42 = vld [vmem:[#allocation24_spill] sm:$0xff] }
 0x638   : >> { %v3238_v53 = vpop.f32.mrf.mxu0  ;;  %6026 = vmatmul.msk.f32.vlgmr.msra.gmra.mxu1 %vm2312_vm15, %v9100_v37  ;;  %4345 = vperm.xlu1 %6395, %v10145_v17   ;;  %v2817_v31 = vadd.f32 %v8711_v41, %v2503_v35 }
 0x639   : >> { %4355 = vperm.xlu0 %6394, %v10146_v3  }
 0x63a   : >> { %v3052_v51 = vadd.f32 %v8759_v27, %v2817_v31  ;;  %v10152_v27 = vld [vmem:[#allocation49_spill] sm:$0xff] }
 0x63b   : >> { %5911 = vmatmul.msk.f32.gmra.mxu0 %vm2312_vm15, %v8752_v10  ;;  %5960 = vmatmul.msk.f32.gmra.mxu2 %vm2312_vm15, %v8732_v8  ;;  %v2506_v35 = vadd.f32 %v10153_v24, %v10152_v27  ;;  %v10158_v27 = vld [vmem:[#allocation35_spill] sm:$0xff] }
 0x63c   : >> { %v3282_v17 = vadd.f32 %v3238_v53, %v3052_v51 }
 0x63d   : >> { %v9117_v50 = vpop.f32.mrf.mxu1  ;;  %v2818_v53 = vadd.f32 %v8736_v13, %v2506_v35  ;;  %v10159_v35 = vld [vmem:[#allocation27_spill] sm:$0xff] }
 0x63e   : >> { %v3466_v61 = vpop.f32.mrf.mxu2 }
 0x63f   : >> { %v9128_v10 = vadd.f32 %v3466_v61, %v3281_v39  ;;  %v9144_v39 = vld [vmem:[%s9963_s5 + $0x410] sm:$0xff]  ;;  %v10150_v61 = vld [vmem:[#allocation26_spill] sm:$0xff]  ;;  %4350 = vperm.xlu2 %6393, %v10154_v42   ;;  %v3053_v31 = vadd.f32 %v8784_v46, %v2818_v53 }
 0x640   : >> { %v3241_v8 = vpop.f32.mrf.mxu0  ;;  %6027 = vmatmul.msk.f32.gmra.mxu1 %vm2312_vm15, %v9122_v40  ;;  %4360 = vperm.xlu1 %6395, %v10150_v61   ;;  %v10157_v46 = vld [vmem:[#allocation50_spill] sm:$0xff] }
 0x641   : >> { %4370 = vperm.xlu0 %6394, %v10151_v58   ;;  %v3283_v51 = vadd.f32 %v3241_v8, %v3053_v31  ;;  %v10155_v58 = vld [vmem:[#allocation29_spill] sm:$0xff]  ;;  %v2509_v24 = vadd.f32 %v10158_v27, %v10157_v46 }
 0x643   : >> { %5912 = vmatmul.msk.f32.gmra.mxu0 %vm2312_vm15, %v8777_v12  ;;  %5961 = vmatmul.msk.f32.gmra.mxu2 %vm2312_vm15, %v8757_v28  ;;  %v2819_v8 = vadd.f32 %v8761_v49, %v2509_v24 }
 0x645   : >> { %v9139_v3 = vpop.f32.mrf.mxu1  ;;  %v3054_v42 = vadd.f32 %v8809_v57, %v2819_v8  ;;  %v10162_v57 = vld [vmem:[#allocation30_spill] sm:$0xff] }
 0x646   : >> { %v3469_v41 = vpop.f32.mrf.mxu2 }
 0x647   : >> { %v9150_v12 = vadd.f32 %v3469_v41, %v3282_v17  ;;  %v9166_v17 = vld [vmem:[%s9963_s5 + $0x418] sm:$0xff]  ;;  %v10156_v41 = vld [vmem:[#allocation31_spill] sm:$0xff]  ;;  %4365 = vperm.xlu2 %6393, %v10159_v35   ;;  %v9208_v35 = vld [vmem:[%s9963_s5 + $0x428] sm:$0xff] }
 0x648   : >> { %v3244_v28 = vpop.f32.mrf.mxu0  ;;  %6028 = vmatmul.msk.f32.gmra.mxu1 %vm2312_vm15, %v9144_v39  ;;  %4375 = vperm.xlu1 %6395, %v10155_v58  }
 0x649   : >> { %4385 = vperm.xlu0 %6394, %v10156_v41   ;;  %v3284_v53 = vadd.f32 %v3244_v28, %v3054_v42  ;;  %v10160_v41 = vld [vmem:[#allocation51_spill] sm:$0xff]  ;;  %v10163_v42 = vld [vmem:[#allocation52_spill] sm:$0xff] }
 0x64b   : >> { %5913 = vmatmul.msk.f32.gmra.mxu0 %vm2312_vm15, %v8802_v15  ;;  %5962 = vmatmul.msk.f32.gmra.mxu2 %vm2312_vm15, %v8782_v0 }
 0x64d   : >> { %v9161_v61 = vpop.f32.mrf.mxu1 }
 0x64e   : >> { %v3472_v13 = vpop.f32.mrf.mxu2 }
 0x64f   : >> { %v9172_v15 = vadd.f32 %v3472_v13, %v3283_v51  ;;  %v9188_v51 = vld [vmem:[%s9963_s5 + $0x420] sm:$0xff]  ;;  %v10161_v13 = vld [vmem:[#allocation36_spill] sm:$0xff]  ;;  %4380 = vperm.xlu2 %6393, %v10162_v57  }
 0x650   : >> { %v3247_v0 = vpop.f32.mrf.mxu0  ;;  %6029 = vmatmul.msk.f32.gmra.mxu1 %vm2312_vm15, %v9166_v17  ;;  %v2512_v49 = vadd.f32 %v10161_v13, %v10160_v41 }
 0x653   : >> { %5914 = vmatmul.msk.f32.gmra.mxu0 %vm2312_vm15, %v8827_v7  ;;  %5963 = vmatmul.msk.f32.gmra.mxu2 %vm2312_vm15, %v8807_v25  ;;  %v2820_v25 = vadd.f32 %v8786_v44, %v2512_v49  ;;  %v9227_v49 = vld [vmem:[%s9963_s5 + $0x430] sm:$0xff] }
 0x655   : >> { %v9183_v31 = vpop.f32.mrf.mxu1  ;;  %v3055_v28 = vadd.f32 %v8834_v6, %v2820_v25  ;;  %v10165_v25 = vld [vmem:[#allocation53_spill] sm:$0xff] }
 0x656   : >> { %v3475_v58 = vpop.f32.mrf.mxu2 }
 0x657   : >> { %v9192_v46 = vadd.f32 %v3475_v58, %v3284_v53  ;;  %v3285_v27 = vadd.f32 %v3247_v0, %v3055_v28  ;;  %v10164_v53 = vld [vmem:[#allocation37_spill] sm:$0xff]  ;;  %v3572_v0 = vpop.f32.mrf.mxu3 }
 0x658   : >> { %v3250_v7 = vpop.f32.mrf.mxu0  ;;  %6030 = vmatmul.msk.f32.gmra.mxu1 %vm2312_vm15, %v9188_v51  ;;  %v2515_v44 = vadd.f32 %v10164_v53, %v10163_v42  ;;  %v9248_v53 = vld [vmem:[%s9963_s5 + $0x438] sm:$0xff] }
 0x65b   : >> { %5915 = vmatmul.msk.f32.gmra.mxu0 %vm2312_vm15, %v8852_v11  ;;  %5964 = vmatmul.msk.f32.gmra.mxu2 %vm2312_vm15, %v8832_v30  ;;  %v2821_v30 = vadd.f32 %v8811_v60, %v2515_v44  ;;  %v10166_v60 = vld [vmem:[#allocation38_spill] sm:$0xff] }
 0x65c   : >> { %v2518_v28 = vadd.f32 %v10166_v60, %v10165_v25  ;;  %v9299_v60 = vld [vmem:[%s9963_s5 + $0x450] sm:$0xff] }
 0x65d   : >> { %v9203_v24 = vpop.f32.mrf.mxu1  ;;  %v3056_v11 = vadd.f32 %v8859_v29, %v2821_v30 }
 0x65e   : >> { %v3478_v8 = vpop.f32.mrf.mxu2 }
 0x65f   : >> { %v9212_v58 = vadd.f32 %v3478_v8, %v3285_v27  ;;  %v3286_v41 = vadd.f32 %v3250_v7, %v3056_v11  ;;  %v3575_v7 = vpop.f32.mrf.mxu3 }
 0x660   : >> { %v3253_v6 = vpop.f32.mrf.mxu0  ;;  %6031 = vmatmul.msk.f32.gmra.mxu1 %vm2312_vm15, %v9208_v35 }
 0x663   : >> { %5916 = vmatmul.msk.f32.gmra.mxu0 %vm2312_vm15, %v8877_v20  ;;  %5965 = vmatmul.msk.f32.gmra.mxu2 %vm2312_vm15, %v8857_v23  ;;  %v2822_v23 = vadd.f32 %v8836_v43, %v2518_v28 }
 0x665   : >> { %v9222_v13 = vpop.f32.mrf.mxu1  ;;  %v3057_v20 = vadd.f32 %v8884_v21, %v2822_v23 }
 0x666   : >> { %v3481_v57 = vpop.f32.mrf.mxu2 }
 0x667   : >> { %v9231_v29 = vadd.f32 %v3481_v57, %v3286_v41  ;;  %v3287_v8 = vadd.f32 %v3253_v6, %v3057_v20  ;;  %v9265_v6 = vld [vmem:[%s9963_s5 + $0x440] sm:$0xff]  ;;  %v3578_v41 = vpop.f32.mrf.mxu3 }
 0x668   : >> { %v9233_v27 = vpop.f32.mrf.mxu0  ;;  %6032 = vmatmul.msk.f32.gmra.mxu1 %vm2312_vm15, %v9227_v49 }
 0x66b   : >> { %5917 = vmatmul.msk.f32.gmra.mxu0 %vm2312_vm15, %v8904_v63  ;;  %5966 = vmatmul.msk.f32.gmra.mxu2 %vm2312_vm15, %v8882_v14  ;;  %v3373_v14 = vadd.f32 %v8899_v62, %v8529_v22  ;;  %v3374_v22 = vadd.f32 %v8923_v4, %v8552_v36  ;;  %v3375_v4 = vadd.f32 %v8947_v48, %v8575_v33  ;;  %v10170_v33 = vld [vmem:[#allocation60_spill] sm:$0xff] }
 0x66c   : >> { %v3376_v48 = vadd.f32 %v8971_v45, %v10170_v33  ;;  %v10173_v45 = vld [vmem:[#allocation62_spill] sm:$0xff]  ;;  %v9350_v33 = vld [vmem:[%s9963_s5 + $0x468] sm:$0xff] }
 0x66d   : >> { %v9243_v42 = vpop.f32.mrf.mxu1  ;;  %v3604_v63 = vadd.f32 %v3572_v0, %v3373_v14  ;;  %v3605_v62 = vadd.f32 %v3575_v7, %v3374_v22 }
 0x66e   : >> { %v3484_v44 = vpop.f32.mrf.mxu2 }
 0x66f   : >> { %v9250_v30 = vadd.f32 %v3484_v44, %v3287_v8  ;;  %v3581_v36 = vpop.f32.mrf.mxu3  ;;  %v9316_v8 = vld [vmem:[%s9963_s5 + $0x458] sm:$0xff] }
 0x670   : >> { %v9252_v43 = vpop.f32.mrf.mxu0  ;;  %6033 = vmatmul.msk.f32.gmra.mxu1 %vm2312_vm15, %v9248_v53  ;;  %v3607_v20 = vadd.f32 %v3581_v36, %v3376_v48 }
 0x673   : >> { %5918 = vmatmul.msk.f32.gmra.mxu0 %vm2312_vm15, %v8928_v2  ;;  %5967 = vmatmul.msk.f32.gmra.mxu2 %vm2312_vm15, %v8909_v47  ;;  %v9282_v2 = vld [vmem:[%s9963_s5 + $0x448] sm:$0xff] }
 0x675   : >> { %v3806_v21 = vpop.f32.mrf.mxu1 }
 0x676   : >> { %v9267_v11 = vadd.f32 %v3806_v21, %v3604_v63  ;;  %v10174_v63 = vld [vmem:[#allocation86_spill] sm:$0xff] }
 0x678   : >> { %10167 = vst [vmem:[#allocation47_spill] sm:$0xff] %v9267_v11  ;;  %v9269_v57 = vpop.f32.mrf.mxu0  ;;  %6034 = vmatmul.msk.f32.gmra.mxu1 %vm2312_vm15, %v9265_v6 }
 0x67b   : >> { %5919 = vmatmul.msk.f32.gmra.mxu0 %vm2312_vm15, %v8952_v38  ;;  %5968 = vmatmul.msk.f32.gmra.mxu2 %vm2312_vm15, %v8933_v5  ;;  %v3606_v5 = vadd.f32 %v3578_v41, %v3375_v4  ;;  %v10177_v4 = vld [vmem:[#allocation89_spill] sm:$0xff] }
 0x67d   : >> { %v3809_v47 = vpop.f32.mrf.mxu1 }
 0x67e   : >> { %v9284_v0 = vadd.f32 %v3809_v47, %v3605_v62  ;;  %v9333_v62 = vld [vmem:[%s9963_s5 + $0x460] sm:$0xff] }
 0x680   : >> { %10168 = vst [vmem:[#allocation32_spill] sm:$0xff] %v9284_v0  ;;  %v9286_v25 = vpop.f32.mrf.mxu0  ;;  %6035 = vmatmul.msk.f32.gmra.mxu1 %vm2312_vm15, %v9282_v2 }
 0x683   : >> { %5920 = vmatmul.msk.f32.gmra.mxu0 %vm2312_vm15, %v8976_v32  ;;  %5969 = vmatmul.msk.f32.gmra.mxu2 %vm2312_vm15, %v8957_v26  ;;  %v3584_v32 = vpop.f32.mrf.mxu3  ;;  %v10171_v26 = vld [vmem:[#allocation83_spill] sm:$0xff] }
 0x685   : >> { %v3812_v38 = vpop.f32.mrf.mxu1 }
 0x686   : >> { %v9301_v28 = vadd.f32 %v3812_v38, %v3606_v5 }
 0x688   : >> { %10169 = vst [vmem:[#allocation48_spill] sm:$0xff] %v9301_v28  ;;  %v9303_v23 = vpop.f32.mrf.mxu0  ;;  %6036 = vmatmul.msk.f32.gmra.mxu1 %vm2312_vm15, %v9299_v60  ;;  %v10201_v28 = vld [vmem:[#allocation75_spill] sm:$0xff] }
 0x68b   : >> { %5921 = vmatmul.msk.f32.gmra.mxu0 %vm2312_vm15, %v9001_v56  ;;  %5970 = vmatmul.msk.f32.gmra.mxu2 %vm2312_vm15, %v10171_v26  ;;  %v3377_v56 = vadd.f32 %v8996_v18, %v10173_v45  ;;  %v3587_v41 = vpop.f32.mrf.mxu3  ;;  %v10176_v18 = vld [vmem:[#allocation64_spill] sm:$0xff] }
 0x68d   : >> { %v3815_v7 = vpop.f32.mrf.mxu1  ;;  %v3608_v21 = vadd.f32 %v3584_v32, %v3377_v56 }
 0x68e   : >> { %v9318_v44 = vadd.f32 %v3815_v7, %v3607_v20  ;;  %v10181_v7 = vld [vmem:[#allocation93_spill] sm:$0xff] }
 0x690   : >> { %10172 = vst [vmem:[#allocation33_spill] sm:$0xff] %v9318_v44  ;;  %v9320_v14 = vpop.f32.mrf.mxu0  ;;  %6037 = vmatmul.msk.f32.gmra.mxu1 %vm2312_vm15, %v9316_v8 }
 0x693   : >> { %5922 = vmatmul.msk.f32.gmra.mxu0 %vm2312_vm15, %v9025_v54  ;;  %5971 = vmatmul.msk.f32.gmra.mxu2 %vm2312_vm15, %v10174_v63  ;;  %v3378_v54 = vadd.f32 %v9020_v55, %v10176_v18  ;;  %v3590_v32 = vpop.f32.mrf.mxu3  ;;  %v10179_v55 = vld [vmem:[#allocation65_spill] sm:$0xff]  ;;  %v10183_v18 = vld [vmem:[#allocation66_spill] sm:$0xff] }
 0x694   : >> { %v9367_v63 = vld [vmem:[%s9963_s5 + $0x470] sm:$0xff] }
 0x695   : >> { %v3818_v22 = vpop.f32.mrf.mxu1  ;;  %v3609_v5 = vadd.f32 %v3587_v41, %v3378_v54 }
 0x696   : >> { %v9335_v47 = vadd.f32 %v3818_v22, %v3608_v21 }
 0x698   : >> { %10175 = vst [vmem:[#allocation49_spill] sm:$0xff] %v9335_v47  ;;  %v9337_v36 = vpop.f32.mrf.mxu0  ;;  %6038 = vmatmul.msk.f32.gmra.mxu1 %vm2312_vm15, %v9333_v62 }
 0x69b   : >> { %5923 = vmatmul.msk.f32.gmra.mxu0 %vm2312_vm15, %v9049_v59  ;;  %5972 = vmatmul.msk.f32.gmra.mxu2 %vm2312_vm15, %v10177_v4  ;;  %v10180_v59 = vld [vmem:[#allocation92_spill] sm:$0xff]  ;;  %v3593_v22 = vpop.f32.mrf.mxu3 }
 0x69c   : >> { %v3379_v20 = vadd.f32 %v10180_v59, %v10179_v55 }
 0x69d   : >> { %v3821_v38 = vpop.f32.mrf.mxu1 }
 0x69e   : >> { %v9352_v48 = vadd.f32 %v3821_v38, %v3609_v5  ;;  %v3610_v45 = vadd.f32 %v3590_v32, %v3379_v20  ;;  %v9384_v38 = vld [vmem:[%s9963_s5 + $0x478] sm:$0xff]  ;;  %v10186_v20 = vld [vmem:[#allocation9_spill] sm:$0xff] }
 0x6a0   : >> { %10178 = vst [vmem:[#allocation34_spill] sm:$0xff] %v9352_v48  ;;  %v9354_v26 = vpop.f32.mrf.mxu0  ;;  %6039 = vmatmul.msk.f32.gmra.mxu1 %vm2312_vm15, %v9350_v33 }
 0x6a3   : >> { %5924 = vmatmul.msk.f32.gmra.mxu0 %vm2312_vm15, %v9071_v52  ;;  %5973 = vmatmul.msk.f32.gmra.mxu2 %vm2312_vm15, %v10181_v7  ;;  %v10184_v52 = vld [vmem:[#allocation95_spill] sm:$0xff] }
 0x6a4   : >> { %v3380_v54 = vadd.f32 %v10184_v52, %v10183_v18  ;;  %v10187_v7 = vld [vmem:[#allocation11_spill] sm:$0xff] }
 0x6a5   : >> { %v3824_v56 = vpop.f32.mrf.mxu1  ;;  %vm10188_vm6 = vcmp.eq.s32.totalorder %v10186_v20, %v10187_v7 }
 0x6a6   : >> { %v9369_v21 = vadd.f32 %v3824_v56, %v3610_v45  ;;  %v3611_v4 = vadd.f32 %v3593_v22, %v3380_v54  ;;  %v10189_v45 = vld [vmem:[#allocation16_spill] sm:$0xff] }
 0x6a7   : >> { %vm10190_vm7 = vcmp.eq.s32.totalorder %v10186_v20, %v10189_v45  ;;  %v10195_v56 = vld [vmem:[#allocation54_spill] sm:$0xff] }
 0x6a8   : >> { %10182 = vst [vmem:[#allocation50_spill] sm:$0xff] %v9369_v21  ;;  %v9371_v41 = vpop.f32.mrf.mxu0  ;;  %6040 = vmatmul.msk.f32.gmra.mxu1 %vm2312_vm15, %v9367_v63  ;;  %v10200_v21 = vld [vmem:[#allocation40_spill] sm:$0xff] }
 0x6ab   : >> { %5974 = vmatmul.msk.f32.gmra.mxu2 %vm2312_vm15, %v9076_v19  ;;  %6009 = vmatmul.msk.f32.vlgmr.msra.gmra.mxu0 %vm2312_vm15, %v9100_v37  ;;  %v3487_v19 = vpop.f32.mrf.mxu2  ;;  %v6570_v37 = vmov 1.0  }
 0x6ac   : >> { %6043 = vmatpush.msk.msra.mxu2 %vm10188_vm6, %v6570_v37  ;;  %6063 = vmatpush.msk.msra.mxu3 %vm10190_vm7, %v6570_v37 }
 0x6ad   : >> { %v3827_v5 = vpop.f32.mrf.mxu1 }
 0x6ae   : >> { %v9386_v32 = vadd.f32 %v3827_v5, %v3611_v4  ;;  %6044 = vmatpush.msk.msra.mxu2 %vm6696_vm1, %v6570_v37  ;;  %6064 = vmatpush.msk.msra.mxu3 %vm6752_vm4, %v6570_v37 }
 0x6b0   : >> { %10185 = vst [vmem:[#allocation35_spill] sm:$0xff] %v9386_v32  ;;  %v9388_v55 = vpop.f32.mrf.mxu0  ;;  %6041 = vmatmul.msk.f32.gmra.mxu1 %vm2312_vm15, %v9384_v38  ;;  %6045 = vmatpush.msk.msra.mxu2 %vm6691_vm0, %v6570_v37  ;;  %v10199_v32 = vld [vmem:[#allocation55_spill] sm:$0xff] }
 0x6b1   : >> { %6065 = vmatpush.msk.msra.mxu3 %vm6747_vm2, %v6570_v37  ;;  %v2524_v48 = vadd.f32 %v10200_v21, %v10199_v32  ;;  %v10205_v21 = vld [vmem:[#allocation78_spill] sm:$0xff] }
 0x6b3   : >> { %6010 = vmatmul.msk.f32.gmra.mxu0 %vm2312_vm15, %v9122_v40  ;;  %v3490_v40 = vpop.f32.mrf.mxu2  ;;  %v2824_v0 = vadd.f32 %v10201_v28, %v2524_v48  ;;  %v10206_v28 = vld [vmem:[#allocation81_spill] sm:$0xff] }
 0x6b8   : >> { %v9394_v59 = vpop.f32.mrf.mxu0 }
 0x6bb   : >> { %6011 = vmatmul.msk.f32.gmra.mxu0 %vm2312_vm15, %v9144_v39  ;;  %v3493_v4 = vpop.f32.mrf.mxu2  ;;  %v10197_v39 = vld [vmem:[#allocation73_spill] sm:$0xff] }
 0x6c0   : >> { %v9408_v18 = vpop.f32.mrf.mxu0 }
 0x6c3   : >> { %6012 = vmatmul.msk.f32.gmra.mxu0 %vm2312_vm15, %v9166_v17  ;;  %v3496_v7 = vpop.f32.mrf.mxu2  ;;  %v10196_v17 = vld [vmem:[#allocation39_spill] sm:$0xff] }
 0x6c4   : >> { %v2521_v22 = vadd.f32 %v10196_v17, %v10195_v56  ;;  %v10202_v17 = vld [vmem:[#allocation79_spill] sm:$0xff] }
 0x6c5   : >> { %v3059_v11 = vadd.f32 %v10202_v17, %v2824_v0 }
 0x6c6   : >> { %v2823_v9 = vadd.f32 %v10197_v39, %v2521_v22  ;;  %v10204_v22 = vld [vmem:[#allocation41_spill] sm:$0xff] }
 0x6c8   : >> { %v9416_v54 = vpop.f32.mrf.mxu0 }
 0x6cb   : >> { %6013 = vmatmul.msk.f32.gmra.mxu0 %vm2312_vm15, %v9188_v51  ;;  %v3499_v37 = vpop.f32.mrf.mxu2  ;;  %v10198_v51 = vld [vmem:[#allocation77_spill] sm:$0xff] }
 0x6cc   : >> { %v3058_v20 = vadd.f32 %v10198_v51, %v2823_v9  ;;  %v3289_v9 = vadd.f32 %v9252_v43, %v3059_v11 }
 0x6d0   : >> { %v9420_v5 = vpop.f32.mrf.mxu0 }
 0x6d3   : >> { %6014 = vmatmul.msk.f32.gmra.mxu0 %vm2312_vm15, %v9208_v35  ;;  %v3288_v35 = vadd.f32 %v9233_v27, %v3058_v20  ;;  %v3520_v20 = vadd.f32 %v3490_v40, %v3289_v9  ;;  %v10210_v9 = vld [vmem:[#allocation84_spill] sm:$0xff] }
 0x6d5   : >> { %v3519_v47 = vadd.f32 %v3487_v19, %v3288_v35  ;;  %v10209_v35 = vld [vmem:[#allocation80_spill] sm:$0xff] }
 0x6d8   : >> { %v9424_v45 = vpop.f32.mrf.mxu0 }
 0x6db   : >> { %6015 = vmatmul.msk.f32.gmra.mxu0 %vm2312_vm15, %v9227_v49  ;;  %v3502_v49 = vpop.f32.mrf.mxu2 }
 0x6e0   : >> { %v9430_v52 = vpop.f32.mrf.mxu0 }
 0x6e3   : >> { %6016 = vmatmul.msk.f32.gmra.mxu0 %vm2312_vm15, %v9248_v53  ;;  %v10203_v53 = vld [vmem:[#allocation56_spill] sm:$0xff]  ;;  %v3505_v51 = vpop.f32.mrf.mxu2 }
 0x6e4   : >> { %v2527_v27 = vadd.f32 %v10204_v22, %v10203_v53 }
 0x6e6   : >> { %v2825_v32 = vadd.f32 %v10205_v21, %v2527_v27  ;;  %v4013_v21 = vpop.f32.mrf.mxu3 }
 0x6e8   : >> { %v3722_v44 = vpop.f32.mrf.mxu0 }
 0x6e9   : >> { %v9440_v56 = vadd.f32 %v3722_v44, %v3519_v47  ;;  %v3060_v44 = vadd.f32 %v10206_v28, %v2825_v32  ;;  %v10208_v47 = vld [vmem:[#allocation42_spill] sm:$0xff] }
 0x6eb   : >> { %6017 = vmatmul.msk.f32.gmra.mxu0 %vm2312_vm15, %v9265_v6  ;;  %v3290_v0 = vadd.f32 %v9269_v57, %v3060_v44  ;;  %v10207_v6 = vld [vmem:[#allocation57_spill] sm:$0xff]  ;;  %v3508_v22 = vpop.f32.mrf.mxu2 }
 0x6ec   : >> { %v2530_v43 = vadd.f32 %v10208_v47, %v10207_v6  ;;  %v10214_v6 = vld [vmem:[#allocation87_spill] sm:$0xff] }
 0x6ed   : >> { %v3521_v11 = vadd.f32 %v3493_v4, %v3290_v0  ;;  %v10213_v4 = vld [vmem:[#allocation82_spill] sm:$0xff]  ;;  %v4244_v0 = vpop.f32.mrf.mxu1 }
 0x6ee   : >> { %v2826_v40 = vadd.f32 %v10209_v35, %v2530_v43 }
 0x6f0   : >> { %v3725_v39 = vpop.f32.mrf.mxu0  ;;  %v3061_v53 = vadd.f32 %v10210_v9, %v2826_v40  ;;  %v10217_v40 = vld [vmem:[#allocation85_spill] sm:$0xff] }
 0x6f1   : >> { %v9449_v19 = vadd.f32 %v3725_v39, %v3520_v20  ;;  %v10212_v20 = vld [vmem:[#allocation43_spill] sm:$0xff] }
 0x6f2   : >> { %v3291_v27 = vadd.f32 %v9286_v25, %v3061_v53  ;;  %v10215_v25 = vld [vmem:[#allocation59_spill] sm:$0xff] }
 0x6f3   : >> { %6018 = vmatmul.msk.f32.gmra.mxu0 %vm2312_vm15, %v9282_v2  ;;  %v10211_v2 = vld [vmem:[#allocation58_spill] sm:$0xff]  ;;  %v3928_v43 = vpop.f32.mrf.mxu2 }
 0x6f4   : >> { %v2533_v57 = vadd.f32 %v10212_v20, %v10211_v2  ;;  %v3522_v39 = vadd.f32 %v3496_v7, %v3291_v27  ;;  %v4016_v27 = vpop.f32.mrf.mxu3  ;;  %v10218_v2 = vld [vmem:[#allocation90_spill] sm:$0xff] }
 0x6f6   : >> { %v2827_v28 = vadd.f32 %v10213_v4, %v2533_v57  ;;  %v4247_v57 = vpop.f32.mrf.mxu1 }
 0x6f8   : >> { %v3728_v48 = vpop.f32.mrf.mxu0  ;;  %v3062_v47 = vadd.f32 %v10214_v6, %v2827_v28  ;;  %v10221_v6 = vld [vmem:[#allocation88_spill] sm:$0xff] }
 0x6f9   : >> { %v9458_v17 = vadd.f32 %v3728_v48, %v3521_v11  ;;  %v10216_v11 = vld [vmem:[#allocation44_spill] sm:$0xff] }
 0x6fa   : >> { %v2536_v48 = vadd.f32 %v10216_v11, %v10215_v25  ;;  %v10222_v25 = vld [vmem:[#allocation94_spill] sm:$0xff] }
 0x6fb   : >> { %6019 = vmatmul.msk.f32.gmra.mxu0 %vm2312_vm15, %v9299_v60  ;;  %v3292_v60 = vadd.f32 %v9303_v23, %v3062_v47  ;;  %v10219_v23 = vld [vmem:[#allocation61_spill] sm:$0xff]  ;;  %v3931_v28 = vpop.f32.mrf.mxu2 }
 0x6fc   : >> { %v2828_v9 = vadd.f32 %v10217_v40, %v2536_v48  ;;  %v4019_v48 = vpop.f32.mrf.mxu3 }
 0x6fd   : >> { %v3523_v35 = vadd.f32 %v3499_v37, %v3292_v60 }
 0x6fe   : >> { %v3063_v20 = vadd.f32 %v10218_v2, %v2828_v9  ;;  %v10225_v2 = vld [vmem:[#allocation91_spill] sm:$0xff] }
 0x700   : >> { %v3731_v32 = vpop.f32.mrf.mxu0 }
 0x701   : >> { %v9467_v44 = vadd.f32 %v3731_v32, %v3522_v39  ;;  %v10220_v39 = vld [vmem:[#allocation45_spill] sm:$0xff] }
 0x702   : >> { %v2539_v32 = vadd.f32 %v10220_v39, %v10219_v23 }
 0x703   : >> { %6020 = vmatmul.msk.f32.gmra.mxu0 %vm2312_vm15, %v9316_v8  ;;  %v3293_v8 = vadd.f32 %v9320_v14, %v3063_v20  ;;  %v10223_v14 = vld [vmem:[#allocation63_spill] sm:$0xff]  ;;  %v3934_v23 = vpop.f32.mrf.mxu2 }
 0x704   : >> { %v2829_v47 = vadd.f32 %v10221_v6, %v2539_v32  ;;  %v10226_v32 = vld [vmem:[#allocation67_spill] sm:$0xff] }
 0x705   : >> { %v3524_v4 = vadd.f32 %v3502_v49, %v3293_v8 }
 0x706   : >> { %v3064_v11 = vadd.f32 %v10222_v25, %v2829_v47 }
 0x708   : >> { %v3734_v7 = vpop.f32.mrf.mxu0 }
 0x709   : >> { %v9476_v53 = vadd.f32 %v3734_v7, %v3523_v35  ;;  %v4250_v35 = vpop.f32.mrf.mxu1  ;;  %v10224_v7 = vld [vmem:[#allocation46_spill] sm:$0xff] }
 0x70a   : >> { %v2542_v40 = vadd.f32 %v10224_v7, %v10223_v14  ;;  %v10227_v14 = vld [vmem:[#allocation68_spill] sm:$0xff] }
 0x70b   : >> { %6021 = vmatmul.msk.f32.gmra.mxu0 %vm2312_vm15, %v9333_v62  ;;  %v3294_v62 = vadd.f32 %v9337_v36, %v3064_v11  ;;  %v3830_v36 = vadd.f32 %v9095_v1, %v10226_v32  ;;  %v3831_v1 = vadd.f32 %v9117_v50, %v10227_v14  ;;  %v10229_v14 = vld [vmem:[#allocation70_spill] sm:$0xff] }
 0x70c   : >> { %v2830_v20 = vadd.f32 %v10225_v2, %v2542_v40 }
 0x70d   : >> { %v3525_v9 = vadd.f32 %v3505_v51, %v3294_v62  ;;  %v4061_v6 = vadd.f32 %v4013_v21, %v3830_v36  ;;  %v4311_v62 = vpop.permute.xlu2 %4310  ;;  %v4062_v40 = vadd.f32 %v4016_v27, %v3831_v1 }
 0x70e   : >> { %v3065_v39 = vadd.f32 %v9080_v16, %v2830_v20  ;;  %v9506_v16 = vpop.f32.mrf.mxu2  ;;  %v4316_v20 = vpop.permute.xlu0 %4315 }
 0x70f   : >> { %v4292_v11 = vadd.f32 %v4244_v0, %v4061_v6 }
 0x710   : >> { %v3737_v37 = vpop.f32.mrf.mxu0 }
 0x711   : >> { %v9485_v60 = vadd.f32 %v3737_v37, %v3524_v4  ;;  %v4022_v4 = vpop.f32.mrf.mxu3  ;;  %v4253_v51 = vpop.f32.mrf.mxu1 }
 0x713   : >> { %6022 = vmatmul.msk.f32.gmra.mxu0 %vm2312_vm15, %v9350_v33  ;;  %v3295_v33 = vadd.f32 %v9354_v26, %v3065_v39  ;;  %v3746_v26 = vadd.f32 %v9371_v41, %v9106_v34  ;;  %v3747_v34 = vadd.f32 %v9388_v55, %v9128_v10  ;;  %v10228_v39 = vld [vmem:[#allocation69_spill] sm:$0xff] }
 0x714   : >> { %v3832_v50 = vadd.f32 %v9139_v3, %v10228_v39  ;;  %v10230_v39 = vld [vmem:[#allocation71_spill] sm:$0xff] }
 0x715   : >> { %v3526_v37 = vadd.f32 %v3508_v22, %v3295_v33  ;;  %v3976_v22 = vadd.f32 %v3928_v43, %v3746_v26  ;;  %v3977_v27 = vadd.f32 %v3931_v28, %v3747_v34  ;;  %v3748_v28 = vadd.f32 %v9394_v59, %v9150_v12 }
 0x716   : >> { %v9520_v33 = vpop.f32.mrf.mxu2 }
 0x718   : >> { %v3740_v49 = vpop.f32.mrf.mxu0 }
 0x719   : >> { %v9494_v8 = vadd.f32 %v3740_v49, %v3525_v9  ;;  %v9512_v21 = vpop.f32.mrf.mxu3  ;;  %v9514_v49 = vpop.f32.mrf.mxu1 }
 0x71b   : >> { %6023 = vmatmul.msk.f32.gmra.mxu0 %vm2312_vm15, %v9367_v63  ;;  %v4404_v63 = vadd.f32 %v4311_v62, %v4292_v11 }
 0x71d   : >> { %v4484_v0 = vmul.f32 0.01, %v4404_v63  ;;  %vm4468_vm3 = vcmp.ge.f32.partialorder %v4404_v63, 0.0 }
 0x71f   : >> { %v4500_v43 = vsel %vm4468_vm3, %v4404_v63, %v4484_v0 }
 0x720   : >> { %v3743_v47 = vpop.f32.mrf.mxu0 }
 0x721   : >> { %v9502_v25 = vadd.f32 %v3743_v47, %v3526_v37  ;;  %v9522_v11 = vpop.f32.mrf.mxu3  ;;  %v4259_v26 = vpop.f32.mrf.mxu1 }
 0x723   : >> { %6024 = vmatmul.msk.f32.gmra.mxu0 %vm2312_vm15, %v9384_v38  ;;  %v4293_v38 = vadd.f32 %v4247_v57, %v4062_v40  ;;  %v4063_v57 = vadd.f32 %v4019_v48, %v3832_v50  ;;  %v3833_v48 = vadd.f32 %v9161_v61, %v10229_v14  ;;  %v3749_v61 = vadd.f32 %v9408_v18, %v9172_v15 }
 0x724   : >> { %v3834_v50 = vadd.f32 %v9183_v31, %v10230_v39 }
 0x725   : >> { %v4405_v32 = vadd.f32 %v4316_v20, %v4293_v38  ;;  %v4294_v55 = vadd.f32 %v4250_v35, %v4063_v57  ;;  %v4064_v35 = vadd.f32 %v4022_v4, %v3833_v48 }
 0x727   : >> { %v4485_v10 = vmul.f32 0.01, %v4405_v32  ;;  %vm4469_vm12 = vcmp.ge.f32.partialorder %v4405_v32, 0.0  ;;  %v4295_v12 = vadd.f32 %v4253_v51, %v4064_v35 }
 0x728   : >> { %v4159_v7 = vpop.f32.mrf.mxu0 }
 0x729   : >> { %v4207_v9 = vadd.f32 %v4159_v7, %v3976_v22  ;;  %v4501_v1 = vsel %vm4469_vm12, %v4405_v32, %v4485_v10  ;;  %v3978_v22 = vadd.f32 %v3934_v23, %v3748_v28  ;;  %v4031_v34 = vpop.f32.mrf.mxu3  ;;  %v4262_v4 = vpop.f32.mrf.mxu1 }
 0x72b   : >> { %v4388_v2 = vadd.f32 %v4311_v62, %v4207_v9  ;;  %v4321_v62 = vpop.permute.xlu1 %4320  ;;  %v3943_v9 = vpop.f32.mrf.mxu2 }
 0x72c   : >> { %v4406_v7 = vadd.f32 %v4321_v62, %v4294_v55 }
 0x72d   : >> { %vm4420_vm5 = vcmp.ge.f32.partialorder %v4388_v2, 0.0  ;;  %v4436_v41 = vmul.f32 0.01, %v4388_v2 }
 0x72e   : >> { %vm4470_vm14 = vcmp.ge.f32.partialorder %v4406_v7, 0.0 }
 0x72f   : >> { %v4452_v36 = vsel %vm4420_vm5, %v4388_v2, %v4436_v41  ;;  %v4326_v41 = vpop.permute.xlu2 %4325 }
 0x730   : >> { %v4516_v37 = vmax.f32 %v4452_v36, %v4500_v43  ;;  %v4162_v6 = vpop.f32.mrf.mxu0  ;;  %v4407_v32 = vadd.f32 %v4326_v41, %v4295_v12 }
 0x731   : >> { %v4208_v47 = vadd.f32 %v4162_v6, %v3977_v27  ;;  %v3979_v27 = vadd.f32 %v9506_v16, %v3749_v61  ;;  %v4065_v6 = vadd.f32 %v9512_v21, %v3834_v50  ;;  %v3750_v16 = vadd.f32 %v9416_v54, %v9192_v46 }
 0x732   : >> { %6046 = vmatmul.msk.f32.vlgmr.msra.gmra.mxu2 %vm4532_vm8, %v4516_v37  ;;  %6066 = vmatmul.msk.f32.vlgmr.msra.gmra.mxu3 %vm4532_vm8, %v4516_v37  ;;  %v4487_v15 = vmul.f32 0.01, %v4407_v32  ;;  %vm4471_vm6 = vcmp.ge.f32.partialorder %v4407_v32, 0.0 }
 0x733   : >> { %v4389_v3 = vadd.f32 %v4316_v20, %v4208_v47  ;;  %v4486_v20 = vmul.f32 0.01, %v4406_v7  ;;  %v3946_v47 = vpop.f32.mrf.mxu2  ;;  %v4296_v18 = vadd.f32 %v9514_v49, %v4065_v6  ;;  %v4331_v10 = vpop.permute.xlu1 %4330 }
 0x734   : >> { %v4503_v28 = vsel %vm4471_vm6, %v4407_v32, %v4487_v15  ;;  %v4341_v32 = vpop.permute.xlu0 %4340 }
 0x735   : >> { %vm4421_vm13 = vcmp.ge.f32.partialorder %v4389_v3, 0.0  ;;  %v4437_v63 = vmul.f32 0.01, %v4389_v3  ;;  %v4502_v43 = vsel %vm4470_vm14, %v4406_v7, %v4486_v20  ;;  %v4408_v14 = vadd.f32 %v4331_v10, %v4296_v18 }
 0x737   : >> { %v4453_v40 = vsel %vm4421_vm13, %v4389_v3, %v4437_v63  ;;  %v10231_v3 = vld [vmem:[#allocation72_spill] sm:$0xff]  ;;  %v3980_v63 = vadd.f32 %v9520_v33, %v3750_v16  ;;  %v4488_v46 = vmul.f32 0.01, %v4408_v14  ;;  %vm4472_vm3 = vcmp.ge.f32.partialorder %v4408_v14, 0.0 }
 0x738   : >> { %v4165_v0 = vpop.f32.mrf.mxu0  ;;  %v4517_v38 = vmax.f32 %v4453_v40, %v4501_v1  ;;  %v3835_v21 = vadd.f32 %v9203_v24, %v10231_v3  ;;  %v4265_v1 = vpop.f32.mrf.mxu1  ;;  %v3751_v33 = vadd.f32 %v9420_v5, %v9212_v58 }
 0x739   : >> { %v4209_v2 = vadd.f32 %v4165_v0, %v3978_v22  ;;  %v4336_v24 = vpop.permute.xlu2 %4335 }
 0x73a   : >> { %6047 = vmatmul.msk.f32.gmra.mxu2 %vm4532_vm8, %v4517_v38  ;;  %6067 = vmatmul.msk.f32.gmra.mxu3 %vm4532_vm8, %v4517_v38  ;;  %v4066_v7 = vadd.f32 %v9522_v11, %v3835_v21  ;;  %v4504_v11 = vsel %vm4472_vm3, %v4408_v14, %v4488_v46  ;;  %v3981_v12 = vadd.f32 %v3943_v9, %v3751_v33 }
 0x73b   : >> { %v4390_v59 = vadd.f32 %v4321_v62, %v4209_v2  ;;  %v4034_v62 = vpop.f32.mrf.mxu3  ;;  %v3949_v38 = vpop.f32.mrf.mxu2  ;;  %v10232_v2 = vld [vmem:[#allocation74_spill] sm:$0xff] }
 0x73c   : >> { %v4297_v54 = vadd.f32 %v4259_v26, %v4066_v7  ;;  %v3836_v20 = vadd.f32 %v9222_v13, %v10232_v2  ;;  %v3752_v13 = vadd.f32 %v9424_v45, %v9231_v29  ;;  %v4346_v3 = vpop.permute.xlu1 %4345  ;;  %v10234_v7 = vld [vmem:[#allocation47_spill] sm:$0xff] }
 0x73d   : >> { %vm4422_vm11 = vcmp.ge.f32.partialorder %v4390_v59, 0.0  ;;  %v4438_v23 = vmul.f32 0.01, %v4390_v59 }
 0x73e   : >> { %v4067_v26 = vadd.f32 %v4031_v34, %v3836_v20  ;;  %v3982_v6 = vadd.f32 %v3946_v47, %v3752_v13  ;;  %v3753_v47 = vadd.f32 %v9430_v52, %v9250_v30 }
 0x73f   : >> { %v4454_v36 = vsel %vm4422_vm11, %v4390_v59, %v4438_v23  ;;  %v4409_v59 = vadd.f32 %v4336_v24, %v4297_v54 }
 0x740   : >> { %v4168_v37 = vpop.f32.mrf.mxu0  ;;  %v4518_v51 = vmax.f32 %v4454_v36, %v4502_v43  ;;  %v4268_v43 = vpop.f32.mrf.mxu1  ;;  %v4298_v5 = vadd.f32 %v4262_v4, %v4067_v26  ;;  %v10233_v36 = vld [vmem:[#allocation76_spill] sm:$0xff] }
 0x741   : >> { %v4210_v57 = vadd.f32 %v4168_v37, %v3979_v27  ;;  %v4489_v58 = vmul.f32 0.01, %v4409_v59  ;;  %vm4473_vm12 = vcmp.ge.f32.partialorder %v4409_v59, 0.0  ;;  %v3837_v37 = vadd.f32 %v9243_v42, %v10233_v36  ;;  %v4351_v52 = vpop.permute.xlu2 %4350 }
 0x742   : >> { %6048 = vmatmul.msk.f32.gmra.mxu2 %vm4532_vm8, %v4518_v51  ;;  %6068 = vmatmul.msk.f32.gmra.mxu3 %vm4532_vm8, %v4518_v51 }
 0x743   : >> { %v4391_v31 = vadd.f32 %v4326_v41, %v4210_v57  ;;  %v4037_v61 = vpop.f32.mrf.mxu3  ;;  %v3952_v34 = vpop.f32.mrf.mxu2  ;;  %v4505_v51 = vsel %vm4473_vm12, %v4409_v59, %v4489_v58  ;;  %v4410_v57 = vadd.f32 %v4341_v32, %v4298_v5  ;;  %v10235_v59 = vld [vmem:[#allocation32_spill] sm:$0xff] }
 0x745   : >> { %vm4423_vm7 = vcmp.ge.f32.partialorder %v4391_v31, 0.0  ;;  %v4439_v55 = vmul.f32 0.01, %v4391_v31  ;;  %v4490_v29 = vmul.f32 0.01, %v4410_v57  ;;  %vm4474_vm14 = vcmp.ge.f32.partialorder %v4410_v57, 0.0 }
 0x747   : >> { %v4455_v48 = vsel %vm4423_vm7, %v4391_v31, %v4439_v55 }
 0x748   : >> { %v4171_v22 = vpop.f32.mrf.mxu0  ;;  %v4519_v49 = vmax.f32 %v4455_v48, %v4503_v28  ;;  %v4271_v42 = vpop.f32.mrf.mxu1  ;;  %v4506_v28 = vsel %vm4474_vm14, %v4410_v57, %v4490_v29 }
 0x749   : >> { %v4211_v40 = vadd.f32 %v4171_v22, %v3980_v63  ;;  %v3983_v63 = vadd.f32 %v3949_v38, %v3753_v47  ;;  %v10237_v47 = vld [vmem:[#allocation33_spill] sm:$0xff] }
 0x74a   : >> { %6049 = vmatmul.msk.f32.gmra.mxu2 %vm4532_vm8, %v4519_v49  ;;  %6069 = vmatmul.msk.f32.gmra.mxu3 %vm4532_vm8, %v4519_v49 }
 0x74b   : >> { %v4392_v0 = vadd.f32 %v4331_v10, %v4211_v40  ;;  %v4068_v10 = vadd.f32 %v4034_v62, %v3837_v37  ;;  %v4040_v16 = vpop.f32.mrf.mxu3  ;;  %v3955_v48 = vpop.f32.mrf.mxu2  ;;  %v4069_v40 = vadd.f32 %v4037_v61, %v10234_v7 }
 0x74d   : >> { %vm4424_vm5 = vcmp.ge.f32.partialorder %v4392_v0, 0.0  ;;  %v4440_v35 = vmul.f32 0.01, %v4392_v0  ;;  %v4299_v45 = vadd.f32 %v4265_v1, %v4068_v10  ;;  %v4300_v54 = vadd.f32 %v4268_v43, %v4069_v40  ;;  %v4356_v43 = vpop.permute.xlu0 %4355 }
 0x74f   : >> { %v4456_v41 = vsel %vm4424_vm5, %v4392_v0, %v4440_v35  ;;  %v4411_v62 = vadd.f32 %v4346_v3, %v4299_v45  ;;  %v3984_v35 = vadd.f32 %v3952_v34, %v9440_v56  ;;  %v4412_v2 = vadd.f32 %v4351_v52, %v4300_v54  ;;  %v10236_v34 = vld [vmem:[#allocation48_spill] sm:$0xff] }
 0x750   : >> { %v4174_v23 = vpop.f32.mrf.mxu0  ;;  %v4520_v39 = vmax.f32 %v4456_v41, %v4504_v11  ;;  %v4274_v38 = vpop.f32.mrf.mxu1  ;;  %v4070_v41 = vadd.f32 %v4040_v16, %v10235_v59 }
 0x751   : >> { %v4212_v50 = vadd.f32 %v4174_v23, %v3981_v12  ;;  %v4491_v1 = vmul.f32 0.01, %v4411_v62  ;;  %vm4475_vm6 = vcmp.ge.f32.partialorder %v4411_v62, 0.0  ;;  %vm4476_vm3 = vcmp.ge.f32.partialorder %v4412_v2, 0.0 }
 0x752   : >> { %6050 = vmatmul.msk.f32.gmra.mxu2 %vm4532_vm8, %v4520_v39  ;;  %6070 = vmatmul.msk.f32.gmra.mxu3 %vm4532_vm8, %v4520_v39  ;;  %v4492_v39 = vmul.f32 0.01, %v4412_v2  ;;  %v4301_v26 = vadd.f32 %v4271_v42, %v4070_v41 }
 0x753   : >> { %v4393_v27 = vadd.f32 %v4336_v24, %v4212_v50  ;;  %v4043_v30 = vpop.f32.mrf.mxu3  ;;  %v4507_v33 = vsel %vm4475_vm6, %v4411_v62, %v4491_v1  ;;  %v3958_v23 = vpop.f32.mrf.mxu2 }
 0x754   : >> { %v4508_v5 = vsel %vm4476_vm3, %v4412_v2, %v4492_v39  ;;  %v3986_v16 = vadd.f32 %v3958_v23, %v9458_v17 }
 0x755   : >> { %vm4425_vm13 = vcmp.ge.f32.partialorder %v4393_v27, 0.0  ;;  %v4441_v9 = vmul.f32 0.01, %v4393_v27 }
 0x757   : >> { %v4457_v15 = vsel %vm4425_vm13, %v4393_v27, %v4441_v9  ;;  %v3985_v27 = vadd.f32 %v3955_v48, %v9449_v19 }
 0x758   : >> { %v4177_v18 = vpop.f32.mrf.mxu0  ;;  %v4521_v31 = vmax.f32 %v4457_v15, %v4505_v51  ;;  %v4277_v9 = vpop.f32.mrf.mxu1  ;;  %v4071_v51 = vadd.f32 %v4043_v30, %v10236_v34  ;;  %v10238_v30 = vld [vmem:[#allocation49_spill] sm:$0xff] }
 0x759   : >> { %v4213_v4 = vadd.f32 %v4177_v18, %v3982_v6 }
 0x75a   : >> { %6051 = vmatmul.msk.f32.gmra.mxu2 %vm4532_vm8, %v4521_v31  ;;  %6071 = vmatmul.msk.f32.gmra.mxu3 %vm4532_vm8, %v4521_v31  ;;  %v4302_v15 = vadd.f32 %v4274_v38, %v4071_v51  ;;  %v4361_v31 = vpop.permute.xlu1 %4360 }
 0x75b   : >> { %v4394_v55 = vadd.f32 %v4341_v32, %v4213_v4  ;;  %v4046_v56 = vpop.f32.mrf.mxu3  ;;  %v4413_v32 = vadd.f32 %v4356_v43, %v4301_v26  ;;  %v3961_v10 = vpop.f32.mrf.mxu2 }
 0x75c   : >> { %v4414_v29 = vadd.f32 %v4361_v31, %v4302_v15  ;;  %v3987_v40 = vadd.f32 %v3961_v10, %v9467_v44  ;;  %v10240_v15 = vld [vmem:[#allocation50_spill] sm:$0xff] }
 0x75d   : >> { %vm4426_vm11 = vcmp.ge.f32.partialorder %v4394_v55, 0.0  ;;  %v4442_v21 = vmul.f32 0.01, %v4394_v55  ;;  %v4493_v57 = vmul.f32 0.01, %v4413_v32  ;;  %vm4477_vm12 = vcmp.ge.f32.partialorder %v4413_v32, 0.0 }
 0x75e   : >> { %v4494_v62 = vmul.f32 0.01, %v4414_v29  ;;  %vm4478_vm14 = vcmp.ge.f32.partialorder %v4414_v29, 0.0 }
 0x75f   : >> { %v4458_v14 = vsel %vm4426_vm11, %v4394_v55, %v4442_v21  ;;  %v4509_v4 = vsel %vm4477_vm12, %v4413_v32, %v4493_v57  ;;  %v4072_v21 = vadd.f32 %v4046_v56, %v10237_v47 }
 0x760   : >> { %v4180_v22 = vpop.f32.mrf.mxu0  ;;  %v4522_v49 = vmax.f32 %v4458_v14, %v4506_v28  ;;  %v4510_v7 = vsel %vm4478_vm14, %v4414_v29, %v4494_v62  ;;  %v10241_v62 = vld [vmem:[#allocation35_spill] sm:$0xff] }
 0x761   : >> { %v4214_v46 = vadd.f32 %v4180_v22, %v3983_v63  ;;  %v4280_v63 = vpop.f32.mrf.mxu1  ;;  %v4303_v14 = vadd.f32 %v4277_v9, %v4072_v21  ;;  %v4366_v22 = vpop.permute.xlu2 %4365 }
 0x762   : >> { %6052 = vmatmul.msk.f32.gmra.mxu2 %vm4532_vm8, %v4522_v49  ;;  %6072 = vmatmul.msk.f32.gmra.mxu3 %vm4532_vm8, %v4522_v49 }
 0x763   : >> { %v4395_v0 = vadd.f32 %v4346_v3, %v4214_v46  ;;  %v4049_v55 = vpop.f32.mrf.mxu3  ;;  %v3964_v49 = vpop.f32.mrf.mxu2  ;;  %v4415_v46 = vadd.f32 %v4366_v22, %v4303_v14 }
 0x764   : >> { %v3988_v59 = vadd.f32 %v3964_v49, %v9476_v53 }
 0x765   : >> { %vm4427_vm7 = vcmp.ge.f32.partialorder %v4395_v0, 0.0  ;;  %v4443_v24 = vmul.f32 0.01, %v4395_v0  ;;  %vm4479_vm6 = vcmp.ge.f32.partialorder %v4415_v46, 0.0 }
 0x767   : >> { %v4459_v20 = vsel %vm4427_vm7, %v4395_v0, %v4443_v24 }
 0x768   : >> { %v4183_v11 = vpop.f32.mrf.mxu0  ;;  %v4523_v12 = vmax.f32 %v4459_v20, %v4507_v33  ;;  %v4495_v33 = vmul.f32 0.01, %v4415_v46  ;;  %v4371_v20 = vpop.permute.xlu0 %4370 }
 0x769   : >> { %v4215_v61 = vadd.f32 %v4183_v11, %v3984_v35  ;;  %v4283_v11 = vpop.f32.mrf.mxu1  ;;  %v4381_v29 = vpop.permute.xlu2 %4380 }
 0x76a   : >> { %6053 = vmatmul.msk.f32.gmra.mxu2 %vm4532_vm8, %v4523_v12  ;;  %6073 = vmatmul.msk.f32.gmra.mxu3 %vm4532_vm8, %v4523_v12  ;;  %v4511_v12 = vsel %vm4479_vm6, %v4415_v46, %v4495_v33 }
 0x76b   : >> { %v4396_v50 = vadd.f32 %v4351_v52, %v4215_v61  ;;  %v4073_v52 = vadd.f32 %v4049_v55, %v10238_v30  ;;  %v4052_v38 = vpop.f32.mrf.mxu3  ;;  %v3967_v23 = vpop.f32.mrf.mxu2 }
 0x76d   : >> { %vm4428_vm5 = vcmp.ge.f32.partialorder %v4396_v50, 0.0  ;;  %v4444_v58 = vmul.f32 0.01, %v4396_v50  ;;  %v4304_v35 = vadd.f32 %v4280_v63, %v4073_v52 }
 0x76f   : >> { %v4460_v13 = vsel %vm4428_vm5, %v4396_v50, %v4444_v58  ;;  %v4416_v41 = vadd.f32 %v4371_v20, %v4304_v35  ;;  %v10239_v50 = vld [vmem:[#allocation34_spill] sm:$0xff] }
 0x770   : >> { %v4186_v36 = vpop.f32.mrf.mxu0  ;;  %v4524_v37 = vmax.f32 %v4460_v13, %v4508_v5  ;;  %v4376_v13 = vpop.permute.xlu1 %4375 }
 0x771   : >> { %v4216_v6 = vadd.f32 %v4186_v36, %v3985_v27  ;;  %v4496_v56 = vmul.f32 0.01, %v4416_v41  ;;  %vm4480_vm3 = vcmp.ge.f32.partialorder %v4416_v41, 0.0  ;;  %v4286_v9 = vpop.f32.mrf.mxu1 }
 0x772   : >> { %6054 = vmatmul.msk.f32.gmra.mxu2 %vm4532_vm8, %v4524_v37  ;;  %6074 = vmatmul.msk.f32.gmra.mxu3 %vm4532_vm8, %v4524_v37  ;;  %v3989_v37 = vadd.f32 %v3967_v23, %v9485_v60 }
 0x773   : >> { %v4397_v18 = vadd.f32 %v4356_v43, %v4216_v6  ;;  %v4074_v43 = vadd.f32 %v4052_v38, %v10239_v50  ;;  %v4055_v32 = vpop.f32.mrf.mxu3  ;;  %v4512_v36 = vsel %vm4480_vm3, %v4416_v41, %v4496_v56  ;;  %v3970_v10 = vpop.f32.mrf.mxu2  ;;  %vm4736_vm3 = vcmask 113664  }
 0x775   : >> { %vm4429_vm13 = vcmp.ge.f32.partialorder %v4397_v18, 0.0  ;;  %v4445_v19 = vmul.f32 0.01, %v4397_v18  ;;  %v4305_v5 = vadd.f32 %v4283_v11, %v4074_v43 }
 0x777   : >> { %v4461_v45 = vsel %vm4429_vm13, %v4397_v18, %v4445_v19  ;;  %v4417_v34 = vadd.f32 %v4376_v13, %v4305_v5  ;;  %v4075_v18 = vadd.f32 %v4055_v32, %v10240_v15 }
 0x778   : >> { %v4189_v3 = vpop.f32.mrf.mxu0  ;;  %v4525_v42 = vmax.f32 %v4461_v45, %v4509_v4 }
 0x779   : >> { %v4217_v28 = vadd.f32 %v4189_v3, %v3986_v16  ;;  %v4497_v19 = vmul.f32 0.01, %v4417_v34  ;;  %v4306_v4 = vadd.f32 %v4286_v9, %v4075_v18  ;;  %vm4481_vm12 = vcmp.ge.f32.partialorder %v4417_v34, 0.0  ;;  %v4289_v21 = vpop.f32.mrf.mxu1 }
 0x77a   : >> { %6055 = vmatmul.msk.f32.gmra.mxu2 %vm4532_vm8, %v4525_v42  ;;  %6075 = vmatmul.msk.f32.gmra.mxu3 %vm4532_vm8, %v4525_v42  ;;  %v3990_v3 = vadd.f32 %v3970_v10, %v9494_v8 }
 0x77b   : >> { %v4398_v48 = vadd.f32 %v4361_v31, %v4217_v28  ;;  %v4058_v60 = vpop.f32.mrf.mxu3  ;;  %v4513_v55 = vsel %vm4481_vm12, %v4417_v34, %v4497_v19  ;;  %v4418_v42 = vadd.f32 %v4381_v29, %v4306_v4 }
 0x77c   : >> { %v4076_v14 = vadd.f32 %v4058_v60, %v10241_v62 }
 0x77d   : >> { %vm4430_vm11 = vcmp.ge.f32.partialorder %v4398_v48, 0.0  ;;  %v4446_v17 = vmul.f32 0.01, %v4398_v48  ;;  %vm4482_vm14 = vcmp.ge.f32.partialorder %v4418_v42, 0.0 }
 0x77f   : >> { %v4462_v1 = vsel %vm4430_vm11, %v4398_v48, %v4446_v17  ;;  %v4307_v17 = vadd.f32 %v4289_v21, %v4076_v14 }
 0x780   : >> { %v4192_v54 = vpop.f32.mrf.mxu0  ;;  %v4526_v0 = vmax.f32 %v4462_v1, %v4510_v7  ;;  %v3973_v7 = vpop.f32.mrf.mxu2 }
 0x781   : >> { %v4218_v24 = vadd.f32 %v4192_v54, %v3987_v40  ;;  %v4386_v40 = vpop.permute.xlu0 %4385  ;;  %v3991_v1 = vadd.f32 %v3973_v7, %v9502_v25  ;;  %v9640_v7 = vld [vmem:[%s9966_s8] sm:$0xff] (%p2264_p6) }
 0x782   : >> { %6056 = vmatmul.msk.f32.gmra.mxu2 %vm4532_vm8, %v4526_v0  ;;  %6076 = vmatmul.msk.f32.gmra.mxu3 %vm4532_vm8, %v4526_v0  ;;  %v4419_v54 = vadd.f32 %v4386_v40, %v4307_v17 }
 0x783   : >> { %v4399_v2 = vadd.f32 %v4366_v22, %v4218_v24  ;;  %v4498_v22 = vmul.f32 0.01, %v4418_v42 }
 0x784   : >> { %v4499_v38 = vmul.f32 0.01, %v4419_v54  ;;  %vm4483_vm6 = vcmp.ge.f32.partialorder %v4419_v54, 0.0 }
 0x785   : >> { %vm4431_vm7 = vcmp.ge.f32.partialorder %v4399_v2, 0.0  ;;  %v4447_v44 = vmul.f32 0.01, %v4399_v2  ;;  %v4514_v46 = vsel %vm4482_vm14, %v4418_v42, %v4498_v22 }
 0x787   : >> { %v4463_v61 = vsel %vm4431_vm7, %v4399_v2, %v4447_v44  ;;  %v4515_v2 = vsel %vm4483_vm6, %v4419_v54, %v4499_v38 }
 0x788   : >> { %v4195_v39 = vpop.f32.mrf.mxu0  ;;  %v4527_v26 = vmax.f32 %v4463_v61, %v4511_v12 }
 0x789   : >> { %v4219_v58 = vadd.f32 %v4195_v39, %v3988_v59 }
 0x78a   : >> { %6057 = vmatmul.msk.f32.gmra.mxu2 %vm4532_vm8, %v4527_v26  ;;  %6077 = vmatmul.msk.f32.gmra.mxu3 %vm4532_vm8, %v4527_v26 }
 0x78b   : >> { %v4400_v27 = vadd.f32 %v4371_v20, %v4219_v58 }
 0x78d   : >> { %vm4432_vm5 = vcmp.ge.f32.partialorder %v4400_v27, 0.0  ;;  %v4448_v53 = vmul.f32 0.01, %v4400_v27 }
 0x78f   : >> { %v4464_v51 = vsel %vm4432_vm5, %v4400_v27, %v4448_v53 }
 0x790   : >> { %v4198_v6 = vpop.f32.mrf.mxu0  ;;  %v4528_v57 = vmax.f32 %v4464_v51, %v4512_v36 }
 0x791   : >> { %v4220_v31 = vadd.f32 %v4198_v6, %v3989_v37 }
 0x792   : >> { %6058 = vmatmul.msk.f32.gmra.mxu2 %vm4532_vm8, %v4528_v57  ;;  %6078 = vmatmul.msk.f32.gmra.mxu3 %vm4532_vm8, %v4528_v57 }
 0x793   : >> { %v4401_v16 = vadd.f32 %v4376_v13, %v4220_v31 }
 0x795   : >> { %vm4433_vm13 = vcmp.ge.f32.partialorder %v4401_v16, 0.0  ;;  %v4449_v45 = vmul.f32 0.01, %v4401_v16 }
 0x797   : >> { %v4465_v47 = vsel %vm4433_vm13, %v4401_v16, %v4449_v45 }
 0x798   : >> { %v4201_v28 = vpop.f32.mrf.mxu0  ;;  %v4529_v63 = vmax.f32 %v4465_v47, %v4513_v55 }
 0x799   : >> { %v4221_v48 = vadd.f32 %v4201_v28, %v3990_v3 }
 0x79a   : >> { %6059 = vmatmul.msk.f32.gmra.mxu2 %vm4532_vm8, %v4529_v63  ;;  %6079 = vmatmul.msk.f32.gmra.mxu3 %vm4532_vm8, %v4529_v63 }
 0x79b   : >> { %v4402_v49 = vadd.f32 %v4381_v29, %v4221_v48 }
 0x79d   : >> { %vm4434_vm11 = vcmp.ge.f32.partialorder %v4402_v49, 0.0  ;;  %v4450_v8 = vmul.f32 0.01, %v4402_v49 }
 0x79f   : >> { %v4466_v0 = vsel %vm4434_vm11, %v4402_v49, %v4450_v8 }
 0x7a0   : >> { %v4204_v30 = vpop.f32.mrf.mxu0  ;;  %v4530_v52 = vmax.f32 %v4466_v0, %v4514_v46 }
 0x7a1   : >> { %v4222_v24 = vadd.f32 %v4204_v30, %v3991_v1 }
 0x7a2   : >> { %6060 = vmatmul.msk.f32.gmra.mxu2 %vm4532_vm8, %v4530_v52  ;;  %6080 = vmatmul.msk.f32.gmra.mxu3 %vm4532_vm8, %v4530_v52 }
 0x7a3   : >> { %v4403_v33 = vadd.f32 %v4386_v40, %v4222_v24 }
 0x7a5   : >> { %vm4435_vm7 = vcmp.ge.f32.partialorder %v4403_v33, 0.0  ;;  %v4451_v35 = vmul.f32 0.01, %v4403_v33 }
 0x7a7   : >> { %v4467_v20 = vsel %vm4435_vm7, %v4403_v33, %v4451_v35 }
 0x7a8   : >> { %v4531_v11 = vmax.f32 %v4467_v20, %v4515_v2 }
 0x7aa   : >> { %6061 = vmatmul.msk.f32.gmra.mxu2 %vm4532_vm8, %v4531_v11  ;;  %6081 = vmatmul.msk.f32.gmra.mxu3 %vm4532_vm8, %v4531_v11 }
 0x7b5   : >> { %v4602_v25 = vpop.f32.mrf.mxu2  ;;  %v4670_v44 = vpop.f32.mrf.mxu3 }
 0x7b6   : >> { %v4718_v12 = vmax.f32 %v4602_v25, %v4670_v44 }
 0x7b8   : >> { %4737 = vst.msk [vmem:[%s9600_s11] sm:$0xff] %vm4736_vm3, %v4718_v12 }
 0x7bd   : >> { %v4605_v59 = vpop.f32.mrf.mxu2  ;;  %v4673_v41 = vpop.f32.mrf.mxu3 }
 0x7be   : >> { %v4719_v61 = vmax.f32 %v4605_v59, %v4673_v41 }
 0x7c0   : >> { %4738 = vst.msk [vmem:[%s9600_s11 + $0x8] sm:$0xff] %vm4736_vm3, %v4719_v61 }
 0x7c5   : >> { %v4608_v23 = vpop.f32.mrf.mxu2  ;;  %v4676_v39 = vpop.f32.mrf.mxu3 }
 0x7c6   : >> { %v4720_v26 = vmax.f32 %v4608_v23, %v4676_v39 }
 0x7c8   : >> { %4739 = vst.msk [vmem:[%s9600_s11 + $0x10] sm:$0xff] %vm4736_vm3, %v4720_v26 }
 0x7cd   : >> { %v4611_v50 = vpop.f32.mrf.mxu2  ;;  %v4679_v43 = vpop.f32.mrf.mxu3 }
 0x7ce   : >> { %v4721_v58 = vmax.f32 %v4611_v50, %v4679_v43 }
 0x7d0   : >> { %4740 = vst.msk [vmem:[%s9600_s11 + $0x18] sm:$0xff] %vm4736_vm3, %v4721_v58 }
 0x7d5   : >> { %v4614_v56 = vpop.f32.mrf.mxu2  ;;  %v4682_v5 = vpop.f32.mrf.mxu3 }
 0x7d6   : >> { %v4722_v27 = vmax.f32 %v4614_v56, %v4682_v5 }
 0x7d8   : >> { %4741 = vst.msk [vmem:[%s9600_s11 + $0x20] sm:$0xff] %vm4736_vm3, %v4722_v27 }
 0x7dd   : >> { %v4617_v32 = vpop.f32.mrf.mxu2  ;;  %v4685_v13 = vpop.f32.mrf.mxu3 }
 0x7de   : >> { %v4723_v53 = vmax.f32 %v4617_v32, %v4685_v13 }
 0x7e0   : >> { %4742 = vst.msk [vmem:[%s9600_s11 + $0x28] sm:$0xff] %vm4736_vm3, %v4723_v53 }
 0x7e5   : >> { %v4620_v9 = vpop.f32.mrf.mxu2  ;;  %v4688_v36 = vpop.f32.mrf.mxu3 }
 0x7e6   : >> { %v4724_v37 = vmax.f32 %v4620_v9, %v4688_v36 }
 0x7e8   : >> { %4743 = vst.msk [vmem:[%s9600_s11 + $0x30] sm:$0xff] %vm4736_vm3, %v4724_v37 }
 0x7ed   : >> { %v4623_v34 = vpop.f32.mrf.mxu2  ;;  %v4691_v51 = vpop.f32.mrf.mxu3 }
 0x7ee   : >> { %v4725_v6 = vmax.f32 %v4623_v34, %v4691_v51 }
 0x7f0   : >> { %4744 = vst.msk [vmem:[%s9600_s11 + $0x38] sm:$0xff] %vm4736_vm3, %v4725_v6 }
 0x7f5   : >> { %v4626_v57 = vpop.f32.mrf.mxu2  ;;  %v4694_v15 = vpop.f32.mrf.mxu3 }
 0x7f6   : >> { %v4726_v18 = vmax.f32 %v4626_v57, %v4694_v15 }
 0x7f8   : >> { %4745 = vst.msk [vmem:[%s9600_s11 + $0x40] sm:$0xff] %vm4736_vm3, %v4726_v18 }
 0x7fd   : >> { %v4629_v31 = vpop.f32.mrf.mxu2  ;;  %v4697_v10 = vpop.f32.mrf.mxu3 }
 0x7fe   : >> { %v4727_v19 = vmax.f32 %v4629_v31, %v4697_v10 }
 0x800   : >> { %4746 = vst.msk [vmem:[%s9600_s11 + $0x48] sm:$0xff] %vm4736_vm3, %v4727_v19 }
 0x805   : >> { %v4632_v4 = vpop.f32.mrf.mxu2  ;;  %v4700_v16 = vpop.f32.mrf.mxu3 }
 0x806   : >> { %v4728_v29 = vmax.f32 %v4632_v4, %v4700_v16 }
 0x808   : >> { %4747 = vst.msk [vmem:[%s9600_s11 + $0x50] sm:$0xff] %vm4736_vm3, %v4728_v29 }
 0x80d   : >> { %v4635_v45 = vpop.f32.mrf.mxu2  ;;  %v4703_v60 = vpop.f32.mrf.mxu3 }
 0x80e   : >> { %v4729_v55 = vmax.f32 %v4635_v45, %v4703_v60 }
 0x810   : >> { %4748 = vst.msk [vmem:[%s9600_s11 + $0x58] sm:$0xff] %vm4736_vm3, %v4729_v55 }
 0x815   : >> { %v4638_v3 = vpop.f32.mrf.mxu2  ;;  %v4706_v42 = vpop.f32.mrf.mxu3 }
 0x816   : >> { %v4730_v47 = vmax.f32 %v4638_v3, %v4706_v42 }
 0x818   : >> { %4749 = vst.msk [vmem:[%s9600_s11 + $0x60] sm:$0xff] %vm4736_vm3, %v4730_v47 }
 0x81d   : >> { %v4641_v21 = vpop.f32.mrf.mxu2  ;;  %v4709_v28 = vpop.f32.mrf.mxu3 }
 0x81e   : >> { %v4731_v63 = vmax.f32 %v4641_v21, %v4709_v28 }
 0x820   : >> { %4750 = vst.msk [vmem:[%s9600_s11 + $0x68] sm:$0xff] %vm4736_vm3, %v4731_v63 }
 0x825   : >> { %v4644_v62 = vpop.f32.mrf.mxu2  ;;  %v4712_v14 = vpop.f32.mrf.mxu3 }
 0x826   : >> { %v4732_v48 = vmax.f32 %v4644_v62, %v4712_v14 }
 0x828   : >> { %4751 = vst.msk [vmem:[%s9600_s11 + $0x70] sm:$0xff] %vm4736_vm3, %v4732_v48 }
 0x82c   : > { %2266 = sbr.rel (!%p2264_p6) target bundleno = 1071 (0x42f), region = 190 }
 0x82d   : >> { %v4647_v22 = vpop.f32.mrf.mxu2  ;;  %v4715_v17 = vpop.f32.mrf.mxu3 }
 0x82e   : >> { %v4733_v49 = vmax.f32 %v4647_v22, %v4715_v17 }
 0x830   : >> { %4752 = vst.msk [vmem:[%s9600_s11 + $0x78] sm:$0xff] %vm4736_vm3, %v4733_v49 }
 0x831 LB: >> { %s6142_s15 = sshll.u32 %s6555_s14, 8  ;;  %s6571_s20 = smov 127   ;;  %vm5198_vm1 = vcmask 1044480   ;;  %vm5194_vm10 = vcmask 105472   ;;  %s6555_s14 = sphi %s9642_s14, %s4759_s14  }
 0x832   : >> { %s9648_s24 = scalar_lea.vmem [#allocation4], %s6142_s15  ;;  %s6130_s10 = sshll.u32 %s6555_s14, 3 }
 0x833   : >> { %s5247_s22 = scalar_lea.vmem %s6666_s26, %s6130_s10  ;;  %s4759_s14 = sadd.s32 1, %s6555_s14  }
 0x834   : >> { %p4756_p7 = scmp.ge.s32.totalorder %s4759_s14, 6  }
 0x837   : >> { %v9651_v40 = vld [vmem:[%s9648_s24 + $0xf0] sm:$0xff]  ;;  %v9654_v8 = vld [vmem:[%s9648_s24 + $0xf8] sm:$0xff]  ;;  %v9660_v54 = vld [vmem:[%s9648_s24 + $0xe0] sm:$0xff] }
 0x838   : >> { %v4777_v46 = vld [vmem:[%s9648_s24 + $0x70] sm:$0xff]  ;;  %v6396_v1 = vpack.i.bf16 %v9651_v40, %v9654_v8  ;;  %v4778_v0 = vld [vmem:[%s9648_s24 + $0x78] sm:$0xff]  ;;  %4989 = vmatpush.msra.mxu3 %v9654_v8  ;;  %v9669_v52 = vld [vmem:[%s9648_s24 + $0xe8] sm:$0xff] }
 0x839   : >> { %v6406_v30 = vpack.i.bf16 %v9660_v54, %v4777_v46  ;;  %4885 = vmatpush.msra.mxu1 %v4778_v0  ;;  %v4775_v24 = vld [vmem:[%s9648_s24 + $0x60] sm:$0xff]  ;;  %v4776_v38 = vld [vmem:[%s9648_s24 + $0x68] sm:$0xff]  ;;  %v9674_v33 = vld [vmem:[%s9648_s24 + $0xd8] sm:$0xff]  ;;  %v6401_v20 = vpack.i.bf16 %v9669_v52, %v4778_v0 }
 0x83a   : >> { %6397 = vrot.lane.b32.xlu0 %v6396_v1, %s6571_s20  ;;  %4990 = vmatpush.msra.mxu3 %v9651_v40  ;;  %v9677_v35 = vld [vmem:[%s9648_s24 + $0x178] sm:$0xff]  ;;  %v6411_v11 = vpack.i.bf16 %v9674_v33, %v4776_v38  ;;  %v9687_v44 = vld [vmem:[%s9648_s24 + $0xd0] sm:$0xff]  ;;  %v9698_v41 = vld [vmem:[%s9648_s24 + $0xc8] sm:$0xff] }
 0x83b   : >> { %6407 = vrot.lane.b32.xlu1 %v6406_v30, %s6571_s20  ;;  %4886 = vmatpush.msra.mxu1 %v4777_v46  ;;  %v6416_v2 = vpack.i.bf16 %v4775_v24, %v9677_v35  ;;  %v4774_v25 = vld [vmem:[%s9648_s24 + $0x58] sm:$0xff]  ;;  %v9690_v12 = vld [vmem:[%s9648_s24 + $0x170] sm:$0xff]  ;;  %v9703_v23 = vld [vmem:[%s9648_s24 + $0x168] sm:$0xff] }
 0x83c   : >> { %4991 = vmatpush.msra.mxu3 %v9669_v52  ;;  %v4773_v59 = vld [vmem:[%s9648_s24 + $0x50] sm:$0xff]  ;;  %v6421_v61 = vpack.i.bf16 %v9690_v12, %v9687_v44  ;;  %v4772_v39 = vld [vmem:[%s9648_s24 + $0x48] sm:$0xff]  ;;  %v9708_v26 = vld [vmem:[%s9648_s24 + $0xc0] sm:$0xff]  ;;  %v6426_v50 = vpack.i.bf16 %v9698_v41, %v4774_v25 }
 0x83d   : >> { %4887 = vmatpush.msra.mxu1 %v4776_v38  ;;  %6417 = vrot.lane.b32.xlu2 %v6416_v2, %s6571_s20  ;;  %v4771_v43 = vld [vmem:[%s9648_s24 + $0x40] sm:$0xff]  ;;  %v6431_v58 = vpack.i.bf16 %v4773_v59, %v9703_v23  ;;  %v9715_v56 = vld [vmem:[%s9648_s24 + $0xb8] sm:$0xff]  ;;  %v9722_v32 = vld [vmem:[%s9648_s24 + $0xb0] sm:$0xff] }
 0x83e   : >> { %4992 = vmatpush.msra.mxu3 %v9660_v54  ;;  %v4770_v5 = vld [vmem:[%s9648_s24 + $0x38] sm:$0xff]  ;;  %v6118_v27 = vld [vmem:[%s9648_s24 + $0x160] sm:$0xff]  ;;  %v4769_v13 = vld [vmem:[%s9648_s24 + $0x30] sm:$0xff]  ;;  %v6441_v34 = vpack.i.bf16 %v9715_v56, %v4772_v39 }
 0x83f   : >> { %4888 = vmatpush.msra.mxu1 %v4775_v24  ;;  %v9729_v53 = vld [vmem:[%s9648_s24 + $0xa8] sm:$0xff]  ;;  %v6436_v9 = vpack.i.bf16 %v6118_v27, %v9708_v26  ;;  %v6117_v36 = vld [vmem:[%s9648_s24 + $0x158] sm:$0xff]  ;;  %v4767_v51 = vld [vmem:[%s9648_s24 + $0x20] sm:$0xff] }
 0x840   : >> { %4993 = vmatpush.msra.mxu3 %v9674_v33  ;;  %v4768_v37 = vld [vmem:[%s9648_s24 + $0x28] sm:$0xff]  ;;  %v6446_v6 = vpack.i.bf16 %v4771_v43, %v6117_v36  ;;  %v4766_v57 = vld [vmem:[%s9648_s24 + $0x18] sm:$0xff]  ;;  %v6116_v15 = vld [vmem:[%s9648_s24 + $0x150] sm:$0xff]  ;;  %v6456_v45 = vpack.i.bf16 %v9729_v53, %v4770_v5 }
 0x841   : >> { %4889 = vmatpush.msra.mxu1 %v4774_v25  ;;  %v9741_v18 = vld [vmem:[%s9648_s24 + $0xa0] sm:$0xff]  ;;  %v4765_v31 = vld [vmem:[%s9648_s24 + $0x10] sm:$0xff]  ;;  %v9748_v10 = vld [vmem:[%s9648_s24 + $0x98] sm:$0xff]  ;;  %v6451_v19 = vpack.i.bf16 %v6116_v15, %v9722_v32 }
 0x842   : >> { %6402 = vrot.lane.b32.xlu0 %v6401_v20, %s6571_s20  ;;  %4994 = vmatpush.msra.mxu3 %v9687_v44  ;;  %v6115_v4 = vld [vmem:[%s9648_s24 + $0x148] sm:$0xff]  ;;  %v9755_v29 = vld [vmem:[%s9648_s24 + $0x90] sm:$0xff]  ;;  %v4763_v60 = vld [vmem:[%s9648_s24] sm:$0xff]  ;;  %v6471_v63 = vpack.i.bf16 %v9748_v10, %v4768_v37 }
 0x843   : >> { %6412 = vrot.lane.b32.xlu1 %v6411_v11, %s6571_s20  ;;  %4890 = vmatpush.msra.mxu1 %v4773_v59  ;;  %v4764_v16 = vld [vmem:[%s9648_s24 + $0x8] sm:$0xff]  ;;  %v6461_v55 = vpack.i.bf16 %v4769_v13, %v6115_v4  ;;  %v6114_v42 = vld [vmem:[%s9648_s24 + $0x140] sm:$0xff]  ;;  %v6113_v28 = vld [vmem:[%s9648_s24 + $0x138] sm:$0xff] }
 0x844   : >> { %4995 = vmatpush.msra.mxu3 %v9698_v41  ;;  %v9761_v3 = vld [vmem:[%s9648_s24 + $0x88] sm:$0xff]  ;;  %v9768_v47 = vld [vmem:[%s9648_s24 + $0x80] sm:$0xff]  ;;  %v6466_v21 = vpack.i.bf16 %v6114_v42, %v9741_v18  ;;  %v6476_v62 = vpack.i.bf16 %v4767_v51, %v6113_v28  ;;  %v6112_v14 = vld [vmem:[%s9648_s24 + $0x130] sm:$0xff] }
 0x845   : >> { %4891 = vmatpush.msra.mxu1 %v4772_v39  ;;  %6422 = vrot.lane.b32.xlu2 %v6421_v61, %s6571_s20  ;;  %v6481_v48 = vpack.i.bf16 %v6112_v14, %v9755_v29  ;;  %v6111_v22 = vld [vmem:[%s9648_s24 + $0x128] sm:$0xff]  ;;  %v6486_v17 = vpack.i.bf16 %v9761_v3, %v4766_v57  ;;  %v6110_v46 = vld [vmem:[%s9648_s24 + $0x120] sm:$0xff]  ;;  %v6109_v1 = vld [vmem:[%s9648_s24 + $0x118] sm:$0xff] }
 0x846   : >> { %4996 = vmatpush.msra.mxu3 %v9708_v26  ;;  %v6491_v49 = vpack.i.bf16 %v4765_v31, %v6111_v22  ;;  %v6496_v0 = vpack.i.bf16 %v6110_v46, %v9768_v47  ;;  %v6108_v30 = vld [vmem:[%s9648_s24 + $0x110] sm:$0xff]  ;;  %v6501_v24 = vpack.i.bf16 %v6109_v1, %v4764_v16  ;;  %v6107_v2 = vld [vmem:[%s9648_s24 + $0x108] sm:$0xff] }
 0x847   : >> { %4892 = vmatpush.msra.mxu1 %v4771_v43  ;;  %v6506_v38 = vpack.i.bf16 %v6108_v30, %v4763_v60 }
 0x848   : >> { %4997 = vmatpush.msra.mxu3 %v9715_v56 }
 0x849   : >> { %4893 = vmatpush.msra.mxu1 %v4770_v5 }
 0x84a   : >> { %6427 = vrot.lane.b32.xlu0 %v6426_v50, %s6571_s20  ;;  %4998 = vmatpush.msra.mxu3 %v9722_v32 }
 0x84b   : >> { %6432 = vrot.lane.b32.xlu1 %v6431_v58, %s6571_s20  ;;  %4894 = vmatpush.msra.mxu1 %v4769_v13 }
 0x84c   : >> { %4999 = vmatpush.msra.mxu3 %v9729_v53 }
 0x84d   : >> { %4895 = vmatpush.msra.mxu1 %v4768_v37  ;;  %6437 = vrot.lane.b32.xlu2 %v6436_v9, %s6571_s20 }
 0x84e   : >> { %5000 = vmatpush.msra.mxu3 %v9741_v18 }
 0x84f   : >> { %4896 = vmatpush.msra.mxu1 %v4767_v51 }
 0x850   : >> { %5001 = vmatpush.msra.mxu3 %v9748_v10 }
 0x851   : >> { %4897 = vmatpush.msra.mxu1 %v4766_v57 }
 0x852   : >> { %6442 = vrot.lane.b32.xlu0 %v6441_v34, %s6571_s20  ;;  %5002 = vmatpush.msra.mxu3 %v9755_v29 }
 0x853   : >> { %6447 = vrot.lane.b32.xlu1 %v6446_v6, %s6571_s20  ;;  %4898 = vmatpush.msra.mxu1 %v4765_v31 }
 0x854   : >> { %5003 = vmatpush.msra.mxu3 %v9761_v3 }
 0x855   : >> { %4899 = vmatpush.msra.mxu1 %v4764_v16  ;;  %6452 = vrot.lane.b32.xlu2 %v6451_v19, %s6571_s20 }
 0x856   : >> { %5004 = vmatpush.msra.mxu3 %v9768_v47 }
 0x857   : >> { %4900 = vmatpush.msra.mxu1 %v4763_v60 }
 0x859   : >> { %5051 = vmatpush.msrb.mxu1 %v9677_v35  ;;  %v6106_v35 = vld [vmem:[%s9648_s24 + $0x100] sm:$0xff] }
 0x85a   : >> { %6457 = vrot.lane.b32.xlu0 %v6456_v45, %s6571_s20  ;;  %v6511_v20 = vpack.i.bf16 %v6106_v35, %v6107_v2 }
 0x85b   : >> { %6462 = vrot.lane.b32.xlu1 %v6461_v55, %s6571_s20  ;;  %5052 = vmatpush.msrb.mxu1 %v9690_v12 }
 0x85d   : >> { %5053 = vmatpush.msrb.mxu1 %v9703_v23  ;;  %6467 = vrot.lane.b32.xlu2 %v6466_v21, %s6571_s20 }
 0x85f   : >> { %5054 = vmatpush.msrb.mxu1 %v6118_v27 }
 0x861   : >> { %5055 = vmatpush.msrb.mxu1 %v6117_v36 }
 0x862   : >> { %6472 = vrot.lane.b32.xlu0 %v6471_v63, %s6571_s20 }
 0x863   : >> { %6477 = vrot.lane.b32.xlu1 %v6476_v62, %s6571_s20  ;;  %5056 = vmatpush.msrb.mxu1 %v6116_v15 }
 0x865   : >> { %5057 = vmatpush.msrb.mxu1 %v6115_v4  ;;  %6482 = vrot.lane.b32.xlu2 %v6481_v48, %s6571_s20 }
 0x867   : >> { %5058 = vmatpush.msrb.mxu1 %v6114_v42 }
 0x869   : >> { %5059 = vmatpush.msrb.mxu1 %v6113_v28 }
 0x86a   : >> { %6487 = vrot.lane.b32.xlu0 %v6486_v17, %s6571_s20 }
 0x86b   : >> { %6492 = vrot.lane.b32.xlu1 %v6491_v49, %s6571_s20  ;;  %5060 = vmatpush.msrb.mxu1 %v6112_v14 }
 0x86d   : >> { %5061 = vmatpush.msrb.mxu1 %v6111_v22  ;;  %6497 = vrot.lane.b32.xlu2 %v6496_v0, %s6571_s20 }
 0x86f   : >> { %5062 = vmatpush.msrb.mxu1 %v6110_v46 }
 0x871   : >> { %5063 = vmatpush.msrb.mxu1 %v6109_v1 }
 0x872   : >> { %6502 = vrot.lane.b32.xlu0 %v6501_v24, %s6571_s20 }
 0x873   : >> { %6507 = vrot.lane.b32.xlu1 %v6506_v38, %s6571_s20  ;;  %5064 = vmatpush.msrb.mxu1 %v6108_v30 }
 0x875   : >> { %5065 = vmatpush.msrb.mxu1 %v6107_v2  ;;  %6512 = vrot.lane.b32.xlu2 %v6511_v20, %s6571_s20 }
 0x877   : >> { %5066 = vmatpush.msrb.mxu1 %v6106_v35 }
 0x897   : >> { %v6418_v11 = vpop.permute.xlu2 %6417 }
 0x898   : >> { %v6419_v25 = vunpack.i.l.bf16 %v6418_v11  ;;  %v6420_v6 = vunpack.i.h.bf16 %v6418_v11 }
 0x89a   : >> { %5159 = vmatpush.msrb.mxu3 %v6419_v25 }
 0x89f   : >> { %v9798_v12 = vpop.permute.xlu2 %6422 }
 0x8a0   : >> { %v6425_v59 = vunpack.i.h.bf16 %v9798_v12  ;;  %v6424_v51 = vunpack.i.l.bf16 %v9798_v12 }
 0x8a2   : >> { %5160 = vmatpush.msrb.mxu3 %v6425_v59 }
 0x8a7   : >> { %v9811_v43 = vpop.permute.xlu2 %6437 }
 0x8a8   : >> { %v6439_v16 = vunpack.i.l.bf16 %v9811_v43  ;;  %v6440_v55 = vunpack.i.h.bf16 %v9811_v43 }
 0x8ac   : >> { %v9801_v61 = vpop.permute.xlu0 %6397 }
 0x8ad   : >> { %v9803_v23 = vpop.permute.xlu1 %6407  ;;  %v6399_v39 = vunpack.i.l.bf16 %v9801_v61  ;;  %v6400_v50 = vunpack.i.h.bf16 %v9801_v61 }
 0x8ae   : >> { %v6409_v9 = vunpack.i.l.bf16 %v9803_v23  ;;  %v6410_v36 = vunpack.i.h.bf16 %v9803_v23  ;;  %v6123_v23 = vld [vmem:[%s9965_s7 + $0x18] sm:$0xff] }
 0x8af   : >> { %4969 = vmatpush.msra.mxu2 %v6399_v39  ;;  %v9832_v15 = vpop.permute.xlu2 %6452 }
 0x8b0   : >> { %v6454_v62 = vunpack.i.l.bf16 %v9832_v15  ;;  %v6455_v22 = vunpack.i.h.bf16 %v9832_v15 }
 0x8b1   : >> { %4970 = vmatpush.msra.mxu2 %v6400_v50 }
 0x8b4   : >> { %v9813_v58 = vpop.permute.xlu0 %6402 }
 0x8b5   : >> { %v9815_v5 = vpop.permute.xlu1 %6412  ;;  %v6404_v27 = vunpack.i.l.bf16 %v9813_v58  ;;  %v6405_v13 = vunpack.i.h.bf16 %v9813_v58 }
 0x8b6   : >> { %v6414_v37 = vunpack.i.l.bf16 %v9815_v5  ;;  %v6415_v34 = vunpack.i.h.bf16 %v9815_v5 }
 0x8b7   : >> { %4865 = vmatpush.msra.mxu0 %v6404_v27  ;;  %4971 = vmatpush.msra.mxu2 %v6405_v13  ;;  %v9850_v17 = vpop.permute.xlu2 %6467 }
 0x8b8   : >> { %v6469_v30 = vunpack.i.l.bf16 %v9850_v17  ;;  %v6470_v35 = vunpack.i.h.bf16 %v9850_v17 }
 0x8b9   : >> { %4866 = vmatpush.msra.mxu0 %v6409_v9  ;;  %4972 = vmatpush.msra.mxu2 %v6410_v36 }
 0x8bb   : >> { %4867 = vmatpush.msra.mxu0 %v6414_v37  ;;  %4973 = vmatpush.msra.mxu2 %v6415_v34 }
 0x8bc   : >> { %v9830_v57 = vpop.permute.xlu0 %6427 }
 0x8bd   : >> { %4868 = vmatpush.msra.mxu0 %v6420_v6  ;;  %4974 = vmatpush.msra.mxu2 %v6424_v51  ;;  %v6433_v31 = vpop.permute.xlu1 %6432  ;;  %v6429_v19 = vunpack.i.l.bf16 %v9830_v57  ;;  %v6430_v4 = vunpack.i.h.bf16 %v9830_v57 }
 0x8be   : >> { %v6435_v45 = vunpack.i.h.bf16 %v6433_v31  ;;  %v6434_v60 = vunpack.i.l.bf16 %v6433_v31  ;;  %v4798_v31 = vld [vmem:[%s9965_s7] sm:$0xff] }
 0x8bf   : >> { %4869 = vmatpush.msra.mxu0 %v6429_v19  ;;  %4975 = vmatpush.msra.mxu2 %v6430_v4  ;;  %v9864_v2 = vpop.permute.xlu2 %6482 }
 0x8c0   : >> { %5161 = vmatpush.msrb.mxu3 %v6434_v60  ;;  %v6484_v27 = vunpack.i.l.bf16 %v9864_v2  ;;  %v6485_v6 = vunpack.i.h.bf16 %v9864_v2  ;;  %4901 = vmatmul.f32.vlgmr.msra.gmra.mxu1 %v4798_v31 }
 0x8c1   : >> { %4870 = vmatpush.msra.mxu0 %v6435_v45  ;;  %4976 = vmatpush.msra.mxu2 %v6439_v16 }
 0x8c2   : >> { %5162 = vmatpush.msrb.mxu3 %v6440_v55 }
 0x8c3   : >> { %5005 = vmatmul.f32.vlgmr.msra.gmra.mxu3 %v4798_v31 }
 0x8c4   : >> { %v9844_v42 = vpop.permute.xlu0 %6442 }
 0x8c5   : >> { %v6448_v21 = vpop.permute.xlu1 %6447  ;;  %v6444_v28 = vunpack.i.l.bf16 %v9844_v42  ;;  %v6445_v63 = vunpack.i.h.bf16 %v9844_v42 }
 0x8c6   : >> { %v6450_v14 = vunpack.i.h.bf16 %v6448_v21  ;;  %v6449_v48 = vunpack.i.l.bf16 %v6448_v21 }
 0x8c7   : >> { %4871 = vmatpush.msra.mxu0 %v6444_v28  ;;  %4977 = vmatpush.msra.mxu2 %v6445_v63  ;;  %v9881_v19 = vpop.permute.xlu2 %6497 }
 0x8c8   : >> { %5163 = vmatpush.msrb.mxu3 %v6449_v48  ;;  %v6499_v28 = vunpack.i.l.bf16 %v9881_v19 }
 0x8c9   : >> { %4872 = vmatpush.msra.mxu0 %v6450_v14  ;;  %4978 = vmatpush.msra.mxu2 %v6454_v62 }
 0x8ca   : >> { %5164 = vmatpush.msrb.mxu3 %v6455_v22  ;;  %v6500_v22 = vunpack.i.h.bf16 %v9881_v19 }
 0x8cc   : >> { %v9856_v49 = vpop.permute.xlu0 %6457 }
 0x8cd   : >> { %v6463_v46 = vpop.permute.xlu1 %6462  ;;  %v6459_v1 = vunpack.i.l.bf16 %v9856_v49  ;;  %v6460_v0 = vunpack.i.h.bf16 %v9856_v49 }
 0x8ce   : >> { %v6465_v24 = vunpack.i.h.bf16 %v6463_v46  ;;  %v6464_v38 = vunpack.i.l.bf16 %v6463_v46  ;;  %v6103_v46 = vld [vmem:[%s9965_s7 + $0x8] sm:$0xff] }
 0x8cf   : >> { %4873 = vmatpush.msra.mxu0 %v6459_v1  ;;  %4979 = vmatpush.msra.mxu2 %v6460_v0  ;;  %v6122_v1 = vld [vmem:[%s9965_s7 + $0x10] sm:$0xff] }
 0x8d0   : >> { %5165 = vmatpush.msrb.mxu3 %v6464_v38  ;;  %5067 = vmatmul.f32.vlgmr.msrb.gmra.mxu1 %v6122_v1  ;;  %v6513_v38 = vpop.permute.xlu2 %6512 }
 0x8d1   : >> { %4874 = vmatpush.msra.mxu0 %v6465_v24  ;;  %4980 = vmatpush.msra.mxu2 %v6469_v30  ;;  %v6515_v61 = vunpack.i.h.bf16 %v6513_v38 }
 0x8d2   : >> { %5166 = vmatpush.msrb.mxu3 %v6470_v35 }
 0x8d4   : >> { %v9868_v20 = vpop.permute.xlu0 %6472 }
 0x8d5   : >> { %v6478_v11 = vpop.permute.xlu1 %6477  ;;  %v6474_v25 = vunpack.i.l.bf16 %v9868_v20  ;;  %v6475_v59 = vunpack.i.h.bf16 %v9868_v20 }
 0x8d6   : >> { %v6480_v9 = vunpack.i.h.bf16 %v6478_v11  ;;  %v6479_v37 = vunpack.i.l.bf16 %v6478_v11 }
 0x8d7   : >> { %4875 = vmatpush.msra.mxu0 %v6474_v25  ;;  %4981 = vmatpush.msra.mxu2 %v6475_v59 }
 0x8d8   : >> { %5167 = vmatpush.msrb.mxu3 %v6479_v37  ;;  %v6514_v37 = vunpack.i.l.bf16 %v6513_v38 }
 0x8d9   : >> { %4876 = vmatpush.msra.mxu0 %v6480_v9  ;;  %4982 = vmatpush.msra.mxu2 %v6484_v27 }
 0x8da   : >> { %5168 = vmatpush.msrb.mxu3 %v6485_v6 }
 0x8dc   : >> { %v9883_v45 = vpop.permute.xlu0 %6487 }
 0x8dd   : >> { %v6493_v60 = vpop.permute.xlu1 %6492  ;;  %v6489_v55 = vunpack.i.l.bf16 %v9883_v45  ;;  %v6490_v21 = vunpack.i.h.bf16 %v9883_v45 }
 0x8de   : >> { %v6495_v14 = vunpack.i.h.bf16 %v6493_v60  ;;  %v6494_v48 = vunpack.i.l.bf16 %v6493_v60 }
 0x8df   : >> { %4877 = vmatpush.msra.mxu0 %v6489_v55  ;;  %4983 = vmatpush.msra.mxu2 %v6490_v21 }
 0x8e0   : >> { %5169 = vmatpush.msrb.mxu3 %v6494_v48 }
 0x8e1   : >> { %4878 = vmatpush.msra.mxu0 %v6495_v14  ;;  %4984 = vmatpush.msra.mxu2 %v6499_v28 }
 0x8e2   : >> { %5170 = vmatpush.msrb.mxu3 %v6500_v22  ;;  %4985 = vmatmul.f32.vlgmr.msra.gmra.mxu2 %v6103_v46 }
 0x8e3   : >> { %5074 = vmatpush.msrb.mxu2 %v6399_v39 }
 0x8e4   : >> { %v6503_v24 = vpop.permute.xlu0 %6502 }
 0x8e5   : >> { %5075 = vmatpush.msrb.mxu2 %v6400_v50  ;;  %v6508_v35 = vpop.permute.xlu1 %6507  ;;  %v6504_v11 = vunpack.i.l.bf16 %v6503_v24  ;;  %v6505_v25 = vunpack.i.h.bf16 %v6503_v24  ;;  %v6572_v50 = vmov 0  }
 0x8e6   : >> { %v6510_v9 = vunpack.i.h.bf16 %v6508_v35  ;;  %v6509_v39 = vunpack.i.l.bf16 %v6508_v35  ;;  %6516 = vset.pattern.permute.xlu0 %v6572_v50 }
 0x8e7   : >> { %5076 = vmatpush.msrb.mxu2 %v6405_v13  ;;  %4879 = vmatpush.msra.mxu0 %v6504_v11 }
 0x8e8   : >> { %5171 = vmatpush.msrb.mxu3 %v6505_v25  ;;  %5182 = vperm.xlu0 %6516, %v9640_v7  }
 0x8e9   : >> { %5077 = vmatpush.msrb.mxu2 %v6410_v36  ;;  %4880 = vmatpush.msra.mxu0 %v6509_v39 }
 0x8ea   : >> { %5172 = vmatpush.msrb.mxu3 %v6510_v9  ;;  %4881 = vmatmul.f32.vlgmr.msra.gmra.mxu0 %v6103_v46 }
 0x8eb   : >> { %5030 = vmatpush.msrb.mxu0 %v9654_v8  ;;  %5078 = vmatpush.msrb.mxu2 %v6415_v34  ;;  %v10243_v8 = vld [vmem:[#allocation19_spill] sm:$0xff] }
 0x8ec   : >> { %5173 = vmatpush.msrb.mxu3 %v6514_v37  ;;  %6127 = vmatpush.msk.msra.mxu1 %vm5198_vm1, %v10243_v8 }
 0x8ed   : >> { %5031 = vmatpush.msrb.mxu0 %v9651_v40  ;;  %5079 = vmatpush.msrb.mxu2 %v6424_v51  ;;  %v10242_v40 = vld [vmem:[#allocation14_spill] sm:$0xff] }
 0x8ee   : >> { %5174 = vmatpush.msrb.mxu3 %v6515_v61 }
 0x8ef   : >> { %5032 = vmatpush.msrb.mxu0 %v9669_v52  ;;  %5080 = vmatpush.msrb.mxu2 %v6430_v4 }
 0x8f0   : >> { %5175 = vmatmul.f32.vlgmr.msrb.gmra.mxu3 %v6123_v23 }
 0x8f1   : >> { %5033 = vmatpush.msrb.mxu0 %v9660_v54  ;;  %5081 = vmatpush.msrb.mxu2 %v6439_v16  ;;  %v6573_v54 = vmov 1.0  }
 0x8f2   : >> { %6128 = vmatpush.msk.msra.mxu1 %vm6747_vm2, %v6573_v54 }
 0x8f3   : >> { %5034 = vmatpush.msrb.mxu0 %v9674_v33  ;;  %5082 = vmatpush.msrb.mxu2 %v6445_v63 }
 0x8f5   : >> { %5035 = vmatpush.msrb.mxu0 %v9687_v44  ;;  %5083 = vmatpush.msrb.mxu2 %v6454_v62 }
 0x8f7   : >> { %5036 = vmatpush.msrb.mxu0 %v9698_v41  ;;  %5084 = vmatpush.msrb.mxu2 %v6460_v0 }
 0x8f9   : >> { %5037 = vmatpush.msrb.mxu0 %v9708_v26  ;;  %5085 = vmatpush.msrb.mxu2 %v6469_v30 }
 0x8fb   : >> { %5038 = vmatpush.msrb.mxu0 %v9715_v56  ;;  %5086 = vmatpush.msrb.mxu2 %v6475_v59 }
 0x8fd   : >> { %5039 = vmatpush.msrb.mxu0 %v9722_v32  ;;  %5087 = vmatpush.msrb.mxu2 %v6484_v27 }
 0x8ff   : >> { %5040 = vmatpush.msrb.mxu0 %v9729_v53  ;;  %5088 = vmatpush.msrb.mxu2 %v6490_v21 }
 0x901   : >> { %5041 = vmatpush.msrb.mxu0 %v9741_v18  ;;  %5089 = vmatpush.msrb.mxu2 %v6499_v28 }
 0x902   : >> { %5090 = vmatmul.f32.vlgmr.msrb.gmra.mxu2 %v6123_v23 }
 0x903   : >> { %5042 = vmatpush.msrb.mxu0 %v9748_v10 }
 0x905   : >> { %5043 = vmatpush.msrb.mxu0 %v9755_v29 }
 0x907   : >> { %5044 = vmatpush.msrb.mxu0 %v9761_v3 }
 0x909   : >> { %5045 = vmatpush.msrb.mxu0 %v9768_v47 }
 0x90a   : >> { %5046 = vmatmul.f32.vlgmr.msrb.gmra.mxu0 %v6122_v1 }
 0x90b   : >> { %6124 = vmatpush.msk.msra.mxu0 %vm5198_vm1, %v10242_v40 }
 0x90d   : >> { %6125 = vmatpush.msk.msra.mxu0 %vm6691_vm0, %v6573_v54 }
 0x93d   : >> { %v4902_v44 = vpop.f32.mrf.mxu1 }
 0x946   : >> { %v5006_v41 = vpop.f32.mrf.mxu3 }
 0x94d   : >> { %v5068_v53 = vpop.f32.mrf.mxu1 }
 0x95a   : >> { %v5183_v3 = vpop.permute.xlu0 %5182 }
 0x965   : >> { %v4986_v26 = vpop.f32.mrf.mxu2 }
 0x966   : >> { %v5007_v56 = vadd.f32 %v5006_v41, %v4986_v26 }
 0x967   : >> { %v4882_v32 = vpop.f32.mrf.mxu0 }
 0x968   : >> { %v5071_v18 = vadd.f32 %v5068_v53, %v5007_v56  ;;  %v4903_v47 = vadd.f32 %v4902_v44, %v4882_v32 }
 0x973   : >> { %v5176_v10 = vpop.f32.mrf.mxu3 }
 0x974   : >> { %v5179_v29 = vadd.f32 %v5176_v10, %v5071_v18 }
 0x976   : >> { %v5186_v58 = vadd.f32 %v5183_v3, %v5179_v29 }
 0x978   : >> { %v5191_v36 = vmul.f32 0.01, %v5186_v58  ;;  %vm5190_vm4 = vcmp.ge.f32.partialorder %v5186_v58, 0.0 }
 0x97a   : >> { %v5192_v57 = vsel %vm5190_vm4, %v5186_v58, %v5191_v36 }
 0x985   : >> { %v5091_v43 = vpop.f32.mrf.mxu2 }
 0x987   : >> { %v5047_v12 = vpop.f32.mrf.mxu0 }
 0x988   : >> { %v5050_v5 = vadd.f32 %v5047_v12, %v4903_v47 }
 0x98a   : >> { %v5094_v13 = vadd.f32 %v5091_v43, %v5050_v5 }
 0x98c   : >> { %v5185_v34 = vadd.f32 %v5183_v3, %v5094_v13 }
 0x98e   : >> { %vm5187_vm9 = vcmp.ge.f32.partialorder %v5185_v34, 0.0  ;;  %v5188_v51 = vmul.f32 0.01, %v5185_v34 }
 0x990   : >> { %v5189_v15 = vsel %vm5187_vm9, %v5185_v34, %v5188_v51 }
 0x991   : >> { %v5193_v4 = vmax.f32 %v5189_v15, %v5192_v57 }
 0x993   : >> { %6126 = vmatmul.msk.f32.vlgmr.msra.gmra.mxu0 %vm5194_vm10, %v5193_v4  ;;  %6129 = vmatmul.msk.f32.vlgmr.msra.gmra.mxu1 %vm5194_vm10, %v5193_v4 }
 0xa0f   : > { %4758 = sbr.rel (!%p4756_p7) target bundleno = 2097 (0x831), region = 201 }
 0xa10   : >> { %v5219_v16 = vpop.f32.mrf.mxu0  ;;  %v5242_v42 = vpop.f32.mrf.mxu1 }
 0xa11   : >> { %v5245_v63 = vmax.f32 %v5219_v16, %v5242_v42 }
 0xa13   : >> { %5249 = vst.msk [vmem:[%s5247_s22] sm:$0xff] %vm2312_vm15, %v5245_v63 }
 0xa14 PF: > { %s19_s30 = sadd.s32 1, %s6539_s30  }
 0xa15   : > { %p16_p8 = scmp.ge.s32.totalorder %s19_s30, 4  }
 0xa17   :  { %18 = sbr.rel (!%p16_p8) target bundleno = 1 (0x1), region = 212 }

</bundles_post_ra>
